<compile_context>
chip_gen: v6e
topology: v6e:2x2x1
jax: 0.10.0
libtpu: 0.0.40
codegen_flags: <defaults>
</compile_context>

<pallas_src>
import functools
import math

import jax
import jax.numpy as jnp
from jax.experimental import pallas as pl
from jax.experimental.pallas import tpu as pltpu


# ---------------------------------------------------------------------------
# In-kernel conv core
# ---------------------------------------------------------------------------
def _im2col_matmul(x, w_ref, b_ref, th, W, fold):
    """x: (th+2, W+2, Cin) bf16 value. Returns f32 (th*W, Cout)."""
    Cin = x.shape[-1]
    Cout = w_ref.shape[-1]
    if fold:
        # Fold the 9 taps into the contraction axis: one K = 9*Cin matmul.
        pieces = [x[dy:dy + th, dx:dx + W, :] for dy in range(3) for dx in range(3)]
        patch = jnp.concatenate(pieces, axis=-1).reshape(th * W, 9 * Cin)
        acc = jnp.dot(patch, w_ref[...], preferred_element_type=jnp.float32)
        acc = acc + b_ref[...]
    else:
        # Tiny-Cin path (head conv): 9 dots, accumulator initialized with bias.
        wv = w_ref[...]
        acc = jnp.broadcast_to(b_ref[...], (th * W, Cout)).astype(jnp.float32)
        for k in range(9):
            dy, dx = divmod(k, 3)
            patch = x[dy:dy + th, dx:dx + W, :].reshape(th * W, Cin)
            acc = acc + jnp.dot(patch, wv[k * Cin:(k + 1) * Cin, :],
                                preferred_element_type=jnp.float32)
    return acc


def _conv3x3_kernel(x_ref, halo_ref, w_ref, b_ref, o_ref, *, th, W, fold, relu):
    # x_ref: (th, W+2, Cin) row tile; halo_ref: (8, W+2, Cin) next rows.
    x = jnp.concatenate([x_ref[...], halo_ref[...][0:2]], axis=0)   # (th+2, W+2, Cin)
    acc = _im2col_matmul(x, w_ref, b_ref, th, W, fold)
    if relu:
        acc = jnp.maximum(acc, 0.0)
    Cout = o_ref.shape[-1]
    o_ref[...] = acc.reshape(th, W, Cout).astype(o_ref.dtype)


def _conv3x3_res_kernel(x_ref, halo_ref, w_ref, b_ref, res_ref, o_ref, *,
                        th, W, fold, res_scale):
    # Second conv of a ResBlock: out = conv(x) * res_scale + residual
    x = jnp.concatenate([x_ref[...], halo_ref[...][0:2]], axis=0)
    acc = _im2col_matmul(x, w_ref, b_ref, th, W, fold)
    Cout = o_ref.shape[-1]
    y = acc.reshape(th, W, Cout)
    if res_scale != 1.0:
        y = y * res_scale
    y = y + res_ref[...].astype(jnp.float32)
    o_ref[...] = y.astype(o_ref.dtype)


# ---------------------------------------------------------------------------
# Tile selection (sized for v7x's 64 MiB VMEM with headroom)
# ---------------------------------------------------------------------------
def _pick_tile_h(H, W, Cin, Cout, has_res, itemsize=4, budget=20 * 1024 * 1024):
    Wp = W + 2
    best = 8
    for th in range(8, H + 1, 8):
        if H % th:
            continue
        blocks = th * Wp * Cin + 8 * Wp * Cin + th * W * Cout   # in + halo + out
        if has_res:
            blocks += th * W * Cout
        interm = (th + 2) * Wp * Cin + 10 * th * W * Cin + 2 * th * W * Cout
        total = (2 * blocks + interm + 9 * Cin * Cout + Cout) * itemsize
        if total <= budget:
            best = th
    return best


# ---------------------------------------------------------------------------
# Pallas conv wrapper: grid over (batch, row tiles)
# ---------------------------------------------------------------------------
def conv3x3_pallas(x, w, b, *, relu=False, residual=None, res_scale=1.0):
    """x: (N, H, W, Cin) NHWC;  w: (Cout, Cin, 3, 3) (PyTorch layout);  b: (Cout,)"""
    N, H, W, Cin = x.shape
    Cout = w.shape[0]
    if H % 8 != 0:
        # TODO(synk): single-tile fallback for H not divisible by 8.
        raise NotImplementedError("conv3x3_pallas assumes H % 8 == 0")

    th = _pick_tile_h(H, W, Cin, Cout, residual is not None)
    T = H // th
    hb = th // 8                      # halo block-index stride (halo block = 8 rows)
    Wp = W + 2
    out_dtype = x.dtype
    fold = Cin >= 8                   # fold taps into K for all non-tiny convs

    # SAME padding: 1 row/col of zeros on top/left, 1 + 6 slack rows on the
    # bottom so the 8-row halo block of the last tile stays in bounds.
    xp = jnp.pad(x, ((0, 0), (1, 7), (1, 1), (0, 0))).astype(jnp.bfloat16)
    wt = jnp.transpose(w, (2, 3, 1, 0)).reshape(9 * Cin, Cout).astype(jnp.bfloat16)
    b2 = b.reshape(1, Cout).astype(jnp.float32)

    x_spec = pl.BlockSpec((None, th, Wp, Cin), lambda n, t: (n, t, 0, 0))
    halo_spec = pl.BlockSpec((None, 8, Wp, Cin), lambda n, t: (n, (t + 1) * hb, 0, 0))
    w_spec = pl.BlockSpec((9 * Cin, Cout), lambda n, t: (0, 0))
    b_spec = pl.BlockSpec((1, Cout), lambda n, t: (0, 0))
    o_spec = pl.BlockSpec((None, th, W, Cout), lambda n, t: (n, t, 0, 0))
    out_shape = jax.ShapeDtypeStruct((N, H, W, Cout), out_dtype)
    cparams = pltpu.CompilerParams(
        dimension_semantics=("parallel", "parallel"),
        vmem_limit_bytes=48 * 1024 * 1024)

    if residual is None:
        kern = functools.partial(_conv3x3_kernel, th=th, W=W, fold=fold, relu=relu)
        return pl.pallas_call(
            kern, out_shape=out_shape, grid=(N, T),
            in_specs=[x_spec, halo_spec, w_spec, b_spec], out_specs=o_spec,
            compiler_params=cparams,
        )(xp, xp, wt, b2)
    else:
        kern = functools.partial(_conv3x3_res_kernel, th=th, W=W, fold=fold,
                                 res_scale=res_scale)
        r_spec = pl.BlockSpec((None, th, W, Cout), lambda n, t: (n, t, 0, 0))
        return pl.pallas_call(
            kern, out_shape=out_shape, grid=(N, T),
            in_specs=[x_spec, halo_spec, w_spec, b_spec, r_spec], out_specs=o_spec,
            compiler_params=cparams,
        )(xp, xp, wt, b2, residual)


# Plain-JAX reference conv (for correctness check only; same default precision).
def conv3x3_ref(x, w, b, *, relu=False, residual=None, res_scale=1.0):
    y = jax.lax.conv_general_dilated(
        x, jnp.transpose(w, (2, 3, 1, 0)), window_strides=(1, 1), padding="SAME",
        dimension_numbers=("NHWC", "HWIO", "NHWC"))
    y = y + b
    if relu:
        y = jnp.maximum(y, 0.0)
    if residual is not None:
        y = y * res_scale + residual
    return y


# ---------------------------------------------------------------------------
# Glue ops (pure layout; stay in plain JAX)
# ---------------------------------------------------------------------------
def pixel_shuffle_nhwc(x, r):
    # NHWC equivalent of torch.nn.PixelShuffle on NCHW.
    N, H, W, C = x.shape
    Cout = C // (r * r)
    x = x.reshape(N, H, W, Cout, r, r)
    x = jnp.transpose(x, (0, 1, 4, 2, 5, 3))
    return x.reshape(N, H * r, W * r, Cout)


def init_params(key, in_ch, out_ch, nf, nb, scale):
    keys = iter(jax.random.split(key, 8 + 4 * nb + 2 * int(round(math.log2(scale)))))

    def conv_p(cin, cout):
        w = jax.random.normal(next(keys), (cout, cin, 3, 3), jnp.float32) / math.sqrt(cin * 9)
        b = jax.random.normal(next(keys), (cout,), jnp.float32) * 0.01
        return w, b

    p = {}
    p["head"] = conv_p(in_ch, nf)
    p["blocks"] = [(conv_p(nf, nf), conv_p(nf, nf)) for _ in range(nb)]
    p["body_tail"] = conv_p(nf, nf)
    # UpSampler for power-of-2 scale: [conv(nf -> 4*nf) + PixelShuffle(2)] per stage
    p["up"] = [conv_p(nf, 4 * nf) for _ in range(int(round(math.log2(scale))))]
    p["tail"] = conv_p(nf, out_ch)
    return p


def edsr_forward(x_nchw, p, *, res_scale=1.0, conv_fn=conv3x3_pallas):
    x = jnp.transpose(x_nchw, (0, 2, 3, 1))          # NCHW -> NHWC
    h = conv_fn(x, *p["head"])                        # head

    # body (ResBlocks + conv).  NOTE: the reference forward computes
    # `res = body(x); res += x` but then returns `self.tail(x)` (head output),
    # so `res` never reaches the returned tensor.  We reproduce that exactly
    # (XLA may DCE this dead computation under jit, which is fine).
    res = h
    for (w1, b1), (w2, b2) in p["blocks"]:
        y = conv_fn(res, w1, b1, relu=True)
        res = conv_fn(y, w2, b2, residual=res, res_scale=res_scale)
    res = conv_fn(res, *p["body_tail"])
    res = res + h                                     # dead w.r.t. the output

    # tail applied to head output `h`, as in the reference forward
    t = h
    for wu, bu in p["up"]:
        t = conv_fn(t, wu, bu)
        t = pixel_shuffle_nhwc(t, 2)
    t = conv_fn(t, *p["tail"])
    return jnp.transpose(t, (0, 3, 1, 2))             # NHWC -> NCHW


# ---------------------------------------------------------------------------
if __name__ == "__main__":
    key = jax.random.PRNGKey(0)
    kx, kp = jax.random.split(key)

    # small config: in/out channels 3, num_features 32, 2 ResBlocks, x2 upscale
    N, Cin, H, W = 2, 3, 16, 16
    Cout_img, nf, nb, scale, res_scale = 3, 32, 2, 2, 1.0

    x = jax.random.normal(kx, (N, Cin, H, W), jnp.float32)
    params = init_params(kp, Cin, Cout_img, nf, nb, scale)

    fwd = jax.jit(functools.partial(edsr_forward, res_scale=res_scale,
                                    conv_fn=conv3x3_pallas))
    out = jax.block_until_ready(fwd(x, params))
    assert out.shape == (N, Cout_img, H * scale, W * scale), out.shape

    ref_fwd = jax.jit(functools.partial(edsr_forward, res_scale=res_scale,
                                        conv_fn=conv3x3_ref))
    ref = jax.block_until_ready(ref_fwd(x, params))

    # Kernel uses bf16-in / f32-acc on the MXU, so compare with a relaxed
    # tolerance against the f32 reference.
    err = float(jnp.max(jnp.abs(out - ref)))
    assert jnp.allclose(out, ref, rtol=2e-2, atol=2e-2), err

    print("KERNEL_OK")
</pallas_src>

<mosaic_0001>
module attributes {stable_mosaic.version = 11 : i64} {
  func.func @_conv3x3_kernel(%arg0: i32, %arg1: i32, %arg2: memref<1x16x18x3xbf16, #tpu.memory_space<vmem>>, %arg3: memref<1x8x18x3xbf16, #tpu.memory_space<vmem>>, %arg4: memref<27x32xbf16, #tpu.memory_space<vmem>>, %arg5: memref<1x32xf32, #tpu.memory_space<vmem>>, %arg6: memref<1x16x16x32xf32, #tpu.memory_space<vmem>>) attributes {dimension_semantics = [#tpu.dimension_semantics<parallel>, #tpu.dimension_semantics<parallel>], iteration_bounds = array<i64: 2, 1>, scalar_prefetch = 0 : i64, scratch_operands = 0 : i64, tpu.core_type = #tpu.core_type<tc>, window_params = [{transform_indices = @transform_0, window_bounds = array<i64: 1, 16, 18, 3>}, {transform_indices = @transform_1, window_bounds = array<i64: 1, 8, 18, 3>}, {pipeline_mode = #tpu.pipeline_mode<synchronous>, transform_indices = @transform_2, window_bounds = array<i64: 27, 32>}, {pipeline_mode = #tpu.pipeline_mode<synchronous>, transform_indices = @transform_3, window_bounds = array<i64: 1, 32>}, {transform_indices = @transform_4, window_bounds = array<i64: 1, 16, 16, 32>}]} {
    %c0 = arith.constant 0 : index
    %c0_0 = arith.constant 0 : index
    %c0_1 = arith.constant 0 : index
    %c0_2 = arith.constant 0 : index
    %0 = vector.load %arg2[%c0, %c0_0, %c0_1, %c0_2] : memref<1x16x18x3xbf16, #tpu.memory_space<vmem>>, vector<1x16x18x3xbf16>
    %1 = vector.shape_cast %0 : vector<1x16x18x3xbf16> to vector<16x18x3xbf16>
    %c0_3 = arith.constant 0 : index
    %c0_4 = arith.constant 0 : index
    %c0_5 = arith.constant 0 : index
    %c0_6 = arith.constant 0 : index
    %2 = vector.load %arg3[%c0_3, %c0_4, %c0_5, %c0_6] : memref<1x8x18x3xbf16, #tpu.memory_space<vmem>>, vector<1x8x18x3xbf16>
    %3 = vector.shape_cast %2 : vector<1x8x18x3xbf16> to vector<8x18x3xbf16>
    %4 = vector.extract_strided_slice %3 {offsets = [0, 0, 0], sizes = [2, 18, 3], strides = [1, 1, 1]} : vector<8x18x3xbf16> to vector<2x18x3xbf16>
    %5 = tpu.concatenate %1, %4 in 0 : vector<16x18x3xbf16>, vector<2x18x3xbf16> -> vector<18x18x3xbf16>
    %c0_7 = arith.constant 0 : index
    %c0_8 = arith.constant 0 : index
    %6 = vector.load %arg4[%c0_7, %c0_8] : memref<27x32xbf16, #tpu.memory_space<vmem>>, vector<27x32xbf16>
    %c0_9 = arith.constant 0 : index
    %c0_10 = arith.constant 0 : index
    %7 = vector.load %arg5[%c0_9, %c0_10] : memref<1x32xf32, #tpu.memory_space<vmem>>, vector<1x32xf32>
    %8 = vector.shape_cast %7 : vector<1x32xf32> to vector<1x32xf32>
    %9 = vector.broadcast %8 : vector<1x32xf32> to vector<256x32xf32>
    %10 = vector.extract_strided_slice %5 {offsets = [0, 0, 0], sizes = [16, 16, 3], strides = [1, 1, 1]} : vector<18x18x3xbf16> to vector<16x16x3xbf16>
    %11 = vector.shape_cast %10 : vector<16x16x3xbf16> to vector<256x3xbf16>
    %12 = vector.extract_strided_slice %6 {offsets = [0, 0], sizes = [3, 32], strides = [1, 1]} : vector<27x32xbf16> to vector<3x32xbf16>
    %cst = arith.constant dense<0.000000e+00> : vector<256x32xf32>
    %13 = tpu.matmul %11, %12, %cst {dimension_numbers = #tpu.dot_dimension_numbers<[1], [0], [0], [1], [0, 0, 1, 1], [], []>} : vector<256x3xbf16>, vector<3x32xbf16>, vector<256x32xf32> -> vector<256x32xf32>
    %14 = arith.addf %9, %13 : vector<256x32xf32>
    %15 = vector.extract_strided_slice %5 {offsets = [0, 1, 0], sizes = [16, 16, 3], strides = [1, 1, 1]} : vector<18x18x3xbf16> to vector<16x16x3xbf16>
    %16 = vector.shape_cast %15 : vector<16x16x3xbf16> to vector<256x3xbf16>
    %17 = vector.extract_strided_slice %6 {offsets = [3, 0], sizes = [3, 32], strides = [1, 1]} : vector<27x32xbf16> to vector<3x32xbf16>
    %cst_11 = arith.constant dense<0.000000e+00> : vector<256x32xf32>
    %18 = tpu.matmul %16, %17, %cst_11 {dimension_numbers = #tpu.dot_dimension_numbers<[1], [0], [0], [1], [0, 0, 1, 1], [], []>} : vector<256x3xbf16>, vector<3x32xbf16>, vector<256x32xf32> -> vector<256x32xf32>
    %19 = arith.addf %14, %18 : vector<256x32xf32>
    %20 = vector.extract_strided_slice %5 {offsets = [0, 2, 0], sizes = [16, 16, 3], strides = [1, 1, 1]} : vector<18x18x3xbf16> to vector<16x16x3xbf16>
    %21 = vector.shape_cast %20 : vector<16x16x3xbf16> to vector<256x3xbf16>
    %22 = vector.extract_strided_slice %6 {offsets = [6, 0], sizes = [3, 32], strides = [1, 1]} : vector<27x32xbf16> to vector<3x32xbf16>
    %cst_12 = arith.constant dense<0.000000e+00> : vector<256x32xf32>
    %23 = tpu.matmul %21, %22, %cst_12 {dimension_numbers = #tpu.dot_dimension_numbers<[1], [0], [0], [1], [0, 0, 1, 1], [], []>} : vector<256x3xbf16>, vector<3x32xbf16>, vector<256x32xf32> -> vector<256x32xf32>
    %24 = arith.addf %19, %23 : vector<256x32xf32>
    %25 = vector.extract_strided_slice %5 {offsets = [1, 0, 0], sizes = [16, 16, 3], strides = [1, 1, 1]} : vector<18x18x3xbf16> to vector<16x16x3xbf16>
    %26 = vector.shape_cast %25 : vector<16x16x3xbf16> to vector<256x3xbf16>
    %27 = vector.extract_strided_slice %6 {offsets = [9, 0], sizes = [3, 32], strides = [1, 1]} : vector<27x32xbf16> to vector<3x32xbf16>
    %cst_13 = arith.constant dense<0.000000e+00> : vector<256x32xf32>
    %28 = tpu.matmul %26, %27, %cst_13 {dimension_numbers = #tpu.dot_dimension_numbers<[1], [0], [0], [1], [0, 0, 1, 1], [], []>} : vector<256x3xbf16>, vector<3x32xbf16>, vector<256x32xf32> -> vector<256x32xf32>
    %29 = arith.addf %24, %28 : vector<256x32xf32>
    %30 = vector.extract_strided_slice %5 {offsets = [1, 1, 0], sizes = [16, 16, 3], strides = [1, 1, 1]} : vector<18x18x3xbf16> to vector<16x16x3xbf16>
    %31 = vector.shape_cast %30 : vector<16x16x3xbf16> to vector<256x3xbf16>
    %32 = vector.extract_strided_slice %6 {offsets = [12, 0], sizes = [3, 32], strides = [1, 1]} : vector<27x32xbf16> to vector<3x32xbf16>
    %cst_14 = arith.constant dense<0.000000e+00> : vector<256x32xf32>
    %33 = tpu.matmul %31, %32, %cst_14 {dimension_numbers = #tpu.dot_dimension_numbers<[1], [0], [0], [1], [0, 0, 1, 1], [], []>} : vector<256x3xbf16>, vector<3x32xbf16>, vector<256x32xf32> -> vector<256x32xf32>
    %34 = arith.addf %29, %33 : vector<256x32xf32>
    %35 = vector.extract_strided_slice %5 {offsets = [1, 2, 0], sizes = [16, 16, 3], strides = [1, 1, 1]} : vector<18x18x3xbf16> to vector<16x16x3xbf16>
    %36 = vector.shape_cast %35 : vector<16x16x3xbf16> to vector<256x3xbf16>
    %37 = vector.extract_strided_slice %6 {offsets = [15, 0], sizes = [3, 32], strides = [1, 1]} : vector<27x32xbf16> to vector<3x32xbf16>
    %cst_15 = arith.constant dense<0.000000e+00> : vector<256x32xf32>
    %38 = tpu.matmul %36, %37, %cst_15 {dimension_numbers = #tpu.dot_dimension_numbers<[1], [0], [0], [1], [0, 0, 1, 1], [], []>} : vector<256x3xbf16>, vector<3x32xbf16>, vector<256x32xf32> -> vector<256x32xf32>
    %39 = arith.addf %34, %38 : vector<256x32xf32>
    %40 = vector.extract_strided_slice %5 {offsets = [2, 0, 0], sizes = [16, 16, 3], strides = [1, 1, 1]} : vector<18x18x3xbf16> to vector<16x16x3xbf16>
    %41 = vector.shape_cast %40 : vector<16x16x3xbf16> to vector<256x3xbf16>
    %42 = vector.extract_strided_slice %6 {offsets = [18, 0], sizes = [3, 32], strides = [1, 1]} : vector<27x32xbf16> to vector<3x32xbf16>
    %cst_16 = arith.constant dense<0.000000e+00> : vector<256x32xf32>
    %43 = tpu.matmul %41, %42, %cst_16 {dimension_numbers = #tpu.dot_dimension_numbers<[1], [0], [0], [1], [0, 0, 1, 1], [], []>} : vector<256x3xbf16>, vector<3x32xbf16>, vector<256x32xf32> -> vector<256x32xf32>
    %44 = arith.addf %39, %43 : vector<256x32xf32>
    %45 = vector.extract_strided_slice %5 {offsets = [2, 1, 0], sizes = [16, 16, 3], strides = [1, 1, 1]} : vector<18x18x3xbf16> to vector<16x16x3xbf16>
    %46 = vector.shape_cast %45 : vector<16x16x3xbf16> to vector<256x3xbf16>
    %47 = vector.extract_strided_slice %6 {offsets = [21, 0], sizes = [3, 32], strides = [1, 1]} : vector<27x32xbf16> to vector<3x32xbf16>
    %cst_17 = arith.constant dense<0.000000e+00> : vector<256x32xf32>
    %48 = tpu.matmul %46, %47, %cst_17 {dimension_numbers = #tpu.dot_dimension_numbers<[1], [0], [0], [1], [0, 0, 1, 1], [], []>} : vector<256x3xbf16>, vector<3x32xbf16>, vector<256x32xf32> -> vector<256x32xf32>
    %49 = arith.addf %44, %48 : vector<256x32xf32>
    %50 = vector.extract_strided_slice %5 {offsets = [2, 2, 0], sizes = [16, 16, 3], strides = [1, 1, 1]} : vector<18x18x3xbf16> to vector<16x16x3xbf16>
    %51 = vector.shape_cast %50 : vector<16x16x3xbf16> to vector<256x3xbf16>
    %52 = vector.extract_strided_slice %6 {offsets = [24, 0], sizes = [3, 32], strides = [1, 1]} : vector<27x32xbf16> to vector<3x32xbf16>
    %cst_18 = arith.constant dense<0.000000e+00> : vector<256x32xf32>
    %53 = tpu.matmul %51, %52, %cst_18 {dimension_numbers = #tpu.dot_dimension_numbers<[1], [0], [0], [1], [0, 0, 1, 1], [], []>} : vector<256x3xbf16>, vector<3x32xbf16>, vector<256x32xf32> -> vector<256x32xf32>
    %54 = arith.addf %49, %53 : vector<256x32xf32>
    %55 = vector.shape_cast %54 : vector<256x32xf32> to vector<16x16x32xf32>
    %c0_19 = arith.constant 0 : index
    %c0_20 = arith.constant 0 : index
    %c0_21 = arith.constant 0 : index
    %c0_22 = arith.constant 0 : index
    %56 = vector.load %arg6[%c0_19, %c0_20, %c0_21, %c0_22] : memref<1x16x16x32xf32, #tpu.memory_space<vmem>>, vector<1x16x16x32xf32>
    %57 = vector.shape_cast %56 : vector<1x16x16x32xf32> to vector<16x16x32xf32>
    %58 = vector.shape_cast %55 : vector<16x16x32xf32> to vector<1x16x16x32xf32>
    tpu.vector_store %arg6[%c0_19, %c0_20, %c0_21, %c0_22], %58 {strides = array<i32>} : memref<1x16x16x32xf32, #tpu.memory_space<vmem>>, vector<1x16x16x32xf32>,
    return
  }
  func.func @transform_0(%arg0: i32, %arg1: i32) -> (i32, i32, i32, i32) {
    %c0_i32 = arith.constant 0 : i32
    %c0_i32_0 = arith.constant 0 : i32
    %c0_i32_1 = arith.constant 0 : i32
    return %arg0, %arg1, %c0_i32, %c0_i32_0 : i32, i32, i32, i32
  }
  func.func @transform_1(%arg0: i32, %arg1: i32) -> (i32, i32, i32, i32) {
    %c1_i32 = arith.constant 1 : i32
    %0 = arith.addi %arg1, %c1_i32 : i32
    %c2_i32 = arith.constant 2 : i32
    %1 = arith.muli %0, %c2_i32 : i32
    %c0_i32 = arith.constant 0 : i32
    %c0_i32_0 = arith.constant 0 : i32
    %c0_i32_1 = arith.constant 0 : i32
    return %arg0, %1, %c0_i32, %c0_i32_0 : i32, i32, i32, i32
  }
  func.func @transform_2(%arg0: i32, %arg1: i32) -> (i32, i32) {
    %c0_i32 = arith.constant 0 : i32
    %c0_i32_0 = arith.constant 0 : i32
    %c0_i32_1 = arith.constant 0 : i32
    return %c0_i32, %c0_i32_0 : i32, i32
  }
  func.func @transform_3(%arg0: i32, %arg1: i32) -> (i32, i32) {
    %c0_i32 = arith.constant 0 : i32
    %c0_i32_0 = arith.constant 0 : i32
    %c0_i32_1 = arith.constant 0 : i32
    return %c0_i32, %c0_i32_0 : i32, i32
  }
  func.func @transform_4(%arg0: i32, %arg1: i32) -> (i32, i32, i32, i32) {
    %c0_i32 = arith.constant 0 : i32
    %c0_i32_0 = arith.constant 0 : i32
    %c0_i32_1 = arith.constant 0 : i32
    return %arg0, %arg1, %c0_i32, %c0_i32_0 : i32, i32, i32, i32
  }
}

module attributes {stable_mosaic.version = 11 : i64} {
  func.func @_conv3x3_kernel(%arg0: i32, %arg1: i32, %arg2: memref<1x16x18x32xbf16, #tpu.memory_space<vmem>>, %arg3: memref<1x8x18x32xbf16, #tpu.memory_space<vmem>>, %arg4: memref<288x128xbf16, #tpu.memory_space<vmem>>, %arg5: memref<1x128xf32, #tpu.memory_space<vmem>>, %arg6: memref<1x16x16x128xf32, #tpu.memory_space<vmem>>) attributes {dimension_semantics = [#tpu.dimension_semantics<parallel>, #tpu.dimension_semantics<parallel>], iteration_bounds = array<i64: 2, 1>, scalar_prefetch = 0 : i64, scratch_operands = 0 : i64, tpu.core_type = #tpu.core_type<tc>, window_params = [{transform_indices = @transform_0, window_bounds = array<i64: 1, 16, 18, 32>}, {transform_indices = @transform_1, window_bounds = array<i64: 1, 8, 18, 32>}, {pipeline_mode = #tpu.pipeline_mode<synchronous>, transform_indices = @transform_2, window_bounds = array<i64: 288, 128>}, {pipeline_mode = #tpu.pipeline_mode<synchronous>, transform_indices = @transform_3, window_bounds = array<i64: 1, 128>}, {transform_indices = @transform_4, window_bounds = array<i64: 1, 16, 16, 128>}]} {
    %c0 = arith.constant 0 : index
    %c0_0 = arith.constant 0 : index
    %c0_1 = arith.constant 0 : index
    %c0_2 = arith.constant 0 : index
    %0 = vector.load %arg2[%c0, %c0_0, %c0_1, %c0_2] : memref<1x16x18x32xbf16, #tpu.memory_space<vmem>>, vector<1x16x18x32xbf16>
    %1 = vector.shape_cast %0 : vector<1x16x18x32xbf16> to vector<16x18x32xbf16>
    %c0_3 = arith.constant 0 : index
    %c0_4 = arith.constant 0 : index
    %c0_5 = arith.constant 0 : index
    %c0_6 = arith.constant 0 : index
    %2 = vector.load %arg3[%c0_3, %c0_4, %c0_5, %c0_6] : memref<1x8x18x32xbf16, #tpu.memory_space<vmem>>, vector<1x8x18x32xbf16>
    %3 = vector.shape_cast %2 : vector<1x8x18x32xbf16> to vector<8x18x32xbf16>
    %4 = vector.extract_strided_slice %3 {offsets = [0, 0, 0], sizes = [2, 18, 32], strides = [1, 1, 1]} : vector<8x18x32xbf16> to vector<2x18x32xbf16>
    %5 = tpu.concatenate %1, %4 in 0 : vector<16x18x32xbf16>, vector<2x18x32xbf16> -> vector<18x18x32xbf16>
    %6 = vector.extract_strided_slice %5 {offsets = [0, 0, 0], sizes = [16, 16, 32], strides = [1, 1, 1]} : vector<18x18x32xbf16> to vector<16x16x32xbf16>
    %7 = vector.extract_strided_slice %5 {offsets = [0, 1, 0], sizes = [16, 16, 32], strides = [1, 1, 1]} : vector<18x18x32xbf16> to vector<16x16x32xbf16>
    %8 = vector.extract_strided_slice %5 {offsets = [0, 2, 0], sizes = [16, 16, 32], strides = [1, 1, 1]} : vector<18x18x32xbf16> to vector<16x16x32xbf16>
    %9 = vector.extract_strided_slice %5 {offsets = [1, 0, 0], sizes = [16, 16, 32], strides = [1, 1, 1]} : vector<18x18x32xbf16> to vector<16x16x32xbf16>
    %10 = vector.extract_strided_slice %5 {offsets = [1, 1, 0], sizes = [16, 16, 32], strides = [1, 1, 1]} : vector<18x18x32xbf16> to vector<16x16x32xbf16>
    %11 = vector.extract_strided_slice %5 {offsets = [1, 2, 0], sizes = [16, 16, 32], strides = [1, 1, 1]} : vector<18x18x32xbf16> to vector<16x16x32xbf16>
    %12 = vector.extract_strided_slice %5 {offsets = [2, 0, 0], sizes = [16, 16, 32], strides = [1, 1, 1]} : vector<18x18x32xbf16> to vector<16x16x32xbf16>
    %13 = vector.extract_strided_slice %5 {offsets = [2, 1, 0], sizes = [16, 16, 32], strides = [1, 1, 1]} : vector<18x18x32xbf16> to vector<16x16x32xbf16>
    %14 = vector.extract_strided_slice %5 {offsets = [2, 2, 0], sizes = [16, 16, 32], strides = [1, 1, 1]} : vector<18x18x32xbf16> to vector<16x16x32xbf16>
    %15 = tpu.concatenate %6, %7, %8, %9, %10, %11, %12, %13, %14 in 2 : vector<16x16x32xbf16>, vector<16x16x32xbf16>, vector<16x16x32xbf16>, vector<16x16x32xbf16>, vector<16x16x32xbf16>, vector<16x16x32xbf16>, vector<16x16x32xbf16>, vector<16x16x32xbf16>, vector<16x16x32xbf16> -> vector<16x16x288xbf16>
    %16 = vector.shape_cast %15 : vector<16x16x288xbf16> to vector<256x288xbf16>
    %c0_7 = arith.constant 0 : index
    %c0_8 = arith.constant 0 : index
    %17 = vector.load %arg4[%c0_7, %c0_8] : memref<288x128xbf16, #tpu.memory_space<vmem>>, vector<288x128xbf16>
    %cst = arith.constant dense<0.000000e+00> : vector<256x128xf32>
    %18 = tpu.matmul %16, %17, %cst {dimension_numbers = #tpu.dot_dimension_numbers<[1], [0], [0], [1], [0, 0, 1, 1], [], []>} : vector<256x288xbf16>, vector<288x128xbf16>, vector<256x128xf32> -> vector<256x128xf32>
    %c0_9 = arith.constant 0 : index
    %c0_10 = arith.constant 0 : index
    %19 = vector.load %arg5[%c0_9, %c0_10] : memref<1x128xf32, #tpu.memory_space<vmem>>, vector<1x128xf32>
    %20 = vector.broadcast %19 : vector<1x128xf32> to vector<256x128xf32>
    %21 = arith.addf %18, %20 : vector<256x128xf32>
    %22 = vector.shape_cast %21 : vector<256x128xf32> to vector<16x16x128xf32>
    %c0_11 = arith.constant 0 : index
    %c0_12 = arith.constant 0 : index
    %c0_13 = arith.constant 0 : index
    %c0_14 = arith.constant 0 : index
    %23 = vector.load %arg6[%c0_11, %c0_12, %c0_13, %c0_14] : memref<1x16x16x128xf32, #tpu.memory_space<vmem>>, vector<1x16x16x128xf32>
    %24 = vector.shape_cast %23 : vector<1x16x16x128xf32> to vector<16x16x128xf32>
    %25 = vector.shape_cast %22 : vector<16x16x128xf32> to vector<1x16x16x128xf32>
    tpu.vector_store %arg6[%c0_11, %c0_12, %c0_13, %c0_14], %25 {strides = array<i32>} : memref<1x16x16x128xf32, #tpu.memory_space<vmem>>, vector<1x16x16x128xf32>,
    return
  }
  func.func @transform_0(%arg0: i32, %arg1: i32) -> (i32, i32, i32, i32) {
    %c0_i32 = arith.constant 0 : i32
    %c0_i32_0 = arith.constant 0 : i32
    %c0_i32_1 = arith.constant 0 : i32
    return %arg0, %arg1, %c0_i32, %c0_i32_0 : i32, i32, i32, i32
  }
  func.func @transform_1(%arg0: i32, %arg1: i32) -> (i32, i32, i32, i32) {
    %c1_i32 = arith.constant 1 : i32
    %0 = arith.addi %arg1, %c1_i32 : i32
    %c2_i32 = arith.constant 2 : i32
    %1 = arith.muli %0, %c2_i32 : i32
    %c0_i32 = arith.constant 0 : i32
    %c0_i32_0 = arith.constant 0 : i32
    %c0_i32_1 = arith.constant 0 : i32
    return %arg0, %1, %c0_i32, %c0_i32_0 : i32, i32, i32, i32
  }
  func.func @transform_2(%arg0: i32, %arg1: i32) -> (i32, i32) {
    %c0_i32 = arith.constant 0 : i32
    %c0_i32_0 = arith.constant 0 : i32
    %c0_i32_1 = arith.constant 0 : i32
    return %c0_i32, %c0_i32_0 : i32, i32
  }
  func.func @transform_3(%arg0: i32, %arg1: i32) -> (i32, i32) {
    %c0_i32 = arith.constant 0 : i32
    %c0_i32_0 = arith.constant 0 : i32
    %c0_i32_1 = arith.constant 0 : i32
    return %c0_i32, %c0_i32_0 : i32, i32
  }
  func.func @transform_4(%arg0: i32, %arg1: i32) -> (i32, i32, i32, i32) {
    %c0_i32 = arith.constant 0 : i32
    %c0_i32_0 = arith.constant 0 : i32
    %c0_i32_1 = arith.constant 0 : i32
    return %arg0, %arg1, %c0_i32, %c0_i32_0 : i32, i32, i32, i32
  }
}

module attributes {stable_mosaic.version = 11 : i64} {
  func.func @_conv3x3_kernel(%arg0: i32, %arg1: i32, %arg2: memref<1x32x34x32xbf16, #tpu.memory_space<vmem>>, %arg3: memref<1x8x34x32xbf16, #tpu.memory_space<vmem>>, %arg4: memref<288x3xbf16, #tpu.memory_space<vmem>>, %arg5: memref<1x3xf32, #tpu.memory_space<vmem>>, %arg6: memref<1x32x32x3xf32, #tpu.memory_space<vmem>>) attributes {dimension_semantics = [#tpu.dimension_semantics<parallel>, #tpu.dimension_semantics<parallel>], iteration_bounds = array<i64: 2, 1>, scalar_prefetch = 0 : i64, scratch_operands = 0 : i64, tpu.core_type = #tpu.core_type<tc>, window_params = [{transform_indices = @transform_0, window_bounds = array<i64: 1, 32, 34, 32>}, {transform_indices = @transform_1, window_bounds = array<i64: 1, 8, 34, 32>}, {pipeline_mode = #tpu.pipeline_mode<synchronous>, transform_indices = @transform_2, window_bounds = array<i64: 288, 3>}, {pipeline_mode = #tpu.pipeline_mode<synchronous>, transform_indices = @transform_3, window_bounds = array<i64: 1, 3>}, {transform_indices = @transform_4, window_bounds = array<i64: 1, 32, 32, 3>}]} {
    %c0 = arith.constant 0 : index
    %c0_0 = arith.constant 0 : index
    %c0_1 = arith.constant 0 : index
    %c0_2 = arith.constant 0 : index
    %0 = vector.load %arg2[%c0, %c0_0, %c0_1, %c0_2] : memref<1x32x34x32xbf16, #tpu.memory_space<vmem>>, vector<1x32x34x32xbf16>
    %1 = vector.shape_cast %0 : vector<1x32x34x32xbf16> to vector<32x34x32xbf16>
    %c0_3 = arith.constant 0 : index
    %c0_4 = arith.constant 0 : index
    %c0_5 = arith.constant 0 : index
    %c0_6 = arith.constant 0 : index
    %2 = vector.load %arg3[%c0_3, %c0_4, %c0_5, %c0_6] : memref<1x8x34x32xbf16, #tpu.memory_space<vmem>>, vector<1x8x34x32xbf16>
    %3 = vector.shape_cast %2 : vector<1x8x34x32xbf16> to vector<8x34x32xbf16>
    %4 = vector.extract_strided_slice %3 {offsets = [0, 0, 0], sizes = [2, 34, 32], strides = [1, 1, 1]} : vector<8x34x32xbf16> to vector<2x34x32xbf16>
    %5 = tpu.concatenate %1, %4 in 0 : vector<32x34x32xbf16>, vector<2x34x32xbf16> -> vector<34x34x32xbf16>
    %6 = vector.extract_strided_slice %5 {offsets = [0, 0, 0], sizes = [32, 32, 32], strides = [1, 1, 1]} : vector<34x34x32xbf16> to vector<32x32x32xbf16>
    %7 = vector.extract_strided_slice %5 {offsets = [0, 1, 0], sizes = [32, 32, 32], strides = [1, 1, 1]} : vector<34x34x32xbf16> to vector<32x32x32xbf16>
    %8 = vector.extract_strided_slice %5 {offsets = [0, 2, 0], sizes = [32, 32, 32], strides = [1, 1, 1]} : vector<34x34x32xbf16> to vector<32x32x32xbf16>
    %9 = vector.extract_strided_slice %5 {offsets = [1, 0, 0], sizes = [32, 32, 32], strides = [1, 1, 1]} : vector<34x34x32xbf16> to vector<32x32x32xbf16>
    %10 = vector.extract_strided_slice %5 {offsets = [1, 1, 0], sizes = [32, 32, 32], strides = [1, 1, 1]} : vector<34x34x32xbf16> to vector<32x32x32xbf16>
    %11 = vector.extract_strided_slice %5 {offsets = [1, 2, 0], sizes = [32, 32, 32], strides = [1, 1, 1]} : vector<34x34x32xbf16> to vector<32x32x32xbf16>
    %12 = vector.extract_strided_slice %5 {offsets = [2, 0, 0], sizes = [32, 32, 32], strides = [1, 1, 1]} : vector<34x34x32xbf16> to vector<32x32x32xbf16>
    %13 = vector.extract_strided_slice %5 {offsets = [2, 1, 0], sizes = [32, 32, 32], strides = [1, 1, 1]} : vector<34x34x32xbf16> to vector<32x32x32xbf16>
    %14 = vector.extract_strided_slice %5 {offsets = [2, 2, 0], sizes = [32, 32, 32], strides = [1, 1, 1]} : vector<34x34x32xbf16> to vector<32x32x32xbf16>
    %15 = tpu.concatenate %6, %7, %8, %9, %10, %11, %12, %13, %14 in 2 : vector<32x32x32xbf16>, vector<32x32x32xbf16>, vector<32x32x32xbf16>, vector<32x32x32xbf16>, vector<32x32x32xbf16>, vector<32x32x32xbf16>, vector<32x32x32xbf16>, vector<32x32x32xbf16>, vector<32x32x32xbf16> -> vector<32x32x288xbf16>
    %16 = vector.shape_cast %15 : vector<32x32x288xbf16> to vector<1024x288xbf16>
    %c0_7 = arith.constant 0 : index
    %c0_8 = arith.constant 0 : index
    %17 = vector.load %arg4[%c0_7, %c0_8] : memref<288x3xbf16, #tpu.memory_space<vmem>>, vector<288x3xbf16>
    %cst = arith.constant dense<0.000000e+00> : vector<1024x3xf32>
    %18 = tpu.matmul %16, %17, %cst {dimension_numbers = #tpu.dot_dimension_numbers<[1], [0], [0], [1], [0, 0, 1, 1], [], []>} : vector<1024x288xbf16>, vector<288x3xbf16>, vector<1024x3xf32> -> vector<1024x3xf32>
    %c0_9 = arith.constant 0 : index
    %c0_10 = arith.constant 0 : index
    %19 = vector.load %arg5[%c0_9, %c0_10] : memref<1x3xf32, #tpu.memory_space<vmem>>, vector<1x3xf32>
    %20 = vector.broadcast %19 : vector<1x3xf32> to vector<1024x3xf32>
    %21 = arith.addf %18, %20 : vector<1024x3xf32>
    %22 = vector.shape_cast %21 : vector<1024x3xf32> to vector<32x32x3xf32>
    %c0_11 = arith.constant 0 : index
    %c0_12 = arith.constant 0 : index
    %c0_13 = arith.constant 0 : index
    %c0_14 = arith.constant 0 : index
    %23 = vector.load %arg6[%c0_11, %c0_12, %c0_13, %c0_14] : memref<1x32x32x3xf32, #tpu.memory_space<vmem>>, vector<1x32x32x3xf32>
    %24 = vector.shape_cast %23 : vector<1x32x32x3xf32> to vector<32x32x3xf32>
    %25 = vector.shape_cast %22 : vector<32x32x3xf32> to vector<1x32x32x3xf32>
    tpu.vector_store %arg6[%c0_11, %c0_12, %c0_13, %c0_14], %25 {strides = array<i32>} : memref<1x32x32x3xf32, #tpu.memory_space<vmem>>, vector<1x32x32x3xf32>,
    return
  }
  func.func @transform_0(%arg0: i32, %arg1: i32) -> (i32, i32, i32, i32) {
    %c0_i32 = arith.constant 0 : i32
    %c0_i32_0 = arith.constant 0 : i32
    %c0_i32_1 = arith.constant 0 : i32
    return %arg0, %arg1, %c0_i32, %c0_i32_0 : i32, i32, i32, i32
  }
  func.func @transform_1(%arg0: i32, %arg1: i32) -> (i32, i32, i32, i32) {
    %c1_i32 = arith.constant 1 : i32
    %0 = arith.addi %arg1, %c1_i32 : i32
    %c4_i32 = arith.constant 4 : i32
    %1 = arith.muli %0, %c4_i32 : i32
    %c0_i32 = arith.constant 0 : i32
    %c0_i32_0 = arith.constant 0 : i32
    %c0_i32_1 = arith.constant 0 : i32
    return %arg0, %1, %c0_i32, %c0_i32_0 : i32, i32, i32, i32
  }
  func.func @transform_2(%arg0: i32, %arg1: i32) -> (i32, i32) {
    %c0_i32 = arith.constant 0 : i32
    %c0_i32_0 = arith.constant 0 : i32
    %c0_i32_1 = arith.constant 0 : i32
    return %c0_i32, %c0_i32_0 : i32, i32
  }
  func.func @transform_3(%arg0: i32, %arg1: i32) -> (i32, i32) {
    %c0_i32 = arith.constant 0 : i32
    %c0_i32_0 = arith.constant 0 : i32
    %c0_i32_1 = arith.constant 0 : i32
    return %c0_i32, %c0_i32_0 : i32, i32
  }
  func.func @transform_4(%arg0: i32, %arg1: i32) -> (i32, i32, i32, i32) {
    %c0_i32 = arith.constant 0 : i32
    %c0_i32_0 = arith.constant 0 : i32
    %c0_i32_1 = arith.constant 0 : i32
    return %arg0, %arg1, %c0_i32, %c0_i32_0 : i32, i32, i32, i32
  }
}

</mosaic_0001>

<bundles_post_ra>
// kernel: edsr_forward.4
= control target key start
LH: loop header
LB: loop body
LE: loop exit
PB: predicated region body
PF: predicated region fallthrough
CT: control target
= control target key end

     0   :  { %s2299_s15 = smov 0   ;;  %s2301_s16 = smov 0   ;;  %s3154_s0 = inlined_call_operand.vmem [shape: bf16[2,24,18,32], index: 0, kind: input, shape index: {}, may-alias: {0,1}]   ;;  %s3155_s1 = inlined_call_operand.vmem [shape: bf16[2,24,18,32], index: 1, kind: input, shape index: {}, may-alias: {0,1}]   ;;  %s3156_s2 = inlined_call_operand.vmem [shape: bf16[288,128], index: 2, kind: input, shape index: {}]   ;;  %s3157_s3 = inlined_call_operand.vmem [shape: f32[1,128], index: 3, kind: input, shape index: {}]   ;;  %s3158_s4 = inlined_call_operand.vmem [shape: f32[2,16,16,128], index: 4, kind: output, shape index: {}]  }
   0x1   :  { %s2303_s17 = smov 0  }
   0x2 LB: > { %s26_s18 = sadd.s32 1, %s2265_s16  ;;  %p1900_p0 = scmp.ge.s32.totalorder %s2269_s17, 1  ;;  %s2269_s17 = sphi %s2303_s17, %s14_s17   ;;  %s2265_s16 = sphi %s2301_s16, %s3163_s16   ;;  %s2261_s15 = sphi %s2299_s15, %s3162_s15  }
   0x3   : > { %p28_p1 = scmp.ge.s32.totalorder %s26_s18, 2  ;;  %p220_p2 = scmp.lt.s32.totalorder %s2269_s17, 3 }
   0x5   : > { %s3165_s18 = smov (%p28_p1, %s26_s18), 0  ;;  %p221_p3 = pnand %p1900_p0, %p220_p2 }
   0x7   : > { %224 = sbr.rel (%p221_p3) target bundleno = 530 (0x212), region = 36 }
   0xc   : > { %p279_p4 = scmp.lt.s32.totalorder %s2261_s15, 1  ;;  %v2218_v0 = vld [vmem:[%s3156_s2 + $0x78] sm:$0xff]   ;;  %v2221_v2 = vld [vmem:[%s3156_s2 + $0x70] sm:$0xff]   ;;  %v2223_v4 = vld [vmem:[%s3156_s2 + $0x68] sm:$0xff]   ;;  %vm728_vm0 = vcmask 1046528   ;;  %s2271_s9 = smov 64  }
   0xd   : > { %1981 = vmatprep.subr.bf16.mxu0 %v2218_v0  ;;  %v2219_v1 = vld [vmem:[%s3156_s2 + $0x38] sm:$0xff]   ;;  %2147 = vmatprep.subr.bf16.mxu1 %v2218_v0  ;;  %v2222_v3 = vld [vmem:[%s3156_s2 + $0x30] sm:$0xff]   ;;  %v2224_v5 = vld [vmem:[%s3156_s2 + $0x28] sm:$0xff]   ;;  %vm503_vm1 = vsmask.f32 7424  ;;  %s2272_s10 = smov 96  }
   0xe   : > { %s3167_s15 = smov (!%p279_p4, %s2261_s15), 1  ;;  %1982 = vmatpush3.bf16.msra.mxu0 %v2219_v1  ;;  %2155 = vmatpush3.bf16.msra.mxu1 %v2219_v1  ;;  %s2273_s11 = smov 32   ;;  %vm983_vm2 = vcmask 261120   ;;  %vm1016_vm3 = vcmask 523264   ;;  %vm1049_vm4 = vcmask 785408  }
   0xf   : > { %s2163_s25 = smul.u32 288, %s3167_s15  ;;  %1983 = vmatprep.subr.bf16.mxu0 %v2221_v2  ;;  %2148 = vmatprep.subr.bf16.mxu1 %v2221_v2 }
  0x11   : > { %s2340_s6 = scalar_lea.vmem %s3154_s0, %s2163_s25  ;;  %s1979_s12 = sadd.s32 192, %s2163_s25 }
  0x12   : > { %v2346_v6 = vld [vmem:[%s2340_s6 + $0xa8] sm:$0xff]   ;;  %v2349_v7 = vld [vmem:[%s2340_s6 + $0x18] sm:$0xff]   ;;  %1984 = vmatpush3.bf16.msra.mxu0 %v2222_v3  ;;  %2156 = vmatpush3.bf16.msra.mxu1 %v2222_v3  ;;  %v2359_v9 = vld [vmem:[%s2340_s6 + $0x14] ss:$0 sps:$4 sm:$0x11]   ;;  %s2446_s19 = scalar_lea.vmem %s3155_s1, %s1979_s12 }
  0x13   : > { %925 = vrot.lane.b32.xlu0 %v2346_v6, %s2271_s9  ;;  %v2354_v8 = vld [vmem:[%s2340_s6 + $0xc] sm:$0xff]   ;;  %1985 = vmatprep.subr.bf16.mxu0 %v2223_v4  ;;  %v2362_v10 = vld [vmem:[%s2340_s6 + $0x9c] sm:$0xff]   ;;  %v733_v13 = vrot.slane %v2359_v9, 1  ;;  %v2370_v14 = vld [vmem:[%s2340_s6 + $0xa4] ss:$0 sps:$4 sm:$0x11]  }
  0x14   : > { %901 = vrot.lane.b32.xlu1 %v2349_v7, %s2271_s9  ;;  %2149 = vmatprep.subr.bf16.mxu1 %v2223_v4  ;;  %v732_v11 = vrot.slane %v2354_v8, 1  ;;  %v2366_v12 = vld [vmem:[%s2340_s6] sm:$0xff]   ;;  %v768_v15 = vrot.slane %v2362_v10, 1  ;;  %v769_v18 = vrot.slane %v2370_v14, 1  ;;  %v2387_v22 = vld [vmem:[%s2340_s6 + $0x90] sm:$0xff]   ;;  %v529_v27 = vshrl.u32 %v2349_v7, 16 }
  0x15   : > { %v729_v16 = vrot.slane %v2366_v12, 1  ;;  %v2200_v19 = vld [vmem:[%s2340_s6 + $0x8] ss:$0 sps:$4 sm:$0x11]   ;;  %v505_v24 = vshrl.u32 %v2366_v12, 16  ;;  %v507_v25 = vshll.u32 %v2366_v12, 16 }
  0x16   : > { %1986 = vmatpush3.bf16.msra.mxu0 %v2224_v5  ;;  %2157 = vmatpush3.bf16.msra.mxu1 %v2224_v5  ;;  %v2377_v17 = vsel %vm728_vm0, %v732_v11, %v733_v13  ;;  %v2384_v20 = vsel %vm728_vm0, %v768_v15, %v769_v18  ;;  %v730_v21 = vrot.slane %v2200_v19, 1  ;;  %v2202_v23 = vld [vmem:[%s2340_s6 + $0x98] ss:$0 sps:$4 sm:$0x11]   ;;  %v512_v26 = vshll.u32 %v2200_v19, 16  ;;  %v2425_v61 = vld [vmem:[%s2340_s6 + $0x24] sm:$0xff]  }
  0x17   : > { %864 = vrot.lane.b32.xlu0 %v2377_v17, %s2273_s11  ;;  %v531_v28 = vshll.u32 %v2349_v7, 16  ;;  %v765_v30 = vrot.slane %v2387_v22, 1  ;;  %v766_v31 = vrot.slane %v2202_v23, 1  ;;  %v649_v32 = vshrl.u32 %v2387_v22, 16  ;;  %v2226_v5 = vld [vmem:[%s3156_s2 + $0x60] sm:$0xff]  }
  0x18   : > { %814 = vrot.lane.b32.xlu1 %v2354_v8, %s2272_s10  ;;  %v731_v29 = vsel %vm728_vm0, %v729_v16, %v730_v21  ;;  %v2203_v33 = vld [vmem:[%s2340_s6 + $0x20] ss:$0 sps:$4 sm:$0x11]   ;;  %v509_v34 = vrot.slane %v507_v25, 1  ;;  %v514_v35 = vrot.slane %v512_v26, 1  ;;  %v651_v36 = vshll.u32 %v2387_v22, 16  ;;  %1987 = vmatprep.subr.bf16.mxu0 %v2226_v5 }
  0x19   : > { %v656_v37 = vshll.u32 %v2202_v23, 16  ;;  %v2403_v38 = vsel %vm728_vm0, %v765_v30, %v766_v31  ;;  %v533_v39 = vrot.slane %v531_v28, 1  ;;  %v536_v40 = vshll.u32 %v2203_v33, 16  ;;  %v2406_v41 = vld [vmem:[%s2340_s6 + $0xb0] ss:$0 sps:$4 sm:$0x11]   ;;  %2150 = vmatprep.subr.bf16.mxu1 %v2226_v5 }
  0x1a   : > { %v675_v42 = vshll.u32 %v2346_v6, 16  ;;  %v510_v43 = vor.u32 %v509_v34, %v505_v24  ;;  %v653_v44 = vrot.slane %v651_v36, 1  ;;  %v673_v46 = vshrl.u32 %v2346_v6, 16  ;;  %v2434_v0 = vld [vmem:[%s2340_s6 + $0x2c] ss:$0 sps:$4 sm:$0x11]  }
  0x1b   : > { %888 = vrot.lane.b32.xlu0 %v2384_v20, %s2273_s11  ;;  %v658_v45 = vrot.slane %v656_v37, 1  ;;  %v534_v47 = vor.u32 %v533_v39, %v529_v27  ;;  %v538_v48 = vrot.slane %v536_v40, 1  ;;  %v680_v50 = vshll.u32 %v2406_v41, 16  ;;  %v2227_v16 = vld [vmem:[%s3156_s2 + $0x20] sm:$0xff]   ;;  %v2472_v24 = vld [vmem:[%s2340_s6 + $0xb4] sm:$0xff]   ;;  %v2487_v34 = vld [vmem:[%s2340_s6 + $0x48] sm:$0xff]  }
  0x1c   : > { %777 = vrot.lane.b32.xlu1 %v731_v29, %s2271_s9  ;;  %v677_v49 = vrot.slane %v675_v42, 1  ;;  %v515_v51 = vsel %vm503_vm1, %v510_v43, %v514_v35  ;;  %v654_v52 = vor.u32 %v653_v44, %v649_v32  ;;  %v519_v53 = vshll.u32 %v2354_v8, 16  ;;  %v2466_v21 = vld [vmem:[%s2340_s6 + $0x3c] sm:$0xff]   ;;  %1988 = vmatpush3.bf16.msra.mxu0 %v2227_v16  ;;  %v2481_v30 = vld [vmem:[%s2340_s6 + $0x44] ss:$0 sps:$4 sm:$0x11]  }
  0x1d   : > { %v2417_v54 = vsel %vm503_vm1, %v534_v47, %v538_v48  ;;  %v517_v55 = vshrl.u32 %v2354_v8, 16  ;;  %v524_v56 = vshll.u32 %v2359_v9, 16  ;;  %v682_v59 = vrot.slane %v680_v50, 1  ;;  %2158 = vmatpush3.bf16.msra.mxu1 %v2227_v16  ;;  %v2478_v27 = vld [vmem:[%s2340_s6 + $0xbc] ss:$0 sps:$4 sm:$0x11]  }
  0x1e   : > { %v2422_v57 = vsel %vm503_vm1, %v654_v52, %v658_v45  ;;  %v678_v58 = vor.u32 %v677_v49, %v673_v46  ;;  %v521_v60 = vrot.slane %v519_v53, 1  ;;  %v735_v2 = vrot.slane %v2349_v7, 1  ;;  %v2229_v35 = vld [vmem:[%s3156_s2 + $0x58] sm:$0xff]  }
  0x1f   : > { %696 = vrot.lane.b32.xlu0 %v515_v51, %s2273_s11  ;;  %v526_v63 = vrot.slane %v524_v56, 1  ;;  %v736_v3 = vrot.slane %v2203_v33, 1  ;;  %v543_v4 = vshll.u32 %v2425_v61, 16  ;;  %v541_v11 = vshrl.u32 %v2425_v61, 16  ;;  %1989 = vmatprep.subr.bf16.mxu0 %v2229_v35  ;;  %v2507_v49 = vld [vmem:[%s2340_s6 + $0x54] sm:$0xff]  }
  0x20   : > { %801 = vrot.lane.b32.xlu1 %v2403_v38, %s2271_s9  ;;  %v522_v62 = vor.u32 %v521_v60, %v517_v55  ;;  %v2437_v1 = vsel %vm503_vm1, %v678_v58, %v682_v59  ;;  %v548_v13 = vshll.u32 %v2434_v0, 16  ;;  %v663_v15 = vshll.u32 %v2362_v10, 16  ;;  %2151 = vmatprep.subr.bf16.mxu1 %v2229_v35  ;;  %v2516_v51 = vld [vmem:[%s2340_s6 + $0x50] ss:$0 sps:$4 sm:$0x11]  }
  0x21   : > { %v2463_v18 = vsel %vm728_vm0, %v735_v2, %v736_v3  ;;  %v545_v19 = vrot.slane %v543_v4, 1  ;;  %v661_v23 = vshrl.u32 %v2362_v10, 16  ;;  %v668_v26 = vshll.u32 %v2370_v14, 16  ;;  %v2533_v3 = vld [vmem:[%s2340_s6 + $0x5c] ss:$0 sps:$4 sm:$0x11]  }
  0x22   : > { %v2454_v9 = vsel %vm503_vm1, %v522_v62, %v526_v63  ;;  %v665_v25 = vrot.slane %v663_v15, 1  ;;  %v550_v29 = vrot.slane %v548_v13, 1  ;;  %v565_v31 = vshrl.u32 %v2466_v21, 16  ;;  %v2230_v4 = vld [vmem:[%s3156_s2 + $0x18] sm:$0xff]   ;;  %v2541_v13 = vld [vmem:[%s2340_s6 + $0x30] sm:$0xff]  }
  0x23   : > { %948 = vrot.lane.b32.xlu0 %v2417_v54, %s2272_s10  ;;  %v546_v28 = vor.u32 %v545_v19, %v541_v11  ;;  %v567_v32 = vshll.u32 %v2466_v21, 16  ;;  %v771_v33 = vrot.slane %v2346_v6, 1  ;;  %v572_v36 = vshll.u32 %v2481_v30, 16  ;;  %v2231_v19 = vld [vmem:[%s3156_s2 + $0x50] sm:$0xff]   ;;  %1990 = vmatpush3.bf16.msra.mxu0 %v2230_v4 }
  0x24   : > { %720 = vrot.lane.b32.xlu1 %v2422_v57, %s2273_s11  ;;  %v666_v37 = vor.u32 %v665_v25, %v661_v23  ;;  %v670_v39 = vrot.slane %v668_v26, 1  ;;  %v772_v40 = vrot.slane %v2406_v41, 1  ;;  %v685_v42 = vshrl.u32 %v2472_v24, 16  ;;  %v2551_v23 = vld [vmem:[%s2340_s6 + $0x38] ss:$0 sps:$4 sm:$0x11]   ;;  %2159 = vmatpush3.bf16.msra.mxu1 %v2230_v4 }
  0x25   : > { %v569_v14 = vrot.slane %v567_v32, 1  ;;  %v2500_v43 = vsel %vm503_vm1, %v546_v28, %v550_v29  ;;  %v574_v45 = vrot.slane %v572_v36, 1  ;;  %v692_v46 = vshll.u32 %v2478_v27, 16  ;;  %1991 = vmatprep.subr.bf16.mxu0 %v2231_v19  ;;  %v2232_v28 = vld [vmem:[%s3156_s2 + $0x10] sm:$0xff]   ;;  %2152 = vmatprep.subr.bf16.mxu1 %v2231_v19  ;;  %v2235_v36 = vld [vmem:[%s3156_s2 + $0x8] sm:$0xff]  }
  0x26   : > { %v577_v47 = vshrl.u32 %v2487_v34, 16  ;;  %v579_v48 = vshll.u32 %v2487_v34, 16  ;;  %v738_v41 = vrot.slane %v2425_v61, 1  ;;  %v2521_v52 = vsel %vm503_vm1, %v666_v37, %v670_v39  ;;  %v2581_v39 = vld [vmem:[%s2340_s6 + $0x68] ss:$0 sps:$4 sm:$0x11]  }
  0x27   : > { %972 = vrot.lane.b32.xlu0 %v2437_v1, %s2272_s10  ;;  %v570_v44 = vor.u32 %v569_v14, %v565_v31  ;;  %v739_v53 = vrot.slane %v2434_v0, 1  ;;  %v2525_v56 = vsel %vm728_vm0, %v771_v33, %v772_v40  ;;  %v584_v59 = vshll.u32 %v2516_v51, 16  ;;  %v2562_v31 = vld [vmem:[%s2340_s6 + $0x60] sm:$0xff]   ;;  %v2234_v14 = vld [vmem:[%s3156_s2 + $0x48] sm:$0xff]   ;;  %1992 = vmatpush3.bf16.msra.mxu0 %v2232_v28 }
  0x28   : > { %838 = vrot.lane.b32.xlu1 %v2362_v10, %s2272_s10  ;;  %v581_v55 = vrot.slane %v579_v48, 1  ;;  %v589_v62 = vshrl.u32 %v2507_v49, 16  ;;  %v591_v63 = vshll.u32 %v2507_v49, 16  ;;  %v694_v11 = vrot.slane %v692_v46, 1  ;;  %2160 = vmatpush3.bf16.msra.mxu1 %v2232_v28  ;;  %v2238_v48 = vld [vmem:[%s3156_s2] sm:$0xff]  }
  0x29   : > { %v2513_v50 = vsel %vm503_vm1, %v570_v44, %v574_v45  ;;  %v586_v2 = vrot.slane %v584_v59, 1  ;;  %v596_v16 = vshll.u32 %v2533_v3, 16  ;;  %v553_v29 = vshrl.u32 %v2541_v13, 16  ;;  %1993 = vmatprep.subr.bf16.mxu0 %v2234_v14  ;;  %2153 = vmatprep.subr.bf16.mxu1 %v2234_v14  ;;  %v2212_v28 = vld [vmem:[%s2446_s19 + $0x8] ss:$0 sps:$4 sm:$0x11]  }
  0x2a   : > { %v582_v60 = vor.u32 %v581_v55, %v577_v47  ;;  %v593_v0 = vrot.slane %v591_v63, 1  ;;  %v555_v33 = vshll.u32 %v2541_v13, 16  ;;  %v601_v37 = vshrl.u32 %v2562_v31, 16  ;;  %v2598_v55 = vld [vmem:[%s2340_s6 + $0x6c] sm:$0xff]   ;;  %v2613_v63 = vld [vmem:[%s2340_s6 + $0x78] sm:$0xff]  }
  0x2b   : > { %866 = vrot.lane.b32.xlu0 %v2463_v18, %s2273_s11  ;;  %v598_v26 = vrot.slane %v596_v16, 1  ;;  %v603_v40 = vshll.u32 %v2562_v31, 16  ;;  %v2591_v44 = vsel %vm728_vm0, %v738_v41, %v739_v53  ;;  %v608_v47 = vshll.u32 %v2581_v39, 16  ;;  %1994 = vmatpush3.bf16.msra.mxu0 %v2235_v36  ;;  %v2603_v41 = vld [vmem:[%s2340_s6 + $0x74] ss:$0 sps:$4 sm:$0x11]  }
  0x2c   : > { %698 = vrot.lane.b32.xlu1 %v2454_v9, %s2273_s11  ;;  %v2544_v15 = vsel %vm503_vm1, %v582_v60, %v586_v2  ;;  %v594_v25 = vor.u32 %v593_v0, %v589_v62  ;;  %v557_v45 = vrot.slane %v555_v33, 1  ;;  %2161 = vmatpush3.bf16.msra.mxu1 %v2235_v36  ;;  %v2608_v53 = vld [vmem:[%s2446_s19] sm:$0xff]   ;;  %v613_v60 = vshrl.u32 %v2598_v55, 16 }
  0x2d   : > { %v605_v46 = vrot.slane %v603_v40, 1  ;;  %v610_v59 = vrot.slane %v608_v47, 1  ;;  %v615_v62 = vshll.u32 %v2598_v55, 16  ;;  %v2620_v16 = vld [vmem:[%s2340_s6 + $0x80] ss:$0 sps:$4 sm:$0x11]  }
  0x2e   : > { %v2569_v35 = vsel %vm503_vm1, %v594_v25, %v598_v26  ;;  %v558_v2 = vor.u32 %v557_v45, %v553_v29  ;;  %v625_v19 = vshrl.u32 %v2613_v63, 16  ;;  %v627_v25 = vshll.u32 %v2613_v63, 16  ;;  %v2633_v40 = vld [vmem:[%s2340_s6 + $0x84] sm:$0xff]   ;;  %v2640_v45 = vld [vmem:[%s2340_s6 + $0x8c] ss:$0 sps:$4 sm:$0x11]  }
  0x2f   : > { %903 = vrot.lane.b32.xlu0 %v2425_v61, %s2271_s9  ;;  %v774_v26 = vrot.slane %v2472_v24, 1  ;;  %v775_v33 = vrot.slane %v2478_v27, 1  ;;  %v637_v27 = vshrl.u32 %v2633_v40, 16 }
  0x30   : > { %779 = vrot.lane.b32.xlu1 %v2377_v17, %s2271_s9  ;;  %v687_v17 = vshll.u32 %v2472_v24, 16  ;;  %v629_v36 = vrot.slane %v627_v25, 1 }
  0x32   : > { %v689_v58 = vrot.slane %v687_v17, 1  ;;  %v2237_v17 = vld [vmem:[%s3156_s2 + $0x40] sm:$0xff]   ;;  %v630_v47 = vor.u32 %v629_v36, %v625_v19  ;;  %v741_v36 = vrot.slane %v2541_v13, 1 }
  0x33   : > { %950 = vrot.lane.b32.xlu0 %v2500_v43, %s2272_s10  ;;  %1995 = vmatprep.subr.bf16.mxu0 %v2237_v17 }
  0x34   : > { %816 = vrot.lane.b32.xlu1 %v2349_v7, %s2272_s10  ;;  %v690_v5 = vor.u32 %v689_v58, %v685_v42  ;;  %v560_v42 = vshll.u32 %v2551_v23, 16  ;;  %v606_v58 = vor.u32 %v605_v46, %v601_v37  ;;  %2154 = vmatprep.subr.bf16.mxu1 %v2237_v17  ;;  %v632_v37 = vshll.u32 %v2620_v16, 16 }
  0x35   : > { %1996 = vmatpush3.bf16.msra.mxu0 %v2238_v48  ;;  %2162 = vmatpush3.bf16.msra.mxu1 %v2238_v48  ;;  %v852_v17 = vshll.u32 %v2608_v53, 16 }
  0x36   : > { %v2565_v32 = vsel %vm503_vm1, %v690_v5, %v694_v11  ;;  %v562_v0 = vrot.slane %v560_v42, 1  ;;  %v2616_v4 = vsel %vm503_vm1, %v606_v58, %v610_v59  ;;  %v620_v5 = vshll.u32 %v2603_v41, 16 }
  0x37   : > { %890 = vrot.lane.b32.xlu0 %v2525_v56, %s2273_s11  ;;  %v617_v11 = vrot.slane %v615_v62, 1  ;;  %v634_v48 = vrot.slane %v632_v37, 1  ;;  %v639_v58 = vshll.u32 %v2633_v40, 16  ;;  %v644_v59 = vshll.u32 %v2640_v45, 16 }
  0x38   : > { %722 = vrot.lane.b32.xlu1 %v2521_v52, %s2273_s11  ;;  %v622_v29 = vrot.slane %v620_v5, 1  ;;  %v2636_v42 = vsel %vm503_vm1, %v558_v2, %v562_v0  ;;  %v850_v62 = vshrl.u32 %v2608_v53, 16  ;;  %v854_v0 = vrot.slane %v852_v17, 1 }
  0x39   : > { %v618_v14 = vor.u32 %v617_v11, %v613_v60  ;;  %v2653_v60 = vsel %vm728_vm0, %v774_v26, %v775_v33  ;;  %v2657_v2 = vsel %vm503_vm1, %v630_v47, %v634_v48  ;;  %v857_v5 = vshll.u32 %v2212_v28, 16  ;;  %v2687_v47 = vld [vmem:[%s2446_s19 + $0xc] sm:$0xff]  }
  0x3a   : > { %v641_v11 = vrot.slane %v639_v58, 1  ;;  %v646_v19 = vrot.slane %v644_v59, 1  ;;  %v742_v37 = vrot.slane %v2551_v23, 1  ;;  %v861_v23 = vrot.slane %v2608_v53, 1  ;;  %v2703_v59 = vld [vmem:[%s3156_s2 + $0x88] sm:$0xff]  }
  0x3b   : > { %927 = vrot.lane.b32.xlu0 %v2472_v24, %s2271_s9  ;;  %v2643_v46 = vsel %vm503_vm1, %v618_v14, %v622_v29  ;;  %v855_v29 = vor.u32 %v854_v0, %v850_v62  ;;  %v859_v26 = vrot.slane %v857_v5, 1  ;;  %v862_v48 = vrot.slane %v2212_v28, 1  ;;  %2111 = vmatprep.subr.bf16.mxu1 %v2703_v59 }
  0x3c   : > { %803 = vrot.lane.b32.xlu1 %v2384_v20, %s2271_s9  ;;  %v642_v25 = vor.u32 %v641_v11, %v637_v27  ;;  %v2680_v17 = vsel %vm728_vm0, %v741_v36, %v742_v37  ;;  %v2695_v27 = vld [vmem:[%s2446_s19 + $0x14] ss:$0 sps:$4 sm:$0x11]   ;;  %v939_v58 = vshll.u32 %v2687_v47, 16  ;;  %v937_v28 = vshrl.u32 %v2687_v47, 16 }
  0x3d   : > { %v2671_v14 = vsel %vm503_vm1, %v855_v29, %v859_v26  ;;  %3160 = vst [vmem:[#allocation2_spill] sm:$0xff] %v2695_v27  ;;  %v2708_v62 = vsel %vm728_vm0, %v861_v23, %v862_v48  ;;  %v944_v5 = vshll.u32 %v2695_v27, 16  ;;  %v744_v29 = vrot.slane %v2466_v21, 1 }
  0x3e   : > { %v2664_v33 = vsel %vm503_vm1, %v642_v25, %v646_v19  ;;  %v941_v0 = vrot.slane %v939_v58, 1  ;;  %v745_v26 = vrot.slane %v2481_v30, 1  ;;  %v747_v30 = vrot.slane %v2487_v34, 1 }
  0x3f   : > { %974 = vrot.lane.b32.xlu0 %v2565_v32, %s2272_s10  ;;  %v946_v19 = vrot.slane %v944_v5, 1  ;;  %v750_v48 = vrot.slane %v2507_v49, 1  ;;  %v751_v58 = vrot.slane %v2533_v3, 1 }
  0x40   : > { %840 = vrot.lane.b32.xlu1 %v2346_v6, %s2272_s10  ;;  %v942_v11 = vor.u32 %v941_v0, %v937_v28  ;;  %v2728_v36 = vsel %vm728_vm0, %v744_v29, %v745_v26  ;;  %v754_v29 = vrot.slane %v2581_v39, 1 }
  0x41   : > { %v2762_v5 = vsel %vm728_vm0, %v750_v48, %v751_v58 }
  0x42   : > { %v947_v25 = vsel %vm503_vm1, %v942_v11, %v946_v19 }
  0x43   : > { %868 = vrot.lane.b32.xlu0 %v2591_v44, %s2273_s11 }
  0x44   : > { %700 = vrot.lane.b32.xlu1 %v2417_v54, %s2273_s11 }
  0x47   : > { %905 = vrot.lane.b32.xlu0 %v2541_v13, %s2271_s9 }
  0x48   : > { %781 = vrot.lane.b32.xlu1 %v2463_v18, %s2271_s9 }
  0x4b   : > { %952 = vrot.lane.b32.xlu0 %v2636_v42, %s2272_s10 }
  0x4c   : > { %818 = vrot.lane.b32.xlu1 %v2425_v61, %s2272_s10 }
  0x4f   : > { %892 = vrot.lane.b32.xlu0 %v2653_v60, %s2273_s11 }
  0x50   : > { %724 = vrot.lane.b32.xlu1 %v2437_v1, %s2273_s11 }
  0x53   : > { %929 = vrot.lane.b32.xlu0 %v2608_v53, %s2271_s9 }
  0x54   : > { %805 = vrot.lane.b32.xlu1 %v2525_v56, %s2271_s9 }
  0x57   : > { %976 = vrot.lane.b32.xlu0 %v2671_v14, %s2272_s10 }
  0x58   : > { %842 = vrot.lane.b32.xlu1 %v2472_v24, %s2272_s10 }
  0x5b   : > { %870 = vrot.lane.b32.xlu0 %v2680_v17, %s2273_s11 }
  0x5c   : > { %702 = vrot.lane.b32.xlu1 %v2500_v43, %s2273_s11 }
  0x5f   : > { %907 = vrot.lane.b32.xlu0 %v2466_v21, %s2271_s9 }
  0x60   : > { %783 = vrot.lane.b32.xlu1 %v2591_v44, %s2271_s9 }
  0x63   : > { %954 = vrot.lane.b32.xlu0 %v2513_v50, %s2272_s10 }
  0x64   : > { %820 = vrot.lane.b32.xlu1 %v2541_v13, %s2272_s10 }
  0x67   : > { %894 = vrot.lane.b32.xlu0 %v2708_v62, %s2273_s11 }
  0x68   : > { %726 = vrot.lane.b32.xlu1 %v2565_v32, %s2273_s11 }
  0x6b   : > { %931 = vrot.lane.b32.xlu0 %v2687_v47, %s2271_s9 }
  0x6c   : > { %807 = vrot.lane.b32.xlu1 %v2653_v60, %s2271_s9 }
  0x6f   : > { %978 = vrot.lane.b32.xlu0 %v947_v25, %s2272_s10  ;;  %v753_v25 = vrot.slane %v2562_v31, 1 }
  0x70   : > { %844 = vrot.lane.b32.xlu1 %v2608_v53, %s2272_s10  ;;  %v748_v53 = vrot.slane %v2516_v51, 1 }
  0x71   : > { %v2783_v58 = vsel %vm728_vm0, %v753_v25, %v754_v29 }
  0x72   : > { %v2745_v37 = vsel %vm728_vm0, %v747_v30, %v748_v53 }
  0x73   : > { %872 = vrot.lane.b32.xlu0 %v2728_v36, %s2273_s11 }
  0x74   : > { %704 = vrot.lane.b32.xlu1 %v2636_v42, %s2273_s11 }
  0x77   : > { %909 = vrot.lane.b32.xlu0 %v2487_v34, %s2271_s9 }
  0x78   : > { %785 = vrot.lane.b32.xlu1 %v2680_v17, %s2271_s9 }
  0x7b   : > { %956 = vrot.lane.b32.xlu0 %v2544_v15, %s2272_s10 }
  0x7c   : > { %822 = vrot.lane.b32.xlu1 %v2466_v21, %s2272_s10 }
  0x7f   : > { %874 = vrot.lane.b32.xlu0 %v2745_v37, %s2273_s11 }
  0x80   : > { %706 = vrot.lane.b32.xlu1 %v2513_v50, %s2273_s11 }
  0x83   : > { %911 = vrot.lane.b32.xlu0 %v2507_v49, %s2271_s9 }
  0x84   : > { %787 = vrot.lane.b32.xlu1 %v2728_v36, %s2271_s9 }
  0x85   : > { %v926_v23 = vpop.permute.xlu0 %925 }
  0x86   : > { %v902_v51 = vpop.permute.xlu1 %901 }
  0x87   : > { %958 = vrot.lane.b32.xlu0 %v2569_v35, %s2272_s10 }
  0x88   : > { %824 = vrot.lane.b32.xlu1 %v2487_v34, %s2272_s10 }
  0x89   : > { %v865_v0 = vpop.permute.xlu0 %864 }
  0x8a   : > { %v815_v28 = vpop.permute.xlu1 %814  ;;  %v1100_v30 = vsel %vm983_vm2, %v2454_v9, %v865_v0 }
  0x8b   : > { %876 = vrot.lane.b32.xlu0 %v2762_v5, %s2273_s11 }
  0x8c   : > { %708 = vrot.lane.b32.xlu1 %v2544_v15, %s2273_s11 }
  0x8d   : > { %v889_v11 = vpop.permute.xlu0 %888 }
  0x8e   : > { %v778_v19 = vpop.permute.xlu1 %777 }
  0x8f   : > { %913 = vrot.lane.b32.xlu0 %v2562_v31, %s2271_s9 }
  0x90   : > { %789 = vrot.lane.b32.xlu1 %v2745_v37, %s2271_s9 }
  0x91   : > { %v697_v26 = vpop.permute.xlu0 %696 }
  0x92   : > { %v802_v3 = vpop.permute.xlu1 %801  ;;  %v985_v53 = vsel %vm983_vm2, %v2366_v12, %v697_v26  ;;  %v1147_v12 = vsel %vm1016_vm3, %v1100_v30, %v902_v51  ;;  %v1136_v26 = vsel %vm983_vm2, %v2521_v52, %v889_v11 }
  0x93   : > { %960 = vrot.lane.b32.xlu0 %v2616_v4, %s2272_s10  ;;  %v1018_v39 = vsel %vm1016_vm3, %v985_v53, %v778_v19  ;;  %v1171_v51 = vsel %vm1016_vm3, %v1136_v26, %v926_v23  ;;  %v757_v23 = vrot.slane %v2603_v41, 1 }
  0x94   : > { %826 = vrot.lane.b32.xlu1 %v2507_v49, %s2272_s10  ;;  %v1051_v19 = vsel %vm1049_vm4, %v1018_v39, %v815_v28 }
  0x95   : > { %v949_v0 = vpop.permute.xlu0 %948 }
  0x96   : > { %v721_v48 = vpop.permute.xlu1 %720  ;;  %v1179_v27 = vsel %vm1049_vm4, %v1147_v12, %v949_v0 }
  0x97   : > { %v1009_v9 = vsel %vm983_vm2, %v2387_v22, %v721_v48  ;;  %878 = vrot.lane.b32.xlu0 %v2783_v58, %s2273_s11  ;;  %1457 = vmatprep.mubr.bf16.mxu0 %v1179_v27  ;;  %v2246_v27 = vld [vmem:[%s3156_s2 + $0x80] sm:$0xff]  }
  0x98   : > { %710 = vrot.lane.b32.xlu1 %v2569_v35, %s2273_s11  ;;  %1458 = vmatmul.mubr.bf16.vlgmr.msra.gmra.mxu0 %v1051_v19  ;;  %v1042_v29 = vsel %vm1016_vm3, %v1009_v9, %v802_v3  ;;  %v756_v3 = vrot.slane %v2598_v55, 1 }
  0x99   : > { %v973_v53 = vpop.permute.xlu0 %972 }
  0x9a   : > { %v839_v25 = vpop.permute.xlu1 %838  ;;  %v1215_v30 = vsel %vm1049_vm4, %v1171_v51, %v973_v53  ;;  %v2816_v9 = vsel %vm728_vm0, %v756_v3, %v757_v23  ;;  %v760_v51 = vrot.slane %v2620_v16, 1 }
  0x9b   : > { %v1087_v11 = vsel %vm1049_vm4, %v1042_v29, %v839_v25  ;;  %915 = vrot.lane.b32.xlu0 %v2598_v55, %s2271_s9  ;;  %1553 = vmatprep.mubr.bf16.mxu1 %v1215_v30 }
  0x9c   : > { %791 = vrot.lane.b32.xlu1 %v2762_v5, %s2271_s9  ;;  %1554 = vmatmul.mubr.bf16.vlgmr.msra.gmra.mxu1 %v1087_v11 }
  0x9d   : > { %v867_v48 = vpop.permute.xlu0 %866  ;;  %2112 = vmatpush3.bf16.msra.mxu1 %v2703_v59 }
  0x9e   : > { %v699_v28 = vpop.permute.xlu1 %698  ;;  %2113 = vmatprep.subr.bf16.mxu1 %v2246_v27  ;;  %v1103_v59 = vsel %vm983_vm2, %v2417_v54, %v867_v48  ;;  %v759_v54 = vrot.slane %v2613_v63, 1 }
  0x9f   : > { %962 = vrot.lane.b32.xlu0 %v2643_v46, %s2272_s10  ;;  %v987_v41 = vsel %vm983_vm2, %v2354_v8, %v699_v28 }
  0xa0   : > { %828 = vrot.lane.b32.xlu1 %v2562_v31, %s2272_s10 }
  0xa1   : > { %v904_v0 = vpop.permute.xlu0 %903  ;;  %2114 = vmatpush3.bf16.msra.mxu1 %v2246_v27  ;;  %v2841_v27 = vsel %vm728_vm0, %v759_v54, %v760_v51 }
  0xa2   : > { %v780_v39 = vpop.permute.xlu1 %779  ;;  %v1149_v19 = vsel %vm1016_vm3, %v1103_v59, %v904_v0 }
  0xa3   : > { %880 = vrot.lane.b32.xlu0 %v2816_v9, %s2273_s11  ;;  %v1020_v12 = vsel %vm1016_vm3, %v987_v41, %v780_v39 }
  0xa4   : > { %712 = vrot.lane.b32.xlu1 %v2616_v4, %s2273_s11 }
  0xa5   : > { %v951_v25 = vpop.permute.xlu0 %950 }
  0xa6   : > { %v817_v26 = vpop.permute.xlu1 %816  ;;  %v1182_v53 = vsel %vm1049_vm4, %v1149_v19, %v951_v25 }
  0xa7   : > { %v1054_v29 = vsel %vm1049_vm4, %v1020_v12, %v817_v26  ;;  %917 = vrot.lane.b32.xlu0 %v2613_v63, %s2271_s9  ;;  %1465 = vmatprep.mubr.bf16.mxu0 %v1182_v53  ;;  %v763_v26 = vrot.slane %v2640_v45, 1 }
  0xa8   : > { %793 = vrot.lane.b32.xlu1 %v2783_v58, %s2271_s9  ;;  %1466 = vmatmul.mubr.bf16.gmra.mxu0 %v1054_v29 }
  0xa9   : > { %v891_v11 = vpop.permute.xlu0 %890 }
  0xaa   : > { %v723_v8 = vpop.permute.xlu1 %722  ;;  %v1139_v16 = vsel %vm983_vm2, %v2437_v1, %v891_v11  ;;  %v762_v1 = vrot.slane %v2633_v40, 1 }
  0xab   : > { %964 = vrot.lane.b32.xlu0 %v2657_v2, %s2272_s10  ;;  %v1011_v3 = vsel %vm983_vm2, %v2362_v10, %v723_v8 }
  0xac   : > { %830 = vrot.lane.b32.xlu1 %v2598_v55, %s2272_s10  ;;  %v2866_v29 = vsel %vm728_vm0, %v762_v1, %v763_v26 }
  0xad   : > { %v928_v28 = vpop.permute.xlu0 %927 }
  0xae   : > { %v804_v30 = vpop.permute.xlu1 %803  ;;  %v1173_v39 = vsel %vm1016_vm3, %v1139_v16, %v928_v28 }
  0xaf   : > { %882 = vrot.lane.b32.xlu0 %v2841_v27, %s2273_s11  ;;  %v1044_v23 = vsel %vm1016_vm3, %v1011_v3, %v804_v30 }
  0xb0   : > { %714 = vrot.lane.b32.xlu1 %v2643_v46, %s2273_s11 }
  0xb1   : > { %v975_v0 = vpop.permute.xlu0 %974 }
  0xb2   : > { %v841_v48 = vpop.permute.xlu1 %840  ;;  %v1218_v59 = vsel %vm1049_vm4, %v1173_v39, %v975_v0 }
  0xb3   : > { %v1090_v41 = vsel %vm1049_vm4, %v1044_v23, %v841_v48  ;;  %919 = vrot.lane.b32.xlu0 %v2633_v40, %s2271_s9  ;;  %1561 = vmatprep.mubr.bf16.mxu1 %v1218_v59 }
  0xb4   : > { %795 = vrot.lane.b32.xlu1 %v2816_v9, %s2271_s9  ;;  %1562 = vmatmul.mubr.bf16.gmra.mxu1 %v1090_v41 }
  0xb5   : > { %v869_v19 = vpop.permute.xlu0 %868 }
  0xb6   : > { %v701_v12 = vpop.permute.xlu1 %700  ;;  %v1106_v45 = vsel %vm983_vm2, %v2500_v43, %v869_v19 }
  0xb7   : > { %966 = vrot.lane.b32.xlu0 %v2664_v33, %s2272_s10  ;;  %v989_v8 = vsel %vm983_vm2, %v2349_v7, %v701_v12 }
  0xb8   : > { %832 = vrot.lane.b32.xlu1 %v2613_v63, %s2272_s10 }
  0xb9   : > { %v906_v53 = vpop.permute.xlu0 %905 }
  0xba   : > { %v782_v25 = vpop.permute.xlu1 %781  ;;  %v1151_v11 = vsel %vm1016_vm3, %v1106_v45, %v906_v53 }
  0xbb   : > { %884 = vrot.lane.b32.xlu0 %v2866_v29, %s2273_s11  ;;  %v1022_v54 = vsel %vm1016_vm3, %v989_v8, %v782_v25 }
  0xbc   : > { %716 = vrot.lane.b32.xlu1 %v2657_v2, %s2273_s11 }
  0xbd   : > { %v953_v30 = vpop.permute.xlu0 %952 }
  0xbe   : > { %v819_v51 = vpop.permute.xlu1 %818  ;;  %v1185_v3 = vsel %vm1049_vm4, %v1151_v11, %v953_v30 }
  0xbf   : > { %v1057_v28 = vsel %vm1049_vm4, %v1022_v54, %v819_v51  ;;  %921 = vrot.lane.b32.xlu0 %v2387_v22, %s2271_s9  ;;  %1473 = vmatprep.mubr.bf16.mxu0 %v1185_v3 }
  0xc0   : > { %797 = vrot.lane.b32.xlu1 %v2841_v27, %s2271_s9  ;;  %1474 = vmatmul.mubr.bf16.gmra.mxu0 %v1057_v28 }
  0xc1   : > { %v893_v43 = vpop.permute.xlu0 %892 }
  0xc2   : > { %v725_v7 = vpop.permute.xlu1 %724  ;;  %v1142_v39 = vsel %vm983_vm2, %v2565_v32, %v893_v43 }
  0xc3   : > { %968 = vrot.lane.b32.xlu0 %v2422_v57, %s2272_s10  ;;  %v1013_v48 = vsel %vm983_vm2, %v2346_v6, %v725_v7 }
  0xc4   : > { %834 = vrot.lane.b32.xlu1 %v2633_v40, %s2272_s10 }
  0xc5   : > { %v930_v23 = vpop.permute.xlu0 %929 }
  0xc6   : > { %v806_v16 = vpop.permute.xlu1 %805  ;;  %v1175_v59 = vsel %vm1016_vm3, %v1142_v39, %v930_v23 }
  0xc7   : > { %886 = vrot.lane.b32.xlu0 %v2403_v38, %s2273_s11  ;;  %v1046_v0 = vsel %vm1016_vm3, %v1013_v48, %v806_v16 }
  0xc8   : > { %718 = vrot.lane.b32.xlu1 %v2664_v33, %s2273_s11 }
  0xc9   : > { %v977_v12 = vpop.permute.xlu0 %976 }
  0xca   : > { %v843_v41 = vpop.permute.xlu1 %842  ;;  %v1221_v26 = vsel %vm1049_vm4, %v1175_v59, %v977_v12 }
  0xcb   : > { %v1093_v1 = vsel %vm1049_vm4, %v1046_v0, %v843_v41  ;;  %923 = vrot.lane.b32.xlu0 %v2362_v10, %s2271_s9  ;;  %1569 = vmatprep.mubr.bf16.mxu1 %v1221_v26 }
  0xcc   : > { %799 = vrot.lane.b32.xlu1 %v2866_v29, %s2271_s9  ;;  %1570 = vmatmul.mubr.bf16.gmra.mxu1 %v1093_v1  ;;  %s1980_s9 = sshll.u32 %s3167_s15, 8 }
  0xcd   : > { %v871_v32 = vpop.permute.xlu0 %870  ;;  %s3052_s27 = scalar_lea.vmem %s3158_s4, %s1980_s9 }
  0xce   : > { %v703_v6 = vpop.permute.xlu1 %702  ;;  %v1109_v8 = vsel %vm983_vm2, %v2636_v42, %v871_v32 }
  0xcf   : > { %970 = vrot.lane.b32.xlu0 %v2521_v52, %s2272_s10  ;;  %v991_v53 = vsel %vm983_vm2, %v2425_v61, %v703_v6 }
  0xd0   : > { %836 = vrot.lane.b32.xlu1 %v2387_v22, %s2272_s10 }
  0xd1   : > { %v908_v25 = vpop.permute.xlu0 %907 }
  0xd2   : > { %v784_v19 = vpop.permute.xlu1 %783  ;;  %v1153_v54 = vsel %vm1016_vm3, %v1109_v8, %v908_v25 }
  0xd3   : > { %v1024_v10 = vsel %vm1016_vm3, %v991_v53, %v784_v19 }
  0xd5   : > { %v955_v51 = vpop.permute.xlu0 %954 }
  0xd6   : > { %v821_v45 = vpop.permute.xlu1 %820  ;;  %v1188_v22 = vsel %vm1049_vm4, %v1153_v54, %v955_v51 }
  0xd7   : > { %v1060_v11 = vsel %vm1049_vm4, %v1024_v10, %v821_v45  ;;  %1481 = vmatprep.mubr.bf16.mxu0 %v1188_v22 }
  0xd8   : > { %1482 = vmatmul.mubr.bf16.gmra.mxu0 %v1060_v11 }
  0xd9   : > { %v895_v30 = vpop.permute.xlu0 %894 }
  0xda   : > { %v727_v52 = vpop.permute.xlu1 %726  ;;  %v1145_v42 = vsel %vm983_vm2, %v2671_v14, %v895_v30 }
  0xdb   : > { %v1015_v61 = vsel %vm983_vm2, %v2472_v24, %v727_v52 }
  0xdd   : > { %v932_v3 = vpop.permute.xlu0 %931 }
  0xde   : > { %v808_v28 = vpop.permute.xlu1 %807  ;;  %v1177_v16 = vsel %vm1016_vm3, %v1145_v42, %v932_v3 }
  0xdf   : > { %v1048_v7 = vsel %vm1016_vm3, %v1015_v61, %v808_v28 }
  0xe1   : > { %v979_v23 = vpop.permute.xlu0 %978 }
  0xe2   : > { %v845_v43 = vpop.permute.xlu1 %844  ;;  %v1224_v39 = vsel %vm1049_vm4, %v1177_v16, %v979_v23 }
  0xe3   : > { %v1096_v48 = vsel %vm1049_vm4, %v1048_v7, %v845_v43  ;;  %1577 = vmatprep.mubr.bf16.mxu1 %v1224_v39 }
  0xe4   : > { %1578 = vmatmul.mubr.bf16.gmra.mxu1 %v1096_v48 }
  0xe5   : > { %v873_v41 = vpop.permute.xlu0 %872  ;;  %2115 = vmatprep.mubr.msk.bf16.mxu1 %vm983_vm2, %v2463_v18 }
  0xe6   : > { %v705_v0 = vpop.permute.xlu1 %704  ;;  %v1112_v12 = vsel %vm983_vm2, %v2513_v50, %v873_v41 }
  0xe7   : > { %v993_v14 = vsel %vm983_vm2, %v2541_v13, %v705_v0 }
  0xe9   : > { %v910_v59 = vpop.permute.xlu0 %909 }
  0xea   : > { %v786_v24 = vpop.permute.xlu1 %785  ;;  %v1155_v6 = vsel %vm1016_vm3, %v1112_v12, %v910_v59 }
  0xeb   : > { %v1026_v1 = vsel %vm1016_vm3, %v993_v14, %v786_v24 }
  0xec   : > { %2116 = vmatmul.mubr.msk.bf16.vlgmr.msra.gmra.mxu1 %vm983_vm2, %v2591_v44 }
  0xed   : > { %v957_v32 = vpop.permute.xlu0 %956  ;;  %2119 = vmatprep.mubr.msk.bf16.mxu1 %vm983_vm2, %v2680_v17 }
  0xee   : > { %v823_v26 = vpop.permute.xlu1 %822  ;;  %v1191_v18 = vsel %vm1049_vm4, %v1155_v6, %v957_v32 }
  0xef   : > { %v1063_v19 = vsel %vm1049_vm4, %v1026_v1, %v823_v26  ;;  %1489 = vmatprep.mubr.bf16.mxu0 %v1191_v18 }
  0xf0   : > { %1490 = vmatmul.mubr.bf16.gmra.mxu0 %v1063_v19 }
  0xf1   : > { %v875_v50 = vpop.permute.xlu0 %874 }
  0xf2   : > { %v707_v13 = vpop.permute.xlu1 %706  ;;  %v1115_v17 = vsel %vm983_vm2, %v2544_v15, %v875_v50 }
  0xf3   : > { %v995_v53 = vsel %vm983_vm2, %v2466_v21, %v707_v13 }
  0xf4   : > { %2120 = vmatmul.mubr.msk.bf16.gmra.mxu1 %vm983_vm2, %v2728_v36 }
  0xf5   : > { %v912_v44 = vpop.permute.xlu0 %911  ;;  %2123 = vmatprep.mubr.msk.bf16.mxu1 %vm983_vm2, %v2745_v37 }
  0xf6   : > { %v788_v25 = vpop.permute.xlu1 %787  ;;  %v1157_v45 = vsel %vm1016_vm3, %v1115_v17, %v912_v44 }
  0xf7   : > { %v1028_v8 = vsel %vm1016_vm3, %v995_v53, %v788_v25 }
  0xf9   : > { %v959_v54 = vpop.permute.xlu0 %958 }
  0xfa   : > { %v825_v10 = vpop.permute.xlu1 %824  ;;  %v1194_v36 = vsel %vm1049_vm4, %v1157_v45, %v959_v54 }
  0xfb   : > { %v1066_v51 = vsel %vm1049_vm4, %v1028_v8, %v825_v10  ;;  %1497 = vmatprep.mubr.bf16.mxu0 %v1194_v36 }
  0xfc   : > { %1498 = vmatmul.mubr.bf16.gmra.mxu0 %v1066_v51  ;;  %2124 = vmatmul.mubr.msk.bf16.gmra.mxu1 %vm983_vm2, %v2762_v5 }
  0xfd   : > { %v877_v21 = vpop.permute.xlu0 %876  ;;  %2127 = vmatprep.mubr.msk.bf16.mxu1 %vm983_vm2, %v2783_v58 }
  0xfe   : > { %v709_v37 = vpop.permute.xlu1 %708  ;;  %v1118_v52 = vsel %vm983_vm2, %v2569_v35, %v877_v21 }
  0xff   : > { %v997_v22 = vsel %vm983_vm2, %v2487_v34, %v709_v37 }
 0x101   : > { %v914_v11 = vpop.permute.xlu0 %913 }
 0x102   : > { %v790_v15 = vpop.permute.xlu1 %789  ;;  %v1159_v5 = vsel %vm1016_vm3, %v1118_v52, %v914_v11 }
 0x103   : > { %v1030_v30 = vsel %vm1016_vm3, %v997_v22, %v790_v15 }
 0x104   : > { %2128 = vmatmul.mubr.msk.bf16.gmra.mxu1 %vm983_vm2, %v2816_v9 }
 0x105   : > { %v961_v3 = vpop.permute.xlu0 %960  ;;  %2131 = vmatprep.mubr.msk.bf16.mxu1 %vm983_vm2, %v2841_v27 }
 0x106   : > { %v827_v28 = vpop.permute.xlu1 %826  ;;  %v1197_v58 = vsel %vm1049_vm4, %v1159_v5, %v961_v3 }
 0x107   : > { %v1069_v61 = vsel %vm1049_vm4, %v1030_v30, %v827_v28  ;;  %1505 = vmatprep.mubr.bf16.mxu0 %v1197_v58 }
 0x108   : > { %1506 = vmatmul.mubr.bf16.gmra.mxu0 %v1069_v61 }
 0x109   : > { %v879_v35 = vpop.permute.xlu0 %878 }
 0x10a   : > { %v711_v34 = vpop.permute.xlu1 %710  ;;  %v1121_v27 = vsel %vm983_vm2, %v2616_v4, %v879_v35 }
 0x10b   : > { %v999_v7 = vsel %vm983_vm2, %v2507_v49, %v711_v34 }
 0x10c   : > { %2132 = vmatmul.mubr.msk.bf16.gmra.mxu1 %vm983_vm2, %v2866_v29 }
 0x10d   : > { %v916_v9 = vpop.permute.xlu0 %915  ;;  %2135 = vmatprep.mubr.msk.bf16.mxu1 %vm983_vm2, %v2403_v38 }
 0x10e   : > { %v792_v42 = vpop.permute.xlu1 %791  ;;  %v1161_v23 = vsel %vm1016_vm3, %v1121_v27, %v916_v9 }
 0x10f   : > { %v1032_v43 = vsel %vm1016_vm3, %v999_v7, %v792_v42 }
 0x111   : > { %v963_v48 = vpop.permute.xlu0 %962 }
 0x112   : > { %v829_v16 = vpop.permute.xlu1 %828  ;;  %v1200_v29 = vsel %vm1049_vm4, %v1161_v23, %v963_v48 }
 0x113   : > { %v1072_v39 = vsel %vm1049_vm4, %v1032_v43, %v829_v16  ;;  %1513 = vmatprep.mubr.bf16.mxu0 %v1200_v29 }
 0x114   : > { %1514 = vmatmul.mubr.bf16.gmra.mxu0 %v1072_v39  ;;  %2136 = vmatmul.mubr.msk.bf16.gmra.mxu1 %vm983_vm2, %v2384_v20 }
 0x115   : > { %v881_v49 = vpop.permute.xlu0 %880  ;;  %2139 = vmatprep.mubr.msk.bf16.mxu1 %vm983_vm2, %v2525_v56  ;;  %v980_v56 = vrot.slane %v2687_v47, 1 }
 0x116   : > { %v713_v38 = vpop.permute.xlu1 %712  ;;  %v1124_v24 = vsel %vm983_vm2, %v2643_v46, %v881_v49 }
 0x117   : > { %v1001_v41 = vsel %vm983_vm2, %v2562_v31, %v713_v38  ;;  %v3161_v31 = vld [vmem:[#allocation2_spill] sm:$0xff] }
 0x118   : > { %v981_v26 = vrot.slane %v3161_v31, 1 }
 0x119   : > { %v918_v0 = vpop.permute.xlu0 %917 }
 0x11a   : > { %v794_v4 = vpop.permute.xlu1 %793  ;;  %v1163_v20 = vsel %vm1016_vm3, %v1124_v24, %v918_v0 }
 0x11b   : > { %v1034_v59 = vsel %vm1016_vm3, %v1001_v41, %v794_v4 }
 0x11c   : > { %2140 = vmatmul.mubr.msk.bf16.gmra.mxu1 %vm983_vm2, %v2653_v60  ;;  %v982_v60 = vsel %vm728_vm0, %v980_v56, %v981_v26 }
 0x11d   : > { %v965_v12 = vpop.permute.xlu0 %964  ;;  %2143 = vmatprep.mubr.msk.bf16.mxu1 %vm983_vm2, %v2708_v62 }
 0x11e   : > { %v831_v14 = vpop.permute.xlu1 %830  ;;  %v1203_v46 = vsel %vm1049_vm4, %v1163_v20, %v965_v12 }
 0x11f   : > { %v1075_v1 = vsel %vm1049_vm4, %v1034_v59, %v831_v14  ;;  %1521 = vmatprep.mubr.bf16.mxu0 %v1203_v46 }
 0x120   : > { %1522 = vmatmul.mubr.bf16.gmra.mxu0 %v1075_v1 }
 0x121   : > { %v883_v32 = vpop.permute.xlu0 %882 }
 0x122   : > { %v715_v6 = vpop.permute.xlu1 %714  ;;  %v1127_v47 = vsel %vm983_vm2, %v2657_v2, %v883_v32 }
 0x123   : > { %v1003_v13 = vsel %vm983_vm2, %v2598_v55, %v715_v6 }
 0x124   : > { %2144 = vmatmul.mubr.msk.bf16.gmra.mxu1 %vm983_vm2, %v982_v60 }
 0x125   : > { %v920_v18 = vpop.permute.xlu0 %919 }
 0x126   : > { %v796_v19 = vpop.permute.xlu1 %795  ;;  %v1165_v25 = vsel %vm1016_vm3, %v1127_v47, %v920_v18 }
 0x127   : > { %v1036_v62 = vsel %vm1016_vm3, %v1003_v13, %v796_v19 }
 0x129   : > { %v967_v44 = vpop.permute.xlu0 %966 }
 0x12a   : > { %v833_v50 = vpop.permute.xlu1 %832  ;;  %v1206_v17 = vsel %vm1049_vm4, %v1165_v25, %v967_v44 }
 0x12b   : > { %v1078_v53 = vsel %vm1049_vm4, %v1036_v62, %v833_v50  ;;  %1529 = vmatprep.mubr.bf16.mxu0 %v1206_v17  ;;  %v3046_v17 = vld [vmem:[%s3157_s3] ss:$0 sm:$0xff] }
 0x12c   : > { %1530 = vmatmul.mubr.bf16.gmra.mxu0 %v1078_v53 }
 0x12d   : > { %v885_v10 = vpop.permute.xlu0 %884 }
 0x12e   : > { %v717_v8 = vpop.permute.xlu1 %716  ;;  %v1130_v2 = vsel %vm983_vm2, %v2664_v33, %v885_v10 }
 0x12f   : > { %v1005_v55 = vsel %vm983_vm2, %v2613_v63, %v717_v8 }
 0x131   : > { %v922_v54 = vpop.permute.xlu0 %921 }
 0x132   : > { %v798_v45 = vpop.permute.xlu1 %797  ;;  %v1167_v37 = vsel %vm1016_vm3, %v1130_v2, %v922_v54 }
 0x133   : > { %v1038_v51 = vsel %vm1016_vm3, %v1005_v55, %v798_v45 }
 0x135   : > { %v969_v21 = vpop.permute.xlu0 %968 }
 0x136   : > { %v835_v36 = vpop.permute.xlu1 %834  ;;  %v1209_v11 = vsel %vm1049_vm4, %v1167_v37, %v969_v21 }
 0x137   : > { %v1081_v15 = vsel %vm1049_vm4, %v1038_v51, %v835_v36  ;;  %1537 = vmatprep.mubr.bf16.mxu0 %v1209_v11 }
 0x138   : > { %1538 = vmatmul.mubr.bf16.gmra.mxu0 %v1081_v15 }
 0x139   : > { %v887_v52 = vpop.permute.xlu0 %886 }
 0x13a   : > { %v719_v22 = vpop.permute.xlu1 %718  ;;  %v1133_v33 = vsel %vm983_vm2, %v2422_v57, %v887_v52 }
 0x13b   : > { %v1007_v63 = vsel %vm983_vm2, %v2633_v40, %v719_v22 }
 0x13d   : > { %v924_v28 = vpop.permute.xlu0 %923 }
 0x13e   : > { %v800_v30 = vpop.permute.xlu1 %799  ;;  %v1169_v61 = vsel %vm1016_vm3, %v1133_v33, %v924_v28 }
 0x13f   : > { %v1040_v5 = vsel %vm1016_vm3, %v1007_v63, %v800_v30 }
 0x141   : > { %v971_v58 = vpop.permute.xlu0 %970 }
 0x142   : > { %v837_v3 = vpop.permute.xlu1 %836  ;;  %v1212_v35 = vsel %vm1049_vm4, %v1169_v61, %v971_v58 }
 0x143   : > { %v1084_v34 = vsel %vm1049_vm4, %v1040_v5, %v837_v3  ;;  %1545 = vmatprep.mubr.bf16.mxu0 %v1212_v35 }
 0x144   : > { %1546 = vmatmul.mubr.bf16.gmra.mxu0 %v1084_v34 }
 0x158   : > { %v1997_v48 = vpop.f32.mrf.mxu0 }
 0x15a   : > { %v1998_v49 = vpop.f32.mrf.mxu0 }
 0x15b   : > { %v1999_v25 = vadd.f32 %v1998_v49, %v1997_v48 }
 0x15c   : > { %v2069_v42 = vpop.f32.mrf.mxu1  ;;  %v2000_v4 = vpop.f32.mrf.mxu0 }
 0x15d   : > { %v1460_v2 = vadd.f32 %v1999_v25, %v3046_v17 }
 0x15e   : > { %v2070_v9 = vpop.f32.mrf.mxu1  ;;  %v2001_v0 = vpop.f32.mrf.mxu0 }
 0x15f   : > { %v3022_v7 = vadd.f32 %v2070_v9, %v2069_v42  ;;  %v2002_v54 = vadd.f32 %v2001_v0, %v2000_v4 }
 0x160   : > { %v2072_v40 = vpop.f32.mrf.mxu1 }
 0x161   : > { %v1463_v28 = vadd.f32 %v2002_v54, %v3046_v17 }
 0x162   : > { %v2073_v27 = vpop.f32.mrf.mxu1 }
 0x163   : > { %v3024_v43 = vadd.f32 %v2073_v27, %v2072_v40 }
 0x168   : > { %v2003_v41 = vpop.f32.mrf.mxu0 }
 0x16a   : > { %v2004_v24 = vpop.f32.mrf.mxu0 }
 0x16b   : > { %v2005_v62 = vadd.f32 %v2004_v24, %v2003_v41 }
 0x16c   : > { %v2006_v14 = vpop.f32.mrf.mxu0 }
 0x16d   : > { %v1468_v10 = vadd.f32 %v2005_v62, %v3046_v17 }
 0x16e   : > { %v2007_v56 = vpop.f32.mrf.mxu0 }
 0x16f   : > { %v2008_v8 = vadd.f32 %v2007_v56, %v2006_v14 }
 0x171   : > { %v1471_v15 = vadd.f32 %v2008_v8, %v3046_v17 }
 0x174   : > { %v2075_v57 = vpop.f32.mrf.mxu1 }
 0x176   : > { %v2076_v16 = vpop.f32.mrf.mxu1 }
 0x177   : > { %v3026_v23 = vadd.f32 %v2076_v16, %v2075_v57 }
 0x178   : > { %v2078_v39 = vpop.f32.mrf.mxu1 }
 0x17a   : > { %v2079_v29 = vpop.f32.mrf.mxu1 }
 0x17b   : > { %v3028_v38 = vadd.f32 %v2079_v29, %v2078_v39 }
 0x180   : > { %v2009_v46 = vpop.f32.mrf.mxu0 }
 0x182   : > { %v2010_v6 = vpop.f32.mrf.mxu0 }
 0x183   : > { %v2011_v52 = vadd.f32 %v2010_v6, %v2009_v46 }
 0x184   : > { %v2012_v32 = vpop.f32.mrf.mxu0 }
 0x185   : > { %v1476_v42 = vadd.f32 %v2011_v52, %v3046_v17 }
 0x186   : > { %v2013_v60 = vpop.f32.mrf.mxu0 }
 0x187   : > { %v2014_v34 = vadd.f32 %v2013_v60, %v2012_v32 }
 0x189   : > { %v1479_v29 = vadd.f32 %v2014_v34, %v3046_v17 }
 0x18c   : > { %v2081_v59 = vpop.f32.mrf.mxu1 }
 0x18e   : > { %v2082_v20 = vpop.f32.mrf.mxu1 }
 0x18f   : > { %v3030_v12 = vadd.f32 %v2082_v20, %v2081_v59 }
 0x190   : > { %v2084_v1 = vpop.f32.mrf.mxu1 }
 0x192   : > { %v2085_v31 = vpop.f32.mrf.mxu1 }
 0x193   : > { %v3032_v26 = vadd.f32 %v2085_v31, %v2084_v1 }
 0x198   : > { %v2015_v19 = vpop.f32.mrf.mxu0 }
 0x19a   : > { %v2016_v13 = vpop.f32.mrf.mxu0 }
 0x19b   : > { %v2017_v37 = vadd.f32 %v2016_v13, %v2015_v19 }
 0x19c   : > { %v2018_v44 = vpop.f32.mrf.mxu0 }
 0x19d   : > { %v1484_v61 = vadd.f32 %v2017_v37, %v3046_v17 }
 0x19e   : > { %v2019_v51 = vpop.f32.mrf.mxu0 }
 0x19f   : > { %v2020_v5 = vadd.f32 %v2019_v51, %v2018_v44 }
 0x1a1   : > { %v1487_v57 = vadd.f32 %v2020_v5, %v3046_v17 }
 0x1a4   : > { %v3034_v18 = vpop.f32.mrf.mxu1 }
 0x1a6   : > { %v3036_v47 = vpop.f32.mrf.mxu1 }
 0x1a8   : > { %v3038_v50 = vpop.f32.mrf.mxu1 }
 0x1aa   : > { %v3041_v53 = vpop.f32.mrf.mxu1 }
 0x1ac   : > { %v2117_v45 = vpop.f32.mrf.mxu1 }
 0x1ad   : > { %v1629_v55 = vadd.f32 %v2117_v45, %v1468_v10 }
 0x1ae   : > { %v1620_v36 = vpop.f32.mrf.mxu1 }
 0x1af   : > { %1749 = vst [vmem:[%s3052_s27 + $0x10] sm:$0xff] %v1629_v55  ;;  %v1621_v21 = vadd.f32 %v1620_v36, %v1460_v2 }
 0x1b0   : > { %v2021_v11 = vpop.f32.mrf.mxu0  ;;  %v2118_v22 = vpop.f32.mrf.mxu1 }
 0x1b1   : > { %1747 = vst [vmem:[%s3052_s27] sm:$0xff] %v1621_v21  ;;  %v1632_v30 = vadd.f32 %v2118_v22, %v1471_v15 }
 0x1b2   : > { %v2022_v63 = vpop.f32.mrf.mxu0  ;;  %v1623_v33 = vpop.f32.mrf.mxu1 }
 0x1b3   : > { %1750 = vst [vmem:[%s3052_s27 + $0x18] sm:$0xff] %v1632_v30  ;;  %v1624_v3 = vadd.f32 %v1623_v33, %v1463_v28  ;;  %v2023_v48 = vadd.f32 %v2022_v63, %v2021_v11 }
 0x1b4   : > { %v2121_v58 = vpop.f32.mrf.mxu1  ;;  %v2024_v9 = vpop.f32.mrf.mxu0 }
 0x1b5   : > { %1748 = vst [vmem:[%s3052_s27 + $0x8] sm:$0xff] %v1624_v3  ;;  %v1645_v35 = vadd.f32 %v2121_v58, %v1484_v61  ;;  %v1492_v14 = vadd.f32 %v2023_v48, %v3046_v17 }
 0x1b6   : > { %v1636_v40 = vpop.f32.mrf.mxu1  ;;  %v2025_v49 = vpop.f32.mrf.mxu0 }
 0x1b7   : > { %1753 = vst [vmem:[%s3052_s27 + $0x30] sm:$0xff] %v1645_v35  ;;  %v1637_v27 = vadd.f32 %v1636_v40, %v1476_v42  ;;  %v2026_v59 = vadd.f32 %v2025_v49, %v2024_v9 }
 0x1b8   : > { %v2122_v16 = vpop.f32.mrf.mxu1 }
 0x1b9   : > { %1751 = vst [vmem:[%s3052_s27 + $0x20] sm:$0xff] %v1637_v27  ;;  %v1648_v39 = vadd.f32 %v2122_v16, %v1487_v57  ;;  %v1495_v60 = vadd.f32 %v2026_v59, %v3046_v17  ;;  %v2089_v59 = vadd.f32 %v3036_v47, %v3034_v18  ;;  %v2092_v18 = vadd.f32 %v3041_v53, %v3038_v50 }
 0x1ba   : > { %v1639_v4 = vpop.f32.mrf.mxu1 }
 0x1bb   : > { %1754 = vst [vmem:[%s3052_s27 + $0x38] sm:$0xff] %v1648_v39  ;;  %v1640_v0 = vadd.f32 %v1639_v4, %v1479_v29  ;;  %v1564_v29 = vadd.f32 %v3026_v23, %v3046_v17 }
 0x1bc   : > { %v2027_v41 = vpop.f32.mrf.mxu0  ;;  %v2125_v24 = vpop.f32.mrf.mxu1 }
 0x1bd   : > { %1752 = vst [vmem:[%s3052_s27 + $0x28] sm:$0xff] %v1640_v0 }
 0x1be   : > { %v2028_v20 = vpop.f32.mrf.mxu0  ;;  %v1652_v1 = vpop.f32.mrf.mxu1 }
 0x1bf   : > { %v2029_v56 = vadd.f32 %v2028_v20, %v2027_v41  ;;  %v1653_v31 = vadd.f32 %v1652_v1, %v1492_v14  ;;  %v1556_v41 = vadd.f32 %v3022_v7, %v3046_v17  ;;  %v1567_v1 = vadd.f32 %v3028_v38, %v3046_v17 }
 0x1c0   : > { %v2030_v46 = vpop.f32.mrf.mxu0  ;;  %v2126_v6 = vpop.f32.mrf.mxu1  ;;  %v1559_v7 = vadd.f32 %v3024_v43, %v3046_v17  ;;  %v1580_v38 = vadd.f32 %v2089_v59, %v3046_v17  ;;  %v1572_v43 = vadd.f32 %v3030_v12, %v3046_v17  ;;  %v1575_v12 = vadd.f32 %v3032_v26, %v3046_v17 }
 0x1c1   : > { %v1500_v32 = vadd.f32 %v2029_v56, %v3046_v17  ;;  %1755 = vst [vmem:[%s3052_s27 + $0x40] sm:$0xff] %v1653_v31 }
 0x1c2   : > { %v2031_v19 = vpop.f32.mrf.mxu0  ;;  %v1655_v13 = vpop.f32.mrf.mxu1 }
 0x1c3   : > { %v1661_v62 = vadd.f32 %v2125_v24, %v1500_v32  ;;  %v2032_v25 = vadd.f32 %v2031_v19, %v2030_v46  ;;  %v1656_v44 = vadd.f32 %v1655_v13, %v1495_v60 }
 0x1c4   : > { %v2129_v8 = vpop.f32.mrf.mxu1 }
 0x1c5   : > { %1757 = vst [vmem:[%s3052_s27 + $0x50] sm:$0xff] %v1661_v62  ;;  %v1503_v10 = vadd.f32 %v2032_v25, %v3046_v17  ;;  %1756 = vst [vmem:[%s3052_s27 + $0x48] sm:$0xff] %v1656_v44 }
 0x1c6   : > { %v1668_v45 = vpop.f32.mrf.mxu1 }
 0x1c7   : > { %v1664_v54 = vadd.f32 %v2126_v6, %v1503_v10  ;;  %v1583_v10 = vadd.f32 %v2092_v18, %v3046_v17 }
 0x1c8   : > { %v2033_v55 = vpop.f32.mrf.mxu0  ;;  %v2130_v2 = vpop.f32.mrf.mxu1 }
 0x1c9   : > { %1758 = vst [vmem:[%s3052_s27 + $0x58] sm:$0xff] %v1664_v54 }
 0x1ca   : > { %v2034_v51 = vpop.f32.mrf.mxu0  ;;  %v1671_v36 = vpop.f32.mrf.mxu1 }
 0x1cb   : > { %v2035_v37 = vadd.f32 %v2034_v51, %v2033_v55 }
 0x1cc   : > { %v2036_v21 = vpop.f32.mrf.mxu0  ;;  %v3077_v15 = vpop.f32.mrf.mxu1 }
 0x1cd   : > { %v1508_v11 = vadd.f32 %v2035_v37, %v3046_v17 }
 0x1ce   : > { %v2037_v22 = vpop.f32.mrf.mxu0  ;;  %v1684_v52 = vpop.f32.mrf.mxu1 }
 0x1cf   : > { %v1669_v30 = vadd.f32 %v1668_v45, %v1508_v11  ;;  %v2038_v28 = vadd.f32 %v2037_v22, %v2036_v21 }
 0x1d0   : > { %v3080_v63 = vpop.f32.mrf.mxu1 }
 0x1d1   : > { %1759 = vst [vmem:[%s3052_s27 + $0x60] sm:$0xff] %v1669_v30  ;;  %v1511_v33 = vadd.f32 %v2038_v28, %v3046_v17 }
 0x1d2   : > { %v1687_v5 = vpop.f32.mrf.mxu1 }
 0x1d3   : > { %v1672_v3 = vadd.f32 %v1671_v36, %v1511_v33 }
 0x1d4   : > { %v2039_v61 = vpop.f32.mrf.mxu0  ;;  %v3084_v58 = vpop.f32.mrf.mxu1 }
 0x1d5   : > { %1760 = vst [vmem:[%s3052_s27 + $0x68] sm:$0xff] %v1672_v3 }
 0x1d6   : > { %v2040_v34 = vpop.f32.mrf.mxu0  ;;  %v3087_v35 = vpop.f32.mrf.mxu1 }
 0x1d7   : > { %v2041_v42 = vadd.f32 %v2040_v34, %v2039_v61 }
 0x1d8   : > { %v2042_v9 = vpop.f32.mrf.mxu0  ;;  %v3089_v40 = vpop.f32.mrf.mxu1 }
 0x1d9   : > { %v1516_v27 = vadd.f32 %v2041_v42, %v3046_v17 }
 0x1da   : > { %v2043_v57 = vpop.f32.mrf.mxu0  ;;  %v3092_v16 = vpop.f32.mrf.mxu1 }
 0x1db   : > { %v1677_v48 = vadd.f32 %v2129_v8, %v1516_v27  ;;  %v2044_v39 = vadd.f32 %v2043_v57, %v2042_v9 }
 0x1dc   : > { %v2141_v49 = vpop.f32.mrf.mxu1 }
 0x1dd   : > { %1761 = vst [vmem:[%s3052_s27 + $0x70] sm:$0xff] %v1677_v48  ;;  %v1519_v4 = vadd.f32 %v2044_v39, %v3046_v17  ;;  %v1725_v0 = vadd.f32 %v2141_v49, %v1564_v29 }
 0x1de   : > { %v1716_v24 = vpop.f32.mrf.mxu1 }
 0x1df   : > { %v1680_v14 = vadd.f32 %v2130_v2, %v1519_v4  ;;  %1773 = vst [vmem:[%s3052_s27 + $0xd0] sm:$0xff] %v1725_v0  ;;  %v1717_v20 = vadd.f32 %v1716_v24, %v1556_v41 }
 0x1e0   : > { %v2045_v23 = vpop.f32.mrf.mxu0  ;;  %v2142_v56 = vpop.f32.mrf.mxu1 }
 0x1e1   : > { %1762 = vst [vmem:[%s3052_s27 + $0x78] sm:$0xff] %v1680_v14  ;;  %1771 = vst [vmem:[%s3052_s27 + $0xc0] sm:$0xff] %v1717_v20  ;;  %v1728_v31 = vadd.f32 %v2142_v56, %v1567_v1 }
 0x1e2   : > { %v2046_v46 = vpop.f32.mrf.mxu0  ;;  %v1719_v6 = vpop.f32.mrf.mxu1 }
 0x1e3   : > { %1774 = vst [vmem:[%s3052_s27 + $0xd8] sm:$0xff] %v1728_v31  ;;  %v2047_v47 = vadd.f32 %v2046_v46, %v2045_v23  ;;  %v1720_v32 = vadd.f32 %v1719_v6, %v1559_v7 }
 0x1e4   : > { %v2048_v60 = vpop.f32.mrf.mxu0  ;;  %v2145_v19 = vpop.f32.mrf.mxu1 }
 0x1e5   : > { %v1524_v13 = vadd.f32 %v2047_v47, %v3046_v17  ;;  %1772 = vst [vmem:[%s3052_s27 + $0xc8] sm:$0xff] %v1720_v32  ;;  %v1741_v62 = vadd.f32 %v2145_v19, %v1580_v38 }
 0x1e6   : > { %v2049_v25 = vpop.f32.mrf.mxu0  ;;  %v1732_v44 = vpop.f32.mrf.mxu1 }
 0x1e7   : > { %v1685_v50 = vadd.f32 %v1684_v52, %v1524_v13  ;;  %1777 = vst [vmem:[%s3052_s27 + $0xf0] sm:$0xff] %v1741_v62  ;;  %v2050_v53 = vadd.f32 %v2049_v25, %v2048_v60  ;;  %v1733_v8 = vadd.f32 %v1732_v44, %v1572_v43 }
 0x1e8   : > { %v2146_v45 = vpop.f32.mrf.mxu1 }
 0x1e9   : > { %1763 = vst [vmem:[%s3052_s27 + $0x80] sm:$0xff] %v1685_v50  ;;  %v1527_v54 = vadd.f32 %v2050_v53, %v3046_v17  ;;  %1775 = vst [vmem:[%s3052_s27 + $0xe0] sm:$0xff] %v1733_v8  ;;  %v1744_v55 = vadd.f32 %v2146_v45, %v1583_v10 }
 0x1ea   : > { %v1735_v2 = vpop.f32.mrf.mxu1 }
 0x1eb   : > { %v1688_v51 = vadd.f32 %v1687_v5, %v1527_v54  ;;  %1778 = vst [vmem:[%s3052_s27 + $0xf8] sm:$0xff] %v1744_v55  ;;  %v1736_v36 = vadd.f32 %v1735_v2, %v1575_v12 }
 0x1ec   : > { %v2051_v37 = vpop.f32.mrf.mxu0 }
 0x1ed   : > { %1764 = vst [vmem:[%s3052_s27 + $0x88] sm:$0xff] %v1688_v51  ;;  %1776 = vst [vmem:[%s3052_s27 + $0xe8] sm:$0xff] %v1736_v36 }
 0x1ee   : > { %v2052_v21 = vpop.f32.mrf.mxu0 }
 0x1ef   : > { %v2053_v11 = vadd.f32 %v2052_v21, %v2051_v37 }
 0x1f0   : > { %v2054_v22 = vpop.f32.mrf.mxu0 }
 0x1f1   : > { %v1532_v52 = vadd.f32 %v2053_v11, %v3046_v17 }
 0x1f2   : > { %v2055_v30 = vpop.f32.mrf.mxu0 }
 0x1f3   : > { %v1693_v28 = vadd.f32 %v3077_v15, %v1532_v52  ;;  %v2056_v33 = vadd.f32 %v2055_v30, %v2054_v22 }
 0x1f5   : > { %1765 = vst [vmem:[%s3052_s27 + $0x90] sm:$0xff] %v1693_v28  ;;  %v1535_v26 = vadd.f32 %v2056_v33, %v3046_v17 }
 0x1f7   : > { %v1696_v5 = vadd.f32 %v3080_v63, %v1535_v26 }
 0x1f8   : > { %v2057_v3 = vpop.f32.mrf.mxu0 }
 0x1f9   : > { %1766 = vst [vmem:[%s3052_s27 + $0x98] sm:$0xff] %v1696_v5 }
 0x1fa   : > { %v2058_v61 = vpop.f32.mrf.mxu0 }
 0x1fb   : > { %v2059_v34 = vadd.f32 %v2058_v61, %v2057_v3 }
 0x1fc   : > { %v2060_v42 = vpop.f32.mrf.mxu0 }
 0x1fd   : > { %v1540_v9 = vadd.f32 %v2059_v34, %v3046_v17 }
 0x1fe   : > { %v2061_v27 = vpop.f32.mrf.mxu0 }
 0x1ff   : > { %v1701_v57 = vadd.f32 %v3087_v35, %v1540_v9  ;;  %v2062_v48 = vadd.f32 %v2061_v27, %v2060_v42 }
 0x201   : > { %1767 = vst [vmem:[%s3052_s27 + $0xa0] sm:$0xff] %v1701_v57  ;;  %v1543_v15 = vadd.f32 %v2062_v48, %v3046_v17 }
 0x203   : > { %v1704_v39 = vadd.f32 %v3092_v16, %v1543_v15 }
 0x204   : > { %v2063_v29 = vpop.f32.mrf.mxu0 }
 0x205   : > { %1768 = vst [vmem:[%s3052_s27 + $0xa8] sm:$0xff] %v1704_v39 }
 0x206   : > { %v2064_v63 = vpop.f32.mrf.mxu0 }
 0x207   : > { %v2065_v49 = vadd.f32 %v2064_v63, %v2063_v29 }
 0x208   : > { %v2066_v4 = vpop.f32.mrf.mxu0 }
 0x209   : > { %v1548_v0 = vadd.f32 %v2065_v49, %v3046_v17 }
 0x20a   : > { %v2067_v41 = vpop.f32.mrf.mxu0 }
 0x20b   : > { %v1709_v24 = vadd.f32 %v3084_v58, %v1548_v0  ;;  %v2068_v59 = vadd.f32 %v2067_v41, %v2066_v4 }
 0x20d   : > { %1769 = vst [vmem:[%s3052_s27 + $0xb0] sm:$0xff] %v1709_v24  ;;  %v1551_v35 = vadd.f32 %v2068_v59, %v3046_v17 }
 0x20f   : > { %v1712_v14 = vadd.f32 %v3089_v40, %v1551_v35 }
 0x211   : > { %1770 = vst [vmem:[%s3052_s27 + $0xb8] sm:$0xff] %v1712_v14 }
 0x212 PF: > { %s14_s17 = sadd.s32 1, %s2269_s17   ;;  %s3162_s15 = smov %s2265_s16 }
 0x213   : > { %p11_p5 = scmp.ge.s32.totalorder %s14_s17, 4   ;;  %s3163_s16 = smov %s3165_s18 }
 0x215   :  { %13 = sbr.rel (!%p11_p5) target bundleno = 2 (0x2), region = 69 }

// kernel: edsr_forward.3
= control target key start
LH: loop header
LB: loop body
LE: loop exit
PB: predicated region body
PF: predicated region fallthrough
CT: control target
= control target key end

     0   :  { %s4090_s15 = smov 0   ;;  %s4092_s16 = smov 0   ;;  %s5701_s0 = inlined_call_operand.vmem [shape: bf16[2,24,18,3], index: 0, kind: input, shape index: {}, may-alias: {0,1}]   ;;  %s5702_s1 = inlined_call_operand.vmem [shape: bf16[2,24,18,3], index: 1, kind: input, shape index: {}, may-alias: {0,1}]   ;;  %s5703_s2 = inlined_call_operand.vmem [shape: bf16[27,32], index: 2, kind: input, shape index: {}]   ;;  %s5704_s3 = inlined_call_operand.vmem [shape: f32[1,32], index: 3, kind: input, shape index: {}]   ;;  %s5705_s4 = inlined_call_operand.vmem [shape: f32[2,16,16,32], index: 4, kind: output, shape index: {}]  }
   0x1   :  { %s4094_s17 = smov 0  }
   0x2 LB: > { %s26_s18 = sadd.s32 1, %s4058_s16  ;;  %p3296_p0 = scmp.ge.s32.totalorder %s4062_s17, 1  ;;  %s4062_s17 = sphi %s4094_s17, %s14_s17   ;;  %s4058_s16 = sphi %s4092_s16, %s5950_s16   ;;  %s4054_s15 = sphi %s4090_s15, %s5949_s15  }
   0x3   : > { %p28_p1 = scmp.ge.s32.totalorder %s26_s18, 2  ;;  %p220_p2 = scmp.lt.s32.totalorder %s4062_s17, 3 }
   0x5   : > { %s5952_s18 = smov (%p28_p1, %s26_s18), 0  ;;  %p221_p3 = pnand %p3296_p0, %p220_p2 }
   0x7   : > { %224 = sbr.rel (%p221_p3) target bundleno = 526 (0x20e), region = 36 }
   0xc   : > { %v375_v0 = vld [vmem:[%s5703_s2] sm:$0xf]  ;;  %vm515_vm0 = vcmask 1040384   ;;  %vm516_vm1 = vcmask 1041408   ;;  %p279_p4 = scmp.lt.s32.totalorder %s4054_s15, 1  ;;  %v4064_v1 = vmov 65535  }
   0xd   : > { %v517_v2 = vsel %vm515_vm0, 4294967295, %v4064_v1  ;;  %v3350_v3 = vcombine.low %v375_v0, %v375_v0  ;;  %v376_v4 = vld [vmem:[%s5703_s2 + $0x4] sm:$0xf]  ;;  %v377_v13 = vld [vmem:[%s5703_s2 + $0x8] sm:$0xf]  ;;  %vm466_vm2 = vcmask 23552  }
   0xe   : > { %v4114_v5 = vsel %vm516_vm1, %v517_v2, 0  ;;  %s5954_s15 = smov (!%p279_p4, %s4054_s15), 1  ;;  %v3399_v6 = vcombine.low %v375_v0, %v376_v4  ;;  %v4118_v7 = vcombine.low %v376_v4, %v376_v4  ;;  %v4158_v25 = vcombine.low %v376_v4, %v377_v13 }
   0xf   : > { %5749 = vst [vmem:[#allocation2_spill] sm:$0xff] %v4114_v5  ;;  %v520_v8 = vand.u32 %v4114_v5, %v375_v0  ;;  %v1154_v9 = vshrl.u32 %v3350_v3, 16  ;;  %v1157_v10 = vshll.u32 %v3350_v3, 16  ;;  %s3989_s23 = smul.u32 288, %s5954_s15  ;;  %v4160_v26 = vcombine.low %v377_v13, %v377_v13  ;;  %s3527_s11 = sshll.u32 %s5954_s15, 8 }
  0x10   : > { %v1587_v11 = vrot.slane %v3399_v6, 3  ;;  %v1841_v12 = vshll.u32 %v4118_v7, 16  ;;  %v2071_v16 = vrot.slane %v4118_v7, 2  ;;  %5750 = vst [vmem:[#allocation3_spill] sm:$0xff] %v4158_v25  ;;  %vm715_vm3 = vsmask.f32 3328  ;;  %s5540_s14 = scalar_lea.vmem %s5705_s4, %s3527_s11 }
  0x11   : > { %3681 = vmatprep.subr.bf16.mxu0 %v520_v8  ;;  %3987 = vmatprep.subr.bf16.mxu1 %v520_v8  ;;  %v4126_v14 = vrot.slane %v1154_v9, 1  ;;  %v4128_v15 = vrot.slane %v1157_v10, 2  ;;  %s4136_s28 = scalar_lea.vmem %s5701_s0, %s3989_s23  ;;  %5751 = vst [vmem:[#allocation4_spill] sm:$0xff] %v4160_v26  ;;  %vm716_vm4 = vsmask.f32 7440  ;;  %vm1421_vm5 = vcmask 1042432  }
  0x12   : > { %3682 = vmatpush3.bf16.msra.mxu0 %v520_v8  ;;  %3988 = vmatpush3.bf16.msra.mxu1 %v520_v8  ;;  %v4139_v17 = vand.u32 %v1587_v11, %v4114_v5  ;;  %v4142_v19 = vrot.slane %v1841_v12, 1  ;;  %v4145_v20 = vld [vmem:[%s4136_s28] sm:$0xf]  ;;  %v4148_v21 = vld [vmem:[%s4136_s28 + $0x4] sm:$0xf]  ;;  %v4156_v24 = vand.u32 %v2071_v16, %v4114_v5  ;;  %vm1422_vm6 = vcmask 1046532   ;;  %vm4326_vm7 = vmor %vm715_vm3, %vm716_vm4 }
  0x13   : > { %v4151_v22 = vld [vmem:[%s4136_s28 + $0x60] sm:$0xf]  ;;  %v1160_v23 = vor.u32 %v4128_v15, %v4126_v14  ;;  %v3302_v27 = vcombine.low %v4145_v20, %v4148_v21  ;;  %v719_v28 = vshrl.u32 %v4145_v20, 16  ;;  %v722_v29 = vshll.u32 %v4145_v20, 16  ;;  %v4168_v31 = vld [vmem:[%s4136_s28 + $0x64] sm:$0xf]  ;;  %vm4344_vm8 = vmor %vm1421_vm5, %vm1422_vm6 }
  0x14   : > { %v728_v30 = vshll.u32 %v4148_v21, 16  ;;  %3749 = vmatprep.subr.bf16.mxu0 %v4139_v17  ;;  %v732_v32 = vshrl.u32 %v4148_v21, 16  ;;  %v3367_v33 = vrot.slane %v4145_v20, 9  ;;  %v1426_v34 = vrot.slane %v4148_v21, 5  ;;  %v4183_v40 = vld [vmem:[%s4136_s28 + $0xc] sm:$0xf] }
  0x15   : > { %v4176_v35 = vcombine.low %v4151_v22, %v4168_v31  ;;  %3683 = vmatprep.mubr.msk.bf16.mxu0 %vm466_vm2, %v3302_v27  ;;  %v721_v36 = vrot.slane %v719_v28, 4  ;;  %v724_v37 = vrot.slane %v722_v29, 5  ;;  %v911_v39 = vshrl.u32 %v4151_v22, 16  ;;  %v4194_v45 = vld [vmem:[%s4136_s28 + $0x10] sm:$0xf]  ;;  %s3526_s29 = sadd.s32 192, %s3989_s23 }
  0x16   : > { %v4179_v38 = vrot.slane %v728_v30, 5  ;;  %v734_v41 = vrot.slane %v732_v32, 4  ;;  %v4187_v42 = vrot.slane %v1426_v34, 4  ;;  %v914_v43 = vshll.u32 %v4151_v22, 16  ;;  %v4201_v50 = vld [vmem:[%s4136_s28 + $0x6c] sm:$0xf]  ;;  %s4876_s6 = scalar_lea.vmem %s5702_s1, %s3526_s29 }
  0x17   : > { %5752 = vst [vmem:[#allocation5_spill] sm:$0xff] %v4176_v35  ;;  %3699 = vmatprep.mubr.msk.bf16.mxu1 %vm466_vm2, %v4176_v35  ;;  %v920_v44 = vshll.u32 %v4168_v31, 16  ;;  %v725_v46 = vor.u32 %v724_v37, %v721_v36  ;;  %v4196_v47 = vrot.slane %v911_v39, 4  ;;  %v924_v48 = vshrl.u32 %v4168_v31, 16  ;;  %v4210_v55 = vld [vmem:[%s4136_s28 + $0x70] sm:$0xf] }
  0x18   : > { %v735_v51 = vor.u32 %v734_v41, %v4179_v38  ;;  %v4204_v52 = vrot.slane %v914_v43, 5  ;;  %v4218_v58 = vcombine.low %v4183_v40, %v4194_v45  ;;  %v743_v59 = vshrl.u32 %v4183_v40, 16  ;;  %v4222_v60 = vld [vmem:[%s4136_s28 + $0x18] sm:$0xf]  ;;  %v4225_v61 = vld [vmem:[%s4136_s28 + $0x1c] sm:$0xf] }
  0x19   : > { %v4206_v53 = vrot.slane %v920_v44, 5  ;;  %v4212_v56 = vrot.slane %v725_v46, 4  ;;  %v4214_v57 = vrot.slane %v924_v48, 4  ;;  %v746_v63 = vshll.u32 %v4183_v40, 16  ;;  %v4233_v2 = vld [vmem:[%s4136_s28 + $0x78] sm:$0xf] }
  0x1a   : > { %5753 = vst [vmem:[#allocation6_spill] sm:$0xff] %v4218_v58  ;;  %v4227_v62 = vrot.slane %v735_v51, 4  ;;  %v752_v0 = vshll.u32 %v4194_v45, 16  ;;  %v756_v1 = vshrl.u32 %v4194_v45, 16  ;;  %3684 = vmatmul.mubr.msk.bf16.vlgmr.msra.gmra.mxu0 %vm466_vm2, %v4218_v58  ;;  %v745_v3 = vrot.slane %v743_v59, 4 }
  0x1b   : > { %v3368_v4 = vrot.slane %v4183_v40, 9  ;;  %v1433_v6 = vrot.slane %v4194_v45, 5  ;;  %v4241_v8 = vcombine.low %v4201_v50, %v4210_v55  ;;  %v4244_v9 = vld [vmem:[%s4136_s28 + $0x7c] sm:$0xf]  ;;  %v748_v10 = vrot.slane %v746_v63, 5  ;;  %3750 = vmatpush3.bf16.msra.mxu0 %v4139_v17 }
  0x1c   : > { %v4246_v11 = vrot.slane %v752_v0, 5  ;;  %v758_v12 = vrot.slane %v756_v1, 4  ;;  %v4251_v16 = vld [vmem:[%s4136_s28 + $0x24] sm:$0xf]  ;;  %v1210_v30 = vand.u32 %v1160_v23, %v4114_v5  ;;  %v4266_v17 = vld [vmem:[%s4136_s28 + $0x28] sm:$0xf]  ;;  %3817 = vmatprep.subr.bf16.mxu0 %v4156_v24  ;;  %v4272_v37 = vcombine.low %v4222_v60, %v4225_v61 }
  0x1d   : > { %5754 = vst [vmem:[#allocation7_spill] sm:$0xff] %v4241_v8  ;;  %v4255_v27 = vrot.slane %v1433_v6, 4  ;;  %3700 = vmatmul.mubr.msk.bf16.vlgmr.msra.gmra.mxu1 %vm466_vm2, %v4241_v8  ;;  %v749_v32 = vor.u32 %v748_v10, %v745_v3  ;;  %v4276_v41 = vld [vmem:[%s4136_s28 + $0x84] sm:$0xf]  ;;  %v4279_v43 = vld [vmem:[%s4136_s28 + $0x88] sm:$0xf]  ;;  %v4285_v23 = vcombine.low %v4233_v2, %v4244_v9  ;;  %v4306_v1 = vcombine.low %v4251_v16, %v4266_v17 }
  0x1e   : > { %v759_v36 = vor.u32 %v758_v12, %v4246_v11  ;;  %5755 = vst [vmem:[#allocation8_spill] sm:$0xff] %v4272_v37  ;;  %3715 = vmatprep.subr.bf16.mxu1 %v1210_v30  ;;  %v4289_v46 = vld [vmem:[%s4136_s28 + $0x30] sm:$0xf]  ;;  %3687 = vmatprep.mubr.msk.bf16.mxu0 %vm466_vm2, %v4272_v37  ;;  %v4300_v0 = vld [vmem:[%s4136_s28 + $0x34] sm:$0xf]  ;;  %v5759_v29 = vmov 0  ;;  %v731_v59 = vsel %vm4326_vm7, %v4212_v56, %v4179_v38 }
  0x1f   : > { %5756 = vst [vmem:[#allocation9_spill] sm:$0xff] %v4285_v23  ;;  %v4291_v48 = vrot.slane %v749_v32, 4  ;;  %3716 = vmatpush3.bf16.msra.mxu1 %v1210_v30  ;;  %3703 = vmatprep.mubr.msk.bf16.mxu1 %vm466_vm2, %v4285_v23  ;;  %5757 = vst [vmem:[#allocation10_spill] sm:$0xff] %v4306_v1  ;;  %v4312_v30 = vld [vmem:[%s4136_s28 + $0x90] sm:$0xf]  ;;  %v4316_v32 = vcombine.low %v4276_v41, %v4279_v43  ;;  %v5760_v29 = vsel %vm4326_vm7, 4294967295, %v5759_v29 }
  0x20   : > { %v4293_v51 = vrot.slane %v759_v36, 4  ;;  %v4322_v44 = vld [vmem:[%s4136_s28 + $0x94] sm:$0xf]  ;;  %5761 = vst [vmem:[#allocation12_spill] sm:$0xff] %v5760_v29  ;;  %v4334_v28 = vcombine.low %v4289_v46, %v4300_v0  ;;  %v4340_v13 = vld [vmem:[%s4136_s28 + $0x3c] sm:$0xf]  ;;  %v4392_v36 = vsel %vm4344_vm8, %v3367_v33, %v1426_v34  ;;  %v1434_v21 = vsel %vm4344_vm8, %v3368_v4, %v1433_v6 }
  0x21   : > { %5758 = vst [vmem:[#allocation11_spill] sm:$0xff] %v4316_v32  ;;  %v5763_v49 = vmov 0  ;;  %v4350_v54 = vcombine.low %v4312_v30, %v4322_v44  ;;  %v4356_v12 = vld [vmem:[%s4136_s28 + $0x40] sm:$0xf]  ;;  %v4370_v63 = vld [vmem:[%s4136_s28 + $0x9c] sm:$0xf]  ;;  %v755_v39 = vsel %vm4326_vm7, %v4291_v48, %v4246_v11 }
  0x22   : > { %3688 = vmatmul.mubr.msk.bf16.gmra.mxu0 %vm466_vm2, %v4306_v1  ;;  %5762 = vst [vmem:[#allocation13_spill] sm:$0xff] %v4334_v28  ;;  %v5764_v49 = vsel %vm4344_vm8, 4294967295, %v5763_v49  ;;  %v4364_v10 = vcombine.low %v4340_v13, %v4356_v12  ;;  %v4375_v15 = vld [vmem:[%s4136_s28 + $0xa0] sm:$0xf]  ;;  %v4380_v18 = vld [vmem:[%s4136_s28 + $0x48] sm:$0xf] }
  0x23   : > { %5765 = vst [vmem:[#allocation14_spill] sm:$0xff] %v5764_v49  ;;  %5766 = vst [vmem:[#allocation15_spill] sm:$0xff] %v4350_v54  ;;  %3691 = vmatprep.mubr.msk.bf16.mxu0 %vm466_vm2, %v4334_v28  ;;  %v4396_v14 = vcombine.low %v4370_v63, %v4375_v15  ;;  %v4400_v3 = vld [vmem:[%s4136_s28 + $0x4c] sm:$0xf]  ;;  %v4410_v34 = vld [vmem:[%s4136_s28 + $0xa8] sm:$0xf] }
  0x24   : > { %5767 = vst [vmem:[#allocation16_spill] sm:$0xff] %v4364_v10  ;;  %v4406_v20 = vcombine.low %v4380_v18, %v4400_v3  ;;  %v4413_v56 = vld [vmem:[%s4136_s28 + $0xac] sm:$0xf]  ;;  %v4433_v23 = vld [vmem:[%s4136_s28 + $0x54] sm:$0xf]  ;;  %v5772_v11 = vshrl.u32 %v4118_v7, 16 }
  0x25   : > { %3704 = vmatmul.mubr.msk.bf16.gmra.mxu1 %vm466_vm2, %v4316_v32  ;;  %5768 = vst [vmem:[#allocation17_spill] sm:$0xff] %v4396_v14  ;;  %v4427_v33 = vcombine.low %v4410_v34, %v4413_v56  ;;  %v4436_v45 = vld [vmem:[%s4136_s28 + $0x58] sm:$0xf]  ;;  %v4441_v6 = vld [vmem:[%s4136_s28 + $0xb4] sm:$0xf]  ;;  %v5774_v35 = vshrl.u32 %v4222_v60, 16 }
  0x26   : > { %3707 = vmatprep.mubr.msk.bf16.mxu1 %vm466_vm2, %v4350_v54  ;;  %5769 = vst [vmem:[#allocation18_spill] sm:$0xff] %v4406_v20  ;;  %5771 = vst [vmem:[#allocation20_spill] sm:$0xff] %v4441_v6  ;;  %v1844_v48 = vor.u32 %v4142_v19, %v5772_v11  ;;  %v4452_v32 = vcombine.low %v4433_v23, %v4436_v45  ;;  %v4456_v4 = vld [vmem:[%s4136_s28 + $0xb8] sm:$0xf]  ;;  %v323_v54 = vld [vmem:[%s4136_s28 + $0x8] sm:$0x1] }
  0x27   : > { %5770 = vst [vmem:[#allocation19_spill] sm:$0xff] %v4427_v33  ;;  %5773 = vst [vmem:[#allocation21_spill] sm:$0xff] %v4456_v4  ;;  %v4464_v19 = vcombine.low %v4441_v6, %v4456_v4  ;;  %v326_v8 = vld [vmem:[%s4136_s28 + $0x14] sm:$0x1]  ;;  %v738_v7 = vshll.u32 %v323_v54, 16  ;;  %v1429_v40 = vrot.slane %v323_v54, 5 }
  0x28   : > { %v4470_v38 = vand.u32 %v1844_v48, %v4114_v5  ;;  %v1436_v28 = vrot.slane %v326_v8, 5  ;;  %v329_v1 = vld [vmem:[%s4136_s28 + $0x20] sm:$0x1]  ;;  %v5775_v11 = vshll.u32 %v4222_v60, 16  ;;  %v776_v37 = vshll.u32 %v4225_v61, 16 }
  0x29   : > { %v786_v5 = vshll.u32 %v329_v1, 16  ;;  %v1430_v54 = vsel %vm4344_vm8, %v4187_v42, %v1429_v40  ;;  %vm3142_vm9 = vcmask 261120  }
  0x2a   : > { %3692 = vmatmul.mubr.msk.bf16.gmra.mxu0 %vm466_vm2, %v4364_v10  ;;  %v769_v10 = vrot.slane %v5774_v35, 4  ;;  %3783 = vmatprep.subr.bf16.mxu1 %v4470_v38  ;;  %v772_v48 = vrot.slane %v5775_v11, 5  ;;  %v5776_v35 = vshrl.u32 %v4225_v61, 16  ;;  %v3383_v26 = vcombine.low %v4392_v36, %v1430_v54  ;;  %v332_v36 = vld [vmem:[%s4136_s28 + $0x2c] sm:$0x1] }
  0x2b   : > { %3695 = vmatprep.mubr.msk.bf16.mxu0 %vm466_vm2, %v4406_v20  ;;  %v762_v20 = vshll.u32 %v326_v8, 16  ;;  %v778_v4 = vrot.slane %v776_v37, 5  ;;  %v788_v42 = vrot.slane %v786_v5, 5  ;;  %v1440_v37 = vrot.slane %v4225_v61, 5 }
  0x2c   : > { %v782_v58 = vrot.slane %v5776_v35, 4  ;;  %v773_v25 = vor.u32 %v772_v48, %v769_v10  ;;  %v1443_v10 = vrot.slane %v329_v1, 5  ;;  %v3370_v48 = vrot.slane %v4251_v16, 9 }
  0x2d   : > { %3708 = vmatmul.mubr.msk.bf16.gmra.mxu1 %vm466_vm2, %v4396_v14  ;;  %v740_v14 = vrot.slane %v738_v7, 5  ;;  %v764_v8 = vrot.slane %v762_v20, 5  ;;  %v3369_v20 = vrot.slane %v4222_v60, 9  ;;  %v1442_v1 = vrot.slane %v1440_v37, 4 }
  0x2e   : > { %3711 = vmatprep.mubr.msk.bf16.mxu1 %vm466_vm2, %v4427_v33  ;;  %v1437_v33 = vsel %vm4344_vm8, %v4255_v27, %v1436_v28  ;;  %v774_v27 = vrot.slane %v773_v25, 4  ;;  %v783_v28 = vor.u32 %v782_v58, %v778_v4  ;;  %v800_v58 = vshll.u32 %v4266_v17, 16 }
  0x2f   : > { %v4492_v11 = vcombine.low %v1434_v21, %v1437_v33  ;;  %v741_v7 = vsel %vm4326_vm7, %v4227_v62, %v740_v14  ;;  %v765_v35 = vsel %vm4326_vm7, %v4293_v51, %v764_v8  ;;  %v5777_v62 = vshrl.u32 %v4251_v16, 16 }
  0x30   : > { %v3334_v40 = vcombine.low %v731_v59, %v741_v7  ;;  %v4501_v6 = vcombine.low %v755_v39, %v765_v35  ;;  %v5778_v51 = vshll.u32 %v4251_v16, 16  ;;  %v779_v60 = vsel %vm4326_vm7, %v774_v27, %v778_v4  ;;  %v335_v27 = vld [vmem:[%s4136_s28 + $0x38] sm:$0x1] }
  0x31   : > { %v793_v14 = vrot.slane %v5777_v62, 4  ;;  %v784_v25 = vrot.slane %v783_v28, 4  ;;  %v5779_v39 = vshrl.u32 %v4266_v17, 16  ;;  %v1441_v61 = vsel %vm4344_vm8, %v3369_v20, %v1440_v37 }
  0x32   : > { %3696 = vmatmul.mubr.msk.bf16.gmra.mxu0 %vm466_vm2, %v4452_v32  ;;  %v796_v5 = vrot.slane %v5778_v51, 5  ;;  %v810_v33 = vshll.u32 %v332_v36, 16  ;;  %v802_v4 = vrot.slane %v800_v58, 5  ;;  %v1447_v54 = vrot.slane %v4266_v17, 5 }
  0x33   : > { %3751 = vmatprep.mubr.msk.bf16.mxu0 %vm466_vm2, %v3383_v26  ;;  %v806_v59 = vrot.slane %v5779_v39, 4  ;;  %v789_v26 = vsel %vm4326_vm7, %v784_v25, %v788_v42  ;;  %v1444_v7 = vsel %vm4344_vm8, %v1442_v1, %v1443_v10  ;;  %v1450_v62 = vrot.slane %v332_v36, 5 }
  0x34   : > { %v797_v21 = vor.u32 %v796_v5, %v793_v14  ;;  %v4526_v8 = vcombine.low %v779_v60, %v789_v26  ;;  %v812_v20 = vrot.slane %v810_v33, 5  ;;  %v4531_v28 = vcombine.low %v1441_v61, %v1444_v7 }
  0x35   : > { %3712 = vmatmul.mubr.msk.bf16.gmra.mxu1 %vm466_vm2, %v4464_v19  ;;  %v807_v37 = vor.u32 %v806_v59, %v802_v4  ;;  %v1449_v42 = vrot.slane %v1447_v54, 4  ;;  %v5780_v17 = vshrl.u32 %v4289_v46, 16  ;;  %v5781_v51 = vshll.u32 %v4289_v46, 16 }
  0x36   : > { %3717 = vmatprep.mubr.msk.bf16.mxu1 %vm466_vm2, %v3334_v40  ;;  %v798_v35 = vrot.slane %v797_v21, 4  ;;  %v1448_v40 = vsel %vm4344_vm8, %v3370_v48, %v1447_v54  ;;  %v824_v60 = vshll.u32 %v4300_v0, 16  ;;  %v5782_v25 = vshrl.u32 %v4300_v0, 16  ;;  %v338_v48 = vld [vmem:[%s4136_s28 + $0x44] sm:$0x1] }
  0x37   : > { %v817_v14 = vrot.slane %v5780_v17, 4  ;;  %v820_v10 = vrot.slane %v5781_v51, 5  ;;  %v808_v5 = vrot.slane %v807_v37, 4  ;;  %v834_v39 = vshll.u32 %v335_v27, 16 }
  0x38   : > { %v803_v16 = vsel %vm4326_vm7, %v798_v35, %v802_v4  ;;  %v830_v58 = vrot.slane %v5782_v25, 4  ;;  %v1451_v36 = vsel %vm4344_vm8, %v1449_v42, %v1450_v62  ;;  %v3371_v61 = vrot.slane %v4289_v46, 9 }
  0x39   : > { %v821_v59 = vor.u32 %v820_v10, %v817_v14  ;;  %v1454_v1 = vrot.slane %v4300_v0, 5  ;;  %v813_v21 = vsel %vm4326_vm7, %v808_v5, %v812_v20  ;;  %v4555_v33 = vcombine.low %v1448_v40, %v1451_v36 }
  0x3a   : > { %3752 = vmatmul.mubr.msk.bf16.vlgmr.msra.gmra.mxu0 %vm466_vm2, %v4492_v11  ;;  %v826_v26 = vrot.slane %v824_v60, 5  ;;  %v836_v4 = vrot.slane %v834_v39, 5  ;;  %v4560_v54 = vcombine.low %v803_v16, %v813_v21  ;;  %v1457_v35 = vrot.slane %v335_v27, 5 }
  0x3b   : > { %3818 = vmatpush3.bf16.msra.mxu0 %v4156_v24  ;;  %3755 = vmatprep.mubr.msk.bf16.mxu0 %vm466_vm2, %v4531_v28  ;;  %v822_v46 = vrot.slane %v821_v59, 4  ;;  %v1455_v24 = vsel %vm4344_vm8, %v3371_v61, %v1454_v1  ;;  %v1456_v0 = vrot.slane %v1454_v1, 4  ;;  %v5783_v20 = vshrl.u32 %v4340_v13, 16  ;;  %v341_v1 = vld [vmem:[%s4136_s28 + $0x50] sm:$0x1] }
  0x3c   : > { %v831_v7 = vor.u32 %v830_v58, %v826_v26  ;;  %v5784_v40 = vshll.u32 %v4340_v13, 16  ;;  %v848_v62 = vshll.u32 %v4356_v12, 16  ;;  %v5785_v17 = vshrl.u32 %v4356_v12, 16 }
  0x3d   : > { %3718 = vmatmul.mubr.msk.bf16.vlgmr.msra.gmra.mxu1 %vm466_vm2, %v4501_v6  ;;  %v841_v37 = vrot.slane %v5783_v20, 4  ;;  %v827_v16 = vsel %vm4326_vm7, %v822_v46, %v826_v26  ;;  %v858_v14 = vshll.u32 %v338_v48, 16  ;;  %v1458_v27 = vsel %vm4344_vm8, %v1456_v0, %v1457_v35 }
  0x3e   : > { %3784 = vmatpush3.bf16.msra.mxu1 %v4470_v38  ;;  %3721 = vmatprep.mubr.msk.bf16.mxu1 %vm466_vm2, %v4526_v8  ;;  %v844_v42 = vrot.slane %v5784_v40, 5  ;;  %v854_v38 = vrot.slane %v5785_v17, 4  ;;  %v832_v51 = vrot.slane %v831_v7, 4  ;;  %v3372_v5 = vrot.slane %v4340_v13, 9 }
  0x3f   : > { %v4579_v60 = vcombine.low %v1455_v24, %v1458_v27  ;;  %v850_v25 = vrot.slane %v848_v62, 5  ;;  %v860_v58 = vrot.slane %v858_v14, 5  ;;  %v1461_v39 = vrot.slane %v4356_v12, 5 }
  0x40   : > { %v845_v10 = vor.u32 %v844_v42, %v841_v37  ;;  %v837_v36 = vsel %vm4326_vm7, %v832_v51, %v836_v4  ;;  %v1464_v61 = vrot.slane %v338_v48, 5  ;;  %v5786_v21 = vshrl.u32 %v4380_v18, 16 }
  0x41   : > { %v4589_v46 = vcombine.low %v827_v16, %v837_v36  ;;  %v855_v13 = vor.u32 %v854_v38, %v850_v25  ;;  %v1462_v24 = vsel %vm4344_vm8, %v3372_v5, %v1461_v39  ;;  %v1463_v0 = vrot.slane %v1461_v39, 4  ;;  %v344_v5 = vld [vmem:[%s4136_s28 + $0x5c] sm:$0x1] }
  0x42   : > { %v846_v59 = vrot.slane %v845_v10, 4  ;;  %v865_v26 = vrot.slane %v5786_v21, 4  ;;  %3756 = vmatmul.mubr.msk.bf16.gmra.mxu0 %vm466_vm2, %v4555_v33  ;;  %v5787_v4 = vshll.u32 %v4380_v18, 16  ;;  %v872_v7 = vshll.u32 %v4400_v3, 16 }
  0x43   : > { %3759 = vmatprep.mubr.msk.bf16.mxu0 %vm466_vm2, %v4579_v60  ;;  %v5788_v35 = vshrl.u32 %v4400_v3, 16  ;;  %v856_v37 = vrot.slane %v855_v13, 4  ;;  %v1465_v40 = vsel %vm4344_vm8, %v1463_v0, %v1464_v61  ;;  %v882_v42 = vshll.u32 %v341_v1, 16 }
  0x44   : > { %v851_v12 = vsel %vm4326_vm7, %v846_v59, %v850_v25  ;;  %v868_v48 = vrot.slane %v5787_v4, 5  ;;  %v3373_v16 = vrot.slane %v4380_v18, 9  ;;  %v4609_v62 = vcombine.low %v1462_v24, %v1465_v40 }
  0x45   : > { %v878_v20 = vrot.slane %v5788_v35, 4  ;;  %3722 = vmatmul.mubr.msk.bf16.gmra.mxu1 %vm466_vm2, %v4560_v54  ;;  %v874_v38 = vrot.slane %v872_v7, 5  ;;  %v1468_v14 = vrot.slane %v4400_v3, 5  ;;  %v861_v51 = vsel %vm4326_vm7, %v856_v37, %v860_v58  ;;  %v347_v37 = vld [vmem:[%s4136_s28 + $0x68] sm:$0x1] }
  0x46   : > { %3725 = vmatprep.mubr.msk.bf16.mxu1 %vm466_vm2, %v4589_v46  ;;  %v869_v17 = vor.u32 %v868_v48, %v865_v26  ;;  %v884_v27 = vrot.slane %v882_v42, 5  ;;  %v1471_v10 = vrot.slane %v341_v1, 5  ;;  %v5789_v25 = vshrl.u32 %v4433_v23, 16 }
  0x47   : > { %v4617_v36 = vcombine.low %v851_v12, %v861_v51  ;;  %v879_v59 = vor.u32 %v878_v20, %v874_v38  ;;  %v1469_v61 = vsel %vm4344_vm8, %v3373_v16, %v1468_v14  ;;  %v1470_v21 = vrot.slane %v1468_v14, 4 }
  0x48   : > { %v889_v39 = vrot.slane %v5789_v25, 4  ;;  %v870_v18 = vrot.slane %v869_v17, 4  ;;  %v5790_v3 = vshll.u32 %v4433_v23, 16  ;;  %v896_v58 = vshll.u32 %v4436_v45, 16 }
  0x49   : > { %v5791_v1 = vshrl.u32 %v4436_v45, 16  ;;  %v880_v0 = vrot.slane %v879_v59, 4  ;;  %v906_v12 = vshll.u32 %v344_v5, 16  ;;  %v3374_v4 = vrot.slane %v4433_v23, 9 }
  0x4a   : > { %v892_v26 = vrot.slane %v5790_v3, 5  ;;  %v875_v24 = vsel %vm4326_vm7, %v870_v18, %v874_v38  ;;  %3760 = vmatmul.mubr.msk.bf16.gmra.mxu0 %vm466_vm2, %v4609_v62  ;;  %v1472_v48 = vsel %vm4344_vm8, %v1470_v21, %v1471_v10  ;;  %v898_v35 = vrot.slane %v896_v58, 5 }
  0x4b   : > { %v902_v13 = vrot.slane %v5791_v1, 4  ;;  %v1475_v20 = vrot.slane %v4436_v45, 5  ;;  %v885_v40 = vsel %vm4326_vm7, %v880_v0, %v884_v27  ;;  %v4637_v42 = vcombine.low %v1469_v61, %v1472_v48  ;;  %v350_v1 = vld [vmem:[%s4136_s28 + $0x74] sm:$0x1] }
  0x4c   : > { %v893_v7 = vor.u32 %v892_v26, %v889_v39  ;;  %v908_v16 = vrot.slane %v906_v12, 5  ;;  %v1478_v17 = vrot.slane %v344_v5, 5  ;;  %v4641_v23 = vcombine.low %v875_v24, %v885_v40 }
  0x4d   : > { %3726 = vmatmul.mubr.msk.bf16.gmra.mxu1 %vm466_vm2, %v4617_v36  ;;  %v903_v14 = vor.u32 %v902_v13, %v898_v35  ;;  %v1476_v51 = vsel %vm4344_vm8, %v3374_v4, %v1475_v20  ;;  %3763 = vmatprep.mubr.msk.bf16.mxu0 %vm466_vm2, %v4637_v42  ;;  %v1477_v45 = vrot.slane %v1475_v20, 4  ;;  %v5792_v27 = vor.u32 %v4204_v52, %v4196_v47 }
  0x4e   : > { %v894_v38 = vrot.slane %v893_v7, 4  ;;  %v927_v5 = vor.u32 %v4214_v57, %v4206_v53  ;;  %v930_v25 = vshll.u32 %v347_v37, 16  ;;  %3729 = vmatprep.mubr.msk.bf16.mxu1 %vm466_vm2, %v4641_v23  ;;  %v5793_v59 = vrot.slane %v4168_v31, 5 }
  0x4f   : > { %v918_v10 = vrot.slane %v5792_v27, 4  ;;  %v904_v18 = vrot.slane %v903_v14, 4  ;;  %v5794_v61 = vrot.slane %v4151_v22, 9  ;;  %v1479_v57 = vsel %vm4344_vm8, %v1477_v45, %v1478_v17  ;;  %v353_v45 = vld [vmem:[%s4136_s28 + $0x80] sm:$0x1] }
  0x50   : > { %v899_v39 = vsel %vm4326_vm7, %v894_v38, %v898_v35  ;;  %v5795_v47 = vmov %v5793_v59  ;;  %v928_v26 = vrot.slane %v927_v5, 4  ;;  %v932_v58 = vrot.slane %v930_v25, 5 }
  0x51   : > { %v1483_v21 = vsel %vm4344_vm8, %v5794_v61, %v5793_v59  ;;  %v1484_v52 = vrot.slane %v5795_v47, 4  ;;  %v923_v3 = vsel %vm4326_vm7, %v918_v10, %v4206_v53  ;;  %v909_v13 = vsel %vm4326_vm7, %v904_v18, %v908_v16 }
  0x52   : > { %v4672_v22 = vcombine.low %v1476_v51, %v1479_v57  ;;  %v1485_v24 = vrot.slane %v347_v37, 5  ;;  %v5796_v31 = vshrl.u32 %v4201_v50, 16  ;;  %v4676_v12 = vcombine.low %v899_v39, %v909_v13 }
  0x53   : > { %v933_v4 = vsel %vm4326_vm7, %v928_v26, %v932_v58  ;;  %v5797_v53 = vshll.u32 %v4201_v50, 16  ;;  %v944_v7 = vshll.u32 %v4210_v55, 16  ;;  %v5798_v37 = vshrl.u32 %v4210_v55, 16 }
  0x54   : > { %v937_v0 = vrot.slane %v5796_v31, 4  ;;  %3764 = vmatmul.mubr.msk.bf16.gmra.mxu0 %vm466_vm2, %v4672_v22  ;;  %v4685_v35 = vcombine.low %v923_v3, %v933_v4  ;;  %v1486_v20 = vsel %vm4344_vm8, %v1484_v52, %v1485_v24  ;;  %v954_v16 = vshll.u32 %v350_v1, 16 }
  0x55   : > { %v940_v48 = vrot.slane %v5797_v53, 5  ;;  %v950_v40 = vrot.slane %v5798_v37, 4  ;;  %v4691_v17 = vcombine.low %v1483_v21, %v1486_v20  ;;  %v946_v14 = vrot.slane %v944_v7, 5  ;;  %3730 = vmatmul.mubr.msk.bf16.gmra.mxu1 %vm466_vm2, %v4676_v12  ;;  %v356_v37 = vld [vmem:[%s4136_s28 + $0x8c] sm:$0x1] }
  0x56   : > { %v3376_v51 = vrot.slane %v4201_v50, 9  ;;  %v956_v27 = vrot.slane %v954_v16, 5  ;;  %v1489_v10 = vrot.slane %v4210_v55, 5  ;;  %v1492_v5 = vrot.slane %v350_v1, 5  ;;  %3733 = vmatprep.mubr.msk.bf16.mxu1 %vm466_vm2, %v4685_v35 }
  0x57   : > { %v941_v38 = vor.u32 %v940_v48, %v937_v0  ;;  %v5799_v25 = vshrl.u32 %v4233_v2, 16  ;;  %3767 = vmatprep.mubr.msk.bf16.mxu0 %vm466_vm2, %v4691_v17  ;;  %v951_v59 = vor.u32 %v950_v40, %v946_v14  ;;  %v5800_v50 = vshll.u32 %v4233_v2, 16 }
  0x58   : > { %v968_v21 = vshll.u32 %v4244_v9, 16  ;;  %v1490_v55 = vsel %vm4344_vm8, %v3376_v51, %v1489_v10  ;;  %v1491_v47 = vrot.slane %v1489_v10, 4  ;;  %v5801_v52 = vshrl.u32 %v4244_v9, 16 }
  0x59   : > { %v961_v39 = vrot.slane %v5799_v25, 4  ;;  %v942_v18 = vrot.slane %v941_v38, 4  ;;  %v964_v61 = vrot.slane %v5800_v50, 5  ;;  %v978_v3 = vshll.u32 %v353_v45, 16 }
  0x5a   : > { %v974_v57 = vrot.slane %v5801_v52, 4  ;;  %v952_v58 = vrot.slane %v951_v59, 4  ;;  %v970_v13 = vrot.slane %v968_v21, 5  ;;  %v1493_v24 = vsel %vm4344_vm8, %v1491_v47, %v1492_v5 }
  0x5b   : > { %v947_v26 = vsel %vm4326_vm7, %v942_v18, %v946_v14  ;;  %v965_v1 = vor.u32 %v964_v61, %v961_v39  ;;  %v980_v31 = vrot.slane %v978_v3, 5  ;;  %v3377_v0 = vrot.slane %v4233_v2, 9 }
  0x5c   : > { %v1496_v4 = vrot.slane %v4244_v9, 5  ;;  %v957_v53 = vsel %vm4326_vm7, %v952_v58, %v956_v27  ;;  %v4719_v48 = vcombine.low %v1490_v55, %v1493_v24  ;;  %v975_v20 = vor.u32 %v974_v57, %v970_v13 }
  0x5d   : > { %v966_v7 = vrot.slane %v965_v1, 4  ;;  %v4722_v40 = vcombine.low %v947_v26, %v957_v53  ;;  %v1499_v14 = vrot.slane %v353_v45, 5  ;;  %v5802_v51 = vshrl.u32 %v4276_v41, 16  ;;  %v359_v26 = vld [vmem:[%s4136_s28 + $0x98] sm:$0x1] }
  0x5e   : > { %v1497_v16 = vsel %vm4344_vm8, %v3377_v0, %v1496_v4  ;;  %v1498_v38 = vrot.slane %v1496_v4, 4  ;;  %3768 = vmatmul.mubr.msk.bf16.gmra.mxu0 %vm466_vm2, %v4719_v48  ;;  %v976_v9 = vrot.slane %v975_v20, 4  ;;  %v5803_v10 = vshll.u32 %v4276_v41, 16 }
  0x5f   : > { %v971_v2 = vsel %vm4326_vm7, %v966_v7, %v970_v13  ;;  %v985_v27 = vrot.slane %v5802_v51, 4  ;;  %3734 = vmatmul.mubr.msk.bf16.gmra.mxu1 %vm466_vm2, %v4722_v40  ;;  %v992_v25 = vshll.u32 %v4279_v43, 16  ;;  %v5804_v39 = vshrl.u32 %v4279_v43, 16 }
  0x60   : > { %v988_v5 = vrot.slane %v5803_v10, 5  ;;  %v1500_v45 = vsel %vm4344_vm8, %v1498_v38, %v1499_v14  ;;  %v1002_v59 = vshll.u32 %v356_v37, 16  ;;  %v981_v50 = vsel %vm4326_vm7, %v976_v9, %v980_v31 }
  0x61   : > { %v998_v18 = vrot.slane %v5804_v39, 4  ;;  %v4743_v61 = vcombine.low %v1497_v16, %v1500_v45  ;;  %v3378_v55 = vrot.slane %v4276_v41, 9  ;;  %v4746_v47 = vcombine.low %v971_v2, %v981_v50 }
  0x62   : > { %v989_v21 = vor.u32 %v988_v5, %v985_v27  ;;  %v994_v52 = vrot.slane %v992_v25, 5  ;;  %v1004_v57 = vrot.slane %v1002_v59, 5  ;;  %v1503_v3 = vrot.slane %v4279_v43, 5  ;;  %v362_v59 = vld [vmem:[%s4136_s28 + $0xa4] sm:$0x1] }
  0x63   : > { %3771 = vmatprep.mubr.msk.bf16.mxu0 %vm466_vm2, %v4743_v61  ;;  %v1506_v1 = vrot.slane %v356_v37, 5  ;;  %v5805_v13 = vshrl.u32 %v4312_v30, 16  ;;  %v5806_v31 = vshll.u32 %v4312_v30, 16  ;;  %3737 = vmatprep.mubr.msk.bf16.mxu1 %vm466_vm2, %v4746_v47  ;;  %v1016_v53 = vshll.u32 %v4322_v44, 16 }
  0x64   : > { %v990_v58 = vrot.slane %v989_v21, 4  ;;  %v999_v41 = vor.u32 %v998_v18, %v994_v52  ;;  %v1504_v4 = vsel %vm4344_vm8, %v3378_v55, %v1503_v3  ;;  %v1505_v43 = vrot.slane %v1503_v3, 4 }
  0x65   : > { %v1009_v24 = vrot.slane %v5805_v13, 4  ;;  %v1012_v0 = vrot.slane %v5806_v31, 5  ;;  %v5807_v37 = vshrl.u32 %v4322_v44, 16  ;;  %v1026_v38 = vshll.u32 %v359_v26, 16 }
  0x66   : > { %v995_v7 = vsel %vm4326_vm7, %v990_v58, %v994_v52  ;;  %v1000_v14 = vrot.slane %v999_v41, 4  ;;  %v1507_v2 = vsel %vm4344_vm8, %v1505_v43, %v1506_v1  ;;  %v1018_v9 = vrot.slane %v1016_v53, 5 }
  0x67   : > { %v1013_v20 = vor.u32 %v1012_v0, %v1009_v24  ;;  %v1022_v16 = vrot.slane %v5807_v37, 4  ;;  %v3379_v51 = vrot.slane %v4312_v30, 9  ;;  %v4768_v27 = vcombine.low %v1504_v4, %v1507_v2 }
  0x68   : > { %v1028_v5 = vrot.slane %v1026_v38, 5  ;;  %v1510_v45 = vrot.slane %v4322_v44, 5  ;;  %v1005_v25 = vsel %vm4326_vm7, %v1000_v14, %v1004_v57  ;;  %v1513_v18 = vrot.slane %v359_v26, 5 }
  0x69   : > { %v1014_v10 = vrot.slane %v1013_v20, 4  ;;  %v1023_v39 = vor.u32 %v1022_v16, %v1018_v9  ;;  %v5808_v50 = vshrl.u32 %v4370_v63, 16  ;;  %v4776_v55 = vcombine.low %v995_v7, %v1005_v25  ;;  %3772 = vmatmul.mubr.msk.bf16.gmra.mxu0 %vm466_vm2, %v4768_v27  ;;  %v365_v20 = vld [vmem:[%s4136_s28 + $0xb0] sm:$0x1] }
  0x6a   : > { %v1511_v44 = vsel %vm4344_vm8, %v3379_v51, %v1510_v45  ;;  %v1512_v52 = vrot.slane %v1510_v45, 4  ;;  %v5809_v3 = vshll.u32 %v4370_v63, 16  ;;  %v1040_v58 = vshll.u32 %v4375_v15, 16 }
  0x6b   : > { %v1033_v21 = vrot.slane %v5808_v50, 4  ;;  %v1019_v30 = vsel %vm4326_vm7, %v1014_v10, %v1018_v9  ;;  %v1024_v57 = vrot.slane %v1023_v39, 4  ;;  %v5810_v1 = vshrl.u32 %v4375_v15, 16  ;;  %3738 = vmatmul.mubr.msk.bf16.gmra.mxu1 %vm466_vm2, %v4776_v55 }
  0x6c   : > { %v1036_v26 = vrot.slane %v5809_v3, 5  ;;  %v1514_v24 = vsel %vm4344_vm8, %v1512_v52, %v1513_v18  ;;  %v1050_v31 = vshll.u32 %v362_v59, 16  ;;  %v3380_v0 = vrot.slane %v4370_v63, 9 }
  0x6d   : > { %v1046_v13 = vrot.slane %v5810_v1, 4  ;;  %v1517_v41 = vrot.slane %v4375_v15, 5  ;;  %v1029_v4 = vsel %vm4326_vm7, %v1024_v57, %v1028_v5  ;;  %v4797_v43 = vcombine.low %v1511_v44, %v1514_v24  ;;  %v5814_v24 = vld [vmem:[#allocation20_spill] sm:$0xff] }
  0x6e   : > { %v1037_v53 = vor.u32 %v1036_v26, %v1033_v21  ;;  %v1042_v7 = vrot.slane %v1040_v58, 5  ;;  %v4800_v37 = vcombine.low %v1019_v30, %v1029_v4  ;;  %v1052_v16 = vrot.slane %v1050_v31, 5 }
  0x6f   : > { %v1518_v38 = vsel %vm4344_vm8, %v3380_v0, %v1517_v41  ;;  %v1519_v14 = vrot.slane %v1517_v41, 4  ;;  %3775 = vmatprep.mubr.msk.bf16.mxu0 %vm466_vm2, %v4797_v43  ;;  %v1520_v2 = vrot.slane %v362_v59, 5  ;;  %v5811_v9 = vshrl.u32 %v4410_v34, 16 }
  0x70   : > { %v1038_v63 = vrot.slane %v1037_v53, 4  ;;  %v1047_v15 = vor.u32 %v1046_v13, %v1042_v7  ;;  %3741 = vmatprep.mubr.msk.bf16.mxu1 %vm466_vm2, %v4800_v37  ;;  %v5812_v10 = vshll.u32 %v4410_v34, 16  ;;  %v1064_v45 = vshll.u32 %v4413_v56, 16  ;;  %v368_v13 = vld [vmem:[%s4136_s28 + $0xbc] sm:$0x1] }
  0x71   : > { %v1057_v51 = vrot.slane %v5811_v9, 4  ;;  %v5813_v25 = vshrl.u32 %v4413_v56, 16  ;;  %v1074_v18 = vshll.u32 %v365_v20, 16  ;;  %v1521_v21 = vsel %vm4344_vm8, %v1519_v14, %v1520_v2 }
  0x72   : > { %v1060_v5 = vrot.slane %v5812_v10, 5  ;;  %v1043_v50 = vsel %vm4326_vm7, %v1038_v63, %v1042_v7  ;;  %v1048_v59 = vrot.slane %v1047_v15, 4  ;;  %v3381_v30 = vrot.slane %v4410_v34, 9 }
  0x73   : > { %v1070_v39 = vrot.slane %v5813_v25, 4  ;;  %v4820_v44 = vcombine.low %v1518_v38, %v1521_v21  ;;  %v1066_v57 = vrot.slane %v1064_v45, 5  ;;  %v1076_v3 = vrot.slane %v1074_v18, 5 }
  0x74   : > { %v1061_v52 = vor.u32 %v1060_v5, %v1057_v51  ;;  %v1053_v26 = vsel %vm4326_vm7, %v1048_v59, %v1052_v16  ;;  %v1524_v58 = vrot.slane %v4413_v56, 5  ;;  %v1527_v1 = vrot.slane %v365_v20, 5  ;;  %v5817_v56 = vld [vmem:[#allocation21_spill] sm:$0xff] }
  0x75   : > { %v5815_v31 = vshrl.u32 %v5814_v24, 16  ;;  %v4828_v41 = vcombine.low %v1043_v50, %v1053_v26  ;;  %3776 = vmatmul.mubr.msk.bf16.gmra.mxu0 %vm466_vm2, %v4820_v44  ;;  %v1071_v4 = vor.u32 %v1070_v39, %v1066_v57  ;;  %v5816_v53 = vshll.u32 %v5814_v24, 16 }
  0x76   : > { %v1062_v34 = vrot.slane %v1061_v52, 4  ;;  %v1525_v16 = vsel %vm4344_vm8, %v3381_v30, %v1524_v58  ;;  %v1526_v38 = vrot.slane %v1524_v58, 4  ;;  %v1088_v20 = vshll.u32 %v5817_v56, 16  ;;  %v5821_v58 = vld [vmem:[#allocation3_spill] sm:$0xff] }
  0x77   : > { %v1081_v0 = vrot.slane %v5815_v31, 4  ;;  %v1084_v7 = vrot.slane %v5816_v53, 5  ;;  %v5818_v14 = vshrl.u32 %v5817_v56, 16  ;;  %3742 = vmatmul.mubr.msk.bf16.gmra.mxu1 %vm466_vm2, %v4828_v41  ;;  %v1072_v2 = vrot.slane %v1071_v4, 4 }
  0x78   : > { %v1067_v15 = vsel %vm4326_vm7, %v1062_v34, %v1066_v57  ;;  %v1098_v51 = vshll.u32 %v368_v13, 16  ;;  %v1528_v10 = vsel %vm4344_vm8, %v1526_v38, %v1527_v1  ;;  %v1090_v5 = vrot.slane %v1088_v20, 5  ;;  %v5824_v38 = vld [vmem:[#allocation2_spill] sm:$0xff] }
  0x79   : > { %v1094_v63 = vrot.slane %v5818_v14, 4  ;;  %v1085_v9 = vor.u32 %v1084_v7, %v1081_v0  ;;  %v3382_v45 = vrot.slane %v5814_v24, 9  ;;  %v1531_v25 = vrot.slane %v5817_v56, 5  ;;  %v5822_v0 = vld [vmem:[#allocation4_spill] sm:$0xff] }
  0x7a   : > { %v1077_v39 = vsel %vm4326_vm7, %v1072_v2, %v1076_v3  ;;  %v4849_v18 = vcombine.low %v1525_v16, %v1528_v10  ;;  %v1100_v30 = vrot.slane %v1098_v51, 5  ;;  %v1534_v26 = vrot.slane %v368_v13, 5  ;;  %v4889_v2 = vld [vmem:[%s4876_s6] sm:$0xf]  ;;  %v4895_v10 = vld [vmem:[%s4876_s6 + $0x4] sm:$0xf] }
  0x7b   : > { %v1086_v50 = vrot.slane %v1085_v9, 4  ;;  %v4851_v59 = vcombine.low %v1067_v15, %v1077_v39  ;;  %v1095_v21 = vor.u32 %v1094_v63, %v1090_v5  ;;  %v1533_v52 = vrot.slane %v1531_v25, 4  ;;  %v5826_v51 = vld [vmem:[#allocation6_spill] sm:$0xff] }
  0x7c   : > { %5819 = vst [vmem:[#allocation20_spill] sm:$0xff] %v4849_v18  ;;  %3779 = vmatprep.mubr.msk.bf16.mxu0 %vm466_vm2, %v4849_v18  ;;  %v1532_v57 = vsel %vm4344_vm8, %v3382_v45, %v1531_v25  ;;  %v2286_v1 = vshrl.u32 %v5821_v58, 16  ;;  %v2289_v24 = vshll.u32 %v5821_v58, 16  ;;  %v2498_v34 = vrot.slane %v5822_v0, 1 }
  0x7d   : > { %5820 = vst [vmem:[#allocation21_spill] sm:$0xff] %v4851_v59  ;;  %3745 = vmatprep.mubr.msk.bf16.mxu1 %vm466_vm2, %v4851_v59  ;;  %v1091_v3 = vsel %vm4326_vm7, %v1086_v50, %v1090_v5  ;;  %v1096_v31 = vrot.slane %v1095_v21, 4  ;;  %v1535_v4 = vsel %vm4344_vm8, %v1533_v52, %v1534_v26  ;;  %v2726_v63 = vshrl.u32 %v5822_v0, 16  ;;  %v371_v5 = vld [vmem:[%s4876_s6 + $0x8] sm:$0x1] }
  0x7e   : > { %v2288_v53 = vrot.slane %v2286_v1, 3  ;;  %v2291_v13 = vrot.slane %v2289_v24, 4  ;;  %v4870_v16 = vcombine.low %v1532_v57, %v1535_v4  ;;  %v2503_v56 = vand.u32 %v2498_v34, %v5824_v38  ;;  %v5831_v34 = vld [vmem:[#allocation16_spill] sm:$0xff]  ;;  %v5832_v4 = vld [vmem:[#allocation18_spill] sm:$0xff] }
  0x7f   : > { %v1101_v7 = vsel %vm4326_vm7, %v1096_v31, %v1100_v30  ;;  %v2729_v9 = vshll.u32 %v5822_v0, 16  ;;  %v2728_v45 = vrot.slane %v2726_v63, 2  ;;  %v3451_v25 = vrot.slane %v4889_v2, 9  ;;  %v378_v30 = vld [vmem:[%s5703_s2 + $0xc] sm:$0x3]  ;;  %v5829_v31 = vld [vmem:[#allocation10_spill] sm:$0xff] }
  0x80   : > { %5823 = vst [vmem:[#allocation3_spill] sm:$0xff] %v4870_v16  ;;  %v4878_v20 = vcombine.low %v1091_v3, %v1101_v7  ;;  %v2292_v14 = vor.u32 %v2291_v13, %v2288_v53  ;;  %3780 = vmatmul.mubr.msk.bf16.gmra.mxu0 %vm466_vm2, %v4870_v16  ;;  %3885 = vmatprep.subr.bf16.mxu0 %v2503_v56  ;;  %v2274_v50 = vrot.slane %v4895_v10, 5  ;;  %v5828_v3 = vld [vmem:[#allocation8_spill] sm:$0xff]  ;;  %v5830_v0 = vld [vmem:[#allocation13_spill] sm:$0xff]  ;;  %v5834_v13 = vld [vmem:[#allocation7_spill] sm:$0xff]  ;;  %v2054_v63 = vshll.u32 %v4895_v10, 16 }
  0x81   : > { %3819 = vmatprep.mubr.msk.bf16.mxu0 %vm466_vm2, %v4501_v6  ;;  %v2731_v39 = vrot.slane %v2729_v9, 3  ;;  %v2277_v6 = vrot.slane %v371_v5, 5  ;;  %v2947_v1 = vand.u32 %v5824_v38, %v378_v30  ;;  %v5833_v53 = vld [vmem:[#allocation5_spill] sm:$0xff] }
  0x82   : > { %5825 = vst [vmem:[#allocation4_spill] sm:$0xff] %v4878_v20  ;;  %3746 = vmatmul.mubr.msk.bf16.gmra.mxu1 %vm466_vm2, %v4878_v20  ;;  %v2297_v15 = vand.u32 %v2292_v14, %v5824_v38  ;;  %v2275_v52 = vsel %vm4344_vm8, %v3451_v25, %v2274_v50  ;;  %v2276_v57 = vrot.slane %v2274_v50, 4  ;;  %v5835_v7 = vld [vmem:[#allocation9_spill] sm:$0xff]  ;;  %v2058_v14 = vshrl.u32 %v4895_v10, 16 }
  0x83   : > { %3785 = vmatprep.mubr.msk.bf16.mxu1 %vm466_vm2, %v5826_v51  ;;  %v2732_v21 = vor.u32 %v2731_v39, %v2728_v45  ;;  %v2056_v45 = vrot.slane %v2054_v63, 5  ;;  %v5837_v39 = vld [vmem:[#allocation15_spill] sm:$0xff]  ;;  %v5838_v30 = vld [vmem:[#allocation17_spill] sm:$0xff]  ;;  %v3416_v63 = vcombine.low %v4889_v2, %v4895_v10 }
  0x84   : > { %3851 = vmatprep.subr.bf16.mxu1 %v2297_v15  ;;  %v2278_v58 = vsel %vm4344_vm8, %v2276_v57, %v2277_v6  ;;  %v2060_v25 = vrot.slane %v2058_v14, 4 }
  0x85   : > { %v2737_v26 = vand.u32 %v2732_v21, %v5824_v38  ;;  %v4911_v24 = vcombine.low %v2275_v52, %v2278_v58  ;;  %v2045_v38 = vshrl.u32 %v4889_v2, 16  ;;  %v2064_v21 = vshll.u32 %v371_v5, 16 }
  0x86   : > { %v2061_v6 = vor.u32 %v2060_v25, %v2056_v45 }
  0x87   : > { %5827 = vst [vmem:[#allocation2_spill] sm:$0xff] %v4911_v24  ;;  %v2047_v9 = vrot.slane %v2045_v38, 4  ;;  %v2066_v58 = vrot.slane %v2064_v21, 5  ;;  %v5839_v38 = vld [vmem:[#allocation19_spill] sm:$0xff] }
  0x88   : > { %3820 = vmatmul.mubr.msk.bf16.vlgmr.msra.gmra.mxu0 %vm466_vm2, %v4526_v8  ;;  %v2062_v57 = vrot.slane %v2061_v6, 4 }
  0x89   : > { %3886 = vmatpush3.bf16.msra.mxu0 %v2503_v56  ;;  %3823 = vmatprep.mubr.msk.bf16.mxu0 %vm466_vm2, %v4560_v54  ;;  %v2048_v56 = vshll.u32 %v4889_v2, 16 }
  0x8a   : > { %3786 = vmatmul.mubr.msk.bf16.vlgmr.msra.gmra.mxu1 %vm466_vm2, %v5828_v3  ;;  %3953 = vmatprep.subr.bf16.mxu0 %v2947_v1  ;;  %v2067_v5 = vsel %vm4326_vm7, %v2062_v57, %v2066_v58  ;;  %v5080_v57 = vld [vmem:[%s4876_s6 + $0xc] sm:$0xf]  ;;  %v5083_v58 = vld [vmem:[%s4876_s6 + $0x10] sm:$0xf] }
  0x8b   : > { %3852 = vmatpush3.bf16.msra.mxu1 %v2297_v15  ;;  %3789 = vmatprep.mubr.msk.bf16.mxu1 %vm466_vm2, %v5829_v31  ;;  %v5836_v15 = vld [vmem:[#allocation11_spill] sm:$0xff]  ;;  %v2050_v51 = vrot.slane %v2048_v56, 5 }
  0x8c   : > { %3919 = vmatprep.subr.bf16.mxu1 %v2737_v26 }
  0x8d   : > { %v2051_v50 = vor.u32 %v2050_v51, %v2047_v9 }
  0x8f   : > { %v2052_v52 = vrot.slane %v2051_v50, 4 }
  0x90   : > { %3824 = vmatmul.mubr.msk.bf16.gmra.mxu0 %vm466_vm2, %v4589_v46 }
  0x91   : > { %3827 = vmatprep.mubr.msk.bf16.mxu0 %vm466_vm2, %v4617_v36  ;;  %v2057_v56 = vsel %vm4326_vm7, %v2052_v52, %v2056_v45 }
  0x92   : > { %3790 = vmatmul.mubr.msk.bf16.gmra.mxu1 %vm466_vm2, %v5830_v0  ;;  %v4975_v14 = vcombine.low %v2057_v56, %v2067_v5 }
  0x93   : > { %3793 = vmatprep.mubr.msk.bf16.mxu1 %vm466_vm2, %v5831_v34 }
  0x94   : > { %5840 = vst [vmem:[#allocation6_spill] sm:$0xff] %v4975_v14 }
  0x98   : > { %3828 = vmatmul.mubr.msk.bf16.gmra.mxu0 %vm466_vm2, %v4641_v23 }
  0x99   : > { %3831 = vmatprep.mubr.msk.bf16.mxu0 %vm466_vm2, %v4676_v12 }
  0x9a   : > { %3794 = vmatmul.mubr.msk.bf16.gmra.mxu1 %vm466_vm2, %v5832_v4 }
  0x9b   : > { %3797 = vmatprep.mubr.msk.bf16.mxu1 %vm466_vm2, %v4452_v32 }
  0xa0   : > { %3832 = vmatmul.mubr.msk.bf16.gmra.mxu0 %vm466_vm2, %v4685_v35 }
  0xa1   : > { %3835 = vmatprep.mubr.msk.bf16.mxu0 %vm466_vm2, %v4722_v40 }
  0xa2   : > { %3798 = vmatmul.mubr.msk.bf16.gmra.mxu1 %vm466_vm2, %v5833_v53 }
  0xa3   : > { %3801 = vmatprep.mubr.msk.bf16.mxu1 %vm466_vm2, %v5834_v13 }
  0xa8   : > { %3836 = vmatmul.mubr.msk.bf16.gmra.mxu0 %vm466_vm2, %v4746_v47 }
  0xa9   : > { %3839 = vmatprep.mubr.msk.bf16.mxu0 %vm466_vm2, %v4776_v55 }
  0xaa   : > { %3802 = vmatmul.mubr.msk.bf16.gmra.mxu1 %vm466_vm2, %v5835_v7 }
  0xab   : > { %3805 = vmatprep.mubr.msk.bf16.mxu1 %vm466_vm2, %v5836_v15 }
  0xb0   : > { %3840 = vmatmul.mubr.msk.bf16.gmra.mxu0 %vm466_vm2, %v4800_v37 }
  0xb1   : > { %3843 = vmatprep.mubr.msk.bf16.mxu0 %vm466_vm2, %v4828_v41 }
  0xb2   : > { %3806 = vmatmul.mubr.msk.bf16.gmra.mxu1 %vm466_vm2, %v5837_v39 }
  0xb3   : > { %3809 = vmatprep.mubr.msk.bf16.mxu1 %vm466_vm2, %v5838_v30 }
  0xb8   : > { %3844 = vmatmul.mubr.msk.bf16.gmra.mxu0 %vm466_vm2, %v4851_v59 }
  0xb9   : > { %3847 = vmatprep.mubr.msk.bf16.mxu0 %vm466_vm2, %v4878_v20 }
  0xba   : > { %3810 = vmatmul.mubr.msk.bf16.gmra.mxu1 %vm466_vm2, %v5839_v38 }
  0xbb   : > { %3813 = vmatprep.mubr.msk.bf16.mxu1 %vm466_vm2, %v4464_v19 }
  0xc0   : > { %3848 = vmatmul.mubr.msk.bf16.gmra.mxu0 %vm466_vm2, %v4975_v14 }
  0xc1   : > { %3887 = vmatprep.mubr.msk.bf16.mxu0 %vm466_vm2, %v5828_v3 }
  0xc2   : > { %3814 = vmatmul.mubr.msk.bf16.gmra.mxu1 %vm466_vm2, %v3416_v63 }
  0xc3   : > { %3853 = vmatprep.mubr.msk.bf16.mxu1 %vm466_vm2, %v4492_v11 }
  0xc8   : > { %3888 = vmatmul.mubr.msk.bf16.vlgmr.msra.gmra.mxu0 %vm466_vm2, %v5829_v31 }
  0xc9   : > { %3954 = vmatpush3.bf16.msra.mxu0 %v2947_v1  ;;  %3891 = vmatprep.mubr.msk.bf16.mxu0 %vm466_vm2, %v5830_v0 }
  0xca   : > { %3854 = vmatmul.mubr.msk.bf16.vlgmr.msra.gmra.mxu1 %vm466_vm2, %v4531_v28 }
  0xcb   : > { %3920 = vmatpush3.bf16.msra.mxu1 %v2737_v26  ;;  %3857 = vmatprep.mubr.msk.bf16.mxu1 %vm466_vm2, %v4555_v33 }
  0xd0   : > { %3892 = vmatmul.mubr.msk.bf16.gmra.mxu0 %vm466_vm2, %v5831_v34 }
  0xd1   : > { %3895 = vmatprep.mubr.msk.bf16.mxu0 %vm466_vm2, %v5832_v4 }
  0xd2   : > { %3858 = vmatmul.mubr.msk.bf16.gmra.mxu1 %vm466_vm2, %v4579_v60 }
  0xd3   : > { %3861 = vmatprep.mubr.msk.bf16.mxu1 %vm466_vm2, %v4609_v62 }
  0xd8   : > { %3896 = vmatmul.mubr.msk.bf16.gmra.mxu0 %vm466_vm2, %v4452_v32 }
  0xd9   : > { %3899 = vmatprep.mubr.msk.bf16.mxu0 %vm466_vm2, %v5833_v53 }
  0xda   : > { %3862 = vmatmul.mubr.msk.bf16.gmra.mxu1 %vm466_vm2, %v4637_v42  ;;  %v3685_v11 = vpop.f32.mrf.mxu0 }
  0xdb   : > { %3865 = vmatprep.mubr.msk.bf16.mxu1 %vm466_vm2, %v4672_v22 }
  0xdc   : > { %v556_v2 = vpop.f32.mrf.mxu0 }
  0xdd   : > { %v5018_v32 = vpop.f32.mrf.mxu1 }
  0xde   : > { %v3686_v26 = vpop.f32.mrf.mxu0 }
  0xdf   : > { %v5020_v10 = vpop.f32.mrf.mxu1 }
  0xe0   : > { %3900 = vmatmul.mubr.msk.bf16.gmra.mxu0 %vm466_vm2, %v5834_v13  ;;  %v559_v3 = vpop.f32.mrf.mxu0 }
  0xe1   : > { %3903 = vmatprep.mubr.msk.bf16.mxu0 %vm466_vm2, %v5835_v7  ;;  %v5022_v1 = vpop.f32.mrf.mxu1 }
  0xe2   : > { %3866 = vmatmul.mubr.msk.bf16.gmra.mxu1 %vm466_vm2, %v4691_v17  ;;  %v3689_v0 = vpop.f32.mrf.mxu0 }
  0xe3   : > { %3869 = vmatprep.mubr.msk.bf16.mxu1 %vm466_vm2, %v4719_v48  ;;  %v5026_v31 = vpop.f32.mrf.mxu1 }
  0xe4   : > { %v5036_v4 = vpop.f32.mrf.mxu0 }
  0xe5   : > { %v5034_v34 = vpop.f32.mrf.mxu1 }
  0xe6   : > { %v5040_v13 = vpop.f32.mrf.mxu0 }
  0xe7   : > { %v5038_v53 = vpop.f32.mrf.mxu1 }
  0xe8   : > { %3904 = vmatmul.mubr.msk.bf16.gmra.mxu0 %vm466_vm2, %v5836_v15  ;;  %v5044_v15 = vpop.f32.mrf.mxu0 }
  0xe9   : > { %3907 = vmatprep.mubr.msk.bf16.mxu0 %vm466_vm2, %v5837_v39  ;;  %v5042_v7 = vpop.f32.mrf.mxu1 }
  0xea   : > { %3870 = vmatmul.mubr.msk.bf16.gmra.mxu1 %vm466_vm2, %v4743_v61  ;;  %v5050_v51 = vpop.f32.mrf.mxu0 }
  0xeb   : > { %3873 = vmatprep.mubr.msk.bf16.mxu1 %vm466_vm2, %v4768_v27  ;;  %v5048_v9 = vpop.f32.mrf.mxu1 }
  0xec   : > { %5841 = vst [vmem:[#allocation8_spill] sm:$0xff] %v5048_v9  ;;  %v5060_v25 = vpop.f32.mrf.mxu0 }
  0xed   : > { %v5058_v45 = vpop.f32.mrf.mxu1 }
  0xee   : > { %5842 = vst [vmem:[#allocation10_spill] sm:$0xff] %v5058_v45  ;;  %v5064_v50 = vpop.f32.mrf.mxu0 }
  0xef   : > { %v5062_v39 = vpop.f32.mrf.mxu1 }
  0xf0   : > { %3908 = vmatmul.mubr.msk.bf16.gmra.mxu0 %vm466_vm2, %v5838_v30  ;;  %5843 = vst [vmem:[#allocation13_spill] sm:$0xff] %v5062_v39  ;;  %v5068_v21 = vpop.f32.mrf.mxu0 }
  0xf1   : > { %3911 = vmatprep.mubr.msk.bf16.mxu0 %vm466_vm2, %v5839_v38  ;;  %v5066_v6 = vpop.f32.mrf.mxu1 }
  0xf2   : > { %3874 = vmatmul.mubr.msk.bf16.gmra.mxu1 %vm466_vm2, %v4797_v43  ;;  %5844 = vst [vmem:[#allocation16_spill] sm:$0xff] %v5066_v6  ;;  %v5074_v52 = vpop.f32.mrf.mxu0  ;;  %v5104_v6 = vld [vmem:[%s5704_s3] ss:$0 sm:$0xff] }
  0xf3   : > { %3877 = vmatprep.mubr.msk.bf16.mxu1 %vm466_vm2, %v4820_v44  ;;  %v5072_v30 = vpop.f32.mrf.mxu1  ;;  %v685_v29 = vadd.f32 %v3685_v11, %v5104_v6  ;;  %v683_v20 = vadd.f32 %v5104_v6, %v556_v2  ;;  %v684_v9 = vadd.f32 %v5104_v6, %v559_v3 }
  0xf4   : > { %5845 = vst [vmem:[#allocation18_spill] sm:$0xff] %v5072_v30  ;;  %v5089_v56 = vpop.f32.mrf.mxu0 }
  0xf5   : > { %v5087_v38 = vpop.f32.mrf.mxu1 }
  0xf6   : > { %5846 = vst [vmem:[#allocation5_spill] sm:$0xff] %v5087_v38  ;;  %v5095_v30 = vpop.f32.mrf.mxu0 }
  0xf7   : > { %v5093_v5 = vpop.f32.mrf.mxu1 }
  0xf8   : > { %3912 = vmatmul.mubr.msk.bf16.gmra.mxu0 %vm466_vm2, %v4464_v19  ;;  %v3470_v19 = vcombine.low %v5080_v57, %v5083_v58  ;;  %5847 = vst [vmem:[#allocation7_spill] sm:$0xff] %v5093_v5 }
  0xf9   : > { %3915 = vmatprep.mubr.msk.bf16.mxu0 %vm466_vm2, %v3416_v63  ;;  %v5097_v14 = vpop.f32.mrf.mxu1  ;;  %v5099_v63 = vpop.f32.mrf.mxu0 }
  0xfa   : > { %3878 = vmatmul.mubr.msk.bf16.gmra.mxu1 %vm466_vm2, %v4849_v18  ;;  %5848 = vst [vmem:[#allocation9_spill] sm:$0xff] %v5097_v14 }
  0xfb   : > { %3881 = vmatprep.mubr.msk.bf16.mxu1 %vm466_vm2, %v4870_v16  ;;  %v5107_v38 = vpop.f32.mrf.mxu1  ;;  %v3753_v49 = vpop.f32.mrf.mxu0 }
  0xfc   : > { %5849 = vst [vmem:[#allocation11_spill] sm:$0xff] %v5107_v38  ;;  %v686_v38 = vadd.f32 %v3686_v26, %v5104_v6 }
  0xfd   : > { %v3719_v14 = vpop.f32.mrf.mxu1  ;;  %v1673_v5 = vpop.f32.mrf.mxu0 }
  0xfe   : > { %v1375_v16 = vadd.f32 %v3719_v14, %v685_v29  ;;  %v689_v29 = vadd.f32 %v3689_v0, %v5104_v6 }
  0xff   : > { %v3754_v39 = vpop.f32.mrf.mxu0 }
 0x100   : > { %3916 = vmatmul.mubr.msk.bf16.gmra.mxu0 %vm466_vm2, %v3470_v19  ;;  %v1246_v19 = vpop.f32.mrf.mxu1  ;;  %v5118_v45 = vadd.f32 %v3753_v49, %v1375_v16 }
 0x101   : > { %3955 = vmatprep.mubr.msk.bf16.mxu0 %vm466_vm2, %v4531_v28  ;;  %v1373_v11 = vadd.f32 %v1246_v19, %v683_v20  ;;  %v693_v19 = vadd.f32 %v5050_v51, %v5104_v6 }
 0x102   : > { %3882 = vmatmul.mubr.msk.bf16.gmra.mxu1 %vm466_vm2, %v4911_v24  ;;  %v3720_v59 = vpop.f32.mrf.mxu1  ;;  %v1676_v24 = vpop.f32.mrf.mxu0 }
 0x103   : > { %3921 = vmatprep.mubr.msk.bf16.mxu1 %vm466_vm2, %v4526_v8  ;;  %v5121_v28 = vadd.f32 %v1673_v5, %v1373_v11  ;;  %v1376_v18 = vadd.f32 %v3720_v59, %v686_v38 }
 0x104   : > { %v1249_v8 = vpop.f32.mrf.mxu1  ;;  %v3757_v2 = vpop.f32.mrf.mxu0 }
 0x105   : > { %v5128_v49 = vadd.f32 %v3754_v39, %v1376_v18  ;;  %v1374_v16 = vadd.f32 %v1249_v8, %v684_v9 }
 0x106   : > { %v3723_v59 = vpop.f32.mrf.mxu1  ;;  %v1689_v20 = vpop.f32.mrf.mxu0 }
 0x107   : > { %v5136_v14 = vadd.f32 %v1676_v24, %v1374_v16  ;;  %v1379_v26 = vadd.f32 %v3723_v59, %v689_v29 }
 0x108   : > { %3956 = vmatmul.mubr.msk.bf16.vlgmr.msra.gmra.mxu0 %vm466_vm2, %v4555_v33  ;;  %v687_v33 = vadd.f32 %v5104_v6, %v5036_v4  ;;  %v1262_v3 = vpop.f32.mrf.mxu1  ;;  %v3758_v0 = vpop.f32.mrf.mxu0 }
 0x109   : > { %3959 = vmatprep.mubr.msk.bf16.mxu0 %vm466_vm2, %v4579_v60  ;;  %v5140_v18 = vadd.f32 %v3757_v2, %v1379_v26 }
 0x10a   : > { %3922 = vmatmul.mubr.msk.bf16.vlgmr.msra.gmra.mxu1 %vm466_vm2, %v4560_v54  ;;  %v690_v54 = vadd.f32 %v5040_v13, %v5104_v6  ;;  %v1377_v9 = vadd.f32 %v1262_v3, %v687_v33  ;;  %v3724_v60 = vpop.f32.mrf.mxu1  ;;  %v1692_v39 = vpop.f32.mrf.mxu0 }
 0x10b   : > { %3925 = vmatprep.mubr.msk.bf16.mxu1 %vm466_vm2, %v4589_v46  ;;  %v688_v46 = vadd.f32 %v5104_v6, %v5044_v15 }
 0x10c   : > { %v5144_v38 = vadd.f32 %v1689_v20, %v1377_v9  ;;  %v1380_v5 = vadd.f32 %v3724_v60, %v690_v54  ;;  %v1265_v24 = vpop.f32.mrf.mxu1  ;;  %v3761_v4 = vpop.f32.mrf.mxu0  ;;  %v697_v54 = vadd.f32 %v5074_v52, %v5104_v6 }
 0x10d   : > { %v1378_v11 = vadd.f32 %v1265_v24, %v688_v46 }
 0x10e   : > { %v5152_v13 = vadd.f32 %v3758_v0, %v1380_v5  ;;  %v3727_v15 = vpop.f32.mrf.mxu1  ;;  %v1705_v8 = vpop.f32.mrf.mxu0 }
 0x10f   : > { %v5160_v2 = vadd.f32 %v1692_v39, %v1378_v11  ;;  %v1383_v51 = vadd.f32 %v3727_v15, %v693_v19 }
 0x110   : > { %3960 = vmatmul.mubr.msk.bf16.gmra.mxu0 %vm466_vm2, %v4609_v62  ;;  %v691_v62 = vadd.f32 %v5104_v6, %v5060_v25  ;;  %v1278_v29 = vpop.f32.mrf.mxu1  ;;  %v3762_v16 = vpop.f32.mrf.mxu0 }
 0x111   : > { %3963 = vmatprep.mubr.msk.bf16.mxu0 %vm466_vm2, %v4637_v42  ;;  %v5164_v59 = vadd.f32 %v3761_v4, %v1383_v51 }
 0x112   : > { %3926 = vmatmul.mubr.msk.bf16.gmra.mxu1 %vm466_vm2, %v4617_v36  ;;  %v694_v36 = vadd.f32 %v5064_v50, %v5104_v6  ;;  %v1381_v20 = vadd.f32 %v1278_v29, %v691_v62  ;;  %v3728_v42 = vpop.f32.mrf.mxu1  ;;  %v1708_v33 = vpop.f32.mrf.mxu0 }
 0x113   : > { %3929 = vmatprep.mubr.msk.bf16.mxu1 %vm466_vm2, %v4641_v23  ;;  %v692_v23 = vadd.f32 %v5104_v6, %v5068_v21 }
 0x114   : > { %v5168_v26 = vadd.f32 %v1705_v8, %v1381_v20  ;;  %v1384_v3 = vadd.f32 %v3728_v42, %v694_v36  ;;  %v1281_v25 = vpop.f32.mrf.mxu1  ;;  %v3765_v0 = vpop.f32.mrf.mxu0  ;;  %v701_v8 = vadd.f32 %v5018_v32, %v5104_v6 }
 0x115   : > { %v1382_v9 = vadd.f32 %v1281_v25, %v692_v23  ;;  %v2699_v25 = vshrl.u32 %v5080_v57, 16 }
 0x116   : > { %v5176_v50 = vadd.f32 %v3762_v16, %v1384_v3  ;;  %v3731_v21 = vpop.f32.mrf.mxu1  ;;  %v1721_v60 = vpop.f32.mrf.mxu0 }
 0x117   : > { %v5184_v39 = vadd.f32 %v1708_v33, %v1382_v9  ;;  %v1387_v52 = vadd.f32 %v3731_v21, %v697_v54  ;;  %v2708_v54 = vshll.u32 %v5083_v58, 16  ;;  %v2712_v9 = vshrl.u32 %v5083_v58, 16 }
 0x118   : > { %3964 = vmatmul.mubr.msk.bf16.gmra.mxu0 %vm466_vm2, %v4672_v22  ;;  %v695_v22 = vadd.f32 %v5104_v6, %v5089_v56  ;;  %v1294_v46 = vpop.f32.mrf.mxu1  ;;  %v3766_v5 = vpop.f32.mrf.mxu0 }
 0x119   : > { %3967 = vmatprep.mubr.msk.bf16.mxu0 %vm466_vm2, %v4691_v17  ;;  %v5188_v24 = vadd.f32 %v3765_v0, %v1387_v52  ;;  %v2702_v0 = vshll.u32 %v5080_v57, 16  ;;  %v2701_v52 = vrot.slane %v2699_v25, 4  ;;  %v5853_v25 = vld [vmem:[#allocation10_spill] sm:$0xff] }
 0x11a   : > { %3930 = vmatmul.mubr.msk.bf16.gmra.mxu1 %vm466_vm2, %v4676_v12  ;;  %v698_v12 = vadd.f32 %v5095_v30, %v5104_v6  ;;  %v1385_v4 = vadd.f32 %v1294_v46, %v695_v22  ;;  %v3732_v17 = vpop.f32.mrf.mxu1  ;;  %v1724_v19 = vpop.f32.mrf.mxu0  ;;  %v705_v22 = vadd.f32 %v5034_v34, %v5104_v6 }
 0x11b   : > { %3933 = vmatprep.mubr.msk.bf16.mxu1 %vm466_vm2, %v4685_v35  ;;  %v696_v35 = vadd.f32 %v5104_v6, %v5099_v63  ;;  %v2704_v46 = vrot.slane %v2702_v0, 5  ;;  %v709_v0 = vadd.f32 %v5853_v25, %v5104_v6 }
 0x11c   : > { %v5192_v11 = vadd.f32 %v1721_v60, %v1385_v4  ;;  %v1388_v15 = vadd.f32 %v3732_v17, %v698_v12  ;;  %v1297_v56 = vpop.f32.mrf.mxu1  ;;  %v703_v17 = vadd.f32 %v5104_v6, %v5038_v53 }
 0x11d   : > { %v1386_v62 = vadd.f32 %v1297_v56, %v696_v35 }
 0x11e   : > { %v5200_v30 = vadd.f32 %v3766_v5, %v1388_v15  ;;  %v3769_v63 = vpop.f32.mrf.mxu0  ;;  %v2710_v5 = vrot.slane %v2708_v54, 5  ;;  %v374_v15 = vld [vmem:[%s4876_s6 + $0x14] sm:$0x1] }
 0x11f   : > { %v3735_v51 = vpop.f32.mrf.mxu1  ;;  %v5208_v29 = vadd.f32 %v1724_v19, %v1386_v62 }
 0x120   : > { %3968 = vmatmul.mubr.msk.bf16.gmra.mxu0 %vm466_vm2, %v4719_v48  ;;  %v699_v48 = vadd.f32 %v5104_v6, %v5020_v10  ;;  %v1391_v32 = vadd.f32 %v3735_v51, %v701_v8  ;;  %v1737_v16 = vpop.f32.mrf.mxu0  ;;  %v2935_v8 = vrot.slane %v5083_v58, 5  ;;  %v2705_v51 = vor.u32 %v2704_v46, %v2701_v52 }
 0x121   : > { %3971 = vmatprep.mubr.msk.bf16.mxu0 %vm466_vm2, %v4743_v61  ;;  %v1310_v36 = vpop.f32.mrf.mxu1  ;;  %v2718_v58 = vshll.u32 %v374_v15, 16 }
 0x122   : > { %3934 = vmatmul.mubr.msk.bf16.gmra.mxu1 %vm466_vm2, %v4722_v40  ;;  %v702_v40 = vadd.f32 %v5022_v1, %v5104_v6  ;;  %v5212_v20 = vadd.f32 %v3769_v63, %v1391_v32  ;;  %v1389_v42 = vadd.f32 %v1310_v36, %v699_v48  ;;  %v3770_v61 = vpop.f32.mrf.mxu0  ;;  %v5850_v63 = vld [vmem:[#allocation20_spill] sm:$0xff] }
 0x123   : > { %3937 = vmatprep.mubr.msk.bf16.mxu1 %vm466_vm2, %v4746_v47  ;;  %v3736_v33 = vpop.f32.mrf.mxu1  ;;  %v700_v47 = vadd.f32 %v5104_v6, %v5026_v31  ;;  %v5851_v32 = vld [vmem:[#allocation8_spill] sm:$0xff] }
 0x124   : > { %v5216_v23 = vadd.f32 %v1737_v16, %v1389_v42  ;;  %v1392_v3 = vadd.f32 %v3736_v33, %v702_v40  ;;  %v1740_v10 = vpop.f32.mrf.mxu0 }
 0x125   : > { %v1313_v1 = vpop.f32.mrf.mxu1 }
 0x126   : > { %v5226_v31 = vadd.f32 %v3770_v61, %v1392_v3  ;;  %v1390_v21 = vadd.f32 %v1313_v1, %v700_v47  ;;  %v3505_v61 = vrot.slane %v5080_v57, 9  ;;  %v2706_v47 = vrot.slane %v2705_v51, 4  ;;  %v5856_v57 = vld [vmem:[#allocation4_spill] sm:$0xff]  ;;  %v5861_v51 = vld [vmem:[#allocation6_spill] sm:$0xff] }
 0x127   : > { %v2937_v3 = vrot.slane %v2935_v8, 4 }
 0x128   : > { %3972 = vmatmul.mubr.msk.bf16.gmra.mxu0 %vm466_vm2, %v4768_v27  ;;  %v5232_v60 = vadd.f32 %v1740_v10, %v1390_v21  ;;  %v2938_v10 = vrot.slane %v374_v15, 5  ;;  %v2936_v15 = vsel %vm4344_vm8, %v3505_v61, %v2935_v8 }
 0x129   : > { %3975 = vmatprep.mubr.msk.bf16.mxu0 %vm466_vm2, %v4797_v43  ;;  %v3773_v27 = vpop.f32.mrf.mxu0 }
 0x12a   : > { %3938 = vmatmul.mubr.msk.bf16.gmra.mxu1 %vm466_vm2, %v4776_v55  ;;  %v2714_v55 = vrot.slane %v2712_v9, 4  ;;  %v2720_v9 = vrot.slane %v2718_v58, 5 }
 0x12b   : > { %3941 = vmatprep.mubr.msk.bf16.mxu1 %vm466_vm2, %v4800_v37  ;;  %v3739_v12 = vpop.f32.mrf.mxu1  ;;  %v1753_v4 = vpop.f32.mrf.mxu0  ;;  %v706_v37 = vadd.f32 %v5042_v7, %v5104_v6  ;;  %v704_v7 = vadd.f32 %v5104_v6, %v5851_v32 }
 0x12c   : > { %v1395_v19 = vadd.f32 %v3739_v12, %v705_v22  ;;  %v2715_v48 = vor.u32 %v2714_v55, %v2710_v5  ;;  %v5854_v22 = vld [vmem:[#allocation13_spill] sm:$0xff]  ;;  %v5855_v55 = vld [vmem:[#allocation3_spill] sm:$0xff] }
 0x12d   : > { %v1326_v43 = vpop.f32.mrf.mxu1  ;;  %v3774_v35 = vpop.f32.mrf.mxu0  ;;  %v707_v52 = vadd.f32 %v5104_v6, %v5854_v22 }
 0x12e   : > { %v5241_v56 = vadd.f32 %v3773_v27, %v1395_v19  ;;  %v1393_v34 = vadd.f32 %v1326_v43, %v703_v17  ;;  %v2716_v54 = vrot.slane %v2715_v48, 4  ;;  %v5857_v17 = vld [vmem:[#allocation2_spill] sm:$0xff]  ;;  %v2711_v43 = vsel %vm4326_vm7, %v2706_v47, %v2710_v5  ;;  %v5863_v47 = vld [vmem:[#allocation5_spill] sm:$0xff] }
 0x12f   : > { %v3740_v62 = vpop.f32.mrf.mxu1  ;;  %v1756_v53 = vpop.f32.mrf.mxu0  ;;  %v5862_v5 = vld [vmem:[#allocation18_spill] sm:$0xff] }
 0x130   : > { %3976 = vmatmul.mubr.msk.bf16.gmra.mxu0 %vm466_vm2, %v4820_v44  ;;  %v5252_v16 = vadd.f32 %v1753_v4, %v1393_v34  ;;  %v1396_v36 = vadd.f32 %v3740_v62, %v706_v37  ;;  %v5852_v44 = vld [vmem:[#allocation21_spill] sm:$0xff]  ;;  %v2939_v37 = vsel %vm4344_vm8, %v2937_v3, %v2938_v10  ;;  %v5860_v34 = vld [vmem:[#allocation16_spill] sm:$0xff]  ;;  %v2721_v48 = vsel %vm4326_vm7, %v2716_v54, %v2720_v9  ;;  %v5864_v54 = vld [vmem:[#allocation7_spill] sm:$0xff] }
 0x131   : > { %3979 = vmatprep.mubr.msk.bf16.mxu0 %vm466_vm2, %v5850_v63  ;;  %v1329_v40 = vpop.f32.mrf.mxu1  ;;  %v710_v62 = vadd.f32 %v5860_v34, %v5104_v6  ;;  %v3506_v58 = vcombine.low %v2936_v15, %v2939_v37  ;;  %v713_v3 = vadd.f32 %v5863_v47, %v5104_v6  ;;  %v711_v9 = vadd.f32 %v5104_v6, %v5864_v54 }
 0x132   : > { %3942 = vmatmul.mubr.msk.bf16.gmra.mxu1 %vm466_vm2, %v4828_v41  ;;  %v5256_v42 = vadd.f32 %v3774_v35, %v1396_v36  ;;  %v1394_v41 = vadd.f32 %v1329_v40, %v704_v7  ;;  %v708_v7 = vadd.f32 %v5104_v6, %v5862_v5 }
 0x133   : > { %3945 = vmatprep.mubr.msk.bf16.mxu1 %vm466_vm2, %v5852_v44 }
 0x134   : > { %v5261_v1 = vadd.f32 %v1756_v53, %v1394_v41  ;;  %v3488_v41 = vcombine.low %v2711_v43, %v2721_v48 }
 0x135   : > { %v3777_v33 = vpop.f32.mrf.mxu0 }
 0x137   : > { %v3743_v21 = vpop.f32.mrf.mxu1  ;;  %v1769_v27 = vpop.f32.mrf.mxu0 }
 0x138   : > { %v1399_v46 = vadd.f32 %v3743_v21, %v709_v0  ;;  %3980 = vmatmul.mubr.msk.bf16.gmra.mxu0 %vm466_vm2, %v5855_v55 }
 0x139   : > { %v1342_v12 = vpop.f32.mrf.mxu1  ;;  %v3778_v4 = vpop.f32.mrf.mxu0  ;;  %3983 = vmatprep.mubr.msk.bf16.mxu0 %vm466_vm2, %v5857_v17  ;;  %v5866_v17 = vld [vmem:[#allocation11_spill] sm:$0xff] }
 0x13a   : > { %3946 = vmatmul.mubr.msk.bf16.gmra.mxu1 %vm466_vm2, %v5856_v57  ;;  %v5279_v53 = vadd.f32 %v3777_v33, %v1399_v46  ;;  %v1397_v63 = vadd.f32 %v1342_v12, %v707_v52  ;;  %v5865_v52 = vld [vmem:[#allocation9_spill] sm:$0xff]  ;;  %v712_v19 = vadd.f32 %v5104_v6, %v5866_v17 }
 0x13b   : > { %3949 = vmatprep.mubr.msk.bf16.mxu1 %vm466_vm2, %v5861_v51  ;;  %v3744_v32 = vpop.f32.mrf.mxu1  ;;  %v1772_v44 = vpop.f32.mrf.mxu0  ;;  %v714_v46 = vadd.f32 %v5865_v52, %v5104_v6 }
 0x13c   : > { %v5287_v8 = vadd.f32 %v1769_v27, %v1397_v63  ;;  %v1400_v36 = vadd.f32 %v3744_v32, %v710_v62 }
 0x13d   : > { %v1345_v40 = vpop.f32.mrf.mxu1 }
 0x13e   : > { %v5289_v61 = vadd.f32 %v3778_v4, %v1400_v36  ;;  %v1398_v33 = vadd.f32 %v1345_v40, %v708_v7 }
 0x140   : > { %v5293_v10 = vadd.f32 %v1772_v44, %v1398_v33  ;;  %v3781_v25 = vpop.f32.mrf.mxu0  ;;  %3984 = vmatmul.mubr.msk.bf16.gmra.mxu0 %vm466_vm2, %v3506_v58 }
 0x142   : > { %v3747_v0 = vpop.f32.mrf.mxu1  ;;  %3950 = vmatmul.mubr.msk.bf16.gmra.mxu1 %vm466_vm2, %v3488_v41  ;;  %v1785_v27 = vpop.f32.mrf.mxu0 }
 0x143   : > { %v1403_v21 = vadd.f32 %v3747_v0, %v713_v3 }
 0x144   : > { %v1358_v22 = vpop.f32.mrf.mxu1  ;;  %v3782_v12 = vpop.f32.mrf.mxu0 }
 0x145   : > { %v5301_v55 = vadd.f32 %v3781_v25, %v1403_v21  ;;  %v1401_v57 = vadd.f32 %v1358_v22, %v711_v9 }
 0x146   : > { %v3748_v4 = vpop.f32.mrf.mxu1  ;;  %v1788_v15 = vpop.f32.mrf.mxu0 }
 0x147   : > { %v5305_v43 = vadd.f32 %v1785_v27, %v1401_v57  ;;  %v1404_v35 = vadd.f32 %v3748_v4, %v714_v46 }
 0x148   : > { %v1361_v37 = vpop.f32.mrf.mxu1  ;;  %v3821_v63 = vpop.f32.mrf.mxu0 }
 0x149   : > { %v5307_v34 = vadd.f32 %v3782_v12, %v1404_v35  ;;  %v1402_v62 = vadd.f32 %v1361_v37, %v712_v19 }
 0x14a   : > { %v3787_v51 = vpop.f32.mrf.mxu1  ;;  %v2112_v5 = vpop.f32.mrf.mxu0 }
 0x14b   : > { %v5309_v48 = vadd.f32 %v1788_v15, %v1402_v62  ;;  %v2014_v32 = vadd.f32 %v3787_v51, %v5118_v45 }
 0x14c   : > { %v1885_v7 = vpop.f32.mrf.mxu1  ;;  %v3822_v44 = vpop.f32.mrf.mxu0 }
 0x14d   : > { %v5312_v36 = vadd.f32 %v3821_v63, %v2014_v32  ;;  %v2012_v6 = vadd.f32 %v1885_v7, %v5121_v28 }
 0x14e   : > { %v3788_v58 = vpop.f32.mrf.mxu1  ;;  %v2115_v33 = vpop.f32.mrf.mxu0 }
 0x14f   : > { %v5315_v40 = vadd.f32 %v2112_v5, %v2012_v6  ;;  %v2015_v41 = vadd.f32 %v3788_v58, %v5128_v49 }
 0x150   : > { %v1888_v47 = vpop.f32.mrf.mxu1  ;;  %v3825_v0 = vpop.f32.mrf.mxu0 }
 0x151   : > { %v5318_v3 = vadd.f32 %v3822_v44, %v2015_v41  ;;  %v2013_v25 = vadd.f32 %v1888_v47, %v5136_v14 }
 0x152   : > { %v3791_v45 = vpop.f32.mrf.mxu1  ;;  %v2128_v21 = vpop.f32.mrf.mxu0 }
 0x153   : > { %v5321_v54 = vadd.f32 %v2115_v33, %v2013_v25  ;;  %v2018_v9 = vadd.f32 %v3791_v45, %v5140_v18 }
 0x154   : > { %v1901_v28 = vpop.f32.mrf.mxu1  ;;  %v3826_v52 = vpop.f32.mrf.mxu0 }
 0x155   : > { %v5324_v27 = vadd.f32 %v3825_v0, %v2018_v9  ;;  %v2016_v22 = vadd.f32 %v1901_v28, %v5144_v38 }
 0x156   : > { %v3792_v49 = vpop.f32.mrf.mxu1  ;;  %v2131_v12 = vpop.f32.mrf.mxu0 }
 0x157   : > { %v5327_v46 = vadd.f32 %v2128_v21, %v2016_v22  ;;  %v2019_v57 = vadd.f32 %v3792_v49, %v5152_v13 }
 0x158   : > { %v1904_v14 = vpop.f32.mrf.mxu1  ;;  %v3829_v19 = vpop.f32.mrf.mxu0 }
 0x159   : > { %v5330_v4 = vadd.f32 %v3826_v52, %v2019_v57  ;;  %v2017_v17 = vadd.f32 %v1904_v14, %v5160_v2 }
 0x15a   : > { %v3795_v18 = vpop.f32.mrf.mxu1  ;;  %v2144_v37 = vpop.f32.mrf.mxu0 }
 0x15b   : > { %v5333_v35 = vadd.f32 %v2131_v12, %v2017_v17  ;;  %v2022_v15 = vadd.f32 %v3795_v18, %v5164_v59 }
 0x15c   : > { %v1917_v38 = vpop.f32.mrf.mxu1  ;;  %v3830_v51 = vpop.f32.mrf.mxu0 }
 0x15d   : > { %v5336_v62 = vadd.f32 %v3829_v19, %v2022_v15  ;;  %v2020_v63 = vadd.f32 %v1917_v38, %v5168_v26 }
 0x15e   : > { %v3796_v13 = vpop.f32.mrf.mxu1  ;;  %v2147_v7 = vpop.f32.mrf.mxu0 }
 0x15f   : > { %v5339_v32 = vadd.f32 %v2144_v37, %v2020_v63  ;;  %v2023_v5 = vadd.f32 %v3796_v13, %v5176_v50 }
 0x160   : > { %v1920_v2 = vpop.f32.mrf.mxu1  ;;  %v3833_v58 = vpop.f32.mrf.mxu0 }
 0x161   : > { %v5342_v6 = vadd.f32 %v3830_v51, %v2023_v5  ;;  %v2021_v44 = vadd.f32 %v1920_v2, %v5184_v39 }
 0x162   : > { %v3799_v59 = vpop.f32.mrf.mxu1  ;;  %v2160_v47 = vpop.f32.mrf.mxu0 }
 0x163   : > { %v5345_v41 = vadd.f32 %v2147_v7, %v2021_v44  ;;  %v2026_v33 = vadd.f32 %v3799_v59, %v5188_v24 }
 0x164   : > { %v1933_v26 = vpop.f32.mrf.mxu1  ;;  %v3834_v45 = vpop.f32.mrf.mxu0 }
 0x165   : > { %v5348_v25 = vadd.f32 %v3833_v58, %v2026_v33  ;;  %v2024_v0 = vadd.f32 %v1933_v26, %v5192_v11 }
 0x166   : > { %v3800_v50 = vpop.f32.mrf.mxu1  ;;  %v2163_v28 = vpop.f32.mrf.mxu0 }
 0x167   : > { %v5351_v9 = vadd.f32 %v2160_v47, %v2024_v0  ;;  %v2027_v21 = vadd.f32 %v3800_v50, %v5200_v30 }
 0x168   : > { %v1936_v39 = vpop.f32.mrf.mxu1  ;;  %v3837_v49 = vpop.f32.mrf.mxu0 }
 0x169   : > { %v5354_v22 = vadd.f32 %v3834_v45, %v2027_v21  ;;  %v2025_v52 = vadd.f32 %v1936_v39, %v5208_v29 }
 0x16a   : > { %v3803_v24 = vpop.f32.mrf.mxu1  ;;  %v2176_v14 = vpop.f32.mrf.mxu0 }
 0x16b   : > { %v5357_v57 = vadd.f32 %v2163_v28, %v2025_v52  ;;  %v2030_v12 = vadd.f32 %v3803_v24, %v5212_v20 }
 0x16c   : > { %v1949_v11 = vpop.f32.mrf.mxu1  ;;  %v3838_v18 = vpop.f32.mrf.mxu0 }
 0x16d   : > { %v5360_v17 = vadd.f32 %v3837_v49, %v2030_v12  ;;  %v2028_v19 = vadd.f32 %v1949_v11, %v5216_v23 }
 0x16e   : > { %v3804_v30 = vpop.f32.mrf.mxu1  ;;  %v2179_v38 = vpop.f32.mrf.mxu0 }
 0x16f   : > { %v5363_v15 = vadd.f32 %v2176_v14, %v2028_v19  ;;  %v2031_v37 = vadd.f32 %v3804_v30, %v5226_v31 }
 0x170   : > { %v1952_v29 = vpop.f32.mrf.mxu1  ;;  %v3841_v13 = vpop.f32.mrf.mxu0 }
 0x171   : > { %v5366_v63 = vadd.f32 %v3838_v18, %v2031_v37  ;;  %v2029_v51 = vadd.f32 %v1952_v29, %v5232_v60 }
 0x172   : > { %v3807_v20 = vpop.f32.mrf.mxu1  ;;  %v2192_v2 = vpop.f32.mrf.mxu0 }
 0x173   : > { %5867 = vst [vmem:[#allocation15_spill] sm:$0xff] %v5366_v63  ;;  %v5369_v5 = vadd.f32 %v2179_v38, %v2029_v51  ;;  %v2034_v7 = vadd.f32 %v3807_v20, %v5241_v56 }
 0x174   : > { %v1965_v23 = vpop.f32.mrf.mxu1  ;;  %v3842_v59 = vpop.f32.mrf.mxu0 }
 0x175   : > { %5868 = vst [vmem:[#allocation17_spill] sm:$0xff] %v5369_v5  ;;  %v5372_v44 = vadd.f32 %v3841_v13, %v2034_v7  ;;  %v2032_v58 = vadd.f32 %v1965_v23, %v5252_v16 }
 0x176   : > { %v3808_v31 = vpop.f32.mrf.mxu1  ;;  %v2195_v26 = vpop.f32.mrf.mxu0 }
 0x177   : > { %5869 = vst [vmem:[#allocation19_spill] sm:$0xff] %v5372_v44  ;;  %v5375_v33 = vadd.f32 %v2192_v2, %v2032_v58  ;;  %v2035_v47 = vadd.f32 %v3808_v31, %v5256_v42 }
 0x178   : > { %v1968_v60 = vpop.f32.mrf.mxu1  ;;  %v3845_v50 = vpop.f32.mrf.mxu0 }
 0x179   : > { %5870 = vst [vmem:[#allocation20_spill] sm:$0xff] %v5375_v33  ;;  %v5378_v0 = vadd.f32 %v3842_v59, %v2035_v47  ;;  %v2033_v45 = vadd.f32 %v1968_v60, %v5261_v1 }
 0x17a   : > { %v3811_v56 = vpop.f32.mrf.mxu1  ;;  %v2208_v39 = vpop.f32.mrf.mxu0 }
 0x17b   : > { %5871 = vst [vmem:[#allocation8_spill] sm:$0xff] %v5378_v0  ;;  %v5381_v21 = vadd.f32 %v2195_v26, %v2033_v45  ;;  %v2038_v28 = vadd.f32 %v3811_v56, %v5279_v53 }
 0x17c   : > { %v1981_v16 = vpop.f32.mrf.mxu1  ;;  %v3846_v24 = vpop.f32.mrf.mxu0 }
 0x17d   : > { %5872 = vst [vmem:[#allocation21_spill] sm:$0xff] %v5381_v21  ;;  %v5384_v52 = vadd.f32 %v3845_v50, %v2038_v28  ;;  %v2036_v49 = vadd.f32 %v1981_v16, %v5287_v8 }
 0x17e   : > { %v3812_v42 = vpop.f32.mrf.mxu1  ;;  %v2211_v11 = vpop.f32.mrf.mxu0 }
 0x17f   : > { %5873 = vst [vmem:[#allocation10_spill] sm:$0xff] %v5384_v52  ;;  %v5387_v12 = vadd.f32 %v2208_v39, %v2036_v49  ;;  %v2039_v14 = vadd.f32 %v3812_v42, %v5289_v61 }
 0x180   : > { %v1984_v1 = vpop.f32.mrf.mxu1  ;;  %v3849_v30 = vpop.f32.mrf.mxu0 }
 0x181   : > { %5874 = vst [vmem:[#allocation13_spill] sm:$0xff] %v5387_v12  ;;  %v5390_v19 = vadd.f32 %v3846_v24, %v2039_v14  ;;  %v2037_v18 = vadd.f32 %v1984_v1, %v5293_v10 }
 0x182   : > { %v3815_v53 = vpop.f32.mrf.mxu1  ;;  %v2224_v29 = vpop.f32.mrf.mxu0 }
 0x183   : > { %5875 = vst [vmem:[#allocation3_spill] sm:$0xff] %v5390_v19  ;;  %v5393_v37 = vadd.f32 %v2211_v11, %v2037_v18  ;;  %v2042_v38 = vadd.f32 %v3815_v53, %v5301_v55 }
 0x184   : > { %v1997_v8 = vpop.f32.mrf.mxu1  ;;  %v3850_v20 = vpop.f32.mrf.mxu0 }
 0x185   : > { %5876 = vst [vmem:[#allocation4_spill] sm:$0xff] %v5393_v37  ;;  %v5396_v51 = vadd.f32 %v3849_v30, %v2042_v38  ;;  %v2040_v13 = vadd.f32 %v1997_v8, %v5305_v43 }
 0x186   : > { %v3816_v61 = vpop.f32.mrf.mxu1  ;;  %v2227_v23 = vpop.f32.mrf.mxu0 }
 0x187   : > { %5877 = vst [vmem:[#allocation2_spill] sm:$0xff] %v5396_v51  ;;  %v5399_v7 = vadd.f32 %v2224_v29, %v2040_v13  ;;  %v2043_v2 = vadd.f32 %v3816_v61, %v5307_v34 }
 0x188   : > { %v2000_v10 = vpop.f32.mrf.mxu1  ;;  %v5405_v31 = vpop.f32.mrf.mxu0 }
 0x189   : > { %5878 = vst [vmem:[#allocation12_spill] sm:$0xff] %v5399_v7  ;;  %v5402_v58 = vadd.f32 %v3850_v20, %v2043_v2  ;;  %v2041_v59 = vadd.f32 %v2000_v10, %v5309_v48 }
 0x18a   : > { %v3855_v55 = vpop.f32.mrf.mxu1  ;;  %v5409_v26 = vpop.f32.mrf.mxu0 }
 0x18b   : > { %5879 = vst [vmem:[#allocation14_spill] sm:$0xff] %v5402_v58  ;;  %v5407_v47 = vadd.f32 %v2227_v23, %v2041_v59 }
 0x18c   : > { %v2333_v43 = vpop.f32.mrf.mxu1  ;;  %v5411_v60 = vpop.f32.mrf.mxu0 }
 0x18d   : > { %5880 = vst [vmem:[#allocation16_spill] sm:$0xff] %v5407_v47 }
 0x18e   : > { %v3856_v45 = vpop.f32.mrf.mxu1  ;;  %v5413_v50 = vpop.f32.mrf.mxu0 }
 0x190   : > { %v5415_v34 = vpop.f32.mrf.mxu1  ;;  %v5417_v56 = vpop.f32.mrf.mxu0 }
 0x192   : > { %v5419_v28 = vpop.f32.mrf.mxu1  ;;  %v5421_v48 = vpop.f32.mrf.mxu0 }
 0x194   : > { %v5423_v39 = vpop.f32.mrf.mxu1  ;;  %v5425_v16 = vpop.f32.mrf.mxu0 }
 0x196   : > { %v5427_v49 = vpop.f32.mrf.mxu1  ;;  %v5429_v24 = vpop.f32.mrf.mxu0 }
 0x198   : > { %v5431_v42 = vpop.f32.mrf.mxu1  ;;  %v5433_v14 = vpop.f32.mrf.mxu0 }
 0x19a   : > { %v5435_v11 = vpop.f32.mrf.mxu1  ;;  %v5437_v1 = vpop.f32.mrf.mxu0 }
 0x19c   : > { %v5439_v18 = vpop.f32.mrf.mxu1  ;;  %v5441_v30 = vpop.f32.mrf.mxu0 }
 0x19e   : > { %v5443_v53 = vpop.f32.mrf.mxu1  ;;  %v5445_v38 = vpop.f32.mrf.mxu0 }
 0x1a0   : > { %v5447_v29 = vpop.f32.mrf.mxu1  ;;  %v5449_v8 = vpop.f32.mrf.mxu0 }
 0x1a2   : > { %v5451_v13 = vpop.f32.mrf.mxu1  ;;  %v5453_v20 = vpop.f32.mrf.mxu0 }
 0x1a4   : > { %v5455_v61 = vpop.f32.mrf.mxu1  ;;  %v5457_v2 = vpop.f32.mrf.mxu0 }
 0x1a6   : > { %v5459_v23 = vpop.f32.mrf.mxu1  ;;  %v5461_v10 = vpop.f32.mrf.mxu0 }
 0x1a8   : > { %v5463_v59 = vpop.f32.mrf.mxu1  ;;  %v5465_v47 = vpop.f32.mrf.mxu0 }
 0x1aa   : > { %v5467_v58 = vpop.f32.mrf.mxu1  ;;  %v5469_v7 = vpop.f32.mrf.mxu0 }
 0x1ab   : > { %5881 = vst [vmem:[#allocation6_spill] sm:$0xff] %v5469_v7 }
 0x1ac   : > { %v5471_v51 = vpop.f32.mrf.mxu1  ;;  %v5473_v37 = vpop.f32.mrf.mxu0 }
 0x1ad   : > { %5882 = vst [vmem:[#allocation18_spill] sm:$0xff] %v5473_v37 }
 0x1ae   : > { %v5475_v19 = vpop.f32.mrf.mxu1  ;;  %v5477_v12 = vpop.f32.mrf.mxu0 }
 0x1af   : > { %5883 = vst [vmem:[#allocation5_spill] sm:$0xff] %v5475_v19  ;;  %5884 = vst [vmem:[#allocation7_spill] sm:$0xff] %v5477_v12 }
 0x1b0   : > { %v5479_v52 = vpop.f32.mrf.mxu1  ;;  %v5481_v21 = vpop.f32.mrf.mxu0 }
 0x1b1   : > { %5885 = vst [vmem:[#allocation9_spill] sm:$0xff] %v5479_v52  ;;  %5886 = vst [vmem:[#allocation11_spill] sm:$0xff] %v5481_v21 }
 0x1b2   : > { %v5483_v0 = vpop.f32.mrf.mxu1  ;;  %v5485_v33 = vpop.f32.mrf.mxu0 }
 0x1b3   : > { %5887 = vst [vmem:[#allocation22_spill] sm:$0xff] %v5483_v0  ;;  %5888 = vst [vmem:[#allocation23_spill] sm:$0xff] %v5485_v33 }
 0x1b4   : > { %v5487_v44 = vpop.f32.mrf.mxu1  ;;  %v5489_v5 = vpop.f32.mrf.mxu0 }
 0x1b5   : > { %5889 = vst [vmem:[#allocation24_spill] sm:$0xff] %v5487_v44  ;;  %5890 = vst [vmem:[#allocation25_spill] sm:$0xff] %v5489_v5 }
 0x1b6   : > { %v5491_v7 = vpop.f32.mrf.mxu1  ;;  %v5493_v63 = vpop.f32.mrf.mxu0 }
 0x1b7   : > { %5891 = vst [vmem:[#allocation26_spill] sm:$0xff] %v5491_v7  ;;  %5892 = vst [vmem:[#allocation27_spill] sm:$0xff] %v5493_v63 }
 0x1b8   : > { %v5495_v37 = vpop.f32.mrf.mxu1  ;;  %v5497_v19 = vpop.f32.mrf.mxu0 }
 0x1b9   : > { %5893 = vst [vmem:[#allocation28_spill] sm:$0xff] %v5495_v37  ;;  %5894 = vst [vmem:[#allocation29_spill] sm:$0xff] %v5497_v19 }
 0x1ba   : > { %v5499_v12 = vpop.f32.mrf.mxu1  ;;  %v5501_v52 = vpop.f32.mrf.mxu0 }
 0x1bb   : > { %5895 = vst [vmem:[#allocation30_spill] sm:$0xff] %v5499_v12  ;;  %5896 = vst [vmem:[#allocation31_spill] sm:$0xff] %v5501_v52  ;;  %v2462_v52 = vadd.f32 %v3855_v55, %v5312_v36  ;;  %v2461_v36 = vadd.f32 %v5415_v34, %v5321_v54 }
 0x1bc   : > { %v5503_v21 = vpop.f32.mrf.mxu1  ;;  %v5505_v0 = vpop.f32.mrf.mxu0 }
 0x1bd   : > { %5897 = vst [vmem:[#allocation32_spill] sm:$0xff] %v5503_v21  ;;  %5898 = vst [vmem:[#allocation33_spill] sm:$0xff] %v5505_v0 }
 0x1be   : > { %v5507_v33 = vpop.f32.mrf.mxu1  ;;  %v5509_v5 = vpop.f32.mrf.mxu0 }
 0x1bf   : > { %5899 = vst [vmem:[#allocation34_spill] sm:$0xff] %v5507_v33  ;;  %5900 = vst [vmem:[#allocation35_spill] sm:$0xff] %v5509_v5  ;;  %v2460_v33 = vadd.f32 %v2333_v43, %v5315_v40 }
 0x1c0   : > { %v5511_v7 = vpop.f32.mrf.mxu1  ;;  %v5513_v63 = vpop.f32.mrf.mxu0 }
 0x1c1   : > { %5901 = vst [vmem:[#allocation36_spill] sm:$0xff] %v5511_v7  ;;  %5902 = vst [vmem:[#allocation37_spill] sm:$0xff] %v5513_v63  ;;  %v2668_v63 = vadd.f32 %v5405_v31, %v2462_v52  ;;  %v2466_v52 = vadd.f32 %v5419_v28, %v5324_v27  ;;  %v2467_v27 = vadd.f32 %v5427_v49, %v5330_v4 }
 0x1c2   : > { %v5515_v37 = vpop.f32.mrf.mxu1  ;;  %v5517_v19 = vpop.f32.mrf.mxu0 }
 0x1c3   : > { %5903 = vst [vmem:[#allocation38_spill] sm:$0xff] %v5515_v37  ;;  %5904 = vst [vmem:[#allocation39_spill] sm:$0xff] %v5517_v19  ;;  %v2463_v37 = vadd.f32 %v3856_v45, %v5318_v3  ;;  %v2673_v4 = vadd.f32 %v5425_v16, %v2467_v27 }
 0x1c4   : > { %v5519_v12 = vpop.f32.mrf.mxu1  ;;  %v5522_v21 = vpop.f32.mrf.mxu0 }
 0x1c5   : > { %5905 = vst [vmem:[#allocation40_spill] sm:$0xff] %v5519_v12  ;;  %5906 = vst [vmem:[#allocation41_spill] sm:$0xff] %v5522_v21  ;;  %v2666_v12 = vadd.f32 %v5409_v26, %v2460_v33  ;;  %v2669_v3 = vadd.f32 %v5411_v60, %v2463_v37  ;;  %v2672_v37 = vadd.f32 %v5417_v56, %v2466_v52 }
 0x1c6   : > { %v5524_v0 = vpop.f32.mrf.mxu1  ;;  %v5527_v44 = vpop.f32.mrf.mxu0 }
 0x1c7   : > { %5907 = vst [vmem:[#allocation42_spill] sm:$0xff] %v5527_v44 }
 0x1c8   : > { %v5529_v5 = vpop.f32.mrf.mxu1  ;;  %v3957_v19 = vpop.f32.mrf.mxu0 }
 0x1ca   : > { %v3923_v7 = vpop.f32.mrf.mxu1  ;;  %v2983_v21 = vpop.f32.mrf.mxu0 }
 0x1cb   : > { %v2902_v55 = vadd.f32 %v3923_v7, %v2668_v63  ;;  %v2667_v63 = vadd.f32 %v5413_v50, %v2461_v36  ;;  %v2464_v7 = vadd.f32 %v5423_v39, %v5327_v46 }
 0x1cc   : > { %v2773_v40 = vpop.f32.mrf.mxu1  ;;  %v3958_v26 = vpop.f32.mrf.mxu0 }
 0x1cd   : > { %v3112_v33 = vadd.f32 %v3957_v19, %v2902_v55  ;;  %v2900_v31 = vadd.f32 %v2773_v40, %v2666_v12  ;;  %v2670_v46 = vadd.f32 %v5421_v48, %v2464_v7 }
 0x1ce   : > { %v3924_v54 = vpop.f32.mrf.mxu1  ;;  %v2986_v34 = vpop.f32.mrf.mxu0 }
 0x1cf   : > { %3145 = vst.msk [vmem:[%s5540_s14 + $0x10] sm:$0xff] %vm3142_vm9, %v3112_v33  ;;  %v3110_v43 = vadd.f32 %v2983_v21, %v2900_v31  ;;  %v2903_v45 = vadd.f32 %v3924_v54, %v2669_v3  ;;  %v2465_v21 = vadd.f32 %v5431_v42, %v5333_v35  ;;  %v2468_v42 = vadd.f32 %v5439_v18, %v5339_v32 }
 0x1d0   : > { %v2776_v44 = vpop.f32.mrf.mxu1  ;;  %v3961_v60 = vpop.f32.mrf.mxu0  ;;  %v2469_v18 = vadd.f32 %v5447_v29, %v5345_v41  ;;  %v2472_v29 = vadd.f32 %v5455_v61, %v5351_v9  ;;  %v2473_v61 = vadd.f32 %v5463_v59, %v5357_v57  ;;  %v2476_v59 = vadd.f32 %v5471_v51, %v5363_v15  ;;  %v5911_v51 = vld [vmem:[#allocation17_spill] sm:$0xff] }
 0x1d1   : > { %3143 = vst.msk [vmem:[%s5540_s14] sm:$0xff] %vm3142_vm9, %v3110_v43  ;;  %v3113_v12 = vadd.f32 %v3958_v26, %v2903_v45  ;;  %v2901_v19 = vadd.f32 %v2776_v44, %v2667_v63  ;;  %v2470_v44 = vadd.f32 %v5435_v11, %v5336_v62  ;;  %v2671_v35 = vadd.f32 %v5429_v24, %v2465_v21 }
 0x1d2   : > { %v3927_v50 = vpop.f32.mrf.mxu1  ;;  %v2999_v39 = vpop.f32.mrf.mxu0  ;;  %v2471_v11 = vadd.f32 %v5443_v53, %v5342_v6  ;;  %v2674_v32 = vadd.f32 %v5437_v1, %v2468_v42  ;;  %v2474_v53 = vadd.f32 %v5451_v13, %v5348_v25  ;;  %v2675_v41 = vadd.f32 %v5445_v38, %v2469_v18 }
 0x1d3   : > { %3146 = vst.msk [vmem:[%s5540_s14 + $0x18] sm:$0xff] %vm3142_vm9, %v3113_v12  ;;  %v3111_v28 = vadd.f32 %v2986_v34, %v2901_v19  ;;  %v2906_v56 = vadd.f32 %v3927_v50, %v2672_v37  ;;  %v2676_v62 = vadd.f32 %v5433_v14, %v2470_v44  ;;  %v2475_v13 = vadd.f32 %v5459_v23, %v5354_v22 }
 0x1d4   : > { %v2789_v36 = vpop.f32.mrf.mxu1  ;;  %v3962_v55 = vpop.f32.mrf.mxu0  ;;  %v2677_v6 = vadd.f32 %v5441_v30, %v2471_v11  ;;  %v2680_v25 = vadd.f32 %v5449_v8, %v2474_v53  ;;  %v2678_v9 = vadd.f32 %v5453_v20, %v2472_v29  ;;  %v2478_v23 = vadd.f32 %v5467_v58, %v5360_v17  ;;  %v5908_v58 = vld [vmem:[#allocation15_spill] sm:$0xff] }
 0x1d5   : > { %3144 = vst.msk [vmem:[%s5540_s14 + $0x8] sm:$0xff] %vm3142_vm9, %v3111_v28  ;;  %v3116_v49 = vadd.f32 %v3961_v60, %v2906_v56  ;;  %v2904_v48 = vadd.f32 %v2789_v36, %v2670_v46  ;;  %v2681_v22 = vadd.f32 %v5457_v2, %v2475_v13  ;;  %v2679_v57 = vadd.f32 %v5461_v10, %v2473_v61 }
 0x1d6   : > { %v3928_v40 = vpop.f32.mrf.mxu1  ;;  %v3002_v52 = vpop.f32.mrf.mxu0  ;;  %v2684_v17 = vadd.f32 %v5465_v47, %v2478_v23 }
 0x1d7   : > { %3149 = vst.msk [vmem:[%s5540_s14 + $0x30] sm:$0xff] %vm3142_vm9, %v3116_v49  ;;  %v3114_v3 = vadd.f32 %v2999_v39, %v2904_v48  ;;  %v2907_v16 = vadd.f32 %v3928_v40, %v2673_v4 }
 0x1d8   : > { %v2792_v33 = vpop.f32.mrf.mxu1  ;;  %v3965_v26 = vpop.f32.mrf.mxu0 }
 0x1d9   : > { %3147 = vst.msk [vmem:[%s5540_s14 + $0x20] sm:$0xff] %vm3142_vm9, %v3114_v3  ;;  %v3117_v31 = vadd.f32 %v3962_v55, %v2907_v16  ;;  %v2905_v24 = vadd.f32 %v2792_v33, %v2671_v35  ;;  %v5909_v55 = vld [vmem:[#allocation5_spill] sm:$0xff]  ;;  %v5910_v16 = vld [vmem:[#allocation6_spill] sm:$0xff] }
 0x1da   : > { %v3931_v54 = vpop.f32.mrf.mxu1  ;;  %v3015_v7 = vpop.f32.mrf.mxu0  ;;  %v2479_v40 = vadd.f32 %v5909_v55, %v5908_v58  ;;  %v2682_v15 = vadd.f32 %v5910_v16, %v2476_v59  ;;  %v5929_v55 = vld [vmem:[#allocation13_spill] sm:$0xff] }
 0x1db   : > { %3150 = vst.msk [vmem:[%s5540_s14 + $0x38] sm:$0xff] %vm3142_vm9, %v3117_v31  ;;  %v3115_v63 = vadd.f32 %v3002_v52, %v2905_v24  ;;  %v2910_v14 = vadd.f32 %v3931_v54, %v2676_v62  ;;  %v5912_v52 = vld [vmem:[#allocation9_spill] sm:$0xff]  ;;  %v5913_v24 = vld [vmem:[#allocation18_spill] sm:$0xff]  ;;  %v5914_v54 = vld [vmem:[#allocation19_spill] sm:$0xff] }
 0x1dc   : > { %v2805_v43 = vpop.f32.mrf.mxu1  ;;  %v3966_v34 = vpop.f32.mrf.mxu0  ;;  %v2477_v33 = vadd.f32 %v5912_v52, %v5911_v51  ;;  %v5932_v52 = vld [vmem:[#allocation3_spill] sm:$0xff] }
 0x1dd   : > { %3148 = vst.msk [vmem:[%s5540_s14 + $0x28] sm:$0xff] %vm3142_vm9, %v3115_v63  ;;  %v3120_v45 = vadd.f32 %v3965_v26, %v2910_v14  ;;  %v2908_v1 = vadd.f32 %v2805_v43, %v2674_v32  ;;  %v2685_v26 = vadd.f32 %v5913_v24, %v2479_v40  ;;  %v5915_v32 = vld [vmem:[#allocation22_spill] sm:$0xff]  ;;  %v5930_v40 = vld [vmem:[#allocation32_spill] sm:$0xff] }
 0x1de   : > { %v3932_v37 = vpop.f32.mrf.mxu1  ;;  %v3018_v12 = vpop.f32.mrf.mxu0  ;;  %v2482_v18 = vadd.f32 %v5915_v32, %v5914_v54  ;;  %v5935_v32 = vld [vmem:[#allocation4_spill] sm:$0xff] }
 0x1df   : > { %3153 = vst.msk [vmem:[%s5540_s14 + $0x50] sm:$0xff] %vm3142_vm9, %v3120_v45  ;;  %v3118_v27 = vadd.f32 %v3015_v7, %v2908_v1  ;;  %v2911_v30 = vadd.f32 %v3932_v37, %v2677_v6  ;;  %v5916_v6 = vld [vmem:[#allocation7_spill] sm:$0xff]  ;;  %v5917_v45 = vld [vmem:[#allocation20_spill] sm:$0xff] }
 0x1e0   : > { %v2808_v19 = vpop.f32.mrf.mxu1  ;;  %v3969_v50 = vpop.f32.mrf.mxu0  ;;  %v2683_v53 = vadd.f32 %v5916_v6, %v2477_v33  ;;  %v5918_v1 = vld [vmem:[#allocation24_spill] sm:$0xff]  ;;  %v5933_v33 = vld [vmem:[#allocation34_spill] sm:$0xff] }
 0x1e1   : > { %3151 = vst.msk [vmem:[%s5540_s14 + $0x40] sm:$0xff] %vm3142_vm9, %v3118_v27  ;;  %v3121_v60 = vadd.f32 %v3966_v34, %v2911_v30  ;;  %v2909_v38 = vadd.f32 %v2808_v19, %v2675_v41  ;;  %v2480_v34 = vadd.f32 %v5918_v1, %v5917_v45  ;;  %v5919_v30 = vld [vmem:[#allocation11_spill] sm:$0xff]  ;;  %v5920_v19 = vld [vmem:[#allocation8_spill] sm:$0xff]  ;;  %v5938_v1 = vld [vmem:[#allocation2_spill] sm:$0xff] }
 0x1e2   : > { %v3935_v46 = vpop.f32.mrf.mxu1  ;;  %v3031_v28 = vpop.f32.mrf.mxu0 }
 0x1e3   : > { %3154 = vst.msk [vmem:[%s5540_s14 + $0x58] sm:$0xff] %vm3142_vm9, %v3121_v60  ;;  %v3119_v21 = vadd.f32 %v3018_v12, %v2909_v38  ;;  %v2914_v8 = vadd.f32 %v3935_v46, %v2680_v25  ;;  %v2688_v12 = vadd.f32 %v5919_v30, %v2482_v18  ;;  %v5921_v25 = vld [vmem:[#allocation26_spill] sm:$0xff]  ;;  %v5936_v18 = vld [vmem:[#allocation36_spill] sm:$0xff] }
 0x1e4   : > { %v2821_v56 = vpop.f32.mrf.mxu1  ;;  %v3970_v36 = vpop.f32.mrf.mxu0  ;;  %v2483_v13 = vadd.f32 %v5921_v25, %v5920_v19  ;;  %v5941_v25 = vld [vmem:[#allocation12_spill] sm:$0xff] }
 0x1e5   : > { %3152 = vst.msk [vmem:[%s5540_s14 + $0x48] sm:$0xff] %vm3142_vm9, %v3119_v21  ;;  %v3124_v39 = vadd.f32 %v3969_v50, %v2914_v8  ;;  %v2912_v20 = vadd.f32 %v2821_v56, %v2678_v9  ;;  %v5922_v9 = vld [vmem:[#allocation23_spill] sm:$0xff]  ;;  %v5923_v21 = vld [vmem:[#allocation21_spill] sm:$0xff]  ;;  %v5924_v8 = vld [vmem:[#allocation28_spill] sm:$0xff] }
 0x1e6   : > { %v3936_v4 = vpop.f32.mrf.mxu1  ;;  %v3034_v49 = vpop.f32.mrf.mxu0  ;;  %v2686_v61 = vadd.f32 %v5922_v9, %v2480_v34  ;;  %v5939_v34 = vld [vmem:[#allocation38_spill] sm:$0xff] }
 0x1e7   : > { %3157 = vst.msk [vmem:[%s5540_s14 + $0x70] sm:$0xff] %vm3142_vm9, %v3124_v39  ;;  %v3122_v44 = vadd.f32 %v3031_v28, %v2912_v20  ;;  %v2915_v2 = vadd.f32 %v3936_v4, %v2681_v22  ;;  %v2481_v28 = vadd.f32 %v5924_v8, %v5923_v21  ;;  %v5925_v20 = vld [vmem:[#allocation25_spill] sm:$0xff]  ;;  %v5926_v4 = vld [vmem:[#allocation10_spill] sm:$0xff] }
 0x1e8   : > { %v2824_v48 = vpop.f32.mrf.mxu1  ;;  %v3973_v42 = vpop.f32.mrf.mxu0  ;;  %v5944_v8 = vld [vmem:[#allocation14_spill] sm:$0xff] }
 0x1e9   : > { %3155 = vst.msk [vmem:[%s5540_s14 + $0x60] sm:$0xff] %vm3142_vm9, %v3122_v44  ;;  %v3125_v35 = vadd.f32 %v3970_v36, %v2915_v2  ;;  %v2913_v10 = vadd.f32 %v2824_v48, %v2679_v57  ;;  %v2689_v36 = vadd.f32 %v5925_v20, %v2483_v13  ;;  %v5927_v57 = vld [vmem:[#allocation30_spill] sm:$0xff]  ;;  %v5942_v13 = vld [vmem:[#allocation40_spill] sm:$0xff]  ;;  %v5945_v20 = vld [vmem:[#allocation39_spill] sm:$0xff] }
 0x1ea   : > { %v3939_v3 = vpop.f32.mrf.mxu1  ;;  %v3047_v11 = vpop.f32.mrf.mxu0  ;;  %v2486_v59 = vadd.f32 %v5927_v57, %v5926_v4  ;;  %v5946_v4 = vld [vmem:[#allocation16_spill] sm:$0xff] }
 0x1eb   : > { %3158 = vst.msk [vmem:[%s5540_s14 + $0x78] sm:$0xff] %vm3142_vm9, %v3125_v35  ;;  %v3123_v62 = vadd.f32 %v3034_v49, %v2913_v10  ;;  %v2918_v47 = vadd.f32 %v3939_v3, %v2684_v17  ;;  %v5928_v17 = vld [vmem:[#allocation27_spill] sm:$0xff]  ;;  %v2484_v35 = vadd.f32 %v5930_v40, %v5929_v55  ;;  %v2489_v57 = vadd.f32 %v5529_v5, %v5946_v4 }
 0x1ec   : > { %v2837_v31 = vpop.f32.mrf.mxu1  ;;  %v3974_v7 = vpop.f32.mrf.mxu0  ;;  %v2687_v58 = vadd.f32 %v5928_v17, %v2481_v28  ;;  %v2491_v28 = vadd.f32 %v5524_v0, %v5944_v8  ;;  %v5947_v0 = vld [vmem:[#allocation41_spill] sm:$0xff] }
 0x1ed   : > { %3156 = vst.msk [vmem:[%s5540_s14 + $0x68] sm:$0xff] %vm3142_vm9, %v3123_v62  ;;  %v3128_v63 = vadd.f32 %v3973_v42, %v2918_v47  ;;  %v2916_v14 = vadd.f32 %v2837_v31, %v2682_v15  ;;  %v5931_v15 = vld [vmem:[#allocation29_spill] sm:$0xff]  ;;  %v2487_v62 = vadd.f32 %v5933_v33, %v5932_v52 }
 0x1ee   : > { %v3940_v43 = vpop.f32.mrf.mxu1  ;;  %v3050_v29 = vpop.f32.mrf.mxu0  ;;  %v2692_v51 = vadd.f32 %v5931_v15, %v2486_v59 }
 0x1ef   : > { %3161 = vst.msk [vmem:[%s5540_s14 + $0x90] sm:$0xff] %vm3142_vm9, %v3128_v63  ;;  %v3126_v37 = vadd.f32 %v3047_v11, %v2916_v14  ;;  %v2919_v41 = vadd.f32 %v3940_v43, %v2685_v26  ;;  %v5934_v26 = vld [vmem:[#allocation31_spill] sm:$0xff]  ;;  %v2485_v63 = vadd.f32 %v5936_v18, %v5935_v32 }
 0x1f0   : > { %v2840_v27 = vpop.f32.mrf.mxu1  ;;  %v3977_v50 = vpop.f32.mrf.mxu0  ;;  %v2690_v54 = vadd.f32 %v5934_v26, %v2484_v35  ;;  %v5948_v35 = vld [vmem:[#allocation42_spill] sm:$0xff] }
 0x1f1   : > { %3159 = vst.msk [vmem:[%s5540_s14 + $0x80] sm:$0xff] %vm3142_vm9, %v3126_v37  ;;  %v3129_v60 = vadd.f32 %v3974_v7, %v2919_v41  ;;  %v2917_v38 = vadd.f32 %v2840_v27, %v2683_v53  ;;  %v5937_v53 = vld [vmem:[#allocation33_spill] sm:$0xff]  ;;  %v2490_v37 = vadd.f32 %v5939_v34, %v5938_v1 }
 0x1f2   : > { %v3943_v46 = vpop.f32.mrf.mxu1  ;;  %v3063_v23 = vpop.f32.mrf.mxu0  ;;  %v2693_v45 = vadd.f32 %v5937_v53, %v2487_v62 }
 0x1f3   : > { %3162 = vst.msk [vmem:[%s5540_s14 + $0x98] sm:$0xff] %vm3142_vm9, %v3129_v60  ;;  %v3127_v56 = vadd.f32 %v3050_v29, %v2917_v38  ;;  %v2922_v22 = vadd.f32 %v3943_v46, %v2688_v12  ;;  %v5940_v12 = vld [vmem:[#allocation35_spill] sm:$0xff]  ;;  %v2488_v60 = vadd.f32 %v5942_v13, %v5941_v25 }
 0x1f4   : > { %v2853_v39 = vpop.f32.mrf.mxu1  ;;  %v3978_v49 = vpop.f32.mrf.mxu0  ;;  %v2691_v19 = vadd.f32 %v5940_v12, %v2485_v63 }
 0x1f5   : > { %3160 = vst.msk [vmem:[%s5540_s14 + $0x88] sm:$0xff] %vm3142_vm9, %v3127_v56  ;;  %v3132_v44 = vadd.f32 %v3977_v50, %v2922_v22  ;;  %v2920_v2 = vadd.f32 %v2853_v39, %v2686_v61  ;;  %v5943_v61 = vld [vmem:[#allocation37_spill] sm:$0xff] }
 0x1f6   : > { %v3944_v48 = vpop.f32.mrf.mxu1  ;;  %v3066_v3 = vpop.f32.mrf.mxu0  ;;  %v2696_v21 = vadd.f32 %v5943_v61, %v2490_v37 }
 0x1f7   : > { %3165 = vst.msk [vmem:[%s5540_s14 + $0xb0] sm:$0xff] %vm3142_vm9, %v3132_v44  ;;  %v3130_v10 = vadd.f32 %v3063_v23, %v2920_v2  ;;  %v2923_v42 = vadd.f32 %v3944_v48, %v2689_v36  ;;  %v2694_v36 = vadd.f32 %v5945_v20, %v2488_v60  ;;  %v2697_v48 = vadd.f32 %v5947_v0, %v2491_v28 }
 0x1f8   : > { %v2856_v16 = vpop.f32.mrf.mxu1  ;;  %v3981_v31 = vpop.f32.mrf.mxu0 }
 0x1f9   : > { %3163 = vst.msk [vmem:[%s5540_s14 + $0xa0] sm:$0xff] %vm3142_vm9, %v3130_v10  ;;  %v3133_v47 = vadd.f32 %v3978_v49, %v2923_v42  ;;  %v2921_v11 = vadd.f32 %v2856_v16, %v2687_v58  ;;  %v2695_v10 = vadd.f32 %v5948_v35, %v2489_v57 }
 0x1fa   : > { %v3947_v24 = vpop.f32.mrf.mxu1  ;;  %v3079_v43 = vpop.f32.mrf.mxu0 }
 0x1fb   : > { %3166 = vst.msk [vmem:[%s5540_s14 + $0xb8] sm:$0xff] %vm3142_vm9, %v3133_v47  ;;  %v3131_v14 = vadd.f32 %v3066_v3, %v2921_v11  ;;  %v2926_v7 = vadd.f32 %v3947_v24, %v2692_v51 }
 0x1fc   : > { %v2869_v6 = vpop.f32.mrf.mxu1  ;;  %v3982_v27 = vpop.f32.mrf.mxu0 }
 0x1fd   : > { %3164 = vst.msk [vmem:[%s5540_s14 + $0xa8] sm:$0xff] %vm3142_vm9, %v3131_v14  ;;  %v3136_v41 = vadd.f32 %v3981_v31, %v2926_v7  ;;  %v2924_v29 = vadd.f32 %v2869_v6, %v2690_v54 }
 0x1fe   : > { %v3948_v30 = vpop.f32.mrf.mxu1  ;;  %v3082_v46 = vpop.f32.mrf.mxu0 }
 0x1ff   : > { %3169 = vst.msk [vmem:[%s5540_s14 + $0xd0] sm:$0xff] %vm3142_vm9, %v3136_v41  ;;  %v3134_v38 = vadd.f32 %v3079_v43, %v2924_v29  ;;  %v2927_v50 = vadd.f32 %v3948_v30, %v2693_v45 }
 0x200   : > { %v2872_v9 = vpop.f32.mrf.mxu1  ;;  %v3985_v23 = vpop.f32.mrf.mxu0 }
 0x201   : > { %3167 = vst.msk [vmem:[%s5540_s14 + $0xc0] sm:$0xff] %vm3142_vm9, %v3134_v38  ;;  %v3137_v56 = vadd.f32 %v3982_v27, %v2927_v50  ;;  %v2925_v22 = vadd.f32 %v2872_v9, %v2691_v19 }
 0x202   : > { %v3951_v39 = vpop.f32.mrf.mxu1  ;;  %v3095_v2 = vpop.f32.mrf.mxu0 }
 0x203   : > { %3170 = vst.msk [vmem:[%s5540_s14 + $0xd8] sm:$0xff] %vm3142_vm9, %v3137_v56  ;;  %v3135_v59 = vadd.f32 %v3082_v46, %v2925_v22  ;;  %v2930_v44 = vadd.f32 %v3951_v39, %v2696_v21 }
 0x204   : > { %v2885_v49 = vpop.f32.mrf.mxu1  ;;  %v3986_v40 = vpop.f32.mrf.mxu0 }
 0x205   : > { %3168 = vst.msk [vmem:[%s5540_s14 + $0xc8] sm:$0xff] %vm3142_vm9, %v3135_v59  ;;  %v3140_v17 = vadd.f32 %v3985_v23, %v2930_v44  ;;  %v2928_v58 = vadd.f32 %v2885_v49, %v2694_v36 }
 0x206   : > { %v3952_v55 = vpop.f32.mrf.mxu1  ;;  %v3098_v51 = vpop.f32.mrf.mxu0 }
 0x207   : > { %3173 = vst.msk [vmem:[%s5540_s14 + $0xf0] sm:$0xff] %vm3142_vm9, %v3140_v17  ;;  %v3138_v5 = vadd.f32 %v3095_v2, %v2928_v58  ;;  %v2931_v42 = vadd.f32 %v3952_v55, %v2697_v48 }
 0x208   : > { %v2888_v3 = vpop.f32.mrf.mxu1 }
 0x209   : > { %3171 = vst.msk [vmem:[%s5540_s14 + $0xe0] sm:$0xff] %vm3142_vm9, %v3138_v5  ;;  %v3141_v16 = vadd.f32 %v3986_v40, %v2931_v42  ;;  %v2929_v15 = vadd.f32 %v2888_v3, %v2695_v10 }
 0x20b   : > { %3174 = vst.msk [vmem:[%s5540_s14 + $0xf8] sm:$0xff] %vm3142_vm9, %v3141_v16  ;;  %v3139_v52 = vadd.f32 %v3098_v51, %v2929_v15 }
 0x20d   : > { %3172 = vst.msk [vmem:[%s5540_s14 + $0xe8] sm:$0xff] %vm3142_vm9, %v3139_v52 }
 0x20e PF: > { %s14_s17 = sadd.s32 1, %s4062_s17   ;;  %s5949_s15 = smov %s4058_s16 }
 0x20f   : > { %p11_p5 = scmp.ge.s32.totalorder %s14_s17, 4   ;;  %s5950_s16 = smov %s5952_s18 }
 0x211   :  { %13 = sbr.rel (!%p11_p5) target bundleno = 2 (0x2), region = 69 }

// kernel: edsr_forward.5
= control target key start
LH: loop header
LB: loop body
LE: loop exit
PB: predicated region body
PF: predicated region fallthrough
CT: control target
= control target key end

     0   :  { %s5931_s15 = smov 0   ;;  %s5933_s16 = smov 0   ;;  %s9249_s0 = inlined_call_operand.vmem [shape: bf16[2,40,34,32], index: 0, kind: input, shape index: {}, may-alias: {0,1}]   ;;  %s9250_s1 = inlined_call_operand.vmem [shape: bf16[2,40,34,32], index: 1, kind: input, shape index: {}, may-alias: {0,1}]   ;;  %s9251_s2 = inlined_call_operand.vmem [shape: bf16[288,3], index: 2, kind: input, shape index: {}]   ;;  %s9252_s3 = inlined_call_operand.vmem [shape: f32[1,3], index: 3, kind: input, shape index: {}]   ;;  %s9253_s4 = inlined_call_operand.vmem [shape: f32[2,32,32,3], index: 4, kind: output, shape index: {}]  }
   0x1   :  { %s5935_s17 = smov 0  }
   0x2 LB: > { %s26_s18 = sadd.s32 1, %s5896_s16  ;;  %p5199_p0 = scmp.ge.s32.totalorder %s5900_s17, 1  ;;  %s5900_s17 = sphi %s5935_s17, %s14_s17   ;;  %s5896_s16 = sphi %s5933_s16, %s9730_s16   ;;  %s5892_s15 = sphi %s5931_s15, %s9729_s15  }
   0x3   : > { %p28_p1 = scmp.ge.s32.totalorder %s26_s18, 2  ;;  %p220_p2 = scmp.lt.s32.totalorder %s5900_s17, 3 }
   0x5   : > { %s9732_s18 = smov (%p28_p1, %s26_s18), 0  ;;  %p221_p3 = pnand %p5199_p0, %p220_p2 }
   0x7   : > { %224 = sbr.rel (%p221_p3) target bundleno = 1111 (0x457), region = 36 }
   0xc   : > { %p279_p4 = scmp.lt.s32.totalorder %s5892_s15, 1  ;;  %vm907_vm0 = vsmask.f32 7424  ;;  %s5902_s23 = smov 32   ;;  %vm1676_vm1 = vcmask 1046528   ;;  %vm2553_vm2 = vcmask 261120  }
   0xd   : > { %s5904_s30 = smov 64   ;;  %s5905_s9 = smov 96   ;;  %vm2811_vm3 = vcmask 785408   ;;  %vm2682_vm4 = vcmask 523264   ;;  %vm4949_vm5 = vcmask 23552  }
   0xe   : > { %s9734_s15 = smov (!%p279_p4, %s5892_s15), 1 }
   0xf   : > { %s5624_s19 = smul.u32 800, %s9734_s15  ;;  %s5393_s29 = sshll.u32 %s9734_s15, 10 }
  0x10   : > { %s8509_s7 = scalar_lea.vmem %s9253_s4, %s5393_s29 }
  0x11   : > { %s5957_s22 = scalar_lea.vmem %s9249_s0, %s5624_s19  ;;  %s5392_s20 = sadd.s32 640, %s5624_s19 }
  0x12   : > { %v5655_v0 = vld [vmem:[%s5957_s22 + $0x14] sm:$0xff]   ;;  %v5656_v1 = vld [vmem:[%s5957_s22 + $0x1c] sm:$0xff]   ;;  %v5658_v6 = vld [vmem:[%s5957_s22 + $0x8] sm:$0xff]   ;;  %s6892_s25 = scalar_lea.vmem %s9250_s1, %s5392_s20 }
  0x13   : > { %v929_v2 = vshrl.u32 %v5655_v0, 16  ;;  %v931_v3 = vshll.u32 %v5655_v0, 16  ;;  %v936_v4 = vshll.u32 %v5656_v1, 16  ;;  %v5657_v5 = vld [vmem:[%s5957_s22] sm:$0xff]   ;;  %v916_v12 = vshll.u32 %v5658_v6, 16  ;;  %v5661_v23 = vld [vmem:[%s5957_s22 + $0x30] sm:$0xff]  }
  0x14   : > { %v5659_v7 = vld [vmem:[%s5957_s22 + $0x24] ss:$0 sps:$4 sm:$0x11]   ;;  %v909_v10 = vshrl.u32 %v5657_v5, 16  ;;  %v911_v11 = vshll.u32 %v5657_v5, 16  ;;  %v940_v13 = vshrl.u32 %v5656_v1, 16 }
  0x15   : > { %v933_v8 = vrot.slane %v931_v3, 1  ;;  %v938_v9 = vrot.slane %v936_v4, 1  ;;  %v944_v14 = vshll.u32 %v5659_v7, 16  ;;  %v5660_v15 = vld [vmem:[%s5957_s22 + $0x10] ss:$0 sps:$4 sm:$0x11]  }
  0x16   : > { %v913_v17 = vrot.slane %v911_v11, 1  ;;  %v920_v18 = vshrl.u32 %v5658_v6, 16  ;;  %v918_v19 = vrot.slane %v916_v12, 1  ;;  %v924_v22 = vshll.u32 %v5660_v15, 16  ;;  %v5663_v27 = vld [vmem:[%s5957_s22 + $0x28] sm:$0xff]   ;;  %v5666_v46 = vld [vmem:[%s5957_s22 + $0x3c] sm:$0xff]  }
  0x17   : > { %v934_v16 = vor.u32 %v933_v8, %v929_v2  ;;  %v942_v20 = vor.u32 %v940_v13, %v938_v9  ;;  %v946_v21 = vrot.slane %v944_v14, 1  ;;  %v5662_v26 = vld [vmem:[%s5957_s22 + $0x38] ss:$0 sps:$4 sm:$0x11]   ;;  %v956_v31 = vshll.u32 %v5661_v23, 16  ;;  %v5664_v36 = vld [vmem:[%s5957_s22 + $0x44] sm:$0xff]  }
  0x18   : > { %v914_v25 = vor.u32 %v913_v17, %v909_v10  ;;  %v922_v29 = vor.u32 %v920_v18, %v918_v19  ;;  %v926_v30 = vrot.slane %v924_v22, 1  ;;  %v960_v33 = vshrl.u32 %v5661_v23, 16  ;;  %v5665_v41 = vld [vmem:[%s5957_s22 + $0x4c] ss:$0 sps:$4 sm:$0x11]   ;;  %v5667_v53 = vld [vmem:[%s5957_s22 + $0x58] sm:$0xff]  }
  0x19   : > { %v5967_v24 = vsel %vm907_vm0, %v934_v16, %v938_v9  ;;  %v5974_v28 = vsel %vm907_vm0, %v942_v20, %v946_v21  ;;  %v964_v34 = vshll.u32 %v5662_v26, 16  ;;  %v949_v35 = vshrl.u32 %v5663_v27, 16  ;;  %v5668_v54 = vld [vmem:[%s5957_s22 + $0x60] ss:$0 sps:$4 sm:$0x11]   ;;  %v5669_v57 = vld [vmem:[%s5957_s22 + $0x50] sm:$0xff]  }
  0x1a   : > { %1552 = vrot.lane.b32.xlu1 %v5967_v24, %s5902_s23  ;;  %v919_v32 = vsel %vm907_vm0, %v914_v25, %v918_v19  ;;  %v958_v37 = vrot.slane %v956_v31, 1  ;;  %v951_v38 = vshll.u32 %v5663_v27, 16  ;;  %v927_v39 = vsel %vm907_vm0, %v922_v29, %v926_v30  ;;  %v5670_v62 = vld [vmem:[%s5957_s22 + $0x6c] sm:$0xff]   ;;  %v5672_v3 = vld [vmem:[%s5957_s22 + $0x64] sm:$0xff]   ;;  %v5675_v22 = vld [vmem:[%s5957_s22 + $0x78] sm:$0xff]  }
  0x1b   : > { %1548 = vrot.lane.b32.xlu0 %v919_v32, %s5902_s23  ;;  %v966_v40 = vrot.slane %v964_v34, 1  ;;  %v976_v42 = vshll.u32 %v5664_v36, 16  ;;  %v980_v43 = vshrl.u32 %v5664_v36, 16  ;;  %v984_v48 = vshll.u32 %v5665_v41, 16  ;;  %v5673_v20 = vld [vmem:[%s5957_s22 + $0x80] sm:$0xff]   ;;  %v5676_v27 = vld [vmem:[%s5957_s22 + $0x94] sm:$0xff]  }
  0x1c   : > { %v962_v44 = vor.u32 %v960_v33, %v958_v37  ;;  %v953_v45 = vrot.slane %v951_v38, 1  ;;  %v969_v51 = vshrl.u32 %v5666_v46, 16  ;;  %v971_v52 = vshll.u32 %v5666_v46, 16  ;;  %v5671_v6 = vld [vmem:[%s5957_s22 + $0x74] ss:$0 sps:$4 sm:$0x11]  }
  0x1d   : > { %v978_v47 = vrot.slane %v976_v42, 1  ;;  %v986_v56 = vrot.slane %v984_v48, 1  ;;  %v996_v60 = vshll.u32 %v5667_v53, 16  ;;  %v1000_v61 = vshrl.u32 %v5667_v53, 16  ;;  %v5678_v46 = vld [vmem:[%s5957_s22 + $0x8c] sm:$0xff]  }
  0x1e   : > { %1554 = vrot.lane.b32.xlu1 %v5974_v28, %s5902_s23  ;;  %v5986_v49 = vsel %vm907_vm0, %v962_v44, %v966_v40  ;;  %v954_v50 = vor.u32 %v953_v45, %v949_v35  ;;  %v973_v59 = vrot.slane %v971_v52, 1  ;;  %v1004_v0 = vshll.u32 %v5668_v54, 16  ;;  %v5674_v21 = vld [vmem:[%s5957_s22 + $0x88] ss:$0 sps:$4 sm:$0x11]  }
  0x1f   : > { %1550 = vrot.lane.b32.xlu0 %v927_v39, %s5902_s23  ;;  %v982_v55 = vor.u32 %v980_v43, %v978_v47  ;;  %v989_v1 = vshrl.u32 %v5669_v57, 16  ;;  %v991_v2 = vshll.u32 %v5669_v57, 16  ;;  %v998_v5 = vrot.slane %v996_v60, 1  ;;  %v5677_v39 = vld [vmem:[%s5957_s22 + $0x9c] ss:$0 sps:$4 sm:$0x11]  }
  0x20   : > { %v5994_v58 = vsel %vm907_vm0, %v954_v50, %v958_v37  ;;  %v974_v4 = vor.u32 %v973_v59, %v969_v51  ;;  %v1006_v7 = vrot.slane %v1004_v0, 1  ;;  %v1016_v9 = vshll.u32 %v5670_v62, 16  ;;  %v5679_v50 = vld [vmem:[%s5957_s22 + $0xa8] sm:$0xff]   ;;  %v5680_v51 = vld [vmem:[%s5957_s22 + $0xb0] ss:$0 sps:$4 sm:$0x11]  }
  0x21   : > { %v5998_v63 = vsel %vm907_vm0, %v982_v55, %v986_v56  ;;  %v993_v8 = vrot.slane %v991_v2, 1  ;;  %v1020_v10 = vshrl.u32 %v5670_v62, 16  ;;  %v1002_v12 = vor.u32 %v1000_v61, %v998_v5  ;;  %v5681_v56 = vld [vmem:[%s5957_s22 + $0xa0] sm:$0xff]  }
  0x22   : > { %1558 = vrot.lane.b32.xlu1 %v5986_v49, %s5902_s23  ;;  %9377 = vst [vmem:[#allocation2_spill] sm:$0xff] %v5998_v63  ;;  %v6007_v11 = vsel %vm907_vm0, %v974_v4, %v978_v47  ;;  %v1024_v13 = vshll.u32 %v5671_v6, 16  ;;  %v1009_v14 = vshrl.u32 %v5672_v3, 16  ;;  %v1018_v16 = vrot.slane %v1016_v9, 1  ;;  %v5682_v62 = vld [vmem:[%s5957_s22 + $0xbc] sm:$0xff]  }
  0x23   : > { %1556 = vrot.lane.b32.xlu0 %v5994_v58, %s5902_s23  ;;  %v994_v15 = vor.u32 %v993_v8, %v989_v1  ;;  %v1011_v17 = vshll.u32 %v5672_v3, 16  ;;  %v6012_v18 = vsel %vm907_vm0, %v1002_v12, %v1006_v7  ;;  %v1036_v29 = vshll.u32 %v5673_v20, 16  ;;  %v5684_v3 = vld [vmem:[%s5957_s22 + $0xb4] sm:$0xff]   ;;  %v5683_v9 = vld [vmem:[%s5957_s22 + $0xc4] ss:$0 sps:$4 sm:$0x11]  }
  0x24   : > { %9378 = vst [vmem:[#allocation3_spill] sm:$0xff] %v6012_v18  ;;  %v1026_v19 = vrot.slane %v1024_v13, 1  ;;  %v1022_v25 = vor.u32 %v1020_v10, %v1018_v16  ;;  %v1040_v30 = vshrl.u32 %v5673_v20, 16  ;;  %v1044_v31 = vshll.u32 %v5674_v21, 16 }
  0x25   : > { %v6018_v23 = vsel %vm907_vm0, %v994_v15, %v998_v5  ;;  %v1013_v26 = vrot.slane %v1011_v17, 1  ;;  %v1029_v32 = vshrl.u32 %v5675_v22, 16  ;;  %v1031_v35 = vshll.u32 %v5675_v22, 16 }
  0x26   : > { %1562 = vrot.lane.b32.xlu1 %v5998_v63, %s5902_s23  ;;  %9379 = vst [vmem:[#allocation4_spill] sm:$0xff] %v6018_v23  ;;  %v6024_v33 = vsel %vm907_vm0, %v1022_v25, %v1026_v19  ;;  %v1056_v36 = vshll.u32 %v5676_v27, 16  ;;  %v1038_v37 = vrot.slane %v1036_v29, 1  ;;  %v1046_v38 = vrot.slane %v1044_v31, 1  ;;  %v5685_v25 = vld [vmem:[%s5957_s22 + $0xd0] sm:$0xff]  }
  0x27   : > { %1560 = vrot.lane.b32.xlu0 %v6007_v11, %s5902_s23  ;;  %v1014_v34 = vor.u32 %v1013_v26, %v1009_v14  ;;  %v1060_v40 = vshrl.u32 %v5676_v27, 16  ;;  %v1033_v42 = vrot.slane %v1031_v35, 1  ;;  %v1064_v45 = vshll.u32 %v5677_v39, 16  ;;  %v5686_v29 = vld [vmem:[%s5957_s22 + $0xd8] ss:$0 sps:$4 sm:$0x11]  }
  0x28   : > { %v1058_v43 = vrot.slane %v1056_v36, 1  ;;  %v1042_v44 = vor.u32 %v1040_v30, %v1038_v37  ;;  %v1049_v54 = vshrl.u32 %v5678_v46, 16  ;;  %v1051_v55 = vshll.u32 %v5678_v46, 16  ;;  %v5687_v35 = vld [vmem:[%s5957_s22 + $0xc8] sm:$0xff]   ;;  %v5690_v39 = vld [vmem:[%s5957_s22 + $0xdc] sm:$0xff]  }
  0x29   : > { %v6030_v41 = vsel %vm907_vm0, %v1014_v34, %v1018_v16  ;;  %v1034_v47 = vor.u32 %v1033_v42, %v1029_v32  ;;  %v1066_v53 = vrot.slane %v1064_v45, 1  ;;  %v1076_v59 = vshll.u32 %v5679_v50, 16  ;;  %v5688_v36 = vld [vmem:[%s5957_s22 + $0xe4] sm:$0xff]   ;;  %v5689_v45 = vld [vmem:[%s5957_s22 + $0xec] ss:$0 sps:$4 sm:$0x11]  }
  0x2a   : > { %1566 = vrot.lane.b32.xlu1 %v6012_v18, %s5902_s23  ;;  %v1062_v48 = vor.u32 %v1060_v40, %v1058_v43  ;;  %v6040_v52 = vsel %vm907_vm0, %v1042_v44, %v1046_v38  ;;  %v1080_v60 = vshrl.u32 %v5679_v50, 16  ;;  %v1084_v61 = vshll.u32 %v5680_v51, 16 }
  0x2b   : > { %1564 = vrot.lane.b32.xlu0 %v6018_v23, %s5902_s23  ;;  %9380 = vst [vmem:[#allocation5_spill] sm:$0xff] %v6040_v52  ;;  %v6044_v57 = vsel %vm907_vm0, %v1034_v47, %v1038_v37  ;;  %v1053_v0 = vrot.slane %v1051_v55, 1  ;;  %v1069_v1 = vshrl.u32 %v5681_v56, 16  ;;  %v1071_v2 = vshll.u32 %v5681_v56, 16  ;;  %v5691_v56 = vld [vmem:[%s5957_s22 + $0xf8] sm:$0xff]  }
  0x2c   : > { %v6051_v4 = vsel %vm907_vm0, %v1062_v48, %v1066_v53  ;;  %v1078_v5 = vrot.slane %v1076_v59, 1  ;;  %v1086_v6 = vrot.slane %v1084_v61, 1  ;;  %v1096_v10 = vshll.u32 %v5682_v62, 16 }
  0x2d   : > { %9381 = vst [vmem:[#allocation6_spill] sm:$0xff] %v6051_v4  ;;  %v1054_v7 = vor.u32 %v1053_v0, %v1049_v54  ;;  %v1073_v8 = vrot.slane %v1071_v2, 1  ;;  %v1100_v12 = vshrl.u32 %v5682_v62, 16  ;;  %v1089_v14 = vshrl.u32 %v5684_v3, 16 }
  0x2e   : > { %1570 = vrot.lane.b32.xlu1 %v6024_v33, %s5902_s23  ;;  %v1082_v13 = vor.u32 %v1080_v60, %v1078_v5  ;;  %v1091_v15 = vshll.u32 %v5684_v3, 16  ;;  %v1098_v19 = vrot.slane %v1096_v10, 1  ;;  %v1104_v20 = vshll.u32 %v5683_v9, 16  ;;  %v5693_v60 = vld [vmem:[%s5957_s22 + $0xf0] sm:$0xff]  }
  0x2f   : > { %1568 = vrot.lane.b32.xlu0 %v6030_v41, %s5902_s23  ;;  %v6059_v16 = vsel %vm907_vm0, %v1054_v7, %v1058_v43  ;;  %v1074_v17 = vor.u32 %v1073_v8, %v1069_v1  ;;  %v1116_v32 = vshll.u32 %v5685_v25, 16  ;;  %v1120_v34 = vshrl.u32 %v5685_v25, 16  ;;  %v5692_v3 = vld [vmem:[%s5957_s22 + $0x100] ss:$0 sps:$4 sm:$0x11]  }
  0x30   : > { %9382 = vst [vmem:[#allocation7_spill] sm:$0xff] %v6059_v16  ;;  %v6062_v21 = vsel %vm907_vm0, %v1082_v13, %v1086_v6  ;;  %v1093_v22 = vrot.slane %v1091_v15, 1  ;;  %v1102_v26 = vor.u32 %v1100_v12, %v1098_v19  ;;  %v1106_v27 = vrot.slane %v1104_v20, 1  ;;  %v5694_v12 = vld [vmem:[%s5957_s22 + $0x10c] sm:$0xff]  }
  0x31   : > { %9383 = vst [vmem:[#allocation8_spill] sm:$0xff] %v6062_v21  ;;  %v6069_v30 = vsel %vm907_vm0, %v1074_v17, %v1078_v5  ;;  %v1124_v38 = vshll.u32 %v5686_v29, 16  ;;  %v1118_v42 = vrot.slane %v1116_v32, 1  ;;  %v1109_v43 = vshrl.u32 %v5687_v35, 16 }
  0x32   : > { %1574 = vrot.lane.b32.xlu1 %v6040_v52, %s5902_s23  ;;  %9384 = vst [vmem:[#allocation9_spill] sm:$0xff] %v6069_v30  ;;  %v1094_v31 = vor.u32 %v1093_v22, %v1089_v14  ;;  %v6076_v37 = vsel %vm907_vm0, %v1102_v26, %v1106_v27  ;;  %v1111_v44 = vshll.u32 %v5687_v35, 16  ;;  %v1136_v47 = vshll.u32 %v5688_v36, 16  ;;  %v5696_v27 = vld [vmem:[%s5957_s22 + $0x104] sm:$0xff]  }
  0x33   : > { %1572 = vrot.lane.b32.xlu0 %v6044_v57, %s5902_s23  ;;  %9385 = vst [vmem:[#allocation10_spill] sm:$0xff] %v6076_v37  ;;  %v1126_v46 = vrot.slane %v1124_v38, 1  ;;  %v1140_v48 = vshrl.u32 %v5688_v36, 16  ;;  %v1129_v50 = vshrl.u32 %v5690_v39, 16  ;;  %v1122_v51 = vor.u32 %v1120_v34, %v1118_v42  ;;  %v5697_v38 = vld [vmem:[%s5957_s22 + $0x120] sm:$0xff]   ;;  %v6517_v52 = vld [vmem:[%s5957_s22 + $0x28] sm:$0xff]  }
  0x34   : > { %v6080_v40 = vsel %vm907_vm0, %v1094_v31, %v1098_v19  ;;  %v1113_v53 = vrot.slane %v1111_v44, 1  ;;  %v1144_v54 = vshll.u32 %v5689_v45, 16  ;;  %v1131_v55 = vshll.u32 %v5690_v39, 16  ;;  %v5695_v19 = vld [vmem:[%s5957_s22 + $0x114] ss:$0 sps:$4 sm:$0x11]  }
  0x35   : > { %9386 = vst [vmem:[#allocation11_spill] sm:$0xff] %v6080_v40  ;;  %v1138_v59 = vrot.slane %v1136_v47, 1  ;;  %v6090_v61 = vsel %vm907_vm0, %v1122_v51, %v1126_v46  ;;  %v1156_v5 = vshll.u32 %v5691_v56, 16  ;;  %v1160_v6 = vshrl.u32 %v5691_v56, 16  ;;  %v5699_v39 = vld [vmem:[%s5957_s22 + $0x118] sm:$0xff]  }
  0x36   : > { %1578 = vrot.lane.b32.xlu1 %v6051_v4, %s5902_s23  ;;  %9387 = vst [vmem:[#allocation12_spill] sm:$0xff] %v6090_v61  ;;  %v1114_v62 = vor.u32 %v1113_v53, %v1109_v43  ;;  %v1146_v0 = vrot.slane %v1144_v54, 1  ;;  %v1133_v1 = vrot.slane %v1131_v55, 1  ;;  %v1149_v7 = vshrl.u32 %v5693_v60, 16 }
  0x37   : > { %1576 = vrot.lane.b32.xlu0 %v6059_v16, %s5902_s23  ;;  %v1142_v2 = vor.u32 %v1140_v48, %v1138_v59  ;;  %v1151_v10 = vshll.u32 %v5693_v60, 16  ;;  %v1158_v13 = vrot.slane %v1156_v5, 1  ;;  %v1164_v14 = vshll.u32 %v5692_v3, 16  ;;  %v5698_v45 = vld [vmem:[%s5957_s22 + $0x128] ss:$0 sps:$4 sm:$0x11]  }
  0x38   : > { %v6096_v8 = vsel %vm907_vm0, %v1114_v62, %v1118_v42  ;;  %v1134_v9 = vor.u32 %v1133_v1, %v1129_v50  ;;  %v1176_v20 = vshll.u32 %v5694_v12, 16  ;;  %v1180_v22 = vshrl.u32 %v5694_v12, 16  ;;  %v5701_v1 = vld [vmem:[%s5957_s22 + $0x13c] ss:$0 sps:$4 sm:$0x11]  }
  0x39   : > { %9388 = vst [vmem:[#allocation13_spill] sm:$0xff] %v6096_v8  ;;  %v6102_v15 = vsel %vm907_vm0, %v1142_v2, %v1146_v0  ;;  %v1153_v17 = vrot.slane %v1151_v10, 1  ;;  %v1162_v25 = vor.u32 %v1160_v6, %v1158_v13  ;;  %v1166_v26 = vrot.slane %v1164_v14, 1  ;;  %v5702_v2 = vld [vmem:[%s5957_s22 + $0x12c] sm:$0xff]  }
  0x3a   : > { %1582 = vrot.lane.b32.xlu1 %v6062_v21, %s5902_s23  ;;  %9389 = vst [vmem:[#allocation14_spill] sm:$0xff] %v6102_v15  ;;  %v6109_v29 = vsel %vm907_vm0, %v1134_v9, %v1138_v59  ;;  %v1178_v32 = vrot.slane %v1176_v20, 1  ;;  %v1184_v34 = vshll.u32 %v5695_v19, 16  ;;  %v1169_v35 = vshrl.u32 %v5696_v27, 16  ;;  %v5700_v59 = vld [vmem:[%s5957_s22 + $0x134] sm:$0xff]   ;;  %v5703_v14 = vld [vmem:[%s5957_s22 + $0x148] sm:$0xff]  }
  0x3b   : > { %1580 = vrot.lane.b32.xlu0 %v6069_v30, %s5902_s23  ;;  %9390 = vst [vmem:[#allocation15_spill] sm:$0xff] %v6109_v29  ;;  %v1154_v31 = vor.u32 %v1153_v17, %v1149_v7  ;;  %v1171_v36 = vshll.u32 %v5696_v27, 16  ;;  %v6116_v42 = vsel %vm907_vm0, %v1162_v25, %v1166_v26  ;;  %v1196_v47 = vshll.u32 %v5697_v38, 16  ;;  %v5704_v19 = vld [vmem:[%s5957_s22 + $0x150] ss:$0 sps:$4 sm:$0x11]  }
  0x3c   : > { %9391 = vst [vmem:[#allocation16_spill] sm:$0xff] %v6116_v42  ;;  %v1182_v43 = vor.u32 %v1180_v22, %v1178_v32  ;;  %v1186_v44 = vrot.slane %v1184_v34, 1  ;;  %v1200_v48 = vshrl.u32 %v5697_v38, 16  ;;  %v1189_v50 = vshrl.u32 %v5699_v39, 16  ;;  %v5705_v27 = vld [vmem:[%s5957_s22 + $0x140] sm:$0xff]   ;;  %v6409_v30 = vld [vmem:[%s5957_s22 + $0x26c] sm:$0xff]  }
  0x3d   : > { %v1173_v46 = vrot.slane %v1171_v36, 1  ;;  %v6122_v51 = vsel %vm907_vm0, %v1154_v31, %v1158_v13  ;;  %v1204_v53 = vshll.u32 %v5698_v45, 16  ;;  %v1191_v54 = vshll.u32 %v5699_v39, 16  ;;  %9422 = vst [vmem:[#allocation47_spill] sm:$0xff] %v6409_v30 }
  0x3e   : > { %1586 = vrot.lane.b32.xlu1 %v6076_v37, %s5902_s23  ;;  %9392 = vst [vmem:[#allocation17_spill] sm:$0xff] %v6122_v51  ;;  %v1198_v56 = vrot.slane %v1196_v47, 1  ;;  %v6128_v60 = vsel %vm907_vm0, %v1182_v43, %v1186_v44  ;;  %v1216_v6 = vshll.u32 %v5700_v59, 16  ;;  %v1220_v7 = vshrl.u32 %v5700_v59, 16  ;;  %v5706_v44 = vld [vmem:[%s5957_s22 + $0x15c] sm:$0xff]   ;;  %v5709_v59 = vld [vmem:[%s5957_s22 + $0x170] sm:$0xff]  }
  0x3f   : > { %1584 = vrot.lane.b32.xlu0 %v6080_v40, %s5902_s23  ;;  %v1174_v55 = vor.u32 %v1173_v46, %v1169_v35  ;;  %9393 = vst [vmem:[#allocation18_spill] sm:$0xff] %v6128_v60  ;;  %v1206_v62 = vrot.slane %v1204_v53, 1  ;;  %v1193_v0 = vrot.slane %v1191_v54, 1  ;;  %v1224_v10 = vshll.u32 %v5701_v1, 16 }
  0x40   : > { %v1202_v5 = vor.u32 %v1200_v48, %v1198_v56  ;;  %v1209_v12 = vshrl.u32 %v5702_v2, 16  ;;  %v1211_v13 = vshll.u32 %v5702_v2, 16  ;;  %v1218_v17 = vrot.slane %v1216_v6, 1  ;;  %v5707_v46 = vld [vmem:[%s5957_s22 + $0x164] ss:$0 sps:$4 sm:$0x11]  }
  0x41   : > { %v6135_v3 = vsel %vm907_vm0, %v1174_v55, %v1178_v32  ;;  %v1194_v9 = vor.u32 %v1193_v0, %v1189_v50  ;;  %v1226_v22 = vrot.slane %v1224_v10, 1  ;;  %v1236_v26 = vshll.u32 %v5703_v14, 16  ;;  %v5711_v2 = vld [vmem:[%s5957_s22 + $0x168] sm:$0xff]  }
  0x42   : > { %1590 = vrot.lane.b32.xlu1 %v6090_v61, %s5902_s23  ;;  %9394 = vst [vmem:[#allocation19_spill] sm:$0xff] %v6135_v3  ;;  %v6142_v20 = vsel %vm907_vm0, %v1202_v5, %v1206_v62  ;;  %v1213_v25 = vrot.slane %v1211_v13, 1  ;;  %v1222_v32 = vor.u32 %v1220_v7, %v1218_v17  ;;  %v1240_v34 = vshrl.u32 %v5703_v14, 16  ;;  %v5748_v61 = vld [vmem:[%s5957_s22 + $0x274] sm:$0xff]  }
  0x43   : > { %1588 = vrot.lane.b32.xlu0 %v6096_v8, %s5902_s23  ;;  %9395 = vst [vmem:[#allocation20_spill] sm:$0xff] %v6142_v20  ;;  %v6148_v31 = vsel %vm907_vm0, %v1194_v9, %v1198_v56  ;;  %v1244_v35 = vshll.u32 %v5704_v19, 16  ;;  %v1238_v38 = vrot.slane %v1236_v26, 1  ;;  %v1229_v39 = vshrl.u32 %v5705_v27, 16  ;;  %v5708_v56 = vld [vmem:[%s5957_s22 + $0x154] sm:$0xff]  }
  0x44   : > { %9396 = vst [vmem:[#allocation21_spill] sm:$0xff] %v6148_v31  ;;  %v1214_v36 = vor.u32 %v1213_v25, %v1209_v12  ;;  %v1231_v43 = vshll.u32 %v5705_v27, 16  ;;  %v6155_v47 = vsel %vm907_vm0, %v1222_v32, %v1226_v22  ;;  %v1256_v53 = vshll.u32 %v5706_v44, 16  ;;  %v5710_v9 = vld [vmem:[%s5957_s22 + $0x178] ss:$0 sps:$4 sm:$0x11]  }
  0x45   : > { %v1246_v45 = vrot.slane %v1244_v35, 1  ;;  %9397 = vst [vmem:[#allocation22_spill] sm:$0xff] %v6155_v47  ;;  %v1242_v48 = vor.u32 %v1240_v34, %v1238_v38  ;;  %v1260_v54 = vshrl.u32 %v5706_v44, 16  ;;  %v1264_v55 = vshll.u32 %v5707_v46, 16  ;;  %v5712_v32 = vld [vmem:[%s5957_s22 + $0x184] sm:$0xff]  }
  0x46   : > { %1594 = vrot.lane.b32.xlu1 %v6102_v15, %s5902_s23  ;;  %v1233_v50 = vrot.slane %v1231_v43, 1  ;;  %v6162_v62 = vsel %vm907_vm0, %v1214_v36, %v1218_v17  ;;  %v1258_v1 = vrot.slane %v1256_v53, 1  ;;  %v1249_v6 = vshrl.u32 %v5708_v56, 16  ;;  %v5714_v43 = vld [vmem:[%s5957_s22 + $0x17c] sm:$0xff]  }
  0x47   : > { %1592 = vrot.lane.b32.xlu0 %v6109_v29, %s5902_s23  ;;  %9398 = vst [vmem:[#allocation23_spill] sm:$0xff] %v6162_v62  ;;  %v1266_v5 = vrot.slane %v1264_v55, 1  ;;  %v1251_v7 = vshll.u32 %v5708_v56, 16  ;;  %v6169_v10 = vsel %vm907_vm0, %v1242_v48, %v1246_v45  ;;  %v1276_v13 = vshll.u32 %v5709_v59, 16  ;;  %v6392_v29 = vld [vmem:[%s5957_s22 + $0x258] sm:$0xff]  }
  0x48   : > { %v1234_v0 = vor.u32 %v1233_v50, %v1229_v39  ;;  %9399 = vst [vmem:[#allocation24_spill] sm:$0xff] %v6169_v10  ;;  %v1262_v12 = vor.u32 %v1260_v54, %v1258_v1  ;;  %v1280_v14 = vshrl.u32 %v5709_v59, 16  ;;  %v1284_v19 = vshll.u32 %v5710_v9, 16  ;;  %v5713_v39 = vld [vmem:[%s5957_s22 + $0x18c] ss:$0 sps:$4 sm:$0x11]  }
  0x49   : > { %v1253_v17 = vrot.slane %v1251_v7, 1  ;;  %v1269_v22 = vshrl.u32 %v5711_v2, 16  ;;  %v1271_v25 = vshll.u32 %v5711_v2, 16  ;;  %v1278_v27 = vrot.slane %v1276_v13, 1  ;;  %v5715_v59 = vld [vmem:[%s5957_s22 + $0x198] sm:$0xff]   ;;  %v5718_v13 = vld [vmem:[%s5957_s22 + $0x1ac] sm:$0xff]  }
  0x4a   : > { %1598 = vrot.lane.b32.xlu1 %v6116_v42, %s5902_s23  ;;  %v6174_v26 = vsel %vm907_vm0, %v1234_v0, %v1238_v38  ;;  %v1286_v35 = vrot.slane %v1284_v19, 1  ;;  %v6182_v44 = vsel %vm907_vm0, %v1262_v12, %v1266_v5  ;;  %v1296_v46 = vshll.u32 %v5712_v32, 16  ;;  %v5717_v0 = vld [vmem:[%s5957_s22 + $0x190] sm:$0xff]  }
  0x4b   : > { %1596 = vrot.lane.b32.xlu0 %v6122_v51, %s5902_s23  ;;  %9400 = vst [vmem:[#allocation25_spill] sm:$0xff] %v6174_v26  ;;  %v1254_v34 = vor.u32 %v1253_v17, %v1249_v6  ;;  %v1273_v36 = vrot.slane %v1271_v25, 1  ;;  %9401 = vst [vmem:[#allocation26_spill] sm:$0xff] %v6182_v44  ;;  %v1282_v45 = vor.u32 %v1280_v14, %v1278_v27  ;;  %v1300_v38 = vshrl.u32 %v5712_v32, 16 }
  0x4c   : > { %v1304_v48 = vshll.u32 %v5713_v39, 16  ;;  %v1289_v50 = vshrl.u32 %v5714_v43, 16  ;;  %v1298_v55 = vrot.slane %v1296_v46, 1  ;;  %v1291_v56 = vshll.u32 %v5714_v43, 16 }
  0x4d   : > { %v6187_v53 = vsel %vm907_vm0, %v1254_v34, %v1258_v1  ;;  %v1274_v54 = vor.u32 %v1273_v36, %v1269_v22  ;;  %v6194_v2 = vsel %vm907_vm0, %v1282_v45, %v1286_v35  ;;  %v5716_v6 = vld [vmem:[%s5957_s22 + $0x1a0] ss:$0 sps:$4 sm:$0x11]   ;;  %v1316_v12 = vshll.u32 %v5715_v59, 16  ;;  %v5720_v22 = vld [vmem:[%s5957_s22 + $0x1a4] sm:$0xff]  }
  0x4e   : > { %1602 = vrot.lane.b32.xlu1 %v6128_v60, %s5902_s23  ;;  %9402 = vst [vmem:[#allocation27_spill] sm:$0xff] %v6187_v53  ;;  %9403 = vst [vmem:[#allocation28_spill] sm:$0xff] %v6194_v2  ;;  %v1306_v5 = vrot.slane %v1304_v48, 1  ;;  %v1302_v7 = vor.u32 %v1300_v38, %v1298_v55  ;;  %v1293_v9 = vrot.slane %v1291_v56, 1  ;;  %v1320_v1 = vshrl.u32 %v5715_v59, 16  ;;  %v6373_v60 = vld [vmem:[%s5957_s22 + $0x244] sm:$0xff]  }
  0x4f   : > { %1600 = vrot.lane.b32.xlu0 %v6135_v3, %s5902_s23  ;;  %v1324_v14 = vshll.u32 %v5716_v6, 16  ;;  %v1309_v17 = vshrl.u32 %v5717_v0, 16  ;;  %v1311_v19 = vshll.u32 %v5717_v0, 16  ;;  %v6202_v25 = vsel %vm907_vm0, %v1274_v54, %v1278_v27  ;;  %v5719_v43 = vld [vmem:[%s5957_s22 + $0x1b4] ss:$0 sps:$4 sm:$0x11]  }
  0x50   : > { %9404 = vst [vmem:[#allocation29_spill] sm:$0xff] %v6202_v25  ;;  %v1294_v32 = vor.u32 %v1293_v9, %v1289_v50  ;;  %v1318_v34 = vrot.slane %v1316_v12, 1  ;;  %v1336_v35 = vshll.u32 %v5718_v13, 16  ;;  %v1340_v45 = vshrl.u32 %v5718_v13, 16  ;;  %v5721_v0 = vld [vmem:[%s5957_s22 + $0x1c0] sm:$0xff]  }
  0x51   : > { %v1326_v36 = vrot.slane %v1324_v14, 1  ;;  %v1313_v39 = vrot.slane %v1311_v19, 1  ;;  %v6208_v46 = vsel %vm907_vm0, %v1302_v7, %v1306_v5  ;;  %v1329_v56 = vshrl.u32 %v5720_v22, 16  ;;  %v5722_v6 = vld [vmem:[%s5957_s22 + $0x1c8] ss:$0 sps:$4 sm:$0x11]  }
  0x52   : > { %1606 = vrot.lane.b32.xlu1 %v6142_v20, %s5902_s23  ;;  %9405 = vst [vmem:[#allocation30_spill] sm:$0xff] %v6208_v46  ;;  %v1322_v38 = vor.u32 %v1320_v1, %v1318_v34  ;;  %v1338_v48 = vrot.slane %v1336_v35, 1  ;;  %v1344_v50 = vshll.u32 %v5719_v43, 16  ;;  %v1331_v54 = vshll.u32 %v5720_v22, 16  ;;  %v5724_v22 = vld [vmem:[%s5957_s22 + $0x1d4] sm:$0xff]  }
  0x53   : > { %1604 = vrot.lane.b32.xlu0 %v6148_v31, %s5902_s23  ;;  %v1314_v27 = vor.u32 %v1313_v39, %v1309_v17  ;;  %v6213_v59 = vsel %vm907_vm0, %v1294_v32, %v1298_v55  ;;  %v1356_v1 = vshll.u32 %v5721_v0, 16  ;;  %v1360_v13 = vshrl.u32 %v5721_v0, 16  ;;  %v5723_v17 = vld [vmem:[%s5957_s22 + $0x1b8] sm:$0xff]  }
  0x54   : > { %9406 = vst [vmem:[#allocation31_spill] sm:$0xff] %v6213_v59  ;;  %v6220_v5 = vsel %vm907_vm0, %v1322_v38, %v1326_v36  ;;  %v1346_v7 = vrot.slane %v1344_v50, 1  ;;  %v1333_v9 = vrot.slane %v1331_v54, 1  ;;  %v1342_v12 = vor.u32 %v1340_v45, %v1338_v48  ;;  %v5725_v43 = vld [vmem:[%s5957_s22 + $0x1dc] ss:$0 sps:$4 sm:$0x11]  }
  0x55   : > { %9407 = vst [vmem:[#allocation32_spill] sm:$0xff] %v6220_v5  ;;  %v1364_v14 = vshll.u32 %v5722_v6, 16  ;;  %v6226_v55 = vsel %vm907_vm0, %v1314_v27, %v1318_v34  ;;  %v1358_v32 = vrot.slane %v1356_v1, 1  ;;  %v1349_v36 = vshrl.u32 %v5723_v17, 16  ;;  %v5726_v50 = vld [vmem:[%s5957_s22 + $0x1cc] sm:$0xff]  }
  0x56   : > { %1610 = vrot.lane.b32.xlu1 %v6155_v47, %s5902_s23  ;;  %9408 = vst [vmem:[#allocation33_spill] sm:$0xff] %v6226_v55  ;;  %v1334_v19 = vor.u32 %v1333_v9, %v1329_v56  ;;  %v1351_v39 = vshll.u32 %v5723_v17, 16  ;;  %v1376_v45 = vshll.u32 %v5724_v22, 16  ;;  %v1380_v38 = vshrl.u32 %v5724_v22, 16  ;;  %v6237_v56 = vld [vmem:[%s5957_s22 + $0x1e8] sm:$0xff]  }
  0x57   : > { %1608 = vrot.lane.b32.xlu0 %v6162_v62, %s5902_s23  ;;  %v1366_v35 = vrot.slane %v1364_v14, 1  ;;  %v6234_v54 = vsel %vm907_vm0, %v1342_v12, %v1346_v7  ;;  %v1362_v0 = vor.u32 %v1360_v13, %v1358_v32  ;;  %v1384_v6 = vshll.u32 %v5725_v43, 16  ;;  %v6245_v22 = vld [vmem:[%s5957_s22 + $0x1f0] ss:$0 sps:$4 sm:$0x11]   ;;  %v6252_v43 = vld [vmem:[%s5957_s22 + $0x1e0] sm:$0xff]  }
  0x58   : > { %9409 = vst [vmem:[#allocation34_spill] sm:$0xff] %v6234_v54  ;;  %v1353_v34 = vrot.slane %v1351_v39, 1  ;;  %v1378_v27 = vrot.slane %v1376_v45, 1  ;;  %v1369_v9 = vshrl.u32 %v5726_v50, 16  ;;  %v1371_v1 = vshll.u32 %v5726_v50, 16 }
  0x59   : > { %v6242_v14 = vsel %vm907_vm0, %v1334_v19, %v1338_v48  ;;  %v1396_v7 = vshll.u32 %v6237_v56, 16  ;;  %v1386_v12 = vrot.slane %v1384_v6, 1  ;;  %v1400_v39 = vshrl.u32 %v6237_v56, 16 }
  0x5a   : > { %1614 = vrot.lane.b32.xlu1 %v6169_v10, %s5902_s23  ;;  %9410 = vst [vmem:[#allocation35_spill] sm:$0xff] %v6242_v14  ;;  %v1354_v17 = vor.u32 %v1353_v34, %v1349_v36  ;;  %v1373_v13 = vrot.slane %v1371_v1, 1  ;;  %v6255_v48 = vsel %vm907_vm0, %v1362_v0, %v1366_v35  ;;  %v1382_v19 = vor.u32 %v1380_v38, %v1378_v27  ;;  %v6266_v35 = vld [vmem:[%s5957_s22 + $0x1fc] sm:$0xff]   ;;  %v6269_v0 = vld [vmem:[%s5957_s22 + $0x204] ss:$0 sps:$4 sm:$0x11]  }
  0x5b   : > { %1612 = vrot.lane.b32.xlu0 %v6174_v26, %s5902_s23  ;;  %9411 = vst [vmem:[#allocation36_spill] sm:$0xff] %v6255_v48  ;;  %v1398_v36 = vrot.slane %v1396_v7, 1  ;;  %v1404_v45 = vshll.u32 %v6245_v22, 16  ;;  %v1389_v50 = vshrl.u32 %v6252_v43, 16  ;;  %v1391_v34 = vshll.u32 %v6252_v43, 16  ;;  %v6272_v38 = vld [vmem:[%s5957_s22 + $0x1f4] sm:$0xff]  }
  0x5c   : > { %v6263_v6 = vsel %vm907_vm0, %v1354_v17, %v1358_v32  ;;  %v1374_v1 = vor.u32 %v1373_v13, %v1369_v9  ;;  %v1416_v32 = vshll.u32 %v6266_v35, 16  ;;  %v1420_v9 = vshrl.u32 %v6266_v35, 16  ;;  %v6286_v13 = vld [vmem:[%s5957_s22 + $0x208] sm:$0xff]   ;;  %v6334_v10 = vld [vmem:[%s5957_s22 + $0x230] sm:$0xff]  }
  0x5d   : > { %9412 = vst [vmem:[#allocation37_spill] sm:$0xff] %v6263_v6  ;;  %v1402_v7 = vor.u32 %v1400_v39, %v1398_v36  ;;  %v1424_v17 = vshll.u32 %v6269_v0, 16  ;;  %v1409_v39 = vshrl.u32 %v6272_v38, 16  ;;  %v1489_v42 = vshrl.u32 %v6373_v60, 16 }
  0x5e   : > { %1618 = vrot.lane.b32.xlu1 %v6182_v44, %s5902_s23  ;;  %v1491_v51 = vshll.u32 %v6373_v60, 16  ;;  %v1536_v37 = vshll.u32 %v5748_v61, 16  ;;  %v1540_v4 = vshrl.u32 %v5748_v61, 16 }
  0x5f   : > { %1616 = vrot.lane.b32.xlu0 %v6187_v53, %s5902_s23 }
  0x62   : > { %1622 = vrot.lane.b32.xlu1 %v6194_v2, %s5902_s23 }
  0x63   : > { %1620 = vrot.lane.b32.xlu0 %v6202_v25, %s5902_s23 }
  0x66   : > { %1626 = vrot.lane.b32.xlu1 %v6208_v46, %s5902_s23 }
  0x67   : > { %1624 = vrot.lane.b32.xlu0 %v6213_v59, %s5902_s23  ;;  %v1426_v59 = vrot.slane %v1424_v17, 1 }
  0x6a   : > { %1630 = vrot.lane.b32.xlu1 %v6220_v5, %s5902_s23  ;;  %v6277_v5 = vld [vmem:[%s5957_s22 + $0x210] sm:$0xff]  }
  0x6b   : > { %1628 = vrot.lane.b32.xlu0 %v6226_v55, %s5902_s23  ;;  %v6280_v55 = vsel %vm907_vm0, %v1382_v19, %v1386_v12  ;;  %v1418_v19 = vrot.slane %v1416_v32, 1  ;;  %v1436_v46 = vshll.u32 %v6277_v5, 16 }
  0x6c   : > { %9413 = vst [vmem:[#allocation38_spill] sm:$0xff] %v6280_v55 }
  0x6d   : > { %v1422_v25 = vor.u32 %v1420_v9, %v1418_v19  ;;  %v6320_v9 = vld [vmem:[%s5957_s22 + $0x22c] ss:$0 sps:$4 sm:$0x11]  }
  0x6e   : > { %1634 = vrot.lane.b32.xlu1 %v6234_v54, %s5902_s23  ;;  %v1406_v54 = vrot.slane %v1404_v45, 1  ;;  %v1411_v45 = vshll.u32 %v6272_v38, 16  ;;  %v1464_v53 = vshll.u32 %v6320_v9, 16 }
  0x6f   : > { %1632 = vrot.lane.b32.xlu0 %v6242_v14, %s5902_s23  ;;  %v1393_v14 = vrot.slane %v1391_v34, 1  ;;  %v6293_v34 = vsel %vm907_vm0, %v1374_v1, %v1378_v27  ;;  %v1438_v27 = vrot.slane %v1436_v46, 1  ;;  %v6307_v1 = vld [vmem:[%s5957_s22 + $0x224] sm:$0xff]   ;;  %v1429_v46 = vshrl.u32 %v6286_v13, 16 }
  0x70   : > { %9414 = vst [vmem:[#allocation39_spill] sm:$0xff] %v6293_v34  ;;  %v1413_v2 = vrot.slane %v1411_v45, 1  ;;  %v1456_v17 = vshll.u32 %v6307_v1, 16  ;;  %v6324_v45 = vld [vmem:[%s5957_s22 + $0x238] sm:$0xff]  }
  0x71   : > { %v1394_v12 = vor.u32 %v1393_v14, %v1389_v50  ;;  %v1440_v14 = vshrl.u32 %v6277_v5, 16 }
  0x72   : > { %1638 = vrot.lane.b32.xlu1 %v6255_v48, %s5902_s23  ;;  %v6296_v48 = vld [vmem:[%s5957_s22 + $0x218] ss:$0 sps:$4 sm:$0x11]   ;;  %v1414_v32 = vor.u32 %v1413_v2, %v1409_v39  ;;  %v6329_v2 = vsel %vm907_vm0, %v1422_v25, %v1426_v59  ;;  %v1476_v59 = vshll.u32 %v6324_v45, 16 }
  0x73   : > { %1636 = vrot.lane.b32.xlu0 %v6263_v6, %s5902_s23  ;;  %v6302_v6 = vsel %vm907_vm0, %v1402_v7, %v1406_v54  ;;  %v1444_v50 = vshll.u32 %v6296_v48, 16  ;;  %v6313_v54 = vld [vmem:[%s5957_s22 + $0x21c] sm:$0xff]   ;;  %v6316_v7 = vsel %vm907_vm0, %v1394_v12, %v1398_v36  ;;  %9417 = vst [vmem:[#allocation42_spill] sm:$0xff] %v6329_v2  ;;  %v1442_v44 = vor.u32 %v1440_v14, %v1438_v27 }
  0x74   : > { %9415 = vst [vmem:[#allocation40_spill] sm:$0xff] %v6302_v6  ;;  %9416 = vst [vmem:[#allocation41_spill] sm:$0xff] %v6316_v7  ;;  %v1458_v36 = vrot.slane %v1456_v17, 1  ;;  %v1460_v12 = vshrl.u32 %v6307_v1, 16  ;;  %v6339_v26 = vsel %vm907_vm0, %v1414_v32, %v1418_v19  ;;  %v1451_v25 = vshll.u32 %v6313_v54, 16 }
  0x75   : > { %v1446_v39 = vrot.slane %v1444_v50, 1  ;;  %9418 = vst [vmem:[#allocation43_spill] sm:$0xff] %v6339_v26  ;;  %v1466_v14 = vrot.slane %v1464_v53, 1  ;;  %v1449_v50 = vshrl.u32 %v6313_v54, 16  ;;  %v1478_v19 = vrot.slane %v1476_v59, 1 }
  0x76   : > { %1642 = vrot.lane.b32.xlu1 %v6280_v55, %s5902_s23  ;;  %v1431_v55 = vshll.u32 %v6286_v13, 16  ;;  %v6345_v17 = vld [vmem:[%s5957_s22 + $0x240] ss:$0 sps:$4 sm:$0x11]   ;;  %v1462_v47 = vor.u32 %v1460_v12, %v1458_v36  ;;  %v1471_v53 = vshll.u32 %v6334_v10, 16 }
  0x77   : > { %1640 = vrot.lane.b32.xlu0 %v6293_v34, %s5902_s23  ;;  %v6351_v32 = vsel %vm907_vm0, %v1442_v44, %v1446_v39  ;;  %v1484_v62 = vshll.u32 %v6345_v17, 16  ;;  %v1469_v44 = vshrl.u32 %v6334_v10, 16 }
  0x78   : > { %v1433_v34 = vrot.slane %v1431_v55, 1  ;;  %v1473_v39 = vrot.slane %v1471_v53, 1 }
  0x7a   : > { %1646 = vrot.lane.b32.xlu1 %v6302_v6, %s5902_s23  ;;  %v1434_v55 = vor.u32 %v1433_v34, %v1429_v46  ;;  %v1480_v6 = vshrl.u32 %v6324_v45, 16  ;;  %v6358_v34 = vld [vmem:[%s5957_s22 + $0x24c] sm:$0xff]   ;;  %v6361_v46 = vld [vmem:[%s5957_s22 + $0x254] ss:$0 sps:$4 sm:$0x11]  }
  0x7b   : > { %1644 = vrot.lane.b32.xlu0 %v6316_v7, %s5902_s23  ;;  %v1453_v7 = vrot.slane %v1451_v25, 1  ;;  %v1496_v12 = vshll.u32 %v6358_v34, 16  ;;  %v1500_v20 = vshrl.u32 %v6358_v34, 16  ;;  %v1504_v31 = vshll.u32 %v6361_v46, 16 }
  0x7c   : > { %v6364_v25 = vsel %vm907_vm0, %v1434_v55, %v1438_v27  ;;  %v6376_v27 = vsel %vm907_vm0, %v1462_v47, %v1466_v14  ;;  %v1486_v55 = vrot.slane %v1484_v62, 1  ;;  %v1474_v47 = vor.u32 %v1473_v39, %v1469_v44  ;;  %v5746_v14 = vld [vmem:[%s5957_s22 + $0x268] ss:$0 sps:$4 sm:$0x11]  }
  0x7d   : > { %v1454_v59 = vor.u32 %v1453_v7, %v1449_v50  ;;  %9419 = vst [vmem:[#allocation44_spill] sm:$0xff] %v6376_v27  ;;  %v1482_v7 = vor.u32 %v1480_v6, %v1478_v19  ;;  %v6379_v50 = vld [vmem:[%s5957_s22 + $0x260] sm:$0xff]   ;;  %v1498_v53 = vrot.slane %v1496_v12, 1  ;;  %v1506_v3 = vrot.slane %v1504_v31, 1 }
  0x7e   : > { %1650 = vrot.lane.b32.xlu1 %v6329_v2, %s5902_s23  ;;  %v1516_v62 = vshll.u32 %v6379_v50, 16  ;;  %v1520_v6 = vshrl.u32 %v6379_v50, 16  ;;  %v1493_v12 = vrot.slane %v1491_v51, 1  ;;  %v1511_v44 = vshll.u32 %v6392_v29, 16 }
  0x7f   : > { %1648 = vrot.lane.b32.xlu0 %v6339_v26, %s5902_s23  ;;  %v6386_v15 = vsel %vm907_vm0, %v1454_v59, %v1458_v36  ;;  %v1502_v31 = vor.u32 %v1500_v20, %v1498_v53  ;;  %v6398_v8 = vsel %vm907_vm0, %v1482_v7, %v1486_v55  ;;  %v1524_v59 = vshll.u32 %v5746_v14, 16  ;;  %v5749_v39 = vld [vmem:[%s5957_s22 + $0x27c] ss:$0 sps:$4 sm:$0x11]  }
  0x80   : > { %9420 = vst [vmem:[#allocation45_spill] sm:$0xff] %v6398_v8  ;;  %v1518_v36 = vrot.slane %v1516_v62, 1  ;;  %v6405_v40 = vsel %vm907_vm0, %v1474_v47, %v1478_v19  ;;  %v1494_v21 = vor.u32 %v1493_v12, %v1489_v42  ;;  %v1509_v20 = vshrl.u32 %v6392_v29, 16 }
  0x81   : > { %9421 = vst [vmem:[#allocation46_spill] sm:$0xff] %v6405_v40  ;;  %v1513_v51 = vrot.slane %v1511_v44, 1  ;;  %v6414_v7 = vsel %vm907_vm0, %v1502_v31, %v1506_v3  ;;  %v1526_v14 = vrot.slane %v1524_v59, 1  ;;  %v1538_v62 = vrot.slane %v1536_v37, 1 }
  0x82   : > { %1654 = vrot.lane.b32.xlu1 %v6351_v32, %s5902_s23  ;;  %v1522_v55 = vor.u32 %v1520_v6, %v1518_v36  ;;  %v1544_v16 = vshll.u32 %v5749_v39, 16  ;;  %v1531_v19 = vshll.u32 %v6409_v30, 16  ;;  %v6422_v47 = vsel %vm907_vm0, %v1494_v21, %v1498_v53 }
  0x83   : > { %1652 = vrot.lane.b32.xlu0 %v6364_v25, %s5902_s23  ;;  %v1514_v12 = vor.u32 %v1513_v51, %v1509_v20  ;;  %v1529_v3 = vshrl.u32 %v6409_v30, 16  ;;  %v1542_v61 = vor.u32 %v1540_v4, %v1538_v62  ;;  %v5751_v4 = vld [vmem:[%s9251_s2 + $0x38] sm:$0xff]   ;;  %v1802_v30 = vrot.slane %v6272_v38, 1 }
  0x84   : > { %v1533_v31 = vrot.slane %v1531_v19, 1  ;;  %v6430_v37 = vsel %vm907_vm0, %v1522_v55, %v1526_v14  ;;  %v1546_v59 = vrot.slane %v1544_v16, 1  ;;  %v6450_v20 = vld [vmem:[%s5957_s22 + $0x14] sm:$0xff]  }
  0x85   : > { %v6437_v53 = vsel %vm907_vm0, %v1514_v12, %v1518_v36  ;;  %v1682_v51 = vrot.slane %v6450_v20, 1  ;;  %v6454_v36 = vld [vmem:[%s5957_s22 + $0x1c] sm:$0xff]  }
  0x86   : > { %1658 = vrot.lane.b32.xlu1 %v6376_v27, %s5902_s23  ;;  %v1534_v44 = vor.u32 %v1533_v31, %v1529_v3  ;;  %v6447_v16 = vsel %vm907_vm0, %v1542_v61, %v1546_v59  ;;  %v6465_v12 = vld [vmem:[%s5957_s22] sm:$0xff]   ;;  %v6469_v31 = vld [vmem:[%s5957_s22 + $0x8] sm:$0xff]   ;;  %v9329_v59 = vmov 0  }
  0x87   : > { %1656 = vrot.lane.b32.xlu0 %v6386_v15, %s5902_s23  ;;  %9423 = vst [vmem:[#allocation48_spill] sm:$0xff] %v6447_v16  ;;  %v1677_v3 = vrot.slane %v6465_v12, 1  ;;  %3859 = vmatprep.subr.bf16.mxu0 %v9329_v59 }
  0x88   : > { %v6462_v19 = vsel %vm907_vm0, %v1534_v44, %v1538_v62  ;;  %5592 = vmatprep.subr.bf16.mxu1 %v9329_v59  ;;  %3860 = vmatpush1.bf16.msra.mxu0 %v5751_v4  ;;  %v5752_v62 = vld [vmem:[%s9251_s2 + $0x30] sm:$0xff]   ;;  %v9427_v44 = vrot.slane %v6454_v36, 1 }
  0x89   : > { %9425 = vst [vmem:[#allocation50_spill] sm:$0xff] %v6462_v19  ;;  %5608 = vmatpush1.bf16.msra.mxu1 %v5751_v4  ;;  %3861 = vmatprep.subr.bf16.mxu0 %v9329_v59  ;;  %v5753_v4 = vld [vmem:[%s9251_s2 + $0x28] sm:$0xff]  }
  0x8a   : > { %1662 = vrot.lane.b32.xlu1 %v6398_v8, %s5902_s23  ;;  %5593 = vmatprep.subr.bf16.mxu1 %v9329_v59  ;;  %v1797_v59 = vrot.slane %v6252_v43, 1 }
  0x8b   : > { %1660 = vrot.lane.b32.xlu0 %v6405_v40, %s5902_s23 }
  0x8c   : > { %v6419_v42 = vpop.permute.xlu1 %1552  ;;  %3862 = vmatpush1.bf16.msra.mxu0 %v5752_v62 }
  0x8d   : > { %v6425_v6 = vpop.permute.xlu0 %1548  ;;  %5609 = vmatpush1.bf16.msra.mxu1 %v5752_v62  ;;  %v5754_v62 = vld [vmem:[%s9251_s2 + $0x20] sm:$0xff]  }
  0x8e   : > { %1666 = vrot.lane.b32.xlu1 %v6414_v7, %s5902_s23 }
  0x8f   : > { %1664 = vrot.lane.b32.xlu0 %v6422_v47, %s5902_s23 }
  0x90   : > { %v6434_v21 = vpop.permute.xlu1 %1554 }
  0x91   : > { %v6439_v39 = vpop.permute.xlu0 %1550 }
  0x92   : > { %1670 = vrot.lane.b32.xlu1 %v6430_v37, %s5902_s23 }
  0x93   : > { %1668 = vrot.lane.b32.xlu0 %v6437_v53, %s5902_s23 }
  0x94   : > { %v6459_v14 = vpop.permute.xlu1 %1558 }
  0x95   : > { %9424 = vst [vmem:[#allocation49_spill] sm:$0xff] %v6459_v14  ;;  %v6474_v55 = vpop.permute.xlu0 %1556  ;;  %v6484_v14 = vsel %vm1676_vm1, %v1682_v51, %v9427_v44  ;;  %v1803_v51 = vrot.slane %v6266_v35, 1 }
  0x96   : > { %9426 = vst [vmem:[#allocation51_spill] sm:$0xff] %v6474_v55  ;;  %1674 = vrot.lane.b32.xlu1 %v6447_v16, %s5902_s23  ;;  %v9429_v16 = vrot.slane %v6469_v31, 1 }
  0x97   : > { %1672 = vrot.lane.b32.xlu0 %v6462_v19, %s5902_s23 }
  0x98   : > { %v6489_v61 = vpop.permute.xlu1 %1562  ;;  %v1679_v55 = vsel %vm1676_vm1, %v1677_v3, %v9429_v16  ;;  %v9431_v16 = vmov 0  }
  0x99   : > { %9428 = vst [vmem:[#allocation52_spill] sm:$0xff] %v6489_v61  ;;  %v6497_v44 = vpop.permute.xlu0 %1560  ;;  %v9335_v61 = vrot.slane %v6237_v56, 1  ;;  %3863 = vmatprep.subr.bf16.mxu0 %v9431_v16  ;;  %5594 = vmatprep.subr.bf16.mxu1 %v9431_v16 }
  0x9a   : > { %9430 = vst [vmem:[#allocation53_spill] sm:$0xff] %v6497_v44  ;;  %2131 = vrot.lane.b32.xlu1 %v6484_v14, %s5902_s23  ;;  %v6512_v44 = vsel %vm1676_vm1, %v1802_v30, %v1803_v51  ;;  %3864 = vmatpush1.bf16.msra.mxu0 %v5753_v4 }
  0x9b   : > { %1837 = vrot.lane.b32.xlu0 %v1679_v55, %s5904_s30  ;;  %9433 = vst [vmem:[#allocation55_spill] sm:$0xff] %v6512_v44  ;;  %v6527_v55 = vsel %vm1676_vm1, %v1797_v59, %v9335_v61  ;;  %5610 = vmatpush1.bf16.msra.mxu1 %v5753_v4  ;;  %v5755_v59 = vld [vmem:[%s9251_s2 + $0x18] sm:$0xff]  }
  0x9c   : > { %v6508_v3 = vpop.permute.xlu1 %1566  ;;  %9435 = vst [vmem:[#allocation57_spill] sm:$0xff] %v6527_v55  ;;  %3865 = vmatprep.subr.bf16.mxu0 %v9431_v16  ;;  %5595 = vmatprep.subr.bf16.mxu1 %v9431_v16 }
  0x9d   : > { %9432 = vst [vmem:[#allocation54_spill] sm:$0xff] %v6508_v3  ;;  %v6514_v19 = vpop.permute.xlu0 %1564 }
  0x9e   : > { %9434 = vst [vmem:[#allocation56_spill] sm:$0xff] %v6514_v19  ;;  %2269 = vrot.lane.b32.xlu1 %v6517_v52, %s5904_s30  ;;  %3866 = vmatpush1.bf16.msra.mxu0 %v5754_v62 }
  0x9f   : > { %2227 = vrot.lane.b32.xlu0 %v6512_v44, %s5902_s23  ;;  %5611 = vmatpush1.bf16.msra.mxu1 %v5754_v62  ;;  %v5756_v62 = vld [vmem:[%s9251_s2 + $0x10] sm:$0xff]  }
  0xa0   : > { %v6532_v30 = vpop.permute.xlu1 %1570  ;;  %3867 = vmatprep.subr.bf16.mxu0 %v9431_v16  ;;  %5596 = vmatprep.subr.bf16.mxu1 %v9431_v16 }
  0xa1   : > { %9436 = vst [vmem:[#allocation58_spill] sm:$0xff] %v6532_v30  ;;  %v6535_v3 = vpop.permute.xlu0 %1568 }
  0xa2   : > { %9437 = vst [vmem:[#allocation59_spill] sm:$0xff] %v6535_v3  ;;  %1933 = vrot.lane.b32.xlu1 %v6527_v55, %s5904_s30  ;;  %3868 = vmatpush1.bf16.msra.mxu0 %v5755_v59  ;;  %v1805_v55 = vrot.slane %v6269_v0, 1  ;;  %v5757_v0 = vld [vmem:[%s9251_s2 + $0x8] sm:$0xff]  }
  0xa3   : > { %2365 = vrot.lane.b32.xlu0 %v6286_v13, %s5904_s30  ;;  %5612 = vmatpush1.bf16.msra.mxu1 %v5755_v59 }
  0xa4   : > { %v6545_v4 = vpop.permute.xlu1 %1574  ;;  %3869 = vmatprep.subr.bf16.mxu0 %v9431_v16  ;;  %5597 = vmatprep.subr.bf16.mxu1 %v9431_v16  ;;  %v6571_v59 = vsel %vm1676_vm1, %v1803_v51, %v1805_v55  ;;  %v5758_v51 = vld [vmem:[%s9251_s2] sm:$0xff]   ;;  %v1800_v55 = vrot.slane %v6245_v22, 1  ;;  %v5759_v22 = vld [vmem:[%s9251_s2 + $0x78] sm:$0xff]  }
  0xa5   : > { %9438 = vst [vmem:[#allocation60_spill] sm:$0xff] %v6545_v4  ;;  %v6548_v61 = vpop.permute.xlu0 %1572  ;;  %9442 = vst [vmem:[#allocation64_spill] sm:$0xff] %v6571_v59 }
  0xa6   : > { %9439 = vst [vmem:[#allocation61_spill] sm:$0xff] %v6548_v61  ;;  %2516 = vrot.lane.b32.xlu1 %v6364_v25, %s5905_s9  ;;  %v5780_v61 = vld [vmem:[%s5957_s22 + $0x24] ss:$0 sps:$4 sm:$0x11]   ;;  %3870 = vmatpush1.bf16.msra.mxu0 %v5756_v62 }
  0xa7   : > { %2420 = vrot.lane.b32.xlu0 %v5994_v58, %s5905_s9  ;;  %v1685_v30 = vrot.slane %v5780_v61, 1  ;;  %5613 = vmatpush1.bf16.msra.mxu1 %v5756_v62  ;;  %v5781_v62 = vld [vmem:[%s5957_s22 + $0x10] ss:$0 sps:$4 sm:$0x11]  }
  0xa8   : > { %v6559_v4 = vpop.permute.xlu1 %1578  ;;  %3871 = vmatprep.subr.bf16.mxu0 %v9431_v16  ;;  %5598 = vmatprep.subr.bf16.mxu1 %v9431_v16 }
  0xa9   : > { %9440 = vst [vmem:[#allocation62_spill] sm:$0xff] %v6559_v4  ;;  %v6563_v3 = vpop.permute.xlu0 %1576 }
  0xaa   : > { %9441 = vst [vmem:[#allocation63_spill] sm:$0xff] %v6563_v3  ;;  %2071 = vrot.lane.b32.xlu1 %v6272_v38, %s5905_s9  ;;  %v9444_v38 = vrot.slane %v6454_v36, 1  ;;  %3872 = vmatpush1.bf16.msra.mxu0 %v5757_v0 }
  0xab   : > { %1975 = vrot.lane.b32.xlu0 %v6450_v20, %s5905_s9  ;;  %5614 = vmatpush1.bf16.msra.mxu1 %v5757_v0  ;;  %v9448_v0 = vrot.slane %v6237_v56, 1 }
  0xac   : > { %v6576_v61 = vpop.permute.xlu1 %1582  ;;  %v6582_v4 = vsel %vm1676_vm1, %v9444_v38, %v1685_v30  ;;  %3873 = vmatprep.subr.bf16.mxu0 %v9431_v16  ;;  %5599 = vmatprep.subr.bf16.mxu1 %v9431_v16  ;;  %v1680_v38 = vrot.slane %v5781_v62, 1 }
  0xad   : > { %9443 = vst [vmem:[#allocation65_spill] sm:$0xff] %v6576_v61  ;;  %v6584_v3 = vpop.permute.xlu0 %1580 }
  0xae   : > { %9445 = vst [vmem:[#allocation66_spill] sm:$0xff] %v6584_v3  ;;  %2229 = vrot.lane.b32.xlu1 %v6571_v59, %s5902_s23  ;;  %3874 = vmatpush1.bf16.msra.mxu0 %v5758_v51  ;;  %v6609_v3 = vsel %vm1676_vm1, %v9448_v0, %v1800_v55  ;;  %v9340_v0 = vrot.slane %v6277_v5, 1 }
  0xaf   : > { %2133 = vrot.lane.b32.xlu0 %v6582_v4, %s5902_s23  ;;  %9449 = vst [vmem:[#allocation69_spill] sm:$0xff] %v6609_v3  ;;  %5615 = vmatpush1.bf16.msra.mxu1 %v5758_v51  ;;  %v5760_v51 = vld [vmem:[%s9251_s2 + $0x70] sm:$0xff]  }
  0xb0   : > { %v6595_v30 = vpop.permute.xlu1 %1586  ;;  %3875 = vmatprep.subr.bf16.mxu0 %v9431_v16  ;;  %5600 = vmatprep.subr.bf16.mxu1 %v9431_v16 }
  0xb1   : > { %9446 = vst [vmem:[#allocation67_spill] sm:$0xff] %v6595_v30  ;;  %v6599_v61 = vpop.permute.xlu0 %1584  ;;  %v6613_v30 = vld [vmem:[%s5957_s22 + $0x30] sm:$0xff]  }
  0xb2   : > { %9447 = vst [vmem:[#allocation68_spill] sm:$0xff] %v6599_v61  ;;  %2367 = vrot.lane.b32.xlu1 %v6277_v5, %s5904_s30  ;;  %9450 = vst [vmem:[#allocation70_spill] sm:$0xff] %v6613_v30  ;;  %v9452_v61 = vrot.slane %v6469_v31, 1  ;;  %3876 = vmatpush2.bf16.msra.mxu0 %v5759_v22 }
  0xb3   : > { %2271 = vrot.lane.b32.xlu0 %v6613_v30, %s5904_s30  ;;  %5616 = vmatpush2.bf16.msra.mxu1 %v5759_v22  ;;  %v1807_v22 = vrot.slane %v6286_v13, 1 }
  0xb4   : > { %v6617_v62 = vpop.permute.xlu1 %1590  ;;  %v1681_v19 = vsel %vm1676_vm1, %v9452_v61, %v1680_v38  ;;  %3877 = vmatprep.subr.bf16.mxu0 %v9431_v16  ;;  %5601 = vmatprep.subr.bf16.mxu1 %v9431_v16  ;;  %v5761_v38 = vld [vmem:[%s9251_s2 + $0x68] sm:$0xff]  }
  0xb5   : > { %9451 = vst [vmem:[#allocation71_spill] sm:$0xff] %v6617_v62  ;;  %v6623_v56 = vpop.permute.xlu0 %1588 }
  0xb6   : > { %9453 = vst [vmem:[#allocation72_spill] sm:$0xff] %v6623_v56  ;;  %1935 = vrot.lane.b32.xlu1 %v6609_v3, %s5904_s30  ;;  %3878 = vmatpush2.bf16.msra.mxu0 %v5760_v51  ;;  %v1687_v3 = vrot.slane %v6517_v52, 1 }
  0xb7   : > { %1839 = vrot.lane.b32.xlu0 %v1681_v19, %s5904_s30  ;;  %5617 = vmatpush2.bf16.msra.mxu1 %v5760_v51  ;;  %v5762_v51 = vld [vmem:[%s9251_s2 + $0x60] sm:$0xff]  }
  0xb8   : > { %v6632_v55 = vpop.permute.xlu1 %1594  ;;  %3879 = vmatprep.subr.bf16.mxu0 %v9431_v16  ;;  %5602 = vmatprep.subr.bf16.mxu1 %v9431_v16 }
  0xb9   : > { %9454 = vst [vmem:[#allocation73_spill] sm:$0xff] %v6632_v55  ;;  %v6635_v61 = vpop.permute.xlu0 %1592  ;;  %v1688_v55 = vrot.slane %v6613_v30, 1 }
  0xba   : > { %9455 = vst [vmem:[#allocation74_spill] sm:$0xff] %v6635_v61  ;;  %2518 = vrot.lane.b32.xlu1 %v6351_v32, %s5905_s9  ;;  %3880 = vmatpush2.bf16.msra.mxu0 %v5761_v38 }
  0xbb   : > { %2422 = vrot.lane.b32.xlu0 %v5986_v49, %s5905_s9  ;;  %5618 = vmatpush2.bf16.msra.mxu1 %v5761_v38  ;;  %v5763_v38 = vld [vmem:[%s9251_s2 + $0x58] sm:$0xff]  }
  0xbc   : > { %v6647_v19 = vpop.permute.xlu1 %1598  ;;  %3881 = vmatprep.subr.bf16.mxu0 %v9431_v16  ;;  %5603 = vmatprep.subr.bf16.mxu1 %v9431_v16 }
  0xbd   : > { %9456 = vst [vmem:[#allocation75_spill] sm:$0xff] %v6647_v19  ;;  %v6652_v61 = vpop.permute.xlu0 %1596  ;;  %v6662_v19 = vsel %vm1676_vm1, %v1807_v22, %v9340_v0  ;;  %v5764_v0 = vld [vmem:[%s9251_s2 + $0x50] sm:$0xff]  }
  0xbe   : > { %9457 = vst [vmem:[#allocation76_spill] sm:$0xff] %v6652_v61  ;;  %2073 = vrot.lane.b32.xlu1 %v6266_v35, %s5905_s9  ;;  %9458 = vst [vmem:[#allocation77_spill] sm:$0xff] %v6662_v19  ;;  %v6671_v35 = vsel %vm1676_vm1, %v1687_v3, %v1688_v55  ;;  %3882 = vmatpush2.bf16.msra.mxu0 %v5762_v51 }
  0xbf   : > { %1977 = vrot.lane.b32.xlu0 %v6454_v36, %s5905_s9  ;;  %9460 = vst [vmem:[#allocation79_spill] sm:$0xff] %v6671_v35  ;;  %5619 = vmatpush2.bf16.msra.mxu1 %v5762_v51  ;;  %v6695_v51 = vld [vmem:[%s5957_s22 + $0x3c] sm:$0xff]  }
  0xc0   : > { %v6667_v61 = vpop.permute.xlu1 %1602  ;;  %3883 = vmatprep.subr.bf16.mxu0 %v9431_v16  ;;  %5604 = vmatprep.subr.bf16.mxu1 %v9431_v16  ;;  %9464 = vst [vmem:[#allocation83_spill] sm:$0xff] %v6695_v51 }
  0xc1   : > { %9459 = vst [vmem:[#allocation78_spill] sm:$0xff] %v6667_v61  ;;  %v6673_v62 = vpop.permute.xlu0 %1600 }
  0xc2   : > { %9461 = vst [vmem:[#allocation80_spill] sm:$0xff] %v6673_v62  ;;  %2231 = vrot.lane.b32.xlu1 %v6662_v19, %s5902_s23  ;;  %3884 = vmatpush2.bf16.msra.mxu0 %v5763_v38  ;;  %v1815_v62 = vrot.slane %v6320_v9, 1 }
  0xc3   : > { %2135 = vrot.lane.b32.xlu0 %v6671_v35, %s5902_s23  ;;  %5620 = vmatpush2.bf16.msra.mxu1 %v5763_v38  ;;  %v5765_v38 = vld [vmem:[%s9251_s2 + $0x48] sm:$0xff]  }
  0xc4   : > { %v6683_v22 = vpop.permute.xlu1 %1606  ;;  %3885 = vmatprep.subr.bf16.mxu0 %v9431_v16  ;;  %5605 = vmatprep.subr.bf16.mxu1 %v9431_v16 }
  0xc5   : > { %9462 = vst [vmem:[#allocation81_spill] sm:$0xff] %v6683_v22  ;;  %v6686_v3 = vpop.permute.xlu0 %1604 }
  0xc6   : > { %9463 = vst [vmem:[#allocation82_spill] sm:$0xff] %v6686_v3  ;;  %2369 = vrot.lane.b32.xlu1 %v6313_v54, %s5904_s30  ;;  %3886 = vmatpush2.bf16.msra.mxu0 %v5764_v0 }
  0xc7   : > { %2273 = vrot.lane.b32.xlu0 %v6695_v51, %s5904_s30  ;;  %5621 = vmatpush2.bf16.msra.mxu1 %v5764_v0  ;;  %v1810_v0 = vrot.slane %v6296_v48, 1  ;;  %v9471_v48 = vrot.slane %v6277_v5, 1 }
  0xc8   : > { %v6699_v22 = vpop.permute.xlu1 %1610  ;;  %3887 = vmatprep.subr.bf16.mxu0 %v9431_v16  ;;  %5606 = vmatprep.subr.bf16.mxu1 %v9431_v16 }
  0xc9   : > { %9465 = vst [vmem:[#allocation84_spill] sm:$0xff] %v6699_v22  ;;  %v6702_v3 = vpop.permute.xlu0 %1608 }
  0xca   : > { %9466 = vst [vmem:[#allocation85_spill] sm:$0xff] %v6702_v3  ;;  %1937 = vrot.lane.b32.xlu1 %v6512_v44, %s5904_s30  ;;  %3888 = vmatpush2.bf16.msra.mxu0 %v5765_v38  ;;  %v5766_v44 = vld [vmem:[%s9251_s2 + $0x40] sm:$0xff]  }
  0xcb   : > { %1841 = vrot.lane.b32.xlu0 %v6484_v14, %s5904_s30  ;;  %5622 = vmatpush2.bf16.msra.mxu1 %v5765_v38  ;;  %v6737_v38 = vsel %vm1676_vm1, %v9471_v48, %v1810_v0 }
  0xcc   : > { %v6712_v22 = vpop.permute.xlu1 %1614  ;;  %3889 = vmatprep.subr.bf16.mxu0 %v9431_v16  ;;  %5607 = vmatprep.subr.bf16.mxu1 %v9431_v16  ;;  %9472 = vst [vmem:[#allocation90_spill] sm:$0xff] %v6737_v38 }
  0xcd   : > { %9467 = vst [vmem:[#allocation86_spill] sm:$0xff] %v6712_v22  ;;  %v6715_v3 = vpop.permute.xlu0 %1612  ;;  %v5784_v22 = vld [vmem:[%s5957_s22 + $0x38] ss:$0 sps:$4 sm:$0x11]  }
  0xce   : > { %9468 = vst [vmem:[#allocation87_spill] sm:$0xff] %v6715_v3  ;;  %2520 = vrot.lane.b32.xlu1 %v6386_v15, %s5905_s9  ;;  %v1690_v3 = vrot.slane %v5784_v22, 1  ;;  %3890 = vmatpush2.bf16.msra.mxu0 %v5766_v44 }
  0xcf   : > { %2424 = vrot.lane.b32.xlu0 %v6007_v11, %s5905_s9  ;;  %5623 = vmatpush2.bf16.msra.mxu1 %v5766_v44  ;;  %v6759_v44 = vld [vmem:[%s5957_s22 + $0x44] sm:$0xff]  }
  0xd0   : > { %v6726_v14 = vpop.permute.xlu1 %1618  ;;  %v6744_v16 = vsel %vm1676_vm1, %v1688_v55, %v1690_v3  ;;  %9478 = vst [vmem:[#allocation96_spill] sm:$0xff] %v6759_v44 }
  0xd1   : > { %9469 = vst [vmem:[#allocation88_spill] sm:$0xff] %v6726_v14  ;;  %v6730_v61 = vpop.permute.xlu0 %1616  ;;  %9474 = vst [vmem:[#allocation92_spill] sm:$0xff] %v6744_v16 }
  0xd2   : > { %9470 = vst [vmem:[#allocation89_spill] sm:$0xff] %v6730_v61  ;;  %2075 = vrot.lane.b32.xlu1 %v6286_v13, %s5905_s9 }
  0xd3   : > { %1979 = vrot.lane.b32.xlu0 %v6517_v52, %s5905_s9 }
  0xd4   : > { %v6741_v14 = vpop.permute.xlu1 %1622 }
  0xd5   : > { %9473 = vst [vmem:[#allocation91_spill] sm:$0xff] %v6741_v14  ;;  %v6746_v22 = vpop.permute.xlu0 %1620  ;;  %v1813_v14 = vrot.slane %v6307_v1, 1 }
  0xd6   : > { %9475 = vst [vmem:[#allocation93_spill] sm:$0xff] %v6746_v22  ;;  %2233 = vrot.lane.b32.xlu1 %v6737_v38, %s5902_s23 }
  0xd7   : > { %2137 = vrot.lane.b32.xlu0 %v6744_v16, %s5902_s23 }
  0xd8   : > { %v6752_v13 = vpop.permute.xlu1 %1626 }
  0xd9   : > { %9476 = vst [vmem:[#allocation94_spill] sm:$0xff] %v6752_v13  ;;  %v6754_v0 = vpop.permute.xlu0 %1624 }
  0xda   : > { %9477 = vst [vmem:[#allocation95_spill] sm:$0xff] %v6754_v0  ;;  %2371 = vrot.lane.b32.xlu1 %v6307_v1, %s5904_s30  ;;  %v1812_v0 = vrot.slane %v6313_v54, 1 }
  0xdb   : > { %2275 = vrot.lane.b32.xlu0 %v6759_v44, %s5904_s30 }
  0xdc   : > { %v6763_v55 = vpop.permute.xlu1 %1630 }
  0xdd   : > { %9479 = vst [vmem:[#allocation97_spill] sm:$0xff] %v6763_v55  ;;  %v6765_v3 = vpop.permute.xlu0 %1628 }
  0xde   : > { %9480 = vst [vmem:[#allocation98_spill] sm:$0xff] %v6765_v3  ;;  %1939 = vrot.lane.b32.xlu1 %v6571_v59, %s5904_s30  ;;  %v1692_v3 = vrot.slane %v6695_v51, 1 }
  0xdf   : > { %1843 = vrot.lane.b32.xlu0 %v6582_v4, %s5904_s30  ;;  %v1693_v4 = vrot.slane %v6759_v44, 1 }
  0xe0   : > { %v6771_v48 = vpop.permute.xlu1 %1634 }
  0xe1   : > { %9481 = vst [vmem:[#allocation99_spill] sm:$0xff] %v6771_v48  ;;  %v6773_v13 = vpop.permute.xlu0 %1632  ;;  %v6797_v59 = vsel %vm1676_vm1, %v1692_v3, %v1693_v4 }
  0xe2   : > { %9482 = vst [vmem:[#allocation100_spill] sm:$0xff] %v6773_v13  ;;  %2522 = vrot.lane.b32.xlu1 %v6376_v27, %s5905_s9  ;;  %v6790_v13 = vsel %vm1676_vm1, %v1812_v0, %v1813_v14 }
  0xe3   : > { %2426 = vrot.lane.b32.xlu0 %v5998_v63, %s5905_s9  ;;  %9485 = vst [vmem:[#allocation103_spill] sm:$0xff] %v6790_v13 }
  0xe4   : > { %v6781_v55 = vpop.permute.xlu1 %1638 }
  0xe5   : > { %9483 = vst [vmem:[#allocation101_spill] sm:$0xff] %v6781_v55  ;;  %v6785_v48 = vpop.permute.xlu0 %1636 }
  0xe6   : > { %9484 = vst [vmem:[#allocation102_spill] sm:$0xff] %v6785_v48  ;;  %2077 = vrot.lane.b32.xlu1 %v6277_v5, %s5905_s9 }
  0xe7   : > { %1981 = vrot.lane.b32.xlu0 %v6613_v30, %s5905_s9  ;;  %v5787_v30 = vld [vmem:[%s5957_s22 + $0x4c] ss:$0 sps:$4 sm:$0x11]  }
  0xe8   : > { %v6794_v22 = vpop.permute.xlu1 %1642 }
  0xe9   : > { %9486 = vst [vmem:[#allocation104_spill] sm:$0xff] %v6794_v22  ;;  %v6799_v55 = vpop.permute.xlu0 %1640  ;;  %v6812_v22 = vld [vmem:[%s5957_s22 + $0x50] sm:$0xff]  }
  0xea   : > { %9487 = vst [vmem:[#allocation105_spill] sm:$0xff] %v6799_v55  ;;  %2235 = vrot.lane.b32.xlu1 %v6790_v13, %s5902_s23 }
  0xeb   : > { %2139 = vrot.lane.b32.xlu0 %v6797_v59, %s5902_s23 }
  0xec   : > { %v6805_v5 = vpop.permute.xlu1 %1646 }
  0xed   : > { %v6807_v0 = vpop.permute.xlu0 %1644 }
  0xee   : > { %2373 = vrot.lane.b32.xlu1 %v6334_v10, %s5904_s30 }
  0xef   : > { %2277 = vrot.lane.b32.xlu0 %v6812_v22, %s5904_s30 }
  0xf0   : > { %v6816_v3 = vpop.permute.xlu1 %1650 }
  0xf1   : > { %v6818_v55 = vpop.permute.xlu0 %1648 }
  0xf2   : > { %1941 = vrot.lane.b32.xlu1 %v6662_v19, %s5904_s30  ;;  %v1695_v19 = vrot.slane %v5787_v30, 1 }
  0xf3   : > { %1845 = vrot.lane.b32.xlu0 %v6671_v35, %s5904_s30  ;;  %v6841_v35 = vsel %vm1676_vm1, %v1813_v14, %v1815_v62  ;;  %v6863_v62 = vld [vmem:[%s5957_s22 + $0x58] sm:$0xff]  }
  0xf4   : > { %v6824_v48 = vpop.permute.xlu1 %1654  ;;  %9491 = vst [vmem:[#allocation109_spill] sm:$0xff] %v6841_v35 }
  0xf5   : > { %9488 = vst [vmem:[#allocation106_spill] sm:$0xff] %v6824_v48  ;;  %v6826_v61 = vpop.permute.xlu0 %1652 }
  0xf6   : > { %2524 = vrot.lane.b32.xlu1 %v6405_v40, %s5905_s9 }
  0xf7   : > { %2428 = vrot.lane.b32.xlu0 %v6018_v23, %s5905_s9  ;;  %v6848_v23 = vsel %vm1676_vm1, %v1693_v4, %v1695_v19 }
  0xf8   : > { %v6833_v56 = vpop.permute.xlu1 %1658 }
  0xf9   : > { %9489 = vst [vmem:[#allocation107_spill] sm:$0xff] %v6833_v56  ;;  %v6836_v63 = vpop.permute.xlu0 %1656 }
  0xfa   : > { %9490 = vst [vmem:[#allocation108_spill] sm:$0xff] %v6836_v63  ;;  %2079 = vrot.lane.b32.xlu1 %v6313_v54, %s5905_s9 }
  0xfb   : > { %1983 = vrot.lane.b32.xlu0 %v6695_v51, %s5905_s9 }
  0xfc   : > { %v6845_v9 = vpop.permute.xlu1 %1662 }
  0xfd   : > { %9492 = vst [vmem:[#allocation110_spill] sm:$0xff] %v6845_v9  ;;  %v6850_v40 = vpop.permute.xlu0 %1660  ;;  %v1818_v9 = vrot.slane %v6324_v45, 1 }
  0xfe   : > { %9493 = vst [vmem:[#allocation111_spill] sm:$0xff] %v6850_v40  ;;  %2237 = vrot.lane.b32.xlu1 %v6841_v35, %s5902_s23 }
  0xff   : > { %2141 = vrot.lane.b32.xlu0 %v6848_v23, %s5902_s23 }
 0x100   : > { %v6856_v54 = vpop.permute.xlu1 %1666 }
 0x101   : > { %9494 = vst [vmem:[#allocation112_spill] sm:$0xff] %v6856_v54  ;;  %v6858_v30 = vpop.permute.xlu0 %1664 }
 0x102   : > { %9495 = vst [vmem:[#allocation113_spill] sm:$0xff] %v6858_v30  ;;  %2375 = vrot.lane.b32.xlu1 %v6324_v45, %s5904_s30  ;;  %v1817_v30 = vrot.slane %v6334_v10, 1 }
 0x103   : > { %2279 = vrot.lane.b32.xlu0 %v6863_v62, %s5904_s30 }
 0x104   : > { %v6867_v19 = vpop.permute.xlu1 %1670 }
 0x105   : > { %9496 = vst [vmem:[#allocation114_spill] sm:$0xff] %v6867_v19  ;;  %v6869_v14 = vpop.permute.xlu0 %1668 }
 0x106   : > { %9497 = vst [vmem:[#allocation115_spill] sm:$0xff] %v6869_v14  ;;  %1943 = vrot.lane.b32.xlu1 %v6737_v38, %s5904_s30  ;;  %v1697_v38 = vrot.slane %v6812_v22, 1 }
 0x107   : > { %1847 = vrot.lane.b32.xlu0 %v6744_v16, %s5904_s30  ;;  %v1698_v16 = vrot.slane %v6863_v62, 1 }
 0x108   : > { %v6875_v4 = vpop.permute.xlu1 %1674 }
 0x109   : > { %9498 = vst [vmem:[#allocation116_spill] sm:$0xff] %v6875_v4  ;;  %v6877_v54 = vpop.permute.xlu0 %1672  ;;  %v6902_v40 = vsel %vm1676_vm1, %v1697_v38, %v1698_v16 }
 0x10a   : > { %9499 = vst [vmem:[#allocation117_spill] sm:$0xff] %v6877_v54  ;;  %2526 = vrot.lane.b32.xlu1 %v6398_v8, %s5905_s9  ;;  %v6897_v54 = vsel %vm1676_vm1, %v1817_v30, %v1818_v9 }
 0x10b   : > { %2430 = vrot.lane.b32.xlu0 %v6012_v18, %s5905_s9  ;;  %9500 = vst [vmem:[#allocation118_spill] sm:$0xff] %v6897_v54 }
 0x10c   : > { %v2132_v19 = vpop.permute.xlu1 %2131 }
 0x10d   : > { %v1838_v4 = vpop.permute.xlu0 %1837  ;;  %v3006_v51 = vsel %vm2553_vm2, %v5967_v24, %v2132_v19 }
 0x10e   : > { %2081 = vrot.lane.b32.xlu1 %v6307_v1, %s5905_s9 }
 0x10f   : > { %1985 = vrot.lane.b32.xlu0 %v6759_v44, %s5905_s9  ;;  %v6914_v44 = vld [vmem:[%s5957_s22 + $0x64] sm:$0xff]  }
 0x110   : > { %v2270_v14 = vpop.permute.xlu1 %2269 }
 0x111   : > { %v2228_v56 = vpop.permute.xlu0 %2227  ;;  %v3197_v48 = vsel %vm2682_vm4, %v3006_v51, %v2270_v14 }
 0x112   : > { %2239 = vrot.lane.b32.xlu1 %v6897_v54, %s5902_s23  ;;  %v3150_v30 = vsel %vm2553_vm2, %v6339_v26, %v2228_v56  ;;  %v2651_v56 = vsel %vm2553_vm2, %v6252_v43, %v6807_v0  ;;  %v1820_v43 = vrot.slane %v6345_v17, 1 }
 0x113   : > { %2143 = vrot.lane.b32.xlu0 %v6902_v40, %s5902_s23 }
 0x114   : > { %v1934_v18 = vpop.permute.xlu1 %1933  ;;  %v6946_v0 = vsel %vm1676_vm1, %v1818_v9, %v1820_v43 }
 0x115   : > { %v2366_v1 = vpop.permute.xlu0 %2365  ;;  %9501 = vst [vmem:[#allocation119_spill] sm:$0xff] %v6946_v0 }
 0x116   : > { %2377 = vrot.lane.b32.xlu1 %v6373_v60, %s5904_s30  ;;  %v3293_v38 = vsel %vm2682_vm4, %v3150_v30, %v2366_v1  ;;  %v2780_v30 = vsel %vm2682_vm4, %v2651_v56, %v1934_v18 }
 0x117   : > { %2281 = vrot.lane.b32.xlu0 %v6914_v44, %s5904_s30 }
 0x118   : > { %v2517_v8 = vpop.permute.xlu1 %2516 }
 0x119   : > { %v3469_v63 = vsel %vm2811_vm3, %v3293_v38, %v2517_v8  ;;  %v2421_v27 = vpop.permute.xlu0 %2420  ;;  %v2555_v8 = vsel %vm2553_vm2, %v6465_v12, %v6425_v6 }
 0x11a   : > { %1945 = vrot.lane.b32.xlu1 %v6790_v13, %s5904_s30  ;;  %4275 = vmatprep.mubr.bf16.mxu1 %v3469_v63  ;;  %v3325_v1 = vsel %vm2811_vm3, %v3197_v48, %v2421_v27  ;;  %v2684_v51 = vsel %vm2682_vm4, %v2555_v8, %v1838_v4  ;;  %v5790_v48 = vld [vmem:[%s5957_s22 + $0x60] ss:$0 sps:$4 sm:$0x11]  }
 0x11b   : > { %1849 = vrot.lane.b32.xlu0 %v6797_v59, %s5904_s30  ;;  %3891 = vmatprep.mubr.bf16.mxu0 %v3325_v1  ;;  %v1700_v6 = vrot.slane %v5790_v48, 1 }
 0x11c   : > { %v2072_v24 = vpop.permute.xlu1 %2071 }
 0x11d   : > { %v2957_v63 = vsel %vm2811_vm3, %v2780_v30, %v2072_v24  ;;  %v1976_v19 = vpop.permute.xlu0 %1975  ;;  %v6951_v17 = vsel %vm1676_vm1, %v1698_v16, %v1700_v6  ;;  %v6963_v16 = vld [vmem:[%s5957_s22 + $0x6c] sm:$0xff]  }
 0x11e   : > { %2528 = vrot.lane.b32.xlu1 %v6422_v47, %s5905_s9  ;;  %4276 = vmatmul.mubr.bf16.vlgmr.msra.gmra.mxu1 %v2957_v63  ;;  %v2813_v18 = vsel %vm2811_vm3, %v2684_v51, %v1976_v19  ;;  %9502 = vst [vmem:[#allocation120_spill] sm:$0xff] %v6951_v17  ;;  %v5792_v51 = vld [vmem:[%s5957_s22 + $0x1e8] sm:$0xff]  }
 0x11f   : > { %2432 = vrot.lane.b32.xlu0 %v6030_v41, %s5905_s9  ;;  %3892 = vmatmul.mubr.bf16.vlgmr.msra.gmra.mxu0 %v2813_v18  ;;  %v2653_v19 = vsel %vm2553_vm2, %v5792_v51, %v6805_v5 }
 0x120   : > { %v2230_v27 = vpop.permute.xlu1 %2229 }
 0x121   : > { %v2134_v12 = vpop.permute.xlu0 %2133  ;;  %v3153_v9 = vsel %vm2553_vm2, %v6329_v2, %v2230_v27  ;;  %v2557_v27 = vsel %vm2553_vm2, %v6469_v31, %v6439_v39  ;;  %v1702_v31 = vrot.slane %v6914_v44, 1 }
 0x122   : > { %2083 = vrot.lane.b32.xlu1 %v6334_v10, %s5905_s9  ;;  %v3009_v30 = vsel %vm2553_vm2, %v5974_v28, %v2134_v12 }
 0x123   : > { %1987 = vrot.lane.b32.xlu0 %v6812_v22, %s5905_s9 }
 0x124   : > { %v2368_v14 = vpop.permute.xlu1 %2367 }
 0x125   : > { %v2272_v4 = vpop.permute.xlu0 %2271  ;;  %v3295_v56 = vsel %vm2682_vm4, %v3153_v9, %v2368_v14  ;;  %v1822_v14 = vrot.slane %v6373_v60, 1 }
 0x126   : > { %2241 = vrot.lane.b32.xlu1 %v6946_v0, %s5902_s23  ;;  %v3199_v8 = vsel %vm2682_vm4, %v3009_v30, %v2272_v4  ;;  %v1823_v4 = vrot.slane %v6358_v34, 1 }
 0x127   : > { %2145 = vrot.lane.b32.xlu0 %v6951_v17, %s5902_s23 }
 0x128   : > { %v1936_v38 = vpop.permute.xlu1 %1935  ;;  %v6997_v9 = vsel %vm1676_vm1, %v1822_v14, %v1823_v4 }
 0x129   : > { %v1840_v10 = vpop.permute.xlu0 %1839  ;;  %v2782_v43 = vsel %vm2682_vm4, %v2653_v19, %v1936_v38  ;;  %v1703_v38 = vrot.slane %v6963_v16, 1  ;;  %9503 = vst [vmem:[#allocation121_spill] sm:$0xff] %v6997_v9 }
 0x12a   : > { %2379 = vrot.lane.b32.xlu1 %v6358_v34, %s5904_s30  ;;  %v2686_v6 = vsel %vm2682_vm4, %v2557_v27, %v1840_v10 }
 0x12b   : > { %2283 = vrot.lane.b32.xlu0 %v6963_v16, %s5904_s30 }
 0x12c   : > { %v2519_v1 = vpop.permute.xlu1 %2518 }
 0x12d   : > { %v3472_v24 = vsel %vm2811_vm3, %v3295_v56, %v2519_v1  ;;  %v2423_v63 = vpop.permute.xlu0 %2422  ;;  %v7002_v56 = vsel %vm1676_vm1, %v1702_v31, %v1703_v38  ;;  %v1825_v31 = vrot.slane %v6361_v46, 1 }
 0x12e   : > { %1947 = vrot.lane.b32.xlu1 %v6841_v35, %s5904_s30  ;;  %4283 = vmatprep.mubr.bf16.mxu1 %v3472_v24  ;;  %v3328_v18 = vsel %vm2811_vm3, %v3199_v8, %v2423_v63  ;;  %9504 = vst [vmem:[#allocation122_spill] sm:$0xff] %v7002_v56  ;;  %v7014_v63 = vld [vmem:[%s5957_s22 + $0x78] sm:$0xff]   ;;  %v9534_v35 = vld [vmem:[#allocation3_spill] sm:$0xff] }
 0x12f   : > { %1851 = vrot.lane.b32.xlu0 %v6848_v23, %s5904_s30  ;;  %3899 = vmatprep.mubr.bf16.mxu0 %v3328_v18 }
 0x130   : > { %v2074_v28 = vpop.permute.xlu1 %2073 }
 0x131   : > { %v2960_v48 = vsel %vm2811_vm3, %v2782_v43, %v2074_v28  ;;  %v1978_v12 = vpop.permute.xlu0 %1977 }
 0x132   : > { %2530 = vrot.lane.b32.xlu1 %v6414_v7, %s5905_s9  ;;  %4284 = vmatmul.mubr.bf16.gmra.mxu1 %v2960_v48  ;;  %v2816_v5 = vsel %vm2811_vm3, %v2686_v6, %v1978_v12  ;;  %v2559_v12 = vsel %vm2553_vm2, %v6450_v20, %v6419_v42 }
 0x133   : > { %2434 = vrot.lane.b32.xlu0 %v6024_v33, %s5905_s9  ;;  %3900 = vmatmul.mubr.bf16.gmra.mxu0 %v2816_v5 }
 0x134   : > { %v2232_v39 = vpop.permute.xlu1 %2231 }
 0x135   : > { %v2136_v10 = vpop.permute.xlu0 %2135  ;;  %v3156_v24 = vsel %vm2553_vm2, %v6364_v25, %v2232_v39  ;;  %v5794_v25 = vld [vmem:[%s5957_s22 + $0x1f4] sm:$0xff]  }
 0x136   : > { %2085 = vrot.lane.b32.xlu1 %v6324_v45, %s5905_s9  ;;  %v3012_v19 = vsel %vm2553_vm2, %v5994_v58, %v2136_v10  ;;  %v2655_v27 = vsel %vm2553_vm2, %v5794_v25, %v6818_v55 }
 0x137   : > { %1989 = vrot.lane.b32.xlu0 %v6863_v62, %s5905_s9 }
 0x138   : > { %v2370_v34 = vpop.permute.xlu1 %2369 }
 0x139   : > { %v2274_v1 = vpop.permute.xlu0 %2273  ;;  %v3297_v8 = vsel %vm2682_vm4, %v3156_v24, %v2370_v34  ;;  %v5795_v34 = vld [vmem:[%s5957_s22 + $0x74] ss:$0 sps:$4 sm:$0x11]  }
 0x13a   : > { %2243 = vrot.lane.b32.xlu1 %v6997_v9, %s5902_s23  ;;  %v3201_v43 = vsel %vm2682_vm4, %v3012_v19, %v2274_v1  ;;  %v1705_v42 = vrot.slane %v5795_v34, 1  ;;  %v7046_v1 = vsel %vm1676_vm1, %v1823_v4, %v1825_v31  ;;  %v7095_v34 = vld [vmem:[%s5957_s22 + $0x24c] sm:$0xff]  }
 0x13b   : > { %2147 = vrot.lane.b32.xlu0 %v7002_v56, %s5902_s23  ;;  %9505 = vst [vmem:[#allocation123_spill] sm:$0xff] %v7046_v1 }
 0x13c   : > { %v1938_v30 = vpop.permute.xlu1 %1937  ;;  %v7051_v46 = vsel %vm1676_vm1, %v1703_v38, %v1705_v42  ;;  %v7063_v38 = vld [vmem:[%s5957_s22 + $0x80] sm:$0xff]  }
 0x13d   : > { %v1842_v45 = vpop.permute.xlu0 %1841  ;;  %v2784_v6 = vsel %vm2682_vm4, %v2655_v27, %v1938_v30  ;;  %9506 = vst [vmem:[#allocation124_spill] sm:$0xff] %v7051_v46  ;;  %v1708_v31 = vrot.slane %v7063_v38, 1 }
 0x13e   : > { %2381 = vrot.lane.b32.xlu1 %v6392_v29, %s5904_s30  ;;  %v2688_v14 = vsel %vm2682_vm4, %v2559_v12, %v1842_v45 }
 0x13f   : > { %2285 = vrot.lane.b32.xlu0 %v7014_v63, %s5904_s30 }
 0x140   : > { %v2521_v51 = vpop.permute.xlu1 %2520 }
 0x141   : > { %v3475_v18 = vsel %vm2811_vm3, %v3297_v8, %v2521_v51  ;;  %v2425_v28 = vpop.permute.xlu0 %2424 }
 0x142   : > { %1949 = vrot.lane.b32.xlu1 %v6897_v54, %s5904_s30  ;;  %4291 = vmatprep.mubr.bf16.mxu1 %v3475_v18  ;;  %v3331_v48 = vsel %vm2811_vm3, %v3201_v43, %v2425_v28 }
 0x143   : > { %1853 = vrot.lane.b32.xlu0 %v6902_v40, %s5904_s30  ;;  %3907 = vmatprep.mubr.bf16.mxu0 %v3331_v48 }
 0x144   : > { %v2076_v58 = vpop.permute.xlu1 %2075 }
 0x145   : > { %v2963_v5 = vsel %vm2811_vm3, %v2784_v6, %v2076_v58  ;;  %v1980_v39 = vpop.permute.xlu0 %1979  ;;  %v2561_v6 = vsel %vm2553_vm2, %v6454_v36, %v6434_v21  ;;  %v1707_v36 = vrot.slane %v7014_v63, 1 }
 0x146   : > { %2532 = vrot.lane.b32.xlu1 %v6437_v53, %s5905_s9  ;;  %4292 = vmatmul.mubr.bf16.gmra.mxu1 %v2963_v5  ;;  %v2819_v55 = vsel %vm2811_vm3, %v2688_v14, %v1980_v39  ;;  %v1827_v14 = vrot.slane %v6392_v29, 1  ;;  %v1828_v39 = vrot.slane %v6379_v50, 1 }
 0x147   : > { %2436 = vrot.lane.b32.xlu0 %v6044_v57, %s5905_s9  ;;  %3908 = vmatmul.mubr.bf16.gmra.mxu0 %v2819_v55  ;;  %v9507_v55 = vld [vmem:[#allocation5_spill] sm:$0xff]  ;;  %v7105_v42 = vsel %vm1676_vm1, %v1707_v36, %v1708_v31 }
 0x148   : > { %v2234_v10 = vpop.permute.xlu1 %2233  ;;  %v7100_v29 = vsel %vm1676_vm1, %v1827_v14, %v1828_v39  ;;  %9509 = vst [vmem:[#allocation125_spill] sm:$0xff] %v7105_v42 }
 0x149   : > { %v2138_v20 = vpop.permute.xlu0 %2137  ;;  %v3159_v4 = vsel %vm2553_vm2, %v6351_v32, %v2234_v10  ;;  %v5797_v32 = vld [vmem:[%s5957_s22 + $0x1fc] sm:$0xff]   ;;  %9508 = vst [vmem:[#allocation5_spill] sm:$0xff] %v7100_v29 }
 0x14a   : > { %2087 = vrot.lane.b32.xlu1 %v6373_v60, %s5905_s9  ;;  %v3015_v19 = vsel %vm2553_vm2, %v5986_v49, %v2138_v20  ;;  %v2657_v25 = vsel %vm2553_vm2, %v5797_v32, %v6816_v3 }
 0x14b   : > { %1991 = vrot.lane.b32.xlu0 %v6914_v44, %s5905_s9 }
 0x14c   : > { %v2372_v30 = vpop.permute.xlu1 %2371 }
 0x14d   : > { %v2276_v45 = vpop.permute.xlu0 %2275  ;;  %v3299_v8 = vsel %vm2682_vm4, %v3159_v4, %v2372_v30 }
 0x14e   : > { %2245 = vrot.lane.b32.xlu1 %v7046_v1, %s5902_s23  ;;  %v3203_v43 = vsel %vm2682_vm4, %v3015_v19, %v2276_v45 }
 0x14f   : > { %2149 = vrot.lane.b32.xlu0 %v7051_v46, %s5902_s23 }
 0x150   : > { %v1940_v24 = vpop.permute.xlu1 %1939 }
 0x151   : > { %v1844_v60 = vpop.permute.xlu0 %1843  ;;  %v2786_v48 = vsel %vm2682_vm4, %v2657_v25, %v1940_v24  ;;  %v9510_v24 = vld [vmem:[#allocation47_spill] sm:$0xff] }
 0x152   : > { %2383 = vrot.lane.b32.xlu1 %v6379_v50, %s5904_s30  ;;  %v2690_v12 = vsel %vm2682_vm4, %v2561_v6, %v1844_v60 }
 0x153   : > { %2287 = vrot.lane.b32.xlu0 %v7063_v38, %s5904_s30 }
 0x154   : > { %v2523_v51 = vpop.permute.xlu1 %2522 }
 0x155   : > { %v3478_v18 = vsel %vm2811_vm3, %v3299_v8, %v2523_v51  ;;  %v2427_v28 = vpop.permute.xlu0 %2426  ;;  %v7117_v8 = vld [vmem:[%s5957_s22 + $0x8c] sm:$0xff]  }
 0x156   : > { %1951 = vrot.lane.b32.xlu1 %v6946_v0, %s5904_s30  ;;  %4299 = vmatprep.mubr.bf16.mxu1 %v3478_v18  ;;  %v3334_v27 = vsel %vm2811_vm3, %v3203_v43, %v2427_v28 }
 0x157   : > { %1855 = vrot.lane.b32.xlu0 %v6951_v17, %s5904_s30  ;;  %3915 = vmatprep.mubr.bf16.mxu0 %v3334_v27 }
 0x158   : > { %v2078_v49 = vpop.permute.xlu1 %2077 }
 0x159   : > { %v2966_v58 = vsel %vm2811_vm3, %v2786_v48, %v2078_v49  ;;  %v1982_v5 = vpop.permute.xlu0 %1981  ;;  %v9511_v48 = vld [vmem:[#allocation51_spill] sm:$0xff] }
 0x15a   : > { %2534 = vrot.lane.b32.xlu1 %v6430_v37, %s5905_s9  ;;  %4300 = vmatmul.mubr.bf16.gmra.mxu1 %v2966_v58  ;;  %v2822_v3 = vsel %vm2811_vm3, %v2690_v12, %v1982_v5  ;;  %v2563_v49 = vsel %vm2553_vm2, %v6517_v52, %v9511_v48  ;;  %v9512_v12 = vld [vmem:[#allocation50_spill] sm:$0xff]  ;;  %v5802_v52 = vld [vmem:[%s5957_s22 + $0x88] ss:$0 sps:$4 sm:$0x11]   ;;  %v5806_v48 = vld [vmem:[%s5957_s22 + $0x210] sm:$0xff]  }
 0x15b   : > { %2438 = vrot.lane.b32.xlu0 %v9507_v55, %s5905_s9  ;;  %3916 = vmatmul.mubr.bf16.gmra.mxu0 %v2822_v3  ;;  %v5801_v3 = vld [vmem:[%s5957_s22 + $0x268] ss:$0 sps:$4 sm:$0x11]  }
 0x15c   : > { %v2236_v21 = vpop.permute.xlu1 %2235  ;;  %v1830_v14 = vrot.slane %v5801_v3, 1  ;;  %v9519_v3 = vld [vmem:[#allocation49_spill] sm:$0xff] }
 0x15d   : > { %v2140_v10 = vpop.permute.xlu0 %2139  ;;  %v3162_v60 = vsel %vm2553_vm2, %v6386_v15, %v2236_v21  ;;  %v5800_v15 = vld [vmem:[%s5957_s22 + $0x208] sm:$0xff]  }
 0x15e   : > { %2089 = vrot.lane.b32.xlu1 %v7095_v34, %s5905_s9  ;;  %v3018_v19 = vsel %vm2553_vm2, %v6007_v11, %v2140_v10  ;;  %v2659_v32 = vsel %vm2553_vm2, %v5800_v15, %v6826_v61  ;;  %v9513_v21 = vld [vmem:[#allocation7_spill] sm:$0xff]  ;;  %v1710_v10 = vrot.slane %v5802_v52, 1  ;;  %v9517_v15 = vld [vmem:[#allocation2_spill] sm:$0xff] }
 0x15f   : > { %1993 = vrot.lane.b32.xlu0 %v6963_v16, %s5905_s9 }
 0x160   : > { %v2374_v50 = vpop.permute.xlu1 %2373 }
 0x161   : > { %v2278_v20 = vpop.permute.xlu0 %2277  ;;  %v3301_v4 = vsel %vm2682_vm4, %v3162_v60, %v2374_v50 }
 0x162   : > { %2247 = vrot.lane.b32.xlu1 %v7100_v29, %s5902_s23  ;;  %v3205_v43 = vsel %vm2682_vm4, %v3018_v19, %v2278_v20  ;;  %v7147_v20 = vld [vmem:[%s5957_s22 + $0x258] sm:$0xff]  }
 0x163   : > { %2151 = vrot.lane.b32.xlu0 %v7105_v42, %s5902_s23  ;;  %v7164_v19 = vld [vmem:[%s5957_s22 + $0x274] sm:$0xff]  }
 0x164   : > { %v1942_v30 = vpop.permute.xlu1 %1941 }
 0x165   : > { %v1846_v45 = vpop.permute.xlu0 %1845  ;;  %v2788_v27 = vsel %vm2682_vm4, %v2659_v32, %v1942_v30  ;;  %v7152_v30 = vsel %vm1676_vm1, %v1828_v39, %v1830_v14  ;;  %v9516_v39 = vld [vmem:[#allocation44_spill] sm:$0xff]  ;;  %v9520_v14 = vld [vmem:[#allocation70_spill] sm:$0xff] }
 0x166   : > { %2385 = vrot.lane.b32.xlu1 %v9510_v24, %s5904_s30  ;;  %v2692_v58 = vsel %vm2682_vm4, %v2563_v49, %v1846_v45  ;;  %9514 = vst [vmem:[#allocation47_spill] sm:$0xff] %v7152_v30  ;;  %v7157_v24 = vsel %vm1676_vm1, %v1708_v31, %v1710_v10  ;;  %v9518_v49 = vld [vmem:[#allocation106_spill] sm:$0xff] }
 0x167   : > { %2289 = vrot.lane.b32.xlu0 %v7117_v8, %s5904_s30  ;;  %9515 = vst [vmem:[#allocation51_spill] sm:$0xff] %v7157_v24 }
 0x168   : > { %v2525_v51 = vpop.permute.xlu1 %2524 }
 0x169   : > { %v3481_v18 = vsel %vm2811_vm3, %v3301_v4, %v2525_v51  ;;  %v2429_v28 = vpop.permute.xlu0 %2428 }
 0x16a   : > { %1953 = vrot.lane.b32.xlu1 %v6997_v9, %s5904_s30  ;;  %4307 = vmatprep.mubr.bf16.mxu1 %v3481_v18  ;;  %v3337_v25 = vsel %vm2811_vm3, %v3205_v43, %v2429_v28  ;;  %v7172_v43 = vld [vmem:[%s5957_s22 + $0x94] sm:$0xff]  }
 0x16b   : > { %1857 = vrot.lane.b32.xlu0 %v7002_v56, %s5904_s30  ;;  %3923 = vmatprep.mubr.bf16.mxu0 %v3337_v25 }
 0x16c   : > { %v2080_v11 = vpop.permute.xlu1 %2079 }
 0x16d   : > { %v2969_v6 = vsel %vm2811_vm3, %v2788_v27, %v2080_v11  ;;  %v1984_v61 = vpop.permute.xlu0 %1983 }
 0x16e   : > { %2536 = vrot.lane.b32.xlu1 %v9512_v12, %s5905_s9  ;;  %4308 = vmatmul.mubr.bf16.gmra.mxu1 %v2969_v6  ;;  %v2825_v5 = vsel %vm2811_vm3, %v2692_v58, %v1984_v61  ;;  %v2661_v6 = vsel %vm2553_vm2, %v5806_v48, %v9518_v49  ;;  %v7220_v48 = vld [vmem:[%s6892_s25 + $0x8] sm:$0xff]  }
 0x16f   : > { %2440 = vrot.lane.b32.xlu0 %v9513_v21, %s5905_s9  ;;  %3924 = vmatmul.mubr.bf16.gmra.mxu0 %v2825_v5 }
 0x170   : > { %v2238_v36 = vpop.permute.xlu1 %2237 }
 0x171   : > { %v2142_v50 = vpop.permute.xlu0 %2141  ;;  %v3165_v18 = vsel %vm2553_vm2, %v9516_v39, %v2238_v36  ;;  %v2565_v36 = vsel %vm2553_vm2, %v9520_v14, %v9519_v3  ;;  %v2114_v14 = vshll.u32 %v7220_v48, 16 }
 0x172   : > { %2091 = vrot.lane.b32.xlu1 %v7147_v20, %s5905_s9  ;;  %v3021_v32 = vsel %vm2553_vm2, %v9517_v15, %v2142_v50  ;;  %v1712_v15 = vrot.slane %v7117_v8, 1 }
 0x173   : > { %1995 = vrot.lane.b32.xlu0 %v7014_v63, %s5905_s9 }
 0x174   : > { %v2376_v45 = vpop.permute.xlu1 %2375 }
 0x175   : > { %v2280_v60 = vpop.permute.xlu0 %2279  ;;  %v3303_v31 = vsel %vm2682_vm4, %v3165_v18, %v2376_v45  ;;  %v9521_v45 = vld [vmem:[#allocation48_spill] sm:$0xff]  ;;  %v9357_v18 = vrot.slane %v7164_v19, 1 }
 0x176   : > { %2249 = vrot.lane.b32.xlu1 %v7152_v30, %s5902_s23  ;;  %v3207_v27 = vsel %vm2682_vm4, %v3021_v32, %v2280_v60  ;;  %v9356_v32 = vrot.slane %v7172_v43, 1 }
 0x177   : > { %2153 = vrot.lane.b32.xlu0 %v7157_v24, %s5902_s23 }
 0x178   : > { %v1944_v4 = vpop.permute.xlu1 %1943 }
 0x179   : > { %v1848_v51 = vpop.permute.xlu0 %1847  ;;  %v2790_v61 = vsel %vm2682_vm4, %v2661_v6, %v1944_v4  ;;  %v7198_v4 = vld [vmem:[%s5957_s22 + $0x26c] sm:$0xff]  }
 0x17a   : > { %2387 = vrot.lane.b32.xlu1 %v7164_v19, %s5904_s30  ;;  %v2694_v10 = vsel %vm2682_vm4, %v2565_v36, %v1848_v51  ;;  %v1832_v39 = vrot.slane %v7198_v4, 1 }
 0x17b   : > { %2291 = vrot.lane.b32.xlu0 %v7172_v43, %s5904_s30 }
 0x17c   : > { %v2527_v28 = vpop.permute.xlu1 %2526 }
 0x17d   : > { %v3484_v25 = vsel %vm2811_vm3, %v3303_v31, %v2527_v28  ;;  %v2431_v11 = vpop.permute.xlu0 %2430  ;;  %v7203_v31 = vld [vmem:[%s6892_s25] sm:$0xff]  }
 0x17e   : > { %1955 = vrot.lane.b32.xlu1 %v7046_v1, %s5904_s30  ;;  %4315 = vmatprep.mubr.bf16.mxu1 %v3484_v25  ;;  %v3340_v58 = vsel %vm2811_vm3, %v3207_v27, %v2431_v11  ;;  %v9522_v28 = vld [vmem:[#allocation6_spill] sm:$0xff]  ;;  %v7217_v11 = vsel %vm1676_vm1, %v1832_v39, %v9357_v18  ;;  %v2109_v49 = vshll.u32 %v7203_v31, 16  ;;  %v2116_v39 = vrot.slane %v2114_v14, 1  ;;  %v9525_v18 = vld [vmem:[#allocation4_spill] sm:$0xff] }
 0x17f   : > { %1859 = vrot.lane.b32.xlu0 %v7051_v46, %s5904_s30  ;;  %3931 = vmatprep.mubr.bf16.mxu0 %v3340_v58  ;;  %v7210_v27 = vld [vmem:[%s5957_s22 + $0x260] sm:$0xff]   ;;  %9523 = vst [vmem:[#allocation50_spill] sm:$0xff] %v7217_v11  ;;  %v7228_v58 = vsel %vm1676_vm1, %v1712_v15, %v9356_v32 }
 0x180   : > { %v2082_v5 = vpop.permute.xlu1 %2081  ;;  %v2111_v3 = vrot.slane %v2109_v49, 1  ;;  %v7242_v32 = vld [vmem:[%s5957_s22 + $0xa0] sm:$0xff]  }
 0x181   : > { %v2972_v52 = vsel %vm2811_vm3, %v2790_v61, %v2082_v5  ;;  %v1986_v50 = vpop.permute.xlu0 %1985  ;;  %v2107_v5 = vshrl.u32 %v7203_v31, 16 }
 0x182   : > { %2538 = vrot.lane.b32.xlu1 %v9521_v45, %s5905_s9  ;;  %4316 = vmatmul.mubr.bf16.gmra.mxu1 %v2972_v52  ;;  %v2828_v60 = vsel %vm2811_vm3, %v2694_v10, %v1986_v50  ;;  %v9524_v10 = vld [vmem:[#allocation46_spill] sm:$0xff] }
 0x183   : > { %2442 = vrot.lane.b32.xlu0 %v9522_v28, %s5905_s9  ;;  %3932 = vmatmul.mubr.bf16.gmra.mxu0 %v2828_v60  ;;  %v2112_v60 = vor.u32 %v2111_v3, %v2107_v5 }
 0x184   : > { %v2240_v51 = vpop.permute.xlu1 %2239 }
 0x185   : > { %v2144_v25 = vpop.permute.xlu0 %2143  ;;  %v3168_v50 = vsel %vm2553_vm2, %v9524_v10, %v2240_v51  ;;  %v5810_v51 = vld [vmem:[%s5957_s22 + $0x21c] sm:$0xff]   ;;  %v7257_v14 = vsel %vm907_vm0, %v2112_v60, %v2116_v39 }
 0x186   : > { %2093 = vrot.lane.b32.xlu1 %v7210_v27, %s5905_s9  ;;  %v3024_v1 = vsel %vm2553_vm2, %v9525_v18, %v2144_v25  ;;  %v5773_v18 = vld [vmem:[%s9251_s2 + $0x88] sm:$0xff]   ;;  %v9527_v25 = vld [vmem:[#allocation53_spill] sm:$0xff] }
 0x187   : > { %1997 = vrot.lane.b32.xlu0 %v7063_v38, %s5905_s9  ;;  %5460 = vmatprep.subr.bf16.mxu1 %v5773_v18  ;;  %v5811_v60 = vld [vmem:[%s5957_s22 + $0x27c] ss:$0 sps:$4 sm:$0x11]  }
 0x188   : > { %v2378_v6 = vpop.permute.xlu1 %2377  ;;  %5461 = vmatpush3.bf16.msra.mxu1 %v5773_v18 }
 0x189   : > { %v2282_v61 = vpop.permute.xlu0 %2281  ;;  %v3305_v15 = vsel %vm2682_vm4, %v3168_v50, %v2378_v6  ;;  %v9526_v6 = vld [vmem:[#allocation108_spill] sm:$0xff] }
 0x18a   : > { %2251 = vrot.lane.b32.xlu1 %v7217_v11, %s5902_s23  ;;  %v3209_v0 = vsel %vm2682_vm4, %v3024_v1, %v2282_v61  ;;  %v2663_v5 = vsel %vm2553_vm2, %v5810_v51, %v9526_v6  ;;  %v9528_v61 = vld [vmem:[#allocation83_spill] sm:$0xff]  ;;  %v5812_v6 = vld [vmem:[%s5957_s22 + $0x9c] ss:$0 sps:$4 sm:$0x11]  }
 0x18b   : > { %2155 = vrot.lane.b32.xlu0 %v7228_v58, %s5902_s23  ;;  %v2567_v10 = vsel %vm2553_vm2, %v9528_v61, %v9527_v25  ;;  %v9532_v25 = vrot.slane %v7172_v43, 1 }
 0x18c   : > { %v1946_v36 = vpop.permute.xlu1 %1945 }
 0x18d   : > { %v1850_v52 = vpop.permute.xlu0 %1849  ;;  %v2792_v1 = vsel %vm2682_vm4, %v2663_v5, %v1946_v36  ;;  %v1715_v5 = vrot.slane %v5812_v6, 1 }
 0x18e   : > { %2389 = vrot.lane.b32.xlu1 %v7203_v31, %s5904_s30 }
 0x18f   : > { %2293 = vrot.lane.b32.xlu0 %v7242_v32, %s5904_s30  ;;  %v7292_v61 = vsel %vm1676_vm1, %v9532_v25, %v1715_v5  ;;  %v7306_v25 = vld [vmem:[%s5957_s22 + $0xa8] sm:$0xff]  }
 0x190   : > { %v2529_v49 = vpop.permute.xlu1 %2528 }
 0x191   : > { %v3487_v9 = vsel %vm2811_vm3, %v3305_v15, %v2529_v49  ;;  %v2433_v54 = vpop.permute.xlu0 %2432  ;;  %v1835_v15 = vrot.slane %v5811_v60, 1  ;;  %v9529_v49 = vld [vmem:[#allocation9_spill] sm:$0xff] }
 0x192   : > { %1957 = vrot.lane.b32.xlu1 %v7100_v29, %s5904_s30  ;;  %4323 = vmatprep.mubr.bf16.mxu1 %v3487_v9  ;;  %v3343_v3 = vsel %vm2811_vm3, %v3209_v0, %v2433_v54  ;;  %v2696_v0 = vsel %vm2682_vm4, %v2567_v10, %v1850_v52  ;;  %v9530_v52 = vrot.slane %v7164_v19, 1  ;;  %v9533_v60 = vld [vmem:[#allocation45_spill] sm:$0xff] }
 0x193   : > { %1861 = vrot.lane.b32.xlu0 %v7105_v42, %s5904_s30  ;;  %3939 = vmatprep.mubr.bf16.mxu0 %v3343_v3 }
 0x194   : > { %v2084_v9 = vpop.permute.xlu1 %2083 }
 0x195   : > { %v2975_v54 = vsel %vm2811_vm3, %v2792_v1, %v2084_v9  ;;  %v1988_v50 = vpop.permute.xlu0 %1987  ;;  %v7282_v1 = vsel %vm1676_vm1, %v9530_v52, %v1835_v15  ;;  %v7285_v9 = vld [vmem:[%s6892_s25 + $0x10] ss:$0 sps:$4 sm:$0x11]  }
 0x196   : > { %2540 = vrot.lane.b32.xlu1 %v7257_v14, %s5905_s9  ;;  %4324 = vmatmul.mubr.bf16.gmra.mxu1 %v2975_v54  ;;  %v2831_v36 = vsel %vm2811_vm3, %v2696_v0, %v1988_v50  ;;  %9531 = vst [vmem:[#allocation7_spill] sm:$0xff] %v7282_v1  ;;  %v2118_v54 = vshrl.u32 %v7220_v48, 16  ;;  %v2122_v0 = vshll.u32 %v7285_v9, 16 }
 0x197   : > { %2444 = vrot.lane.b32.xlu0 %v9529_v49, %s5905_s9  ;;  %3940 = vmatmul.mubr.bf16.gmra.mxu0 %v2831_v36 }
 0x198   : > { %v2242_v51 = vpop.permute.xlu1 %2241  ;;  %v2120_v6 = vor.u32 %v2118_v54, %v2116_v39  ;;  %v2124_v5 = vrot.slane %v2122_v0, 1  ;;  %v5814_v39 = vld [vmem:[%s5957_s22 + $0x224] sm:$0xff]  }
 0x199   : > { %v2146_v3 = vpop.permute.xlu0 %2145  ;;  %v3171_v15 = vsel %vm2553_vm2, %v9533_v60, %v2242_v51  ;;  %v9535_v51 = vld [vmem:[#allocation107_spill] sm:$0xff] }
 0x19a   : > { %2095 = vrot.lane.b32.xlu1 %v7198_v4, %s5905_s9  ;;  %v3027_v2 = vsel %vm2553_vm2, %v9534_v35, %v2146_v3  ;;  %v7321_v0 = vsel %vm907_vm0, %v2120_v6, %v2124_v5  ;;  %v9537_v3 = vld [vmem:[#allocation96_spill] sm:$0xff] }
 0x19b   : > { %1999 = vrot.lane.b32.xlu0 %v7117_v8, %s5905_s9  ;;  %v5770_v6 = vld [vmem:[%s6892_s25 + $0x14] sm:$0xff]  }
 0x19c   : > { %v2380_v18 = vpop.permute.xlu1 %2379  ;;  %v9538_v5 = vld [vmem:[#allocation8_spill] sm:$0xff] }
 0x19d   : > { %v2284_v10 = vpop.permute.xlu0 %2283  ;;  %v3307_v52 = vsel %vm2682_vm4, %v3171_v15, %v2380_v18  ;;  %v2665_v18 = vsel %vm2553_vm2, %v5814_v39, %v9535_v51  ;;  %v2127_v15 = vrot.slane %v7220_v48, 1  ;;  %v1718_v39 = vrot.slane %v7306_v25, 1 }
 0x19e   : > { %2253 = vrot.lane.b32.xlu1 %v7282_v1, %s5902_s23  ;;  %v3211_v26 = vsel %vm2682_vm4, %v3027_v2, %v2284_v10 }
 0x19f   : > { %2157 = vrot.lane.b32.xlu0 %v7292_v61, %s5902_s23 }
 0x1a0   : > { %v1948_v50 = vpop.permute.xlu1 %1947 }
 0x1a1   : > { %v1852_v36 = vpop.permute.xlu0 %1851  ;;  %v2794_v35 = vsel %vm2682_vm4, %v2665_v18, %v1948_v50  ;;  %v2126_v50 = vrot.slane %v7203_v31, 1 }
 0x1a2   : > { %2391 = vrot.lane.b32.xlu1 %v7220_v48, %s5904_s30 }
 0x1a3   : > { %2295 = vrot.lane.b32.xlu0 %v7306_v25, %s5904_s30  ;;  %v7344_v18 = vsel %vm1676_vm1, %v2126_v50, %v2127_v15 }
 0x1a4   : > { %v2531_v29 = vpop.permute.xlu1 %2530  ;;  %9539 = vst [vmem:[#allocation44_spill] sm:$0xff] %v7344_v18 }
 0x1a5   : > { %v3490_v13 = vsel %vm2811_vm3, %v3307_v52, %v2531_v29  ;;  %v2435_v42 = vpop.permute.xlu0 %2434  ;;  %v9536_v29 = vld [vmem:[#allocation52_spill] sm:$0xff] }
 0x1a6   : > { %1959 = vrot.lane.b32.xlu1 %v7152_v30, %s5904_s30  ;;  %4331 = vmatprep.mubr.bf16.mxu1 %v3490_v13  ;;  %v3346_v54 = vsel %vm2811_vm3, %v3211_v26, %v2435_v42  ;;  %v2569_v13 = vsel %vm2553_vm2, %v9537_v3, %v9536_v29 }
 0x1a7   : > { %1863 = vrot.lane.b32.xlu0 %v7157_v24, %s5904_s30  ;;  %3947 = vmatprep.mubr.bf16.mxu0 %v3346_v54  ;;  %v2698_v60 = vsel %vm2682_vm4, %v2569_v13, %v1852_v36  ;;  %v1717_v36 = vrot.slane %v7242_v32, 1  ;;  %v7347_v54 = vld [vmem:[%s6892_s25 + $0x1c] sm:$0xff]   ;;  %v2401_v13 = vshrl.u32 %v5770_v6, 16 }
 0x1a8   : > { %v2086_v2 = vpop.permute.xlu1 %2085 }
 0x1a9   : > { %v2978_v10 = vsel %vm2811_vm3, %v2794_v35, %v2086_v2  ;;  %v1990_v26 = vpop.permute.xlu0 %1989  ;;  %v2403_v35 = vshll.u32 %v5770_v6, 16  ;;  %v7352_v29 = vsel %vm1676_vm1, %v1717_v36, %v1718_v39 }
 0x1aa   : > { %2542 = vrot.lane.b32.xlu1 %v7321_v0, %s5905_s9  ;;  %4332 = vmatmul.mubr.bf16.gmra.mxu1 %v2978_v10  ;;  %v2834_v42 = vsel %vm2811_vm3, %v2698_v60, %v1990_v26  ;;  %v2408_v60 = vshll.u32 %v7347_v54, 16 }
 0x1ab   : > { %2446 = vrot.lane.b32.xlu0 %v9538_v5, %s5905_s9  ;;  %3948 = vmatmul.mubr.bf16.gmra.mxu0 %v2834_v42  ;;  %v2405_v10 = vrot.slane %v2403_v35, 1 }
 0x1ac   : > { %v2244_v52 = vpop.permute.xlu1 %2243  ;;  %v2410_v30 = vrot.slane %v2408_v60, 1 }
 0x1ad   : > { %v2148_v51 = vpop.permute.xlu0 %2147  ;;  %v3174_v50 = vsel %vm2553_vm2, %v6422_v47, %v2244_v52  ;;  %v2406_v36 = vor.u32 %v2405_v10, %v2401_v13  ;;  %v5816_v47 = vld [vmem:[%s5957_s22 + $0x230] sm:$0xff]   ;;  %v9540_v52 = vld [vmem:[#allocation111_spill] sm:$0xff] }
 0x1ae   : > { %2097 = vrot.lane.b32.xlu1 %v7164_v19, %s5905_s9  ;;  %v3030_v46 = vsel %vm2553_vm2, %v6030_v41, %v2148_v51 }
 0x1af   : > { %2001 = vrot.lane.b32.xlu0 %v7172_v43, %s5905_s9  ;;  %v2411_v10 = vsel %vm907_vm0, %v2406_v36, %v2410_v30 }
 0x1b0   : > { %v2382_v2 = vpop.permute.xlu1 %2381 }
 0x1b1   : > { %v2286_v3 = vpop.permute.xlu0 %2285  ;;  %v3309_v24 = vsel %vm2682_vm4, %v3174_v50, %v2382_v2  ;;  %v2667_v2 = vsel %vm2553_vm2, %v5816_v47, %v9540_v52  ;;  %v9542_v50 = vld [vmem:[#allocation11_spill] sm:$0xff]  ;;  %v5772_v47 = vld [vmem:[%s6892_s25 + $0x24] ss:$0 sps:$4 sm:$0x11]  }
 0x1b2   : > { %2255 = vrot.lane.b32.xlu1 %v7344_v18, %s5902_s23  ;;  %v7364_v18 = vld [vmem:[%s5957_s22 + $0xb4] sm:$0xff]  }
 0x1b3   : > { %2159 = vrot.lane.b32.xlu0 %v7352_v29, %s5902_s23 }
 0x1b4   : > { %v1950_v26 = vpop.permute.xlu1 %1949 }
 0x1b5   : > { %v1854_v42 = vpop.permute.xlu0 %1853  ;;  %v2796_v41 = vsel %vm2682_vm4, %v2667_v2, %v1950_v26  ;;  %v2129_v26 = vrot.slane %v7285_v9, 1 }
 0x1b6   : > { %2393 = vrot.lane.b32.xlu1 %v5770_v6, %s5904_s30  ;;  %v3213_v6 = vsel %vm2682_vm4, %v3030_v46, %v2286_v3 }
 0x1b7   : > { %2297 = vrot.lane.b32.xlu0 %v7364_v18, %s5904_s30 }
 0x1b8   : > { %v2533_v35 = vpop.permute.xlu1 %2532 }
 0x1b9   : > { %v3493_v56 = vsel %vm2811_vm3, %v3309_v24, %v2533_v35  ;;  %v2437_v17 = vpop.permute.xlu0 %2436  ;;  %v9541_v24 = vld [vmem:[#allocation56_spill] sm:$0xff] }
 0x1ba   : > { %1961 = vrot.lane.b32.xlu1 %v7217_v11, %s5904_s30  ;;  %4339 = vmatprep.mubr.bf16.mxu1 %v3493_v56  ;;  %v3349_v13 = vsel %vm2811_vm3, %v3213_v6, %v2437_v17  ;;  %v2571_v56 = vsel %vm2553_vm2, %v6812_v22, %v9541_v24  ;;  %v5817_v35 = vld [vmem:[%s5957_s22 + $0xb0] ss:$0 sps:$4 sm:$0x11]  }
 0x1bb   : > { %1865 = vrot.lane.b32.xlu0 %v7228_v58, %s5904_s30  ;;  %3955 = vmatprep.mubr.bf16.mxu0 %v3349_v13  ;;  %v2700_v3 = vsel %vm2682_vm4, %v2571_v56, %v1854_v42  ;;  %v1720_v22 = vrot.slane %v5817_v35, 1  ;;  %v7396_v42 = vsel %vm1676_vm1, %v2127_v15, %v2129_v26  ;;  %v2412_v13 = vshrl.u32 %v7347_v54, 16  ;;  %v7415_v56 = vld [vmem:[%s5957_s22 + $0xbc] sm:$0xff]  }
 0x1bc   : > { %v2088_v46 = vpop.permute.xlu1 %2087  ;;  %9543 = vst [vmem:[#allocation2_spill] sm:$0xff] %v7396_v42  ;;  %v9544_v26 = vld [vmem:[#allocation110_spill] sm:$0xff] }
 0x1bd   : > { %v2981_v51 = vsel %vm2811_vm3, %v2796_v41, %v2088_v46  ;;  %v1992_v17 = vpop.permute.xlu0 %1991  ;;  %v7402_v52 = vsel %vm1676_vm1, %v1718_v39, %v1720_v22  ;;  %v2414_v41 = vor.u32 %v2412_v13, %v2410_v30  ;;  %v5819_v30 = vld [vmem:[%s5957_s22 + $0x238] sm:$0xff]  }
 0x1be   : > { %2544 = vrot.lane.b32.xlu1 %v2411_v10, %s5905_s9  ;;  %4340 = vmatmul.mubr.bf16.gmra.mxu1 %v2981_v51  ;;  %v2837_v60 = vsel %vm2811_vm3, %v2700_v3, %v1992_v17  ;;  %v2416_v10 = vshll.u32 %v5772_v47, 16  ;;  %v9545_v47 = vld [vmem:[#allocation54_spill] sm:$0xff] }
 0x1bf   : > { %2448 = vrot.lane.b32.xlu0 %v9542_v50, %s5905_s9  ;;  %3956 = vmatmul.mubr.bf16.gmra.mxu0 %v2837_v60 }
 0x1c0   : > { %v2246_v36 = vpop.permute.xlu1 %2245  ;;  %v2418_v46 = vrot.slane %v2416_v10, 1 }
 0x1c1   : > { %v2150_v6 = vpop.permute.xlu0 %2149  ;;  %v3177_v39 = vsel %vm2553_vm2, %v6414_v7, %v2246_v36  ;;  %v5774_v7 = vld [vmem:[%s9251_s2 + $0x80] sm:$0xff]   ;;  %v2669_v36 = vsel %vm2553_vm2, %v5819_v30, %v9544_v26  ;;  %v9547_v30 = vld [vmem:[#allocation13_spill] sm:$0xff] }
 0x1c2   : > { %2099 = vrot.lane.b32.xlu1 %v7203_v31, %s5905_s9  ;;  %v3033_v3 = vsel %vm2553_vm2, %v6024_v33, %v2150_v6  ;;  %v2419_v33 = vsel %vm907_vm0, %v2414_v41, %v2418_v46  ;;  %5462 = vmatprep.subr.bf16.mxu1 %v5774_v7  ;;  %v1723_v46 = vrot.slane %v7415_v56, 1 }
 0x1c3   : > { %2003 = vrot.lane.b32.xlu0 %v7242_v32, %s5905_s9  ;;  %5463 = vmatpush3.bf16.msra.mxu1 %v5774_v7 }
 0x1c4   : > { %v2384_v9 = vpop.permute.xlu1 %2383 }
 0x1c5   : > { %v2288_v2 = vpop.permute.xlu0 %2287  ;;  %v3311_v24 = vsel %vm2682_vm4, %v3177_v39, %v2384_v9  ;;  %v2573_v9 = vsel %vm2553_vm2, %v6863_v62, %v9545_v47  ;;  %v9546_v39 = vld [vmem:[#allocation10_spill] sm:$0xff]  ;;  %v1722_v62 = vrot.slane %v7364_v18, 1 }
 0x1c6   : > { %2257 = vrot.lane.b32.xlu1 %v7396_v42, %s5902_s23 }
 0x1c7   : > { %2161 = vrot.lane.b32.xlu0 %v7402_v52, %s5902_s23 }
 0x1c8   : > { %v1952_v31 = vpop.permute.xlu1 %1951 }
 0x1c9   : > { %v1856_v15 = vpop.permute.xlu0 %1855  ;;  %v2798_v22 = vsel %vm2682_vm4, %v2669_v36, %v1952_v31 }
 0x1ca   : > { %2395 = vrot.lane.b32.xlu1 %v7347_v54, %s5904_s30  ;;  %v3215_v54 = vsel %vm2682_vm4, %v3033_v3, %v2288_v2  ;;  %v2702_v13 = vsel %vm2682_vm4, %v2573_v9, %v1856_v15 }
 0x1cb   : > { %2299 = vrot.lane.b32.xlu0 %v7415_v56, %s5904_s30 }
 0x1cc   : > { %v2535_v51 = vpop.permute.xlu1 %2534 }
 0x1cd   : > { %v3496_v17 = vsel %vm2811_vm3, %v3311_v24, %v2535_v51  ;;  %v2439_v60 = vpop.permute.xlu0 %2438  ;;  %v7452_v51 = vsel %vm1676_vm1, %v1722_v62, %v1723_v46 }
 0x1ce   : > { %1963 = vrot.lane.b32.xlu1 %v7282_v1, %s5904_s30  ;;  %4347 = vmatprep.mubr.bf16.mxu1 %v3496_v17  ;;  %v3352_v35 = vsel %vm2811_vm3, %v3215_v54, %v2439_v60  ;;  %v7455_v17 = vld [vmem:[%s5957_s22 + $0xc8] sm:$0xff]   ;;  %v5821_v54 = vld [vmem:[%s5957_s22 + $0xc4] ss:$0 sps:$4 sm:$0x11]  }
 0x1cf   : > { %1867 = vrot.lane.b32.xlu0 %v7292_v61, %s5904_s30  ;;  %3963 = vmatprep.mubr.bf16.mxu0 %v3352_v35  ;;  %v1725_v60 = vrot.slane %v5821_v54, 1  ;;  %v9553_v54 = vld [vmem:[#allocation59_spill] sm:$0xff] }
 0x1d0   : > { %v2090_v6 = vpop.permute.xlu1 %2089 }
 0x1d1   : > { %v2984_v2 = vsel %vm2811_vm3, %v2798_v22, %v2090_v6  ;;  %v1994_v10 = vpop.permute.xlu0 %1993  ;;  %v7469_v35 = vsel %vm1676_vm1, %v1723_v46, %v1725_v60  ;;  %v2575_v60 = vsel %vm2553_vm2, %v6914_v44, %v9553_v54 }
 0x1d2   : > { %2546 = vrot.lane.b32.xlu1 %v2419_v33, %s5905_s9  ;;  %4348 = vmatmul.mubr.bf16.gmra.mxu1 %v2984_v2  ;;  %v2840_v31 = vsel %vm2811_vm3, %v2702_v13, %v1994_v10 }
 0x1d3   : > { %2450 = vrot.lane.b32.xlu0 %v9546_v39, %s5905_s9  ;;  %3964 = vmatmul.mubr.bf16.gmra.mxu0 %v2840_v31  ;;  %v5822_v31 = vld [vmem:[%s5957_s22 + $0x244] sm:$0xff]  }
 0x1d4   : > { %v2248_v41 = vpop.permute.xlu1 %2247 }
 0x1d5   : > { %v2152_v24 = vpop.permute.xlu0 %2151  ;;  %v3180_v36 = vsel %vm2553_vm2, %v6437_v53, %v2248_v41  ;;  %v9550_v41 = vld [vmem:[#allocation113_spill] sm:$0xff] }
 0x1d6   : > { %2101 = vrot.lane.b32.xlu1 %v7220_v48, %s5905_s9  ;;  %v3036_v47 = vsel %vm2553_vm2, %v6044_v57, %v2152_v24  ;;  %v2671_v62 = vsel %vm2553_vm2, %v5822_v31, %v9550_v41 }
 0x1d7   : > { %2005 = vrot.lane.b32.xlu0 %v7306_v25, %s5905_s9 }
 0x1d8   : > { %v2386_v15 = vpop.permute.xlu1 %2385 }
 0x1d9   : > { %v2290_v3 = vpop.permute.xlu0 %2289  ;;  %v3313_v33 = vsel %vm2682_vm4, %v3180_v36, %v2386_v15 }
 0x1da   : > { %2301 = vrot.lane.b32.xlu1 %v7455_v17, %s5904_s30  ;;  %v3217_v13 = vsel %vm2682_vm4, %v3036_v47, %v2290_v3 }
 0x1db   : > { %2163 = vrot.lane.b32.xlu0 %v7452_v51, %s5902_s23 }
 0x1dc   : > { %v1954_v7 = vpop.permute.xlu1 %1953 }
 0x1dd   : > { %v1858_v48 = vpop.permute.xlu0 %1857  ;;  %v2800_v24 = vsel %vm2682_vm4, %v2671_v62, %v1954_v7 }
 0x1de   : > { %2452 = vrot.lane.b32.xlu1 %v9547_v30, %s5905_s9  ;;  %v7464_v26 = vpop.f32.mrf.mxu1 }
 0x1df   : > { %9548 = vst [vmem:[#allocation106_spill] sm:$0xff] %v7464_v26  ;;  %v7472_v22 = vpop.f32.mrf.mxu0  ;;  %1869 = vrot.lane.b32.xlu0 %v7352_v29, %s5904_s30 }
 0x1e0   : > { %9549 = vst [vmem:[#allocation49_spill] sm:$0xff] %v7472_v22  ;;  %v2537_v6 = vpop.permute.xlu1 %2536  ;;  %v4279_v9 = vpop.f32.mrf.mxu1 }
 0x1e1   : > { %v3499_v2 = vsel %vm2811_vm3, %v3313_v33, %v2537_v6  ;;  %v3895_v53 = vpop.f32.mrf.mxu0  ;;  %v2441_v10 = vpop.permute.xlu0 %2440  ;;  %v2704_v6 = vsel %vm2682_vm4, %v2575_v60, %v1858_v48 }
 0x1e2   : > { %2165 = vrot.lane.b32.xlu1 %v7469_v35, %s5902_s23  ;;  %4355 = vmatprep.mubr.bf16.mxu1 %v3499_v2  ;;  %v7485_v46 = vpop.f32.mrf.mxu1  ;;  %v3355_v57 = vsel %vm2811_vm3, %v3217_v13, %v2441_v10  ;;  %v7502_v2 = vld [vmem:[%s5957_s22 + $0xd0] sm:$0xff]   ;;  %v1727_v13 = vrot.slane %v7455_v17, 1 }
 0x1e3   : > { %9551 = vst [vmem:[#allocation70_spill] sm:$0xff] %v7485_v46  ;;  %v7489_v15 = vpop.f32.mrf.mxu0  ;;  %2007 = vrot.lane.b32.xlu0 %v7364_v18, %s5905_s9  ;;  %3971 = vmatprep.mubr.bf16.mxu0 %v3355_v57  ;;  %v1728_v48 = vrot.slane %v7502_v2, 1  ;;  %v9554_v10 = vld [vmem:[#allocation12_spill] sm:$0xff]  ;;  %v7516_v57 = vld [vmem:[%s5957_s22 + $0xdc] sm:$0xff]  }
 0x1e4   : > { %9552 = vst [vmem:[#allocation48_spill] sm:$0xff] %v7489_v15  ;;  %v2092_v3 = vpop.permute.xlu1 %2091  ;;  %v4282_v36 = vpop.f32.mrf.mxu1 }
 0x1e5   : > { %v2987_v33 = vsel %vm2811_vm3, %v2800_v24, %v2092_v3  ;;  %v3898_v47 = vpop.f32.mrf.mxu0  ;;  %v1996_v9 = vpop.permute.xlu0 %1995  ;;  %v7513_v41 = vsel %vm1676_vm1, %v1727_v13, %v1728_v48  ;;  %v5825_v24 = vld [vmem:[%s5957_s22 + $0xd8] ss:$0 sps:$4 sm:$0x11]   ;;  %v9555_v36 = vld [vmem:[#allocation15_spill] sm:$0xff] }
 0x1e6   : > { %1871 = vrot.lane.b32.xlu1 %v7402_v52, %s5904_s30  ;;  %4356 = vmatmul.mubr.bf16.gmra.mxu1 %v2987_v33  ;;  %v2843_v7 = vsel %vm2811_vm3, %v2704_v6, %v1996_v9  ;;  %v1730_v3 = vrot.slane %v5825_v24, 1 }
 0x1e7   : > { %2303 = vrot.lane.b32.xlu0 %v7502_v2, %s5904_s30  ;;  %3972 = vmatmul.mubr.bf16.gmra.mxu0 %v2843_v7 }
 0x1e8   : > { %v2250_v44 = vpop.permute.xlu1 %2249  ;;  %v7530_v47 = vsel %vm1676_vm1, %v1728_v48, %v1730_v3  ;;  %v9558_v48 = vld [vmem:[#allocation112_spill] sm:$0xff] }
 0x1e9   : > { %v2154_v53 = vpop.permute.xlu0 %2153  ;;  %v3183_v6 = vsel %vm2553_vm2, %v6430_v37, %v2250_v44 }
 0x1ea   : > { %2009 = vrot.lane.b32.xlu1 %v7415_v56, %s5905_s9  ;;  %v3039_v24 = vsel %vm2553_vm2, %v9507_v55, %v2154_v53 }
 0x1eb   : > { %2454 = vrot.lane.b32.xlu0 %v9554_v10, %s5905_s9 }
 0x1ec   : > { %v2388_v31 = vpop.permute.xlu1 %2387 }
 0x1ed   : > { %v2292_v62 = vpop.permute.xlu0 %2291  ;;  %v3315_v9 = vsel %vm2682_vm4, %v3183_v6, %v2388_v31  ;;  %v2673_v31 = vsel %vm2553_vm2, %v7095_v34, %v9558_v48  ;;  %v9561_v6 = vld [vmem:[#allocation58_spill] sm:$0xff] }
 0x1ee   : > { %2305 = vrot.lane.b32.xlu1 %v7516_v57, %s5904_s30 }
 0x1ef   : > { %2167 = vrot.lane.b32.xlu0 %v7513_v41, %s5902_s23 }
 0x1f0   : > { %v1956_v54 = vpop.permute.xlu1 %1955 }
 0x1f1   : > { %v1860_v60 = vpop.permute.xlu0 %1859 }
 0x1f2   : > { %2456 = vrot.lane.b32.xlu1 %v9555_v36, %s5905_s9  ;;  %v7525_v33 = vpop.f32.mrf.mxu1 }
 0x1f3   : > { %9556 = vst [vmem:[#allocation6_spill] sm:$0xff] %v7525_v33  ;;  %v7533_v7 = vpop.f32.mrf.mxu0  ;;  %1873 = vrot.lane.b32.xlu0 %v7452_v51, %s5904_s30  ;;  %v3219_v33 = vsel %vm2682_vm4, %v3039_v24, %v2292_v62 }
 0x1f4   : > { %9557 = vst [vmem:[#allocation46_spill] sm:$0xff] %v7533_v7  ;;  %v2539_v13 = vpop.permute.xlu1 %2538  ;;  %v4287_v46 = vpop.f32.mrf.mxu1 }
 0x1f5   : > { %v3502_v26 = vsel %vm2811_vm3, %v3315_v9, %v2539_v13  ;;  %v3903_v37 = vpop.f32.mrf.mxu0  ;;  %v2443_v44 = vpop.permute.xlu0 %2442  ;;  %v2802_v46 = vsel %vm2682_vm4, %v2673_v31, %v1956_v54  ;;  %v9562_v31 = vld [vmem:[#allocation14_spill] sm:$0xff] }
 0x1f6   : > { %2169 = vrot.lane.b32.xlu1 %v7530_v47, %s5902_s23  ;;  %4363 = vmatprep.mubr.bf16.mxu1 %v3502_v26  ;;  %v7546_v3 = vpop.f32.mrf.mxu1  ;;  %v3358_v55 = vsel %vm2811_vm3, %v3219_v33, %v2443_v44  ;;  %v2577_v26 = vsel %vm2553_vm2, %v6963_v16, %v9561_v6  ;;  %v7563_v37 = vld [vmem:[%s5957_s22 + $0xe4] sm:$0xff]   ;;  %v1732_v44 = vrot.slane %v7516_v57, 1  ;;  %v7577_v6 = vld [vmem:[%s5957_s22 + $0xf0] sm:$0xff]  }
 0x1f7   : > { %9559 = vst [vmem:[#allocation4_spill] sm:$0xff] %v7546_v3  ;;  %v7550_v53 = vpop.f32.mrf.mxu0  ;;  %2011 = vrot.lane.b32.xlu0 %v7455_v17, %s5905_s9  ;;  %3979 = vmatprep.mubr.bf16.mxu0 %v3358_v55  ;;  %v2706_v13 = vsel %vm2682_vm4, %v2577_v26, %v1860_v60  ;;  %v1733_v60 = vrot.slane %v7563_v37, 1  ;;  %v5828_v26 = vld [vmem:[%s5957_s22 + $0xec] ss:$0 sps:$4 sm:$0x11]  }
 0x1f8   : > { %9560 = vst [vmem:[#allocation108_spill] sm:$0xff] %v7550_v53  ;;  %v2094_v62 = vpop.permute.xlu1 %2093  ;;  %v4290_v9 = vpop.f32.mrf.mxu1 }
 0x1f9   : > { %v2990_v34 = vsel %vm2811_vm3, %v2802_v46, %v2094_v62  ;;  %v3906_v24 = vpop.f32.mrf.mxu0  ;;  %v1998_v33 = vpop.permute.xlu0 %1997  ;;  %v7574_v46 = vsel %vm1676_vm1, %v1732_v44, %v1733_v60  ;;  %v1735_v9 = vrot.slane %v5828_v26, 1 }
 0x1fa   : > { %1875 = vrot.lane.b32.xlu1 %v7469_v35, %s5904_s30  ;;  %4364 = vmatmul.mubr.bf16.gmra.mxu1 %v2990_v34  ;;  %v2846_v54 = vsel %vm2811_vm3, %v2706_v13, %v1998_v33  ;;  %v9563_v24 = vld [vmem:[#allocation17_spill] sm:$0xff] }
 0x1fb   : > { %2307 = vrot.lane.b32.xlu0 %v7563_v37, %s5904_s30  ;;  %3980 = vmatmul.mubr.bf16.gmra.mxu0 %v2846_v54  ;;  %v7591_v44 = vsel %vm1676_vm1, %v1733_v60, %v1735_v9  ;;  %v9566_v60 = vld [vmem:[#allocation115_spill] sm:$0xff] }
 0x1fc   : > { %v2252_v16 = vpop.permute.xlu1 %2251 }
 0x1fd   : > { %v2156_v48 = vpop.permute.xlu0 %2155  ;;  %v3186_v54 = vsel %vm2553_vm2, %v9512_v12, %v2252_v16 }
 0x1fe   : > { %2013 = vrot.lane.b32.xlu1 %v7502_v2, %s5905_s9  ;;  %v3042_v1 = vsel %vm2553_vm2, %v9513_v21, %v2156_v48  ;;  %v9569_v48 = vld [vmem:[#allocation61_spill] sm:$0xff] }
 0x1ff   : > { %2458 = vrot.lane.b32.xlu0 %v9562_v31, %s5905_s9 }
 0x200   : > { %v2390_v55 = vpop.permute.xlu1 %2389 }
 0x201   : > { %v2294_v62 = vpop.permute.xlu0 %2293  ;;  %v3317_v3 = vsel %vm2682_vm4, %v3186_v54, %v2390_v55  ;;  %v2675_v55 = vsel %vm2553_vm2, %v7147_v20, %v9566_v60 }
 0x202   : > { %2309 = vrot.lane.b32.xlu1 %v7577_v6, %s5904_s30  ;;  %v3221_v15 = vsel %vm2682_vm4, %v3042_v1, %v2294_v62  ;;  %v2579_v62 = vsel %vm2553_vm2, %v7014_v63, %v9569_v48  ;;  %v7638_v48 = vld [vmem:[%s5957_s22 + $0x104] sm:$0xff]  }
 0x203   : > { %2171 = vrot.lane.b32.xlu0 %v7574_v46, %s5902_s23 }
 0x204   : > { %v1958_v34 = vpop.permute.xlu1 %1957 }
 0x205   : > { %v1862_v13 = vpop.permute.xlu0 %1861 }
 0x206   : > { %2460 = vrot.lane.b32.xlu1 %v9563_v24, %s5905_s9  ;;  %v7586_v33 = vpop.f32.mrf.mxu1  ;;  %v2708_v54 = vsel %vm2682_vm4, %v2579_v62, %v1862_v13  ;;  %v5831_v62 = vld [vmem:[%s5957_s22 + $0x100] ss:$0 sps:$4 sm:$0x11]  }
 0x207   : > { %9564 = vst [vmem:[#allocation53_spill] sm:$0xff] %v7586_v33  ;;  %v7594_v42 = vpop.f32.mrf.mxu0  ;;  %1877 = vrot.lane.b32.xlu0 %v7513_v41, %s5904_s30 }
 0x208   : > { %9565 = vst [vmem:[#allocation83_spill] sm:$0xff] %v7594_v42  ;;  %v2541_v26 = vpop.permute.xlu1 %2540  ;;  %v4295_v11 = vpop.f32.mrf.mxu1 }
 0x209   : > { %v3505_v33 = vsel %vm2811_vm3, %v3317_v3, %v2541_v26  ;;  %v3911_v12 = vpop.f32.mrf.mxu0  ;;  %v2445_v16 = vpop.permute.xlu0 %2444  ;;  %v2804_v11 = vsel %vm2682_vm4, %v2675_v55, %v1958_v34  ;;  %v9570_v55 = vld [vmem:[#allocation16_spill] sm:$0xff] }
 0x20a   : > { %2173 = vrot.lane.b32.xlu1 %v7591_v44, %s5902_s23  ;;  %4371 = vmatprep.mubr.bf16.mxu1 %v3505_v33  ;;  %v7607_v9 = vpop.f32.mrf.mxu1  ;;  %v3361_v21 = vsel %vm2811_vm3, %v3221_v15, %v2445_v16  ;;  %v7624_v12 = vld [vmem:[%s5957_s22 + $0xf8] sm:$0xff]   ;;  %v1737_v16 = vrot.slane %v7577_v6, 1 }
 0x20b   : > { %9567 = vst [vmem:[#allocation9_spill] sm:$0xff] %v7607_v9  ;;  %v7611_v3 = vpop.f32.mrf.mxu0  ;;  %2015 = vrot.lane.b32.xlu0 %v7516_v57, %s5905_s9  ;;  %3987 = vmatprep.mubr.bf16.mxu0 %v3361_v21  ;;  %v1738_v13 = vrot.slane %v7624_v12, 1 }
 0x20c   : > { %9568 = vst [vmem:[#allocation45_spill] sm:$0xff] %v7611_v3  ;;  %v2096_v1 = vpop.permute.xlu1 %2095  ;;  %v4298_v33 = vpop.f32.mrf.mxu1 }
 0x20d   : > { %v2993_v20 = vsel %vm2811_vm3, %v2804_v11, %v2096_v1  ;;  %v3914_v26 = vpop.f32.mrf.mxu0  ;;  %v2000_v15 = vpop.permute.xlu0 %1999  ;;  %v7635_v11 = vsel %vm1676_vm1, %v1737_v16, %v1738_v13  ;;  %v1740_v33 = vrot.slane %v5831_v62, 1 }
 0x20e   : > { %1879 = vrot.lane.b32.xlu1 %v7530_v47, %s5904_s30  ;;  %4372 = vmatmul.mubr.bf16.gmra.mxu1 %v2993_v20  ;;  %v2849_v34 = vsel %vm2811_vm3, %v2708_v54, %v2000_v15  ;;  %v9571_v26 = vld [vmem:[#allocation19_spill] sm:$0xff] }
 0x20f   : > { %2311 = vrot.lane.b32.xlu0 %v7624_v12, %s5904_s30  ;;  %3988 = vmatmul.mubr.bf16.gmra.mxu0 %v2849_v34  ;;  %v7652_v16 = vsel %vm1676_vm1, %v1738_v13, %v1740_v33  ;;  %v9574_v13 = vld [vmem:[#allocation114_spill] sm:$0xff] }
 0x210   : > { %v2254_v63 = vpop.permute.xlu1 %2253 }
 0x211   : > { %v2158_v60 = vpop.permute.xlu0 %2157  ;;  %v3189_v34 = vsel %vm2553_vm2, %v9521_v45, %v2254_v63 }
 0x212   : > { %2017 = vrot.lane.b32.xlu1 %v7563_v37, %s5905_s9  ;;  %v3045_v42 = vsel %vm2553_vm2, %v9522_v28, %v2158_v60  ;;  %v9577_v60 = vld [vmem:[#allocation60_spill] sm:$0xff] }
 0x213   : > { %2462 = vrot.lane.b32.xlu0 %v9570_v55, %s5905_s9 }
 0x214   : > { %v2392_v21 = vpop.permute.xlu1 %2391 }
 0x215   : > { %v2296_v1 = vpop.permute.xlu0 %2295  ;;  %v3319_v9 = vsel %vm2682_vm4, %v3189_v34, %v2392_v21  ;;  %v2677_v21 = vsel %vm2553_vm2, %v7210_v27, %v9574_v13 }
 0x216   : > { %2313 = vrot.lane.b32.xlu1 %v7638_v48, %s5904_s30  ;;  %v3223_v22 = vsel %vm2682_vm4, %v3045_v42, %v2296_v1  ;;  %v2581_v1 = vsel %vm2553_vm2, %v7063_v38, %v9577_v60  ;;  %v7699_v60 = vld [vmem:[%s5957_s22 + $0x118] sm:$0xff]  }
 0x217   : > { %2175 = vrot.lane.b32.xlu0 %v7635_v11, %s5902_s23 }
 0x218   : > { %v1960_v20 = vpop.permute.xlu1 %1959 }
 0x219   : > { %v1864_v54 = vpop.permute.xlu0 %1863 }
 0x21a   : > { %2464 = vrot.lane.b32.xlu1 %v9571_v26, %s5905_s9  ;;  %v7647_v15 = vpop.f32.mrf.mxu1  ;;  %v2710_v34 = vsel %vm2682_vm4, %v2581_v1, %v1864_v54  ;;  %v5834_v1 = vld [vmem:[%s5957_s22 + $0x114] ss:$0 sps:$4 sm:$0x11]  }
 0x21b   : > { %9572 = vst [vmem:[#allocation3_spill] sm:$0xff] %v7647_v15  ;;  %v7655_v3 = vpop.f32.mrf.mxu0  ;;  %1881 = vrot.lane.b32.xlu0 %v7574_v46, %s5904_s30 }
 0x21c   : > { %9573 = vst [vmem:[#allocation107_spill] sm:$0xff] %v7655_v3  ;;  %v2543_v62 = vpop.permute.xlu1 %2542  ;;  %v4303_v53 = vpop.f32.mrf.mxu1 }
 0x21d   : > { %v3508_v15 = vsel %vm2811_vm3, %v3319_v9, %v2543_v62  ;;  %v3919_v45 = vpop.f32.mrf.mxu0  ;;  %v2447_v63 = vpop.permute.xlu0 %2446  ;;  %v2806_v53 = vsel %vm2682_vm4, %v2677_v21, %v1960_v20  ;;  %v9578_v21 = vld [vmem:[#allocation18_spill] sm:$0xff] }
 0x21e   : > { %2177 = vrot.lane.b32.xlu1 %v7652_v16, %s5902_s23  ;;  %4379 = vmatprep.mubr.bf16.mxu1 %v3508_v15  ;;  %v7668_v33 = vpop.f32.mrf.mxu1  ;;  %v3364_v28 = vsel %vm2811_vm3, %v3223_v22, %v2447_v63  ;;  %v7685_v45 = vld [vmem:[%s5957_s22 + $0x10c] sm:$0xff]   ;;  %v1742_v63 = vrot.slane %v7638_v48, 1 }
 0x21f   : > { %9575 = vst [vmem:[#allocation52_spill] sm:$0xff] %v7668_v33  ;;  %v7672_v9 = vpop.f32.mrf.mxu0  ;;  %2019 = vrot.lane.b32.xlu0 %v7577_v6, %s5905_s9  ;;  %3995 = vmatprep.mubr.bf16.mxu0 %v3364_v28  ;;  %v1743_v54 = vrot.slane %v7685_v45, 1 }
 0x220   : > { %9576 = vst [vmem:[#allocation96_spill] sm:$0xff] %v7672_v9  ;;  %v2098_v42 = vpop.permute.xlu1 %2097  ;;  %v4306_v15 = vpop.f32.mrf.mxu1 }
 0x221   : > { %v2996_v27 = vsel %vm2811_vm3, %v2806_v53, %v2098_v42  ;;  %v3922_v62 = vpop.f32.mrf.mxu0  ;;  %v2002_v22 = vpop.permute.xlu0 %2001  ;;  %v7696_v53 = vsel %vm1676_vm1, %v1742_v63, %v1743_v54  ;;  %v1745_v15 = vrot.slane %v5834_v1, 1 }
 0x222   : > { %1883 = vrot.lane.b32.xlu1 %v7591_v44, %s5904_s30  ;;  %4380 = vmatmul.mubr.bf16.gmra.mxu1 %v2996_v27  ;;  %v2852_v20 = vsel %vm2811_vm3, %v2710_v34, %v2002_v22  ;;  %v9579_v62 = vld [vmem:[#allocation21_spill] sm:$0xff] }
 0x223   : > { %2315 = vrot.lane.b32.xlu0 %v7685_v45, %s5904_s30  ;;  %3996 = vmatmul.mubr.bf16.gmra.mxu0 %v2852_v20  ;;  %v7713_v63 = vsel %vm1676_vm1, %v1743_v54, %v1745_v15  ;;  %v9582_v54 = vld [vmem:[#allocation117_spill] sm:$0xff] }
 0x224   : > { %v2256_v38 = vpop.permute.xlu1 %2255 }
 0x225   : > { %v2160_v13 = vpop.permute.xlu0 %2159  ;;  %v3192_v20 = vsel %vm2553_vm2, %v7257_v14, %v2256_v38 }
 0x226   : > { %2021 = vrot.lane.b32.xlu1 %v7624_v12, %s5905_s9  ;;  %v3048_v3 = vsel %vm2553_vm2, %v9529_v49, %v2160_v13  ;;  %v9585_v13 = vld [vmem:[#allocation63_spill] sm:$0xff] }
 0x227   : > { %2466 = vrot.lane.b32.xlu0 %v9578_v21, %s5905_s9 }
 0x228   : > { %v2394_v28 = vpop.permute.xlu1 %2393 }
 0x229   : > { %v2298_v42 = vpop.permute.xlu0 %2297  ;;  %v3321_v33 = vsel %vm2682_vm4, %v3192_v20, %v2394_v28  ;;  %v2679_v28 = vsel %vm2553_vm2, %v7198_v4, %v9582_v54 }
 0x22a   : > { %2317 = vrot.lane.b32.xlu1 %v7699_v60, %s5904_s30 }
 0x22b   : > { %2179 = vrot.lane.b32.xlu0 %v7696_v53, %s5902_s23 }
 0x22c   : > { %v1962_v27 = vpop.permute.xlu1 %1961 }
 0x22d   : > { %v1866_v34 = vpop.permute.xlu0 %1865 }
 0x22e   : > { %2468 = vrot.lane.b32.xlu1 %v9579_v62, %s5905_s9  ;;  %v7708_v22 = vpop.f32.mrf.mxu1  ;;  %v3225_v62 = vsel %vm2682_vm4, %v3048_v3, %v2298_v42  ;;  %v2583_v42 = vsel %vm2553_vm2, %v7117_v8, %v9585_v13  ;;  %v7760_v13 = vld [vmem:[%s5957_s22 + $0x12c] sm:$0xff]  }
 0x22f   : > { %9580 = vst [vmem:[#allocation8_spill] sm:$0xff] %v7708_v22  ;;  %v7716_v9 = vpop.f32.mrf.mxu0  ;;  %1885 = vrot.lane.b32.xlu0 %v7635_v11, %s5904_s30  ;;  %v2712_v20 = vsel %vm2682_vm4, %v2583_v42, %v1866_v34  ;;  %v5837_v42 = vld [vmem:[%s5957_s22 + $0x128] ss:$0 sps:$4 sm:$0x11]  }
 0x230   : > { %9581 = vst [vmem:[#allocation111_spill] sm:$0xff] %v7716_v9  ;;  %v2545_v1 = vpop.permute.xlu1 %2544  ;;  %v4311_v7 = vpop.f32.mrf.mxu1 }
 0x231   : > { %v3511_v22 = vsel %vm2811_vm3, %v3321_v33, %v2545_v1  ;;  %v3927_v14 = vpop.f32.mrf.mxu0  ;;  %v2449_v38 = vpop.permute.xlu0 %2448  ;;  %v2808_v7 = vsel %vm2682_vm4, %v2679_v28, %v1962_v27  ;;  %v9586_v28 = vld [vmem:[#allocation20_spill] sm:$0xff] }
 0x232   : > { %2181 = vrot.lane.b32.xlu1 %v7713_v63, %s5902_s23  ;;  %4387 = vmatprep.mubr.bf16.mxu1 %v3511_v22  ;;  %v7729_v15 = vpop.f32.mrf.mxu1  ;;  %v3367_v49 = vsel %vm2811_vm3, %v3225_v62, %v2449_v38  ;;  %v7746_v14 = vld [vmem:[%s5957_s22 + $0x120] sm:$0xff]   ;;  %v1747_v38 = vrot.slane %v7699_v60, 1 }
 0x233   : > { %9583 = vst [vmem:[#allocation56_spill] sm:$0xff] %v7729_v15  ;;  %v7733_v33 = vpop.f32.mrf.mxu0  ;;  %2023 = vrot.lane.b32.xlu0 %v7638_v48, %s5905_s9  ;;  %4003 = vmatprep.mubr.bf16.mxu0 %v3367_v49  ;;  %v1748_v34 = vrot.slane %v7746_v14, 1 }
 0x234   : > { %9584 = vst [vmem:[#allocation11_spill] sm:$0xff] %v7733_v33  ;;  %v2100_v3 = vpop.permute.xlu1 %2099  ;;  %v4314_v22 = vpop.f32.mrf.mxu1 }
 0x235   : > { %v2999_v4 = vsel %vm2811_vm3, %v2808_v7, %v2100_v3  ;;  %v3930_v1 = vpop.f32.mrf.mxu0  ;;  %v2004_v62 = vpop.permute.xlu0 %2003  ;;  %v7757_v7 = vsel %vm1676_vm1, %v1747_v38, %v1748_v34  ;;  %v1750_v22 = vrot.slane %v5837_v42, 1 }
 0x236   : > { %1887 = vrot.lane.b32.xlu1 %v7652_v16, %s5904_s30  ;;  %4388 = vmatmul.mubr.bf16.gmra.mxu1 %v2999_v4  ;;  %v2855_v27 = vsel %vm2811_vm3, %v2712_v20, %v2004_v62  ;;  %v9587_v1 = vld [vmem:[#allocation23_spill] sm:$0xff] }
 0x237   : > { %2319 = vrot.lane.b32.xlu0 %v7746_v14, %s5904_s30  ;;  %4004 = vmatmul.mubr.bf16.gmra.mxu0 %v2855_v27  ;;  %v7774_v38 = vsel %vm1676_vm1, %v1748_v34, %v1750_v22  ;;  %v9589_v34 = vld [vmem:[#allocation116_spill] sm:$0xff] }
 0x238   : > { %v2258_v8 = vpop.permute.xlu1 %2257 }
 0x239   : > { %v2162_v54 = vpop.permute.xlu0 %2161  ;;  %v3195_v27 = vsel %vm2553_vm2, %v7321_v0, %v2258_v8 }
 0x23a   : > { %2025 = vrot.lane.b32.xlu1 %v7685_v45, %s5905_s9  ;;  %v3051_v9 = vsel %vm2553_vm2, %v9538_v5, %v2162_v54  ;;  %v9591_v54 = vld [vmem:[#allocation62_spill] sm:$0xff] }
 0x23b   : > { %2470 = vrot.lane.b32.xlu0 %v9586_v28, %s5905_s9 }
 0x23c   : > { %v2396_v49 = vpop.permute.xlu1 %2395 }
 0x23d   : > { %v2300_v3 = vpop.permute.xlu0 %2299  ;;  %v3323_v15 = vsel %vm2682_vm4, %v3195_v27, %v2396_v49  ;;  %v2681_v49 = vsel %vm2553_vm2, %v7164_v19, %v9589_v34 }
 0x23e   : > { %2321 = vrot.lane.b32.xlu1 %v7760_v13, %s5904_s30  ;;  %v3227_v28 = vsel %vm2682_vm4, %v3051_v9, %v2300_v3  ;;  %v2585_v3 = vsel %vm2553_vm2, %v7172_v43, %v9591_v54 }
 0x23f   : > { %2183 = vrot.lane.b32.xlu0 %v7757_v7, %s5902_s23 }
 0x240   : > { %v1964_v4 = vpop.permute.xlu1 %1963 }
 0x241   : > { %v1868_v20 = vpop.permute.xlu0 %1867  ;;  %v2810_v5 = vsel %vm2682_vm4, %v2681_v49, %v1964_v4 }
 0x242   : > { %2472 = vrot.lane.b32.xlu1 %v9587_v1, %s5905_s9  ;;  %v7769_v62 = vpop.f32.mrf.mxu1 }
 0x243   : > { %9588 = vst [vmem:[#allocation110_spill] sm:$0xff] %v7769_v62  ;;  %v7777_v33 = vpop.f32.mrf.mxu0  ;;  %1889 = vrot.lane.b32.xlu0 %v7696_v53, %s5904_s30 }
 0x244   : > { %v2547_v42 = vpop.permute.xlu1 %2546  ;;  %v4319_v1 = vpop.f32.mrf.mxu1 }
 0x245   : > { %v3514_v62 = vsel %vm2811_vm3, %v3323_v15, %v2547_v42  ;;  %v3935_v0 = vpop.f32.mrf.mxu0  ;;  %v2451_v8 = vpop.permute.xlu0 %2450 }
 0x246   : > { %2185 = vrot.lane.b32.xlu1 %v7774_v38, %s5902_s23  ;;  %4395 = vmatprep.mubr.bf16.mxu1 %v3514_v62  ;;  %v7790_v22 = vpop.f32.mrf.mxu1  ;;  %v3370_v27 = vsel %vm2811_vm3, %v3227_v28, %v2451_v8  ;;  %v2714_v62 = vsel %vm2682_vm4, %v2585_v3, %v1868_v20  ;;  %v9592_v0 = vld [vmem:[#allocation79_spill] sm:$0xff]  ;;  %v7809_v8 = vld [vmem:[%s5957_s22 + $0x134] sm:$0xff]   ;;  %v1752_v20 = vrot.slane %v7760_v13, 1 }
 0x247   : > { %9590 = vst [vmem:[#allocation54_spill] sm:$0xff] %v7790_v22  ;;  %v7794_v15 = vpop.f32.mrf.mxu0  ;;  %2027 = vrot.lane.b32.xlu0 %v7699_v60, %s5905_s9  ;;  %4011 = vmatprep.mubr.bf16.mxu0 %v3370_v27  ;;  %v1753_v34 = vrot.slane %v7809_v8, 1  ;;  %v9608_v22 = vld [vmem:[#allocation125_spill] sm:$0xff] }
 0x248   : > { %v2102_v9 = vpop.permute.xlu1 %2101  ;;  %v4322_v1 = vpop.f32.mrf.mxu1 }
 0x249   : > { %v3002_v19 = vsel %vm2811_vm3, %v2810_v5, %v2102_v9  ;;  %v3938_v28 = vpop.f32.mrf.mxu0  ;;  %v2006_v42 = vpop.permute.xlu0 %2005  ;;  %v9593_v5 = vld [vmem:[#allocation22_spill] sm:$0xff]  ;;  %v7823_v3 = vsel %vm1676_vm1, %v1752_v20, %v1753_v34 }
 0x24a   : > { %1891 = vrot.lane.b32.xlu1 %v7713_v63, %s5904_s30  ;;  %4396 = vmatmul.mubr.bf16.gmra.mxu1 %v3002_v19  ;;  %v2858_v4 = vsel %vm2811_vm3, %v2714_v62, %v2006_v42  ;;  %v7827_v62 = vld [vmem:[%s5957_s22 + $0x140] sm:$0xff]   ;;  %v9594_v28 = vld [vmem:[#allocation92_spill] sm:$0xff] }
 0x24b   : > { %5464 = vmatprep.mubr.msk.bf16.mxu1 %vm2553_vm2, %v9592_v0  ;;  %2323 = vrot.lane.b32.xlu0 %v7809_v8, %s5904_s30  ;;  %v9595_v0 = vld [vmem:[#allocation66_spill] sm:$0xff] }
 0x24c   : > { %4012 = vmatmul.mubr.bf16.gmra.mxu0 %v2858_v4  ;;  %v2302_v43 = vpop.permute.xlu1 %2301 }
 0x24d   : > { %v2164_v49 = vpop.permute.xlu0 %2163 }
 0x24e   : > { %2029 = vrot.lane.b32.xlu1 %v7746_v14, %s5905_s9  ;;  %v3054_v27 = vsel %vm2553_vm2, %v9542_v50, %v2164_v49  ;;  %v5840_v50 = vld [vmem:[%s5957_s22 + $0x13c] ss:$0 sps:$4 sm:$0x11]  }
 0x24f   : > { %2474 = vrot.lane.b32.xlu0 %v9593_v5, %s5905_s9  ;;  %v3229_v54 = vsel %vm2682_vm4, %v3054_v27, %v2302_v43  ;;  %v1755_v42 = vrot.slane %v5840_v50, 1  ;;  %v2587_v43 = vsel %vm2553_vm2, %v7242_v32, %v9595_v0  ;;  %v9596_v27 = vld [vmem:[#allocation25_spill] sm:$0xff] }
 0x250   : > { %v2453_v9 = vpop.permute.xlu1 %2452 }
 0x251   : > { %v3373_v1 = vsel %vm2811_vm3, %v3229_v54, %v2453_v9  ;;  %v1870_v19 = vpop.permute.xlu0 %1869  ;;  %v7848_v54 = vsel %vm1676_vm1, %v1753_v34, %v1755_v42  ;;  %v9599_v34 = vld [vmem:[#allocation65_spill] sm:$0xff] }
 0x252   : > { %2325 = vrot.lane.b32.xlu1 %v7827_v62, %s5904_s30  ;;  %5465 = vmatmul.mubr.msk.bf16.vlgmr.msra.gmra.mxu1 %vm2553_vm2, %v9594_v28  ;;  %v2716_v20 = vsel %vm2682_vm4, %v2587_v43, %v1870_v19  ;;  %v2589_v42 = vsel %vm2553_vm2, %v7306_v25, %v9599_v34 }
 0x253   : > { %4019 = vmatprep.mubr.bf16.mxu0 %v3373_v1  ;;  %5468 = vmatprep.mubr.msk.bf16.mxu1 %vm2553_vm2, %v6797_v59 }
 0x254   : > { %2187 = vrot.lane.b32.xlu0 %v7823_v3, %s5902_s23  ;;  %v2166_v4 = vpop.permute.xlu1 %2165 }
 0x255   : > { %v2008_v49 = vpop.permute.xlu0 %2007 }
 0x256   : > { %2476 = vrot.lane.b32.xlu1 %v9596_v27, %s5905_s9  ;;  %v7844_v9 = vpop.f32.mrf.mxu1  ;;  %v2861_v59 = vsel %vm2811_vm3, %v2716_v20, %v2008_v49  ;;  %v3057_v49 = vsel %vm2553_vm2, %v9546_v39, %v2166_v4  ;;  %v1757_v4 = vrot.slane %v7827_v62, 1 }
 0x257   : > { %9597 = vst [vmem:[#allocation10_spill] sm:$0xff] %v7844_v9  ;;  %v7850_v1 = vpop.f32.mrf.mxu0  ;;  %4020 = vmatmul.mubr.bf16.gmra.mxu0 %v2861_v59  ;;  %v9607_v9 = vld [vmem:[#allocation124_spill] sm:$0xff] }
 0x258   : > { %1893 = vrot.lane.b32.xlu0 %v7757_v7, %s5904_s30  ;;  %v1872_v32 = vpop.permute.xlu1 %1871  ;;  %v4327_v28 = vpop.f32.mrf.mxu1 }
 0x259   : > { %v3943_v19 = vpop.f32.mrf.mxu0  ;;  %v2304_v50 = vpop.permute.xlu0 %2303 }
 0x25a   : > { %2189 = vrot.lane.b32.xlu1 %v7848_v54, %s5902_s23  ;;  %5469 = vmatmul.mubr.msk.bf16.gmra.mxu1 %vm2553_vm2, %v6848_v23  ;;  %v7858_v0 = vpop.f32.mrf.mxu1  ;;  %v2718_v23 = vsel %vm2682_vm4, %v2589_v42, %v1872_v32  ;;  %v3231_v28 = vsel %vm2682_vm4, %v3057_v49, %v2304_v50  ;;  %v9601_v42 = vld [vmem:[#allocation120_spill] sm:$0xff]  ;;  %v9602_v49 = vld [vmem:[#allocation122_spill] sm:$0xff] }
 0x25b   : > { %9598 = vst [vmem:[#allocation13_spill] sm:$0xff] %v7858_v0  ;;  %5472 = vmatprep.mubr.msk.bf16.mxu1 %vm2553_vm2, %v6902_v40  ;;  %v7865_v43 = vpop.f32.mrf.mxu0  ;;  %v7878_v0 = vld [vmem:[%s5957_s22 + $0x148] sm:$0xff]  }
 0x25c   : > { %9600 = vst [vmem:[#allocation113_spill] sm:$0xff] %v7865_v43  ;;  %2031 = vrot.lane.b32.xlu0 %v7760_v13, %s5905_s9  ;;  %v2010_v20 = vpop.permute.xlu1 %2009  ;;  %v4330_v59 = vpop.f32.mrf.mxu1  ;;  %v1758_v32 = vrot.slane %v7878_v0, 1 }
 0x25d   : > { %v3946_v19 = vpop.f32.mrf.mxu0  ;;  %v2455_v40 = vpop.permute.xlu0 %2454  ;;  %v2864_v25 = vsel %vm2811_vm3, %v2718_v23, %v2010_v20  ;;  %v9603_v23 = vld [vmem:[#allocation24_spill] sm:$0xff] }
 0x25e   : > { %1895 = vrot.lane.b32.xlu1 %v7774_v38, %s5904_s30  ;;  %v3376_v34 = vsel %vm2811_vm3, %v3231_v28, %v2455_v40  ;;  %v7896_v19 = vsel %vm1676_vm1, %v1757_v4, %v1758_v32 }
 0x25f   : > { %4027 = vmatprep.mubr.bf16.mxu0 %v3376_v34  ;;  %v7900_v34 = vld [vmem:[%s5957_s22 + $0x154] sm:$0xff]  }
 0x260   : > { %2327 = vrot.lane.b32.xlu0 %v7878_v0, %s5904_s30  ;;  %v2306_v39 = vpop.permute.xlu1 %2305  ;;  %4028 = vmatmul.mubr.bf16.gmra.mxu0 %v2864_v25 }
 0x261   : > { %v2168_v50 = vpop.permute.xlu0 %2167 }
 0x262   : > { %2033 = vrot.lane.b32.xlu1 %v7809_v8, %s5905_s9  ;;  %5473 = vmatmul.mubr.msk.bf16.gmra.mxu1 %vm2553_vm2, %v9601_v42  ;;  %v3060_v20 = vsel %vm2553_vm2, %v9547_v30, %v2168_v50  ;;  %v5843_v30 = vld [vmem:[%s5957_s22 + $0x150] ss:$0 sps:$4 sm:$0x11]  }
 0x263   : > { %5476 = vmatprep.mubr.msk.bf16.mxu1 %vm2553_vm2, %v9602_v49  ;;  %v3233_v28 = vsel %vm2682_vm4, %v3060_v20, %v2306_v39  ;;  %v1760_v50 = vrot.slane %v5843_v30, 1  ;;  %v9604_v49 = vld [vmem:[#allocation68_spill] sm:$0xff] }
 0x264   : > { %2478 = vrot.lane.b32.xlu0 %v9603_v23, %s5905_s9  ;;  %v2457_v59 = vpop.permute.xlu1 %2456  ;;  %v2591_v39 = vsel %vm2553_vm2, %v7364_v18, %v9604_v49 }
 0x265   : > { %v3379_v40 = vsel %vm2811_vm3, %v3233_v28, %v2457_v59  ;;  %v1874_v25 = vpop.permute.xlu0 %1873  ;;  %v9605_v59 = vld [vmem:[#allocation27_spill] sm:$0xff]  ;;  %v7919_v30 = vsel %vm1676_vm1, %v1758_v32, %v1760_v50 }
 0x266   : > { %2329 = vrot.lane.b32.xlu1 %v7900_v34, %s5904_s30  ;;  %4035 = vmatprep.mubr.bf16.mxu0 %v3379_v40  ;;  %v2720_v4 = vsel %vm2682_vm4, %v2591_v39, %v1874_v25  ;;  %v9610_v32 = vld [vmem:[#allocation67_spill] sm:$0xff] }
 0x268   : > { %2191 = vrot.lane.b32.xlu0 %v7896_v19, %s5902_s23  ;;  %v2170_v42 = vpop.permute.xlu1 %2169 }
 0x269   : > { %v2012_v20 = vpop.permute.xlu0 %2011 }
 0x26a   : > { %2480 = vrot.lane.b32.xlu1 %v9605_v59, %s5905_s9  ;;  %v7913_v28 = vpop.f32.mrf.mxu1  ;;  %5477 = vmatmul.mubr.msk.bf16.gmra.mxu1 %vm2553_vm2, %v9607_v9  ;;  %v2867_v40 = vsel %vm2811_vm3, %v2720_v4, %v2012_v20  ;;  %v3063_v20 = vsel %vm2553_vm2, %v9554_v10, %v2170_v42  ;;  %v7951_v10 = vld [vmem:[%s5957_s22 + $0x15c] sm:$0xff]  }
 0x26b   : > { %9606 = vst [vmem:[#allocation59_spill] sm:$0xff] %v7913_v28  ;;  %5480 = vmatprep.mubr.msk.bf16.mxu1 %vm2553_vm2, %v9608_v22  ;;  %v7923_v18 = vpop.f32.mrf.mxu0  ;;  %4036 = vmatmul.mubr.bf16.gmra.mxu0 %v2867_v40  ;;  %v2593_v22 = vsel %vm2553_vm2, %v7415_v56, %v9610_v32  ;;  %v9612_v56 = vld [vmem:[#allocation51_spill] sm:$0xff] }
 0x26c   : > { %1897 = vrot.lane.b32.xlu0 %v7823_v3, %s5904_s30  ;;  %v1876_v25 = vpop.permute.xlu1 %1875  ;;  %v4335_v49 = vpop.f32.mrf.mxu1 }
 0x26d   : > { %v3951_v39 = vpop.f32.mrf.mxu0  ;;  %v2308_v28 = vpop.permute.xlu0 %2307  ;;  %v2722_v40 = vsel %vm2682_vm4, %v2593_v22, %v1876_v25  ;;  %v1763_v25 = vrot.slane %v7951_v10, 1 }
 0x26e   : > { %2193 = vrot.lane.b32.xlu1 %v7919_v30, %s5902_s23  ;;  %v7929_v9 = vpop.f32.mrf.mxu1  ;;  %v3235_v39 = vsel %vm2682_vm4, %v3063_v20, %v2308_v28  ;;  %v1762_v28 = vrot.slane %v7900_v34, 1 }
 0x26f   : > { %9609 = vst [vmem:[#allocation12_spill] sm:$0xff] %v7929_v9  ;;  %v7934_v50 = vpop.f32.mrf.mxu0 }
 0x270   : > { %9611 = vst [vmem:[#allocation15_spill] sm:$0xff] %v7934_v50  ;;  %2035 = vrot.lane.b32.xlu0 %v7827_v62, %s5905_s9  ;;  %v2014_v4 = vpop.permute.xlu1 %2013  ;;  %v4338_v49 = vpop.f32.mrf.mxu1 }
 0x271   : > { %v3954_v9 = vpop.f32.mrf.mxu0  ;;  %v2459_v43 = vpop.permute.xlu0 %2458  ;;  %v2870_v32 = vsel %vm2811_vm3, %v2722_v40, %v2014_v4  ;;  %v7965_v4 = vsel %vm1676_vm1, %v1762_v28, %v1763_v25  ;;  %v7969_v49 = vld [vmem:[%s5957_s22 + $0x168] sm:$0xff]  }
 0x272   : > { %1899 = vrot.lane.b32.xlu1 %v7848_v54, %s5904_s30  ;;  %5481 = vmatmul.mubr.msk.bf16.gmra.mxu1 %vm2553_vm2, %v9612_v56  ;;  %v3382_v50 = vsel %vm2811_vm3, %v3235_v39, %v2459_v43  ;;  %v9613_v43 = vld [vmem:[#allocation26_spill] sm:$0xff] }
 0x273   : > { %5484 = vmatprep.mubr.msk.bf16.mxu1 %vm2553_vm2, %v7228_v58  ;;  %4043 = vmatprep.mubr.bf16.mxu0 %v3382_v50 }
 0x274   : > { %2331 = vrot.lane.b32.xlu0 %v7951_v10, %s5904_s30  ;;  %v2310_v42 = vpop.permute.xlu1 %2309  ;;  %4044 = vmatmul.mubr.bf16.gmra.mxu0 %v2870_v32  ;;  %v9614_v32 = vld [vmem:[#allocation72_spill] sm:$0xff] }
 0x275   : > { %v2172_v9 = vpop.permute.xlu0 %2171 }
 0x276   : > { %2037 = vrot.lane.b32.xlu1 %v7878_v0, %s5905_s9  ;;  %v3066_v58 = vsel %vm2553_vm2, %v9555_v36, %v2172_v9  ;;  %v5846_v36 = vld [vmem:[%s5957_s22 + $0x164] ss:$0 sps:$4 sm:$0x11]  }
 0x277   : > { %v3237_v50 = vsel %vm2682_vm4, %v3066_v58, %v2310_v42  ;;  %v1765_v39 = vrot.slane %v5846_v36, 1  ;;  %v2595_v42 = vsel %vm2553_vm2, %v7455_v17, %v9614_v32  ;;  %v9615_v58 = vld [vmem:[#allocation29_spill] sm:$0xff] }
 0x278   : > { %2482 = vrot.lane.b32.xlu0 %v9613_v43, %s5905_s9  ;;  %v2461_v22 = vpop.permute.xlu1 %2460 }
 0x279   : > { %v3385_v20 = vsel %vm2811_vm3, %v3237_v50, %v2461_v22  ;;  %v1878_v40 = vpop.permute.xlu0 %1877  ;;  %v7990_v22 = vsel %vm1676_vm1, %v1763_v25, %v1765_v39  ;;  %v9617_v25 = vld [vmem:[#allocation71_spill] sm:$0xff] }
 0x27a   : > { %2333 = vrot.lane.b32.xlu1 %v7969_v49, %s5904_s30  ;;  %5485 = vmatmul.mubr.msk.bf16.gmra.mxu1 %vm2553_vm2, %v7292_v61  ;;  %v2724_v28 = vsel %vm2682_vm4, %v2595_v42, %v1878_v40  ;;  %v2597_v39 = vsel %vm2553_vm2, %v7502_v2, %v9617_v25 }
 0x27b   : > { %4051 = vmatprep.mubr.bf16.mxu0 %v3385_v20  ;;  %5488 = vmatprep.mubr.msk.bf16.mxu1 %vm2553_vm2, %v7352_v29 }
 0x27c   : > { %2195 = vrot.lane.b32.xlu0 %v7965_v4, %s5902_s23  ;;  %v2174_v56 = vpop.permute.xlu1 %2173 }
 0x27d   : > { %v2016_v9 = vpop.permute.xlu0 %2015 }
 0x27e   : > { %2484 = vrot.lane.b32.xlu1 %v9615_v58, %s5905_s9  ;;  %v7986_v61 = vpop.f32.mrf.mxu1  ;;  %v2873_v29 = vsel %vm2811_vm3, %v2724_v28, %v2016_v9  ;;  %v3069_v9 = vsel %vm2553_vm2, %v9562_v31, %v2174_v56  ;;  %v1767_v56 = vrot.slane %v7969_v49, 1 }
 0x27f   : > { %v7992_v50 = vpop.f32.mrf.mxu0  ;;  %4052 = vmatmul.mubr.bf16.gmra.mxu0 %v2873_v29 }
 0x280   : > { %1901 = vrot.lane.b32.xlu0 %v7896_v19, %s5904_s30  ;;  %v1880_v17 = vpop.permute.xlu1 %1879  ;;  %v4343_v20 = vpop.f32.mrf.mxu1 }
 0x281   : > { %v3959_v40 = vpop.f32.mrf.mxu0  ;;  %v2312_v36 = vpop.permute.xlu0 %2311 }
 0x282   : > { %2197 = vrot.lane.b32.xlu1 %v7990_v22, %s5902_s23  ;;  %5489 = vmatmul.mubr.msk.bf16.gmra.mxu1 %vm2553_vm2, %v7402_v52  ;;  %v8000_v32 = vpop.f32.mrf.mxu1  ;;  %v2726_v52 = vsel %vm2682_vm4, %v2597_v39, %v1880_v17  ;;  %v3239_v20 = vsel %vm2682_vm4, %v3069_v9, %v2312_v36 }
 0x283   : > { %9616 = vst [vmem:[#allocation112_spill] sm:$0xff] %v8000_v32  ;;  %5492 = vmatprep.mubr.msk.bf16.mxu1 %vm2553_vm2, %v7452_v51  ;;  %v8007_v42 = vpop.f32.mrf.mxu0  ;;  %v8020_v32 = vld [vmem:[%s5957_s22 + $0x170] sm:$0xff]  }
 0x284   : > { %2039 = vrot.lane.b32.xlu0 %v7900_v34, %s5905_s9  ;;  %v2018_v28 = vpop.permute.xlu1 %2017  ;;  %v4346_v29 = vpop.f32.mrf.mxu1  ;;  %v1768_v17 = vrot.slane %v8020_v32, 1 }
 0x285   : > { %v3962_v40 = vpop.f32.mrf.mxu0  ;;  %v2463_v51 = vpop.permute.xlu0 %2462  ;;  %v2876_v2 = vsel %vm2811_vm3, %v2726_v52, %v2018_v28  ;;  %v9618_v28 = vld [vmem:[#allocation28_spill] sm:$0xff] }
 0x286   : > { %1903 = vrot.lane.b32.xlu1 %v7919_v30, %s5904_s30  ;;  %v3388_v25 = vsel %vm2811_vm3, %v3239_v20, %v2463_v51  ;;  %v8038_v29 = vsel %vm1676_vm1, %v1767_v56, %v1768_v17  ;;  %v8042_v51 = vld [vmem:[%s5957_s22 + $0x17c] sm:$0xff]  }
 0x287   : > { %4059 = vmatprep.mubr.bf16.mxu0 %v3388_v25 }
 0x288   : > { %2335 = vrot.lane.b32.xlu0 %v8020_v32, %s5904_s30  ;;  %v2314_v31 = vpop.permute.xlu1 %2313  ;;  %4060 = vmatmul.mubr.bf16.gmra.mxu0 %v2876_v2  ;;  %v9619_v2 = vld [vmem:[#allocation74_spill] sm:$0xff] }
 0x289   : > { %v2176_v36 = vpop.permute.xlu0 %2175  ;;  %v2599_v25 = vsel %vm2553_vm2, %v7516_v57, %v9619_v2 }
 0x28a   : > { %2041 = vrot.lane.b32.xlu1 %v7951_v10, %s5905_s9  ;;  %5493 = vmatmul.mubr.msk.bf16.gmra.mxu1 %vm2553_vm2, %v7469_v35  ;;  %v3072_v39 = vsel %vm2553_vm2, %v9563_v24, %v2176_v36  ;;  %v5849_v35 = vld [vmem:[%s5957_s22 + $0x178] ss:$0 sps:$4 sm:$0x11]   ;;  %v9620_v36 = vld [vmem:[#allocation31_spill] sm:$0xff] }
 0x28b   : > { %5496 = vmatprep.mubr.msk.bf16.mxu1 %vm2553_vm2, %v7513_v41  ;;  %v3241_v52 = vsel %vm2682_vm4, %v3072_v39, %v2314_v31  ;;  %v1770_v41 = vrot.slane %v5849_v35, 1 }
 0x28c   : > { %2486 = vrot.lane.b32.xlu0 %v9618_v28, %s5905_s9  ;;  %v2465_v9 = vpop.permute.xlu1 %2464 }
 0x28d   : > { %v3391_v20 = vsel %vm2811_vm3, %v3241_v52, %v2465_v9  ;;  %v1882_v40 = vpop.permute.xlu0 %1881  ;;  %v8061_v52 = vsel %vm1676_vm1, %v1768_v17, %v1770_v41  ;;  %v9622_v17 = vld [vmem:[#allocation73_spill] sm:$0xff] }
 0x28e   : > { %2337 = vrot.lane.b32.xlu1 %v8042_v51, %s5904_s30  ;;  %4067 = vmatprep.mubr.bf16.mxu0 %v3391_v20  ;;  %v2728_v31 = vsel %vm2682_vm4, %v2599_v25, %v1882_v40 }
 0x290   : > { %2199 = vrot.lane.b32.xlu0 %v8038_v29, %s5902_s23  ;;  %v2178_v24 = vpop.permute.xlu1 %2177 }
 0x291   : > { %v2020_v56 = vpop.permute.xlu0 %2019 }
 0x292   : > { %2488 = vrot.lane.b32.xlu1 %v9620_v36, %s5905_s9  ;;  %v8055_v39 = vpop.f32.mrf.mxu1  ;;  %5497 = vmatmul.mubr.msk.bf16.gmra.mxu1 %vm2553_vm2, %v7530_v47  ;;  %v2879_v9 = vsel %vm2811_vm3, %v2728_v31, %v2020_v56  ;;  %v3075_v31 = vsel %vm2553_vm2, %v9570_v55, %v2178_v24  ;;  %v8093_v55 = vld [vmem:[%s5957_s22 + $0x184] sm:$0xff]  }
 0x293   : > { %5500 = vmatprep.mubr.msk.bf16.mxu1 %vm2553_vm2, %v7574_v46  ;;  %v8065_v57 = vpop.f32.mrf.mxu0  ;;  %4068 = vmatmul.mubr.bf16.gmra.mxu0 %v2879_v9  ;;  %v2601_v46 = vsel %vm2553_vm2, %v7563_v37, %v9622_v17 }
 0x294   : > { %1905 = vrot.lane.b32.xlu0 %v7965_v4, %s5904_s30  ;;  %v1884_v20 = vpop.permute.xlu1 %1883  ;;  %v4351_v40 = vpop.f32.mrf.mxu1 }
 0x295   : > { %v3967_v35 = vpop.f32.mrf.mxu0  ;;  %v2316_v2 = vpop.permute.xlu0 %2315  ;;  %v2730_v56 = vsel %vm2682_vm4, %v2601_v46, %v1884_v20  ;;  %v1772_v20 = vrot.slane %v8042_v51, 1 }
 0x296   : > { %2201 = vrot.lane.b32.xlu1 %v8061_v52, %s5902_s23  ;;  %v8071_v47 = vpop.f32.mrf.mxu1  ;;  %v3243_v40 = vsel %vm2682_vm4, %v3075_v31, %v2316_v2 }
 0x297   : > { %9621 = vst [vmem:[#allocation58_spill] sm:$0xff] %v8071_v47  ;;  %v8076_v41 = vpop.f32.mrf.mxu0 }
 0x298   : > { %2043 = vrot.lane.b32.xlu0 %v7969_v49, %s5905_s9  ;;  %v2022_v25 = vpop.permute.xlu1 %2021  ;;  %v4354_v9 = vpop.f32.mrf.mxu1 }
 0x299   : > { %v3970_v35 = vpop.f32.mrf.mxu0  ;;  %v2467_v47 = vpop.permute.xlu0 %2466  ;;  %v2882_v37 = vsel %vm2811_vm3, %v2730_v56, %v2022_v25 }
 0x29a   : > { %1907 = vrot.lane.b32.xlu1 %v7990_v22, %s5904_s30  ;;  %5501 = vmatmul.mubr.msk.bf16.gmra.mxu1 %vm2553_vm2, %v7591_v44  ;;  %v3394_v17 = vsel %vm2811_vm3, %v3243_v40, %v2467_v47  ;;  %v1773_v44 = vrot.slane %v8093_v55, 1  ;;  %v9623_v47 = vld [vmem:[#allocation30_spill] sm:$0xff]  ;;  %v8111_v40 = vld [vmem:[%s5957_s22 + $0x190] sm:$0xff]  }
 0x29b   : > { %5504 = vmatprep.mubr.msk.bf16.mxu1 %vm2553_vm2, %v7635_v11  ;;  %4075 = vmatprep.mubr.bf16.mxu0 %v3394_v17  ;;  %v9624_v17 = vld [vmem:[#allocation76_spill] sm:$0xff] }
 0x29c   : > { %2339 = vrot.lane.b32.xlu0 %v8093_v55, %s5904_s30  ;;  %v2318_v24 = vpop.permute.xlu1 %2317  ;;  %4076 = vmatmul.mubr.bf16.gmra.mxu0 %v2882_v37  ;;  %v8107_v31 = vsel %vm1676_vm1, %v1772_v20, %v1773_v44 }
 0x29d   : > { %v2180_v2 = vpop.permute.xlu0 %2179 }
 0x29e   : > { %2045 = vrot.lane.b32.xlu1 %v8020_v32, %s5905_s9  ;;  %v3078_v11 = vsel %vm2553_vm2, %v9571_v26, %v2180_v2  ;;  %v5852_v26 = vld [vmem:[%s5957_s22 + $0x18c] ss:$0 sps:$4 sm:$0x11]  }
 0x29f   : > { %v3245_v25 = vsel %vm2682_vm4, %v3078_v11, %v2318_v24  ;;  %v1775_v35 = vrot.slane %v5852_v26, 1  ;;  %v2603_v24 = vsel %vm2553_vm2, %v7577_v6, %v9624_v17  ;;  %v9625_v11 = vld [vmem:[#allocation33_spill] sm:$0xff] }
 0x2a0   : > { %2490 = vrot.lane.b32.xlu0 %v9623_v47, %s5905_s9  ;;  %v2469_v46 = vpop.permute.xlu1 %2468 }
 0x2a1   : > { %v3397_v56 = vsel %vm2811_vm3, %v3245_v25, %v2469_v46  ;;  %v1886_v9 = vpop.permute.xlu0 %1885  ;;  %v8132_v46 = vsel %vm1676_vm1, %v1773_v44, %v1775_v35  ;;  %v9628_v44 = vld [vmem:[#allocation75_spill] sm:$0xff] }
 0x2a2   : > { %2341 = vrot.lane.b32.xlu1 %v8111_v40, %s5904_s30  ;;  %5505 = vmatmul.mubr.msk.bf16.gmra.mxu1 %vm2553_vm2, %v7652_v16  ;;  %v2732_v20 = vsel %vm2682_vm4, %v2603_v24, %v1886_v9  ;;  %v2605_v35 = vsel %vm2553_vm2, %v7624_v12, %v9628_v44 }
 0x2a3   : > { %4083 = vmatprep.mubr.bf16.mxu0 %v3397_v56  ;;  %5508 = vmatprep.mubr.msk.bf16.mxu1 %vm2553_vm2, %v7696_v53 }
 0x2a4   : > { %2203 = vrot.lane.b32.xlu0 %v8107_v31, %s5902_s23  ;;  %v2182_v37 = vpop.permute.xlu1 %2181 }
 0x2a5   : > { %v2024_v2 = vpop.permute.xlu0 %2023 }
 0x2a6   : > { %2492 = vrot.lane.b32.xlu1 %v9625_v11, %s5905_s9  ;;  %v8128_v16 = vpop.f32.mrf.mxu1  ;;  %v2885_v53 = vsel %vm2811_vm3, %v2732_v20, %v2024_v2  ;;  %v3081_v2 = vsel %vm2553_vm2, %v9578_v21, %v2182_v37  ;;  %v1777_v37 = vrot.slane %v8111_v40, 1 }
 0x2a7   : > { %9626 = vst [vmem:[#allocation14_spill] sm:$0xff] %v8128_v16  ;;  %v8134_v25 = vpop.f32.mrf.mxu0  ;;  %4084 = vmatmul.mubr.bf16.gmra.mxu0 %v2885_v53 }
 0x2a8   : > { %1909 = vrot.lane.b32.xlu0 %v8038_v29, %s5904_s30  ;;  %v1888_v6 = vpop.permute.xlu1 %1887  ;;  %v4359_v56 = vpop.f32.mrf.mxu1 }
 0x2a9   : > { %v3975_v9 = vpop.f32.mrf.mxu0  ;;  %v2320_v26 = vpop.permute.xlu0 %2319 }
 0x2aa   : > { %2205 = vrot.lane.b32.xlu1 %v8132_v46, %s5902_s23  ;;  %5509 = vmatmul.mubr.msk.bf16.gmra.mxu1 %vm2553_vm2, %v7713_v63  ;;  %v8142_v17 = vpop.f32.mrf.mxu1  ;;  %v2734_v63 = vsel %vm2682_vm4, %v2605_v35, %v1888_v6  ;;  %v3247_v56 = vsel %vm2682_vm4, %v3081_v2, %v2320_v26  ;;  %v9629_v35 = vld [vmem:[#allocation21_spill] sm:$0xff]  ;;  %v9630_v2 = vld [vmem:[#allocation32_spill] sm:$0xff] }
 0x2ab   : > { %9627 = vst [vmem:[#allocation17_spill] sm:$0xff] %v8142_v17  ;;  %5512 = vmatprep.mubr.msk.bf16.mxu1 %vm2553_vm2, %v7757_v7  ;;  %v8149_v24 = vpop.f32.mrf.mxu0  ;;  %v8162_v17 = vld [vmem:[%s5957_s22 + $0x198] sm:$0xff]  }
 0x2ac   : > { %2047 = vrot.lane.b32.xlu0 %v8042_v51, %s5905_s9  ;;  %v2026_v20 = vpop.permute.xlu1 %2025  ;;  %v4362_v53 = vpop.f32.mrf.mxu1  ;;  %v1778_v6 = vrot.slane %v8162_v17, 1 }
 0x2ad   : > { %v3978_v9 = vpop.f32.mrf.mxu0  ;;  %v2471_v7 = vpop.permute.xlu0 %2470  ;;  %v2888_v12 = vsel %vm2811_vm3, %v2734_v63, %v2026_v20 }
 0x2ae   : > { %1911 = vrot.lane.b32.xlu1 %v8061_v52, %s5904_s30  ;;  %v3400_v44 = vsel %vm2811_vm3, %v3247_v56, %v2471_v7  ;;  %v8180_v56 = vsel %vm1676_vm1, %v1777_v37, %v1778_v6 }
 0x2af   : > { %4091 = vmatprep.mubr.bf16.mxu0 %v3400_v44 }
 0x2b0   : > { %2343 = vrot.lane.b32.xlu0 %v8162_v17, %s5904_s30  ;;  %v2322_v21 = vpop.permute.xlu1 %2321  ;;  %4092 = vmatmul.mubr.bf16.gmra.mxu0 %v2888_v12  ;;  %v8184_v12 = vld [vmem:[%s5957_s22 + $0x1a4] sm:$0xff]  }
 0x2b1   : > { %v2184_v26 = vpop.permute.xlu0 %2183 }
 0x2b2   : > { %2049 = vrot.lane.b32.xlu1 %v8093_v55, %s5905_s9  ;;  %5513 = vmatmul.mubr.msk.bf16.gmra.mxu1 %vm2553_vm2, %v7774_v38  ;;  %v3084_v20 = vsel %vm2553_vm2, %v9629_v35, %v2184_v26  ;;  %v5855_v38 = vld [vmem:[%s5957_s22 + $0x1a0] ss:$0 sps:$4 sm:$0x11]   ;;  %v9631_v26 = vld [vmem:[#allocation80_spill] sm:$0xff] }
 0x2b3   : > { %5516 = vmatprep.mubr.msk.bf16.mxu1 %vm2553_vm2, %v7823_v3  ;;  %v3249_v53 = vsel %vm2682_vm4, %v3084_v20, %v2322_v21  ;;  %v1780_v3 = vrot.slane %v5855_v38, 1  ;;  %v2607_v21 = vsel %vm2553_vm2, %v7638_v48, %v9631_v26  ;;  %v9632_v20 = vld [vmem:[#allocation35_spill] sm:$0xff] }
 0x2b4   : > { %2494 = vrot.lane.b32.xlu0 %v9630_v2, %s5905_s9  ;;  %v2473_v63 = vpop.permute.xlu1 %2472 }
 0x2b5   : > { %v3403_v9 = vsel %vm2811_vm3, %v3249_v53, %v2473_v63  ;;  %v1890_v7 = vpop.permute.xlu0 %1889 }
 0x2b6   : > { %2345 = vrot.lane.b32.xlu1 %v8184_v12, %s5904_s30  ;;  %4099 = vmatprep.mubr.bf16.mxu0 %v3403_v9  ;;  %v2736_v37 = vsel %vm2682_vm4, %v2607_v21, %v1890_v7  ;;  %v8203_v9 = vsel %vm1676_vm1, %v1778_v6, %v1780_v3  ;;  %v9635_v6 = vld [vmem:[#allocation78_spill] sm:$0xff] }
 0x2b8   : > { %2207 = vrot.lane.b32.xlu0 %v8180_v56, %s5902_s23  ;;  %v2186_v44 = vpop.permute.xlu1 %2185 }
 0x2b9   : > { %v2028_v35 = vpop.permute.xlu0 %2027 }
 0x2ba   : > { %2496 = vrot.lane.b32.xlu1 %v9632_v20, %s5905_s9  ;;  %v8197_v63 = vpop.f32.mrf.mxu1  ;;  %5517 = vmatmul.mubr.msk.bf16.gmra.mxu1 %vm2553_vm2, %v7848_v54  ;;  %v2891_v53 = vsel %vm2811_vm3, %v2736_v37, %v2028_v35  ;;  %v9636_v35 = vld [vmem:[#allocation20_spill] sm:$0xff] }
 0x2bb   : > { %9633 = vst [vmem:[#allocation115_spill] sm:$0xff] %v8197_v63  ;;  %5520 = vmatprep.mubr.msk.bf16.mxu1 %vm2553_vm2, %v7896_v19  ;;  %v8207_v48 = vpop.f32.mrf.mxu0  ;;  %4100 = vmatmul.mubr.bf16.gmra.mxu0 %v2891_v53  ;;  %v2609_v19 = vsel %vm2553_vm2, %v7685_v45, %v9635_v6  ;;  %v3087_v53 = vsel %vm2553_vm2, %v9636_v35, %v2186_v44  ;;  %v8235_v44 = vld [vmem:[%s5957_s22 + $0x1ac] sm:$0xff]  }
 0x2bc   : > { %1913 = vrot.lane.b32.xlu0 %v8107_v31, %s5904_s30  ;;  %v1892_v7 = vpop.permute.xlu1 %1891  ;;  %v4367_v38 = vpop.f32.mrf.mxu1 }
 0x2bd   : > { %v3983_v26 = vpop.f32.mrf.mxu0  ;;  %v2324_v21 = vpop.permute.xlu0 %2323  ;;  %v2738_v38 = vsel %vm2682_vm4, %v2609_v19, %v1892_v7 }
 0x2be   : > { %2209 = vrot.lane.b32.xlu1 %v8203_v9, %s5902_s23  ;;  %v8213_v54 = vpop.f32.mrf.mxu1  ;;  %v3251_v16 = vsel %vm2682_vm4, %v3087_v53, %v2324_v21  ;;  %v1782_v21 = vrot.slane %v8184_v12, 1 }
 0x2bf   : > { %9634 = vst [vmem:[#allocation61_spill] sm:$0xff] %v8213_v54  ;;  %v8218_v3 = vpop.f32.mrf.mxu0 }
 0x2c0   : > { %2051 = vrot.lane.b32.xlu0 %v8111_v40, %s5905_s9  ;;  %v2030_v37 = vpop.permute.xlu1 %2029  ;;  %v4370_v26 = vpop.f32.mrf.mxu1 }
 0x2c1   : > { %v3986_v54 = vpop.f32.mrf.mxu0  ;;  %v2475_v63 = vpop.permute.xlu0 %2474  ;;  %v2894_v45 = vsel %vm2811_vm3, %v2738_v38, %v2030_v37  ;;  %v8253_v26 = vld [vmem:[%s5957_s22 + $0x1b8] sm:$0xff]  }
 0x2c2   : > { %1915 = vrot.lane.b32.xlu1 %v8132_v46, %s5904_s30  ;;  %5521 = vmatmul.mubr.msk.bf16.gmra.mxu1 %vm2553_vm2, %v7919_v30  ;;  %v3406_v6 = vsel %vm2811_vm3, %v3251_v16, %v2475_v63  ;;  %v1783_v30 = vrot.slane %v8235_v44, 1  ;;  %v9637_v16 = vld [vmem:[#allocation23_spill] sm:$0xff]  ;;  %v9638_v63 = vld [vmem:[#allocation34_spill] sm:$0xff] }
 0x2c3   : > { %5524 = vmatprep.mubr.msk.bf16.mxu1 %vm2553_vm2, %v7965_v4  ;;  %4107 = vmatprep.mubr.bf16.mxu0 %v3406_v6 }
 0x2c4   : > { %2347 = vrot.lane.b32.xlu0 %v8235_v44, %s5904_s30  ;;  %v2326_v7 = vpop.permute.xlu1 %2325  ;;  %4108 = vmatmul.mubr.bf16.gmra.mxu0 %v2894_v45  ;;  %v8249_v35 = vsel %vm1676_vm1, %v1782_v21, %v1783_v30  ;;  %v5858_v45 = vld [vmem:[%s5957_s22 + $0x1b4] ss:$0 sps:$4 sm:$0x11]   ;;  %v9639_v21 = vld [vmem:[#allocation82_spill] sm:$0xff] }
 0x2c5   : > { %v1785_v6 = vrot.slane %v5858_v45, 1 }
 0x2c6   : > { %v2188_v54 = vpop.permute.xlu0 %2187  ;;  %2053 = vrot.lane.b32.xlu1 %v8162_v17, %s5905_s9 }
 0x2c7   : > { %v3090_v4 = vsel %vm2553_vm2, %v9637_v16, %v2188_v54  ;;  %v2611_v54 = vsel %vm2553_vm2, %v7699_v60, %v9639_v21 }
 0x2c8   : > { %2498 = vrot.lane.b32.xlu0 %v9638_v63, %s5905_s9  ;;  %v2477_v19 = vpop.permute.xlu1 %2476  ;;  %v3253_v37 = vsel %vm2682_vm4, %v3090_v4, %v2326_v7 }
 0x2c9   : > { %v3409_v53 = vsel %vm2811_vm3, %v3253_v37, %v2477_v19  ;;  %v9640_v19 = vld [vmem:[#allocation37_spill] sm:$0xff]  ;;  %v8274_v37 = vsel %vm1676_vm1, %v1783_v30, %v1785_v6 }
 0x2ca   : > { %v1894_v38 = vpop.permute.xlu0 %1893  ;;  %2349 = vrot.lane.b32.xlu1 %v8253_v26, %s5904_s30  ;;  %5525 = vmatmul.mubr.msk.bf16.gmra.mxu1 %vm2553_vm2, %v7990_v22  ;;  %v9643_v30 = vld [vmem:[#allocation81_spill] sm:$0xff] }
 0x2cb   : > { %4115 = vmatprep.mubr.bf16.mxu0 %v3409_v53  ;;  %5528 = vmatprep.mubr.msk.bf16.mxu1 %vm2553_vm2, %v8038_v29  ;;  %v2740_v16 = vsel %vm2682_vm4, %v2611_v54, %v1894_v38  ;;  %v2613_v6 = vsel %vm2553_vm2, %v7746_v14, %v9643_v30  ;;  %v8304_v30 = vld [vmem:[%s5957_s22 + $0x1c0] sm:$0xff]  }
 0x2cc   : > { %2211 = vrot.lane.b32.xlu0 %v8249_v35, %s5902_s23  ;;  %v2190_v7 = vpop.permute.xlu1 %2189 }
 0x2ce   : > { %v2032_v4 = vpop.permute.xlu0 %2031  ;;  %2500 = vrot.lane.b32.xlu1 %v9640_v19, %s5905_s9  ;;  %v8270_v22 = vpop.f32.mrf.mxu1 }
 0x2cf   : > { %9641 = vst [vmem:[#allocation16_spill] sm:$0xff] %v8270_v22  ;;  %v2897_v29 = vsel %vm2811_vm3, %v2740_v16, %v2032_v4  ;;  %v8276_v53 = vpop.f32.mrf.mxu0 }
 0x2d0   : > { %1917 = vrot.lane.b32.xlu0 %v8180_v56, %s5904_s30  ;;  %4116 = vmatmul.mubr.bf16.gmra.mxu0 %v2897_v29  ;;  %v1896_v60 = vpop.permute.xlu1 %1895  ;;  %v4375_v45 = vpop.f32.mrf.mxu1  ;;  %v3093_v29 = vsel %vm2553_vm2, %v9593_v5, %v2190_v7  ;;  %v1788_v7 = vrot.slane %v8304_v30, 1 }
 0x2d1   : > { %v3991_v38 = vpop.f32.mrf.mxu0 }
 0x2d2   : > { %v2328_v21 = vpop.permute.xlu0 %2327  ;;  %2213 = vrot.lane.b32.xlu1 %v8274_v37, %s5902_s23  ;;  %5529 = vmatmul.mubr.msk.bf16.gmra.mxu1 %vm2553_vm2, %v8061_v52  ;;  %v8284_v54 = vpop.f32.mrf.mxu1  ;;  %v2742_v52 = vsel %vm2682_vm4, %v2613_v6, %v1896_v60 }
 0x2d3   : > { %9642 = vst [vmem:[#allocation19_spill] sm:$0xff] %v8284_v54  ;;  %5532 = vmatprep.mubr.msk.bf16.mxu1 %vm2553_vm2, %v8107_v31  ;;  %v8291_v16 = vpop.f32.mrf.mxu0  ;;  %v3255_v38 = vsel %vm2682_vm4, %v3093_v29, %v2328_v21  ;;  %v9644_v21 = vld [vmem:[#allocation36_spill] sm:$0xff] }
 0x2d4   : > { %2055 = vrot.lane.b32.xlu0 %v8184_v12, %s5905_s9  ;;  %v2034_v4 = vpop.permute.xlu1 %2033  ;;  %v4378_v45 = vpop.f32.mrf.mxu1  ;;  %v1787_v12 = vrot.slane %v8253_v26, 1 }
 0x2d5   : > { %v2900_v31 = vsel %vm2811_vm3, %v2742_v52, %v2034_v4  ;;  %v3994_v54 = vpop.f32.mrf.mxu0  ;;  %v8326_v52 = vld [vmem:[%s5957_s22 + $0x1cc] sm:$0xff]   ;;  %v9645_v45 = vld [vmem:[#allocation85_spill] sm:$0xff] }
 0x2d6   : > { %v2479_v22 = vpop.permute.xlu0 %2478  ;;  %1919 = vrot.lane.b32.xlu1 %v8203_v9, %s5904_s30  ;;  %v8322_v4 = vsel %vm1676_vm1, %v1787_v12, %v1788_v7 }
 0x2d7   : > { %v3412_v14 = vsel %vm2811_vm3, %v3255_v38, %v2479_v22  ;;  %v2615_v38 = vsel %vm2553_vm2, %v7760_v13, %v9645_v45 }
 0x2d8   : > { %2351 = vrot.lane.b32.xlu0 %v8304_v30, %s5904_s30  ;;  %4123 = vmatprep.mubr.bf16.mxu0 %v3412_v14  ;;  %v2330_v5 = vpop.permute.xlu1 %2329 }
 0x2d9   : > { %4124 = vmatmul.mubr.bf16.gmra.mxu0 %v2900_v31 }
 0x2da   : > { %v2192_v60 = vpop.permute.xlu0 %2191  ;;  %2057 = vrot.lane.b32.xlu1 %v8235_v44, %s5905_s9  ;;  %5533 = vmatmul.mubr.msk.bf16.gmra.mxu1 %vm2553_vm2, %v8132_v46 }
 0x2db   : > { %v3096_v22 = vsel %vm2553_vm2, %v9596_v27, %v2192_v60  ;;  %5536 = vmatprep.mubr.msk.bf16.mxu1 %vm2553_vm2, %v8180_v56  ;;  %v5861_v27 = vld [vmem:[%s5957_s22 + $0x1c8] ss:$0 sps:$4 sm:$0x11]  }
 0x2dc   : > { %2502 = vrot.lane.b32.xlu0 %v9644_v21, %s5905_s9  ;;  %v2481_v54 = vpop.permute.xlu1 %2480  ;;  %v3257_v6 = vsel %vm2682_vm4, %v3096_v22, %v2330_v5  ;;  %v1790_v46 = vrot.slane %v5861_v27, 1  ;;  %v9646_v5 = vld [vmem:[#allocation39_spill] sm:$0xff] }
 0x2dd   : > { %v3415_v44 = vsel %vm2811_vm3, %v3257_v6, %v2481_v54 }
 0x2de   : > { %v1898_v29 = vpop.permute.xlu0 %1897  ;;  %2353 = vrot.lane.b32.xlu1 %v8326_v52, %s5904_s30  ;;  %4131 = vmatprep.mubr.bf16.mxu0 %v3415_v44  ;;  %v8345_v22 = vsel %vm1676_vm1, %v1788_v7, %v1790_v46  ;;  %v9648_v7 = vld [vmem:[#allocation84_spill] sm:$0xff] }
 0x2df   : > { %v2744_v31 = vsel %vm2682_vm4, %v2615_v38, %v1898_v29  ;;  %v2617_v27 = vsel %vm2553_vm2, %v7809_v8, %v9648_v7  ;;  %v9649_v7 = vld [vmem:[#allocation38_spill] sm:$0xff] }
 0x2e0   : > { %2215 = vrot.lane.b32.xlu0 %v8322_v4, %s5902_s23  ;;  %v2194_v56 = vpop.permute.xlu1 %2193 }
 0x2e1   : > { %v3099_v45 = vsel %vm2553_vm2, %v9603_v23, %v2194_v56  ;;  %v5862_v23 = vld [vmem:[%s5957_s22 + $0x1d4] sm:$0xff]   ;;  %v1792_v56 = vrot.slane %v8326_v52, 1 }
 0x2e2   : > { %v2036_v14 = vpop.permute.xlu0 %2035  ;;  %2504 = vrot.lane.b32.xlu1 %v9646_v5, %s5905_s9  ;;  %v8339_v12 = vpop.f32.mrf.mxu1  ;;  %5537 = vmatmul.mubr.msk.bf16.gmra.mxu1 %vm2553_vm2, %v8203_v9 }
 0x2e3   : > { %v2903_v60 = vsel %vm2811_vm3, %v2744_v31, %v2036_v14  ;;  %5540 = vmatprep.mubr.msk.bf16.mxu1 %vm2553_vm2, %v8249_v35  ;;  %v8349_v13 = vpop.f32.mrf.mxu0 }
 0x2e4   : > { %1921 = vrot.lane.b32.xlu0 %v8249_v35, %s5904_s30  ;;  %4132 = vmatmul.mubr.bf16.gmra.mxu0 %v2903_v60  ;;  %v1900_v54 = vpop.permute.xlu1 %1899  ;;  %v4383_v6 = vpop.f32.mrf.mxu1 }
 0x2e5   : > { %v3999_v44 = vpop.f32.mrf.mxu0  ;;  %v2746_v38 = vsel %vm2682_vm4, %v2617_v27, %v1900_v54  ;;  %v1793_v54 = vrot.slane %v5862_v23, 1 }
 0x2e6   : > { %v2332_v29 = vpop.permute.xlu0 %2331  ;;  %2217 = vrot.lane.b32.xlu1 %v8345_v22, %s5902_s23  ;;  %v8355_v9 = vpop.f32.mrf.mxu1 }
 0x2e7   : > { %9647 = vst [vmem:[#allocation114_spill] sm:$0xff] %v8355_v9  ;;  %v8360_v46 = vpop.f32.mrf.mxu0  ;;  %v3259_v14 = vsel %vm2682_vm4, %v3099_v45, %v2332_v29  ;;  %v8387_v45 = vsel %vm1676_vm1, %v1792_v56, %v1793_v54  ;;  %v9651_v56 = vld [vmem:[#allocation41_spill] sm:$0xff] }
 0x2e8   : > { %2059 = vrot.lane.b32.xlu0 %v8253_v26, %s5905_s9  ;;  %v2038_v35 = vpop.permute.xlu1 %2037  ;;  %v4386_v31 = vpop.f32.mrf.mxu1 }
 0x2e9   : > { %v2906_v60 = vsel %vm2811_vm3, %v2746_v38, %v2038_v35  ;;  %v4002_v6 = vpop.f32.mrf.mxu0 }
 0x2ea   : > { %v2483_v44 = vpop.permute.xlu0 %2482  ;;  %1923 = vrot.lane.b32.xlu1 %v8274_v37, %s5904_s30  ;;  %5541 = vmatmul.mubr.msk.bf16.gmra.mxu1 %vm2553_vm2, %v8274_v37  ;;  %v9650_v6 = vld [vmem:[#allocation87_spill] sm:$0xff] }
 0x2eb   : > { %v3418_v8 = vsel %vm2811_vm3, %v3259_v14, %v2483_v44  ;;  %5544 = vmatprep.mubr.msk.bf16.mxu1 %vm2553_vm2, %v8322_v4  ;;  %v8391_v14 = vld [vmem:[%s5957_s22 + $0x1e0] sm:$0xff]   ;;  %v2619_v44 = vsel %vm2553_vm2, %v7827_v62, %v9650_v6 }
 0x2ec   : > { %2355 = vrot.lane.b32.xlu0 %v5862_v23, %s5904_s30  ;;  %4139 = vmatprep.mubr.bf16.mxu0 %v3418_v8  ;;  %v2334_v26 = vpop.permute.xlu1 %2333 }
 0x2ed   : > { %4140 = vmatmul.mubr.bf16.gmra.mxu0 %v2906_v60 }
 0x2ee   : > { %v2196_v29 = vpop.permute.xlu0 %2195  ;;  %2061 = vrot.lane.b32.xlu1 %v8304_v30, %s5905_s9 }
 0x2ef   : > { %v3102_v37 = vsel %vm2553_vm2, %v9605_v59, %v2196_v29  ;;  %v5864_v59 = vld [vmem:[%s5957_s22 + $0x1dc] ss:$0 sps:$4 sm:$0x11]  }
 0x2f0   : > { %2506 = vrot.lane.b32.xlu0 %v9649_v7, %s5905_s9  ;;  %v2485_v27 = vpop.permute.xlu1 %2484  ;;  %v3261_v35 = vsel %vm2682_vm4, %v3102_v37, %v2334_v26  ;;  %v1795_v30 = vrot.slane %v5864_v59, 1 }
 0x2f1   : > { %v3421_v38 = vsel %vm2811_vm3, %v3261_v35, %v2485_v27 }
 0x2f2   : > { %v1902_v31 = vpop.permute.xlu0 %1901  ;;  %2357 = vrot.lane.b32.xlu1 %v8391_v14, %s5904_s30  ;;  %5545 = vmatmul.mubr.msk.bf16.gmra.mxu1 %vm2553_vm2, %v8345_v22  ;;  %v8412_v27 = vsel %vm1676_vm1, %v1793_v54, %v1795_v30  ;;  %v9654_v54 = vld [vmem:[#allocation57_spill] sm:$0xff]  ;;  %v9655_v30 = vld [vmem:[#allocation86_spill] sm:$0xff] }
 0x2f3   : > { %4147 = vmatprep.mubr.bf16.mxu0 %v3421_v38  ;;  %5548 = vmatprep.mubr.msk.bf16.mxu1 %vm2553_vm2, %v8387_v45  ;;  %v2748_v8 = vsel %vm2682_vm4, %v2619_v44, %v1902_v31 }
 0x2f4   : > { %2219 = vrot.lane.b32.xlu0 %v8387_v45, %s5902_s23  ;;  %v2198_v60 = vpop.permute.xlu1 %2197 }
 0x2f6   : > { %v2040_v26 = vpop.permute.xlu0 %2039  ;;  %2508 = vrot.lane.b32.xlu1 %v9651_v56, %s5905_s9  ;;  %v8408_v29 = vpop.f32.mrf.mxu1 }
 0x2f7   : > { %9652 = vst [vmem:[#allocation60_spill] sm:$0xff] %v8408_v29  ;;  %v2909_v37 = vsel %vm2811_vm3, %v2748_v8, %v2040_v26  ;;  %v8414_v35 = vpop.f32.mrf.mxu0  ;;  %v3105_v26 = vsel %vm2553_vm2, %v9613_v43, %v2198_v60 }
 0x2f8   : > { %1925 = vrot.lane.b32.xlu0 %v8322_v4, %s5904_s30  ;;  %4148 = vmatmul.mubr.bf16.gmra.mxu0 %v2909_v37  ;;  %v1904_v62 = vpop.permute.xlu1 %1903  ;;  %v4391_v38 = vpop.f32.mrf.mxu1  ;;  %v2621_v4 = vsel %vm2553_vm2, %v7878_v0, %v9655_v30 }
 0x2f9   : > { %v4007_v31 = vpop.f32.mrf.mxu0  ;;  %v2750_v37 = vsel %vm2682_vm4, %v2621_v4, %v1904_v62  ;;  %v9656_v62 = vld [vmem:[#allocation69_spill] sm:$0xff] }
 0x2fa   : > { %v2336_v59 = vpop.permute.xlu0 %2335  ;;  %2221 = vrot.lane.b32.xlu1 %v8412_v27, %s5902_s23  ;;  %5549 = vmatmul.mubr.msk.bf16.gmra.mxu1 %vm2553_vm2, %v8412_v27  ;;  %v8422_v6 = vpop.f32.mrf.mxu1 }
 0x2fb   : > { %9653 = vst [vmem:[#allocation18_spill] sm:$0xff] %v8422_v6  ;;  %5552 = vmatprep.mubr.msk.bf16.mxu1 %vm2553_vm2, %v9654_v54  ;;  %v8429_v44 = vpop.f32.mrf.mxu0  ;;  %v3263_v31 = vsel %vm2682_vm4, %v3105_v26, %v2336_v59 }
 0x2fc   : > { %2063 = vrot.lane.b32.xlu0 %v8326_v52, %s5905_s9  ;;  %v2042_v8 = vpop.permute.xlu1 %2041  ;;  %v4394_v38 = vpop.f32.mrf.mxu1  ;;  %v8442_v52 = vld [vmem:[%s5957_s22 + $0x1e8] sm:$0xff]  }
 0x2fd   : > { %v2912_v6 = vsel %vm2811_vm3, %v2750_v37, %v2042_v8  ;;  %v4010_v29 = vpop.f32.mrf.mxu0  ;;  %v5866_v8 = vld [vmem:[%s5957_s22 + $0x1f4] sm:$0xff]  }
 0x2fe   : > { %v2487_v9 = vpop.permute.xlu0 %2486  ;;  %1927 = vrot.lane.b32.xlu1 %v8345_v22, %s5904_s30  ;;  %v9657_v29 = vld [vmem:[#allocation55_spill] sm:$0xff] }
 0x2ff   : > { %v3424_v0 = vsel %vm2811_vm3, %v3263_v31, %v2487_v9  ;;  %v9658_v9 = vld [vmem:[#allocation40_spill] sm:$0xff]  ;;  %v9660_v31 = vld [vmem:[#allocation43_spill] sm:$0xff] }
 0x300   : > { %2359 = vrot.lane.b32.xlu0 %v8442_v52, %s5904_s30  ;;  %4155 = vmatprep.mubr.bf16.mxu0 %v3424_v0  ;;  %v2338_v43 = vpop.permute.xlu1 %2337 }
 0x301   : > { %4156 = vmatmul.mubr.bf16.gmra.mxu0 %v2912_v6 }
 0x302   : > { %v2200_v60 = vpop.permute.xlu0 %2199  ;;  %2065 = vrot.lane.b32.xlu1 %v5862_v23, %s5905_s9  ;;  %5553 = vmatmul.mubr.msk.bf16.gmra.mxu1 %vm2553_vm2, %v9656_v62  ;;  %v9659_v23 = vld [vmem:[#allocation89_spill] sm:$0xff] }
 0x303   : > { %v3108_v22 = vsel %vm2553_vm2, %v9615_v58, %v2200_v60  ;;  %5556 = vmatprep.mubr.msk.bf16.mxu1 %vm2553_vm2, %v9657_v29  ;;  %v2623_v26 = vsel %vm2553_vm2, %v7900_v34, %v9659_v23 }
 0x304   : > { %2510 = vrot.lane.b32.xlu0 %v9658_v9, %s5905_s9  ;;  %v2489_v59 = vpop.permute.xlu1 %2488  ;;  %v3265_v30 = vsel %vm2682_vm4, %v3108_v22, %v2338_v43  ;;  %v9661_v43 = vld [vmem:[#allocation64_spill] sm:$0xff] }
 0x305   : > { %v3427_v6 = vsel %vm2811_vm3, %v3265_v30, %v2489_v59 }
 0x306   : > { %v1906_v4 = vpop.permute.xlu0 %1905  ;;  %2361 = vrot.lane.b32.xlu1 %v5866_v8, %s5904_s30  ;;  %4163 = vmatprep.mubr.bf16.mxu0 %v3427_v6 }
 0x307   : > { %v2752_v37 = vsel %vm2682_vm4, %v2623_v26, %v1906_v4  ;;  %v9663_v4 = vld [vmem:[#allocation88_spill] sm:$0xff]  ;;  %v8493_v26 = vld [vmem:[%s9252_s3] ss:$0 sm:$0xff] }
 0x308   : > { %2223 = vrot.lane.b32.xlu0 %v9654_v54, %s5902_s23  ;;  %v2202_v58 = vpop.permute.xlu1 %2201  ;;  %v9662_v54 = vld [vmem:[#allocation77_spill] sm:$0xff]  ;;  %v2625_v8 = vsel %vm2553_vm2, %v7951_v10, %v9663_v4  ;;  %v9664_v10 = vld [vmem:[#allocation46_spill] sm:$0xff] }
 0x309   : > { %v5867_v4 = vld [vmem:[%s5957_s22 + $0x1fc] sm:$0xff]  }
 0x30a   : > { %v2044_v38 = vpop.permute.xlu0 %2043  ;;  %2512 = vrot.lane.b32.xlu1 %v9660_v31, %s5905_s9  ;;  %v8467_v0 = vpop.f32.mrf.mxu1  ;;  %5557 = vmatmul.mubr.msk.bf16.gmra.mxu1 %vm2553_vm2, %v9661_v43  ;;  %v3902_v31 = vadd.f32 %v8493_v26, %v9664_v10 }
 0x30b   : > { %v2915_v60 = vsel %vm2811_vm3, %v2752_v37, %v2044_v38  ;;  %5560 = vmatprep.mubr.msk.bf16.mxu1 %vm2553_vm2, %v9662_v54 }
 0x30c   : > { %v8474_v22 = vpop.f32.mrf.mxu0  ;;  %1929 = vrot.lane.b32.xlu0 %v8387_v45, %s5904_s30  ;;  %4164 = vmatmul.mubr.bf16.gmra.mxu0 %v2915_v60  ;;  %v1908_v34 = vpop.permute.xlu1 %1907 }
 0x30d   : > { %v4399_v29 = vpop.f32.mrf.mxu1  ;;  %v2754_v37 = vsel %vm2682_vm4, %v2625_v8, %v1908_v34  ;;  %v9666_v34 = vld [vmem:[#allocation103_spill] sm:$0xff] }
 0x30e   : > { %v4015_v59 = vpop.f32.mrf.mxu0  ;;  %v2340_v30 = vpop.permute.xlu0 %2339  ;;  %2225 = vrot.lane.b32.xlu1 %v9656_v62, %s5902_s23  ;;  %v3111_v62 = vsel %vm2553_vm2, %v9618_v28, %v2202_v58  ;;  %v9665_v29 = vld [vmem:[#allocation90_spill] sm:$0xff] }
 0x30f   : > { %v8480_v6 = vpop.f32.mrf.mxu1  ;;  %v3267_v43 = vsel %vm2682_vm4, %v3111_v62, %v2340_v30  ;;  %v9667_v59 = vld [vmem:[#allocation49_spill] sm:$0xff]  ;;  %v9668_v62 = vld [vmem:[#allocation108_spill] sm:$0xff] }
 0x310   : > { %v8485_v23 = vpop.f32.mrf.mxu0  ;;  %2067 = vrot.lane.b32.xlu0 %v8391_v14, %s5905_s9  ;;  %v2046_v45 = vpop.permute.xlu1 %2045  ;;  %v3894_v30 = vadd.f32 %v8493_v26, %v9667_v59 }
 0x311   : > { %v4402_v38 = vpop.f32.mrf.mxu1  ;;  %v2918_v14 = vsel %vm2811_vm3, %v2754_v37, %v2046_v45  ;;  %v3905_v37 = vadd.f32 %v8493_v26, %v9668_v62  ;;  %v9672_v62 = vld [vmem:[#allocation109_spill] sm:$0xff] }
 0x312   : > { %v4018_v60 = vpop.f32.mrf.mxu0  ;;  %v2491_v54 = vpop.permute.xlu0 %2490  ;;  %1931 = vrot.lane.b32.xlu1 %v8412_v27, %s5904_s30  ;;  %5561 = vmatmul.mubr.msk.bf16.gmra.mxu1 %vm2553_vm2, %v9665_v29 }
 0x313   : > { %v5466_v28 = vpop.f32.mrf.mxu1  ;;  %v3430_v58 = vsel %vm2811_vm3, %v3267_v43, %v2491_v54  ;;  %5564 = vmatprep.mubr.msk.bf16.mxu1 %vm2553_vm2, %v9666_v34  ;;  %v9669_v60 = vld [vmem:[#allocation48_spill] sm:$0xff] }
 0x314   : > { %v4447_v27 = vadd.f32 %v5466_v28, %v3902_v31  ;;  %2363 = vrot.lane.b32.xlu0 %v5867_v4, %s5904_s30  ;;  %4171 = vmatprep.mubr.bf16.mxu0 %v3430_v58  ;;  %v2342_v8 = vpop.permute.xlu1 %2341  ;;  %v3897_v54 = vadd.f32 %v8493_v26, %v9669_v60  ;;  %v9670_v28 = vld [vmem:[#allocation42_spill] sm:$0xff] }
 0x315   : > { %4172 = vmatmul.mubr.bf16.gmra.mxu0 %v2918_v14  ;;  %v4438_v45 = vpop.f32.mrf.mxu1 }
 0x316   : > { %4952 = vst.msk [vmem:[%s8509_s7 + $0x10] sm:$0xff] %vm4949_vm5, %v4447_v27  ;;  %v4439_v38 = vadd.f32 %v4438_v45, %v3894_v30  ;;  %v2204_v10 = vpop.permute.xlu0 %2203  ;;  %2069 = vrot.lane.b32.xlu1 %v8442_v52, %s5905_s9 }
 0x317   : > { %v3114_v31 = vsel %vm2553_vm2, %v9620_v36, %v2204_v10  ;;  %v5467_v43 = vpop.f32.mrf.mxu1  ;;  %v8530_v14 = vpop.f32.mrf.mxu0  ;;  %v9671_v36 = vld [vmem:[#allocation107_spill] sm:$0xff] }
 0x318   : > { %4950 = vst.msk [vmem:[%s8509_s7] sm:$0xff] %vm4949_vm5, %v4439_v38  ;;  %v4450_v29 = vadd.f32 %v5467_v43, %v3905_v37  ;;  %2514 = vrot.lane.b32.xlu0 %v9670_v28, %s5905_s9  ;;  %v2493_v58 = vpop.permute.xlu1 %2492  ;;  %v3269_v34 = vsel %vm2682_vm4, %v3114_v31, %v2342_v8  ;;  %v3918_v30 = vadd.f32 %v8493_v26, %v9671_v36  ;;  %v9673_v38 = vld [vmem:[#allocation118_spill] sm:$0xff]  ;;  %v9674_v8 = vld [vmem:[#allocation83_spill] sm:$0xff] }
 0x319   : > { %v4441_v52 = vpop.f32.mrf.mxu1  ;;  %v3433_v59 = vsel %vm2811_vm3, %v3269_v34, %v2493_v58  ;;  %v4023_v27 = vpop.f32.mrf.mxu0  ;;  %v3910_v10 = vadd.f32 %v8493_v26, %v9674_v8  ;;  %v9676_v58 = vld [vmem:[#allocation96_spill] sm:$0xff] }
 0x31a   : > { %4953 = vst.msk [vmem:[%s8509_s7 + $0x18] sm:$0xff] %vm4949_vm5, %v4450_v29  ;;  %v4442_v4 = vadd.f32 %v4441_v52, %v3897_v54  ;;  %v1910_v45 = vpop.permute.xlu0 %1909  ;;  %4179 = vmatprep.mubr.bf16.mxu0 %v3433_v59  ;;  %5565 = vmatmul.mubr.msk.bf16.gmra.mxu1 %vm2553_vm2, %v9672_v62  ;;  %v9675_v54 = vld [vmem:[#allocation93_spill] sm:$0xff]  ;;  %v3921_v34 = vadd.f32 %v8493_v26, %v9676_v58 }
 0x31b   : > { %v5470_v37 = vpop.f32.mrf.mxu1  ;;  %5568 = vmatprep.mubr.msk.bf16.mxu1 %vm2553_vm2, %v9673_v38  ;;  %v8548_v31 = vpop.f32.mrf.mxu0  ;;  %v2627_v29 = vsel %vm2553_vm2, %v7969_v49, %v9675_v54  ;;  %v9677_v62 = vld [vmem:[#allocation45_spill] sm:$0xff] }
 0x31c   : > { %4951 = vst.msk [vmem:[%s8509_s7 + $0x8] sm:$0xff] %vm4949_vm5, %v4442_v4  ;;  %v4463_v43 = vadd.f32 %v5470_v37, %v3918_v30  ;;  %v2206_v60 = vpop.permute.xlu1 %2205  ;;  %v2756_v52 = vsel %vm2682_vm4, %v2627_v29, %v1910_v45  ;;  %v3913_v37 = vadd.f32 %v8493_v26, %v9677_v62  ;;  %v9678_v29 = vld [vmem:[#allocation119_spill] sm:$0xff] }
 0x31d   : > { %v4454_v28 = vpop.f32.mrf.mxu1  ;;  %v4026_v59 = vpop.f32.mrf.mxu0 }
 0x31e   : > { %4956 = vst.msk [vmem:[%s8509_s7 + $0x30] sm:$0xff] %vm4949_vm5, %v4463_v43  ;;  %v4455_v36 = vadd.f32 %v4454_v28, %v3910_v10  ;;  %v2048_v27 = vpop.permute.xlu0 %2047  ;;  %v3934_v43 = vadd.f32 %v8493_v26, %v7777_v33 }
 0x31f   : > { %v2921_v4 = vsel %vm2811_vm3, %v2756_v52, %v2048_v27  ;;  %v5471_v30 = vpop.f32.mrf.mxu1  ;;  %v9679_v52 = vld [vmem:[#allocation121_spill] sm:$0xff] }
 0x320   : > { %4954 = vst.msk [vmem:[%s8509_s7 + $0x20] sm:$0xff] %vm4949_vm5, %v4455_v36  ;;  %4180 = vmatmul.mubr.bf16.gmra.mxu0 %v2921_v4  ;;  %v4466_v49 = vadd.f32 %v5471_v30, %v3921_v34  ;;  %v1912_v38 = vpop.permute.xlu1 %1911  ;;  %v8563_v8 = vpop.f32.mrf.mxu0  ;;  %v9680_v34 = vld [vmem:[#allocation91_spill] sm:$0xff]  ;;  %v3117_v30 = vsel %vm2553_vm2, %v9623_v47, %v2206_v60 }
 0x321   : > { %v4457_v45 = vpop.f32.mrf.mxu1  ;;  %v2629_v59 = vsel %vm2553_vm2, %v8020_v32, %v9680_v34  ;;  %v9681_v36 = vld [vmem:[#allocation111_spill] sm:$0xff]  ;;  %v3950_v34 = vadd.f32 %v8493_v26, %v7923_v18 }
 0x322   : > { %4957 = vst.msk [vmem:[%s8509_s7 + $0x38] sm:$0xff] %vm4949_vm5, %v4466_v49  ;;  %v4458_v10 = vadd.f32 %v4457_v45, %v3913_v37  ;;  %v2344_v54 = vpop.permute.xlu0 %2343  ;;  %5569 = vmatmul.mubr.msk.bf16.gmra.mxu1 %vm2553_vm2, %v9678_v29  ;;  %v4031_v28 = vpop.f32.mrf.mxu0  ;;  %v3926_v33 = vadd.f32 %v8493_v26, %v9681_v36  ;;  %v2758_v62 = vsel %vm2682_vm4, %v2629_v59, %v1912_v38  ;;  %v9682_v38 = vld [vmem:[#allocation11_spill] sm:$0xff] }
 0x323   : > { %v5474_v58 = vpop.f32.mrf.mxu1  ;;  %5572 = vmatprep.mubr.msk.bf16.mxu1 %vm2553_vm2, %v9679_v52  ;;  %v3937_v45 = vadd.f32 %v8493_v26, %v7794_v15  ;;  %v3271_v32 = vsel %vm2682_vm4, %v3117_v30, %v2344_v54  ;;  %v9684_v30 = vld [vmem:[#allocation5_spill] sm:$0xff] }
 0x324   : > { %4955 = vst.msk [vmem:[%s8509_s7 + $0x28] sm:$0xff] %vm4949_vm5, %v4458_v10  ;;  %v4479_v27 = vadd.f32 %v5474_v58, %v3934_v43  ;;  %v2050_v4 = vpop.permute.xlu1 %2049  ;;  %v8583_v37 = vpop.f32.mrf.mxu0  ;;  %v3929_v58 = vadd.f32 %v8493_v26, %v9682_v38  ;;  %v9686_v38 = vld [vmem:[#allocation113_spill] sm:$0xff] }
 0x325   : > { %v4470_v49 = vpop.f32.mrf.mxu1  ;;  %v2924_v43 = vsel %vm2811_vm3, %v2758_v62, %v2050_v4  ;;  %v3942_v62 = vadd.f32 %v8493_v26, %v7850_v1 }
 0x326   : > { %4960 = vst.msk [vmem:[%s8509_s7 + $0x50] sm:$0xff] %vm4949_vm5, %v4479_v27  ;;  %v4471_v10 = vadd.f32 %v4470_v49, %v3926_v33  ;;  %v2495_v29 = vpop.permute.xlu0 %2494  ;;  %v4034_v28 = vpop.f32.mrf.mxu0  ;;  %v9683_v33 = vld [vmem:[#allocation123_spill] sm:$0xff] }
 0x327   : > { %v3436_v47 = vsel %vm2811_vm3, %v3271_v32, %v2495_v29  ;;  %v5475_v60 = vpop.f32.mrf.mxu1 }
 0x328   : > { %4958 = vst.msk [vmem:[%s8509_s7 + $0x40] sm:$0xff] %vm4949_vm5, %v4471_v10  ;;  %4187 = vmatprep.mubr.bf16.mxu0 %v3436_v47  ;;  %v4482_v15 = vadd.f32 %v5475_v60, %v3937_v45  ;;  %v2346_v54 = vpop.permute.xlu1 %2345 }
 0x329   : > { %4188 = vmatmul.mubr.bf16.gmra.mxu0 %v2924_v43  ;;  %v4473_v52 = vpop.f32.mrf.mxu1 }
 0x32a   : > { %4961 = vst.msk [vmem:[%s8509_s7 + $0x58] sm:$0xff] %vm4949_vm5, %v4482_v15  ;;  %v4474_v59 = vadd.f32 %v4473_v52, %v3929_v58  ;;  %v2208_v36 = vpop.permute.xlu0 %2207  ;;  %5573 = vmatmul.mubr.msk.bf16.gmra.mxu1 %vm2553_vm2, %v9683_v33  ;;  %v3945_v58 = vadd.f32 %v8493_v26, %v9686_v38  ;;  %v3966_v33 = vadd.f32 %v8493_v26, %v8065_v57 }
 0x32b   : > { %v3120_v27 = vsel %vm2553_vm2, %v9625_v11, %v2208_v36  ;;  %v5478_v4 = vpop.f32.mrf.mxu1  ;;  %5576 = vmatprep.mubr.msk.bf16.mxu1 %vm2553_vm2, %v9684_v30  ;;  %v8610_v18 = vpop.f32.mrf.mxu0  ;;  %v9685_v11 = vld [vmem:[#allocation15_spill] sm:$0xff] }
 0x32c   : > { %4959 = vst.msk [vmem:[%s8509_s7 + $0x48] sm:$0xff] %vm4949_vm5, %v4474_v59  ;;  %v4495_v49 = vadd.f32 %v5478_v4, %v3950_v34  ;;  %v2497_v45 = vpop.permute.xlu1 %2496  ;;  %v3273_v32 = vsel %vm2682_vm4, %v3120_v27, %v2346_v54  ;;  %v3953_v29 = vadd.f32 %v8493_v26, %v9685_v11  ;;  %v9687_v34 = vld [vmem:[#allocation95_spill] sm:$0xff] }
 0x32d   : > { %v4486_v43 = vpop.f32.mrf.mxu1  ;;  %v3439_v10 = vsel %vm2811_vm3, %v3273_v32, %v2497_v45  ;;  %v4039_v28 = vpop.f32.mrf.mxu0  ;;  %v2631_v59 = vsel %vm2553_vm2, %v8042_v51, %v9687_v34  ;;  %v3958_v51 = vadd.f32 %v8493_v26, %v7992_v50 }
 0x32e   : > { %4964 = vst.msk [vmem:[%s8509_s7 + $0x70] sm:$0xff] %vm4949_vm5, %v4495_v49  ;;  %v4487_v1 = vadd.f32 %v4486_v43, %v3942_v62  ;;  %v1914_v47 = vpop.permute.xlu0 %1913  ;;  %4195 = vmatprep.mubr.bf16.mxu0 %v3439_v10  ;;  %v9688_v49 = vld [vmem:[#allocation47_spill] sm:$0xff]  ;;  %v9689_v43 = vld [vmem:[#allocation50_spill] sm:$0xff]  ;;  %v3969_v28 = vadd.f32 %v8493_v26, %v8076_v41 }
 0x32f   : > { %v5479_v60 = vpop.f32.mrf.mxu1  ;;  %v8622_v15 = vpop.f32.mrf.mxu0  ;;  %v2760_v27 = vsel %vm2682_vm4, %v2631_v59, %v1914_v47 }
 0x330   : > { %4962 = vst.msk [vmem:[%s8509_s7 + $0x60] sm:$0xff] %vm4949_vm5, %v4487_v1  ;;  %v4498_v54 = vadd.f32 %v5479_v60, %v3953_v29  ;;  %v2210_v52 = vpop.permute.xlu1 %2209 }
 0x331   : > { %v4489_v36 = vpop.f32.mrf.mxu1  ;;  %v4042_v4 = vpop.f32.mrf.mxu0  ;;  %v3123_v41 = vsel %vm2553_vm2, %v9630_v2, %v2210_v52  ;;  %v9691_v2 = vld [vmem:[#allocation7_spill] sm:$0xff] }
 0x332   : > { %4965 = vst.msk [vmem:[%s8509_s7 + $0x78] sm:$0xff] %vm4949_vm5, %v4498_v54  ;;  %v4490_v30 = vadd.f32 %v4489_v36, %v3945_v58  ;;  %v2052_v62 = vpop.permute.xlu0 %2051  ;;  %5577 = vmatmul.mubr.msk.bf16.gmra.mxu1 %vm2553_vm2, %v9688_v49  ;;  %v9690_v58 = vld [vmem:[#allocation94_spill] sm:$0xff]  ;;  %v3961_v54 = vadd.f32 %v8493_v26, %v8007_v42  ;;  %v3982_v4 = vadd.f32 %v8493_v26, %v8207_v48 }
 0x333   : > { %v2927_v45 = vsel %vm2811_vm3, %v2760_v27, %v2052_v62  ;;  %v5482_v32 = vpop.f32.mrf.mxu1  ;;  %5580 = vmatprep.mubr.msk.bf16.mxu1 %vm2553_vm2, %v9689_v43  ;;  %v2633_v50 = vsel %vm2553_vm2, %v8093_v55, %v9690_v58  ;;  %v3974_v48 = vadd.f32 %v8493_v26, %v8134_v25 }
 0x334   : > { %4963 = vst.msk [vmem:[%s8509_s7 + $0x68] sm:$0xff] %vm4949_vm5, %v4490_v30  ;;  %4196 = vmatmul.mubr.bf16.gmra.mxu0 %v2927_v45  ;;  %v4511_v57 = vadd.f32 %v5482_v32, %v3966_v33  ;;  %v1916_v10 = vpop.permute.xlu1 %1915  ;;  %v8641_v11 = vpop.f32.mrf.mxu0  ;;  %v9692_v32 = vld [vmem:[#allocation44_spill] sm:$0xff] }
 0x335   : > { %v4502_v29 = vpop.f32.mrf.mxu1  ;;  %v2762_v36 = vsel %vm2682_vm4, %v2633_v50, %v1916_v10  ;;  %v3977_v50 = vadd.f32 %v8493_v26, %v8149_v24 }
 0x336   : > { %4968 = vst.msk [vmem:[%s8509_s7 + $0x90] sm:$0xff] %vm4949_vm5, %v4511_v57  ;;  %v4503_v1 = vadd.f32 %v4502_v29, %v3958_v51  ;;  %v2348_v47 = vpop.permute.xlu0 %2347  ;;  %v4047_v60 = vpop.f32.mrf.mxu0  ;;  %v5868_v57 = vld [vmem:[%s6892_s25 + $0x14] sm:$0xff]   ;;  %v5869_v29 = vld [vmem:[%s6892_s25 + $0x1c] sm:$0xff]  }
 0x337   : > { %v5483_v38 = vpop.f32.mrf.mxu1  ;;  %v3275_v55 = vsel %vm2682_vm4, %v3123_v41, %v2348_v47  ;;  %v2548_v10 = vrot.slane %v5868_v57, 1  ;;  %v3985_v47 = vadd.f32 %v8493_v26, %v8218_v3 }
 0x338   : > { %4966 = vst.msk [vmem:[%s8509_s7 + $0x80] sm:$0xff] %vm4949_vm5, %v4503_v1  ;;  %v4514_v34 = vadd.f32 %v5483_v38, %v3969_v28  ;;  %v2054_v59 = vpop.permute.xlu1 %2053  ;;  %v8657_v33 = vpop.f32.mrf.mxu0  ;;  %v2549_v28 = vrot.slane %v5869_v29, 1 }
 0x339   : > { %v4505_v27 = vpop.f32.mrf.mxu1  ;;  %v2930_v42 = vsel %vm2811_vm3, %v2762_v36, %v2054_v59 }
 0x33a   : > { %4969 = vst.msk [vmem:[%s8509_s7 + $0x98] sm:$0xff] %vm4949_vm5, %v4514_v34  ;;  %v4506_v30 = vadd.f32 %v4505_v27, %v3961_v54  ;;  %v2499_v62 = vpop.permute.xlu0 %2498  ;;  %5581 = vmatmul.mubr.msk.bf16.gmra.mxu1 %vm2553_vm2, %v9691_v2  ;;  %v4050_v52 = vpop.f32.mrf.mxu0  ;;  %v2550_v41 = vsel %vm1676_vm1, %v2548_v10, %v2549_v28 }
 0x33b   : > { %v3442_v49 = vsel %vm2811_vm3, %v3275_v55, %v2499_v62  ;;  %v5486_v45 = vpop.f32.mrf.mxu1  ;;  %5584 = vmatprep.mubr.msk.bf16.mxu1 %vm2553_vm2, %v9692_v32  ;;  %v5870_v62 = vld [vmem:[%s6892_s25 + $0x24] ss:$0 sps:$4 sm:$0x11]   ;;  %v3990_v52 = vadd.f32 %v8493_v26, %v8276_v53 }
 0x33c   : > { %4967 = vst.msk [vmem:[%s8509_s7 + $0x88] sm:$0xff] %vm4949_vm5, %v4506_v30  ;;  %4203 = vmatprep.mubr.bf16.mxu0 %v3442_v49  ;;  %v4527_v43 = vadd.f32 %v5486_v45, %v3982_v4  ;;  %v2350_v51 = vpop.permute.xlu1 %2349  ;;  %v2551_v2 = vrot.slane %v5870_v62, 1  ;;  %v9694_v32 = vld [vmem:[#allocation98_spill] sm:$0xff] }
 0x33d   : > { %4204 = vmatmul.mubr.bf16.gmra.mxu0 %v2930_v42  ;;  %v4518_v1 = vpop.f32.mrf.mxu1  ;;  %v9693_v42 = vld [vmem:[#allocation2_spill] sm:$0xff] }
 0x33e   : > { %4972 = vst.msk [vmem:[%s8509_s7 + $0xb0] sm:$0xff] %vm4949_vm5, %v4527_v43  ;;  %v4519_v60 = vadd.f32 %v4518_v1, %v3974_v48  ;;  %v2212_v25 = vpop.permute.xlu0 %2211  ;;  %v2635_v48 = vsel %vm2553_vm2, %v8111_v40, %v9694_v32  ;;  %v3993_v40 = vadd.f32 %v8493_v26, %v8291_v16 }
 0x33f   : > { %v3126_v38 = vsel %vm2553_vm2, %v9632_v20, %v2212_v25  ;;  %v5487_v58 = vpop.f32.mrf.mxu1  ;;  %v8686_v54 = vpop.f32.mrf.mxu0  ;;  %v3998_v20 = vadd.f32 %v8493_v26, %v8349_v13 }
 0x340   : > { %4970 = vst.msk [vmem:[%s8509_s7 + $0xa0] sm:$0xff] %vm4949_vm5, %v4519_v60  ;;  %v4530_v34 = vadd.f32 %v5487_v58, %v3985_v47  ;;  %v2501_v59 = vpop.permute.xlu1 %2500  ;;  %v3277_v3 = vsel %vm2682_vm4, %v3126_v38, %v2350_v51  ;;  %v4001_v51 = vadd.f32 %v8493_v26, %v8360_v46  ;;  %v2552_v60 = vsel %vm1676_vm1, %v2549_v28, %v2551_v2 }
 0x341   : > { %v4521_v36 = vpop.f32.mrf.mxu1  ;;  %v3445_v27 = vsel %vm2811_vm3, %v3277_v3, %v2501_v59  ;;  %v4055_v24 = vpop.f32.mrf.mxu0  ;;  %v9695_v3 = vld [vmem:[#allocation97_spill] sm:$0xff] }
 0x342   : > { %4973 = vst.msk [vmem:[%s8509_s7 + $0xb8] sm:$0xff] %vm4949_vm5, %v4530_v34  ;;  %v4522_v4 = vadd.f32 %v4521_v36, %v3977_v50  ;;  %v1918_v55 = vpop.permute.xlu0 %1917  ;;  %4211 = vmatprep.mubr.bf16.mxu0 %v3445_v27  ;;  %5585 = vmatmul.mubr.msk.bf16.gmra.mxu1 %vm2553_vm2, %v9693_v42  ;;  %v4014_v50 = vadd.f32 %v8493_v26, %v8474_v22 }
 0x343   : > { %v5490_v30 = vpop.f32.mrf.mxu1  ;;  %5588 = vmatprep.mubr.msk.bf16.mxu1 %vm2553_vm2, %v2550_v41  ;;  %v8703_v13 = vpop.f32.mrf.mxu0  ;;  %v2764_v57 = vsel %vm2682_vm4, %v2635_v48, %v1918_v55  ;;  %v2637_v41 = vsel %vm2553_vm2, %v8162_v17, %v9695_v3  ;;  %v4006_v36 = vadd.f32 %v8493_v26, %v8414_v35  ;;  %v4017_v42 = vadd.f32 %v8493_v26, %v8485_v23 }
 0x344   : > { %4971 = vst.msk [vmem:[%s8509_s7 + $0xa8] sm:$0xff] %vm4949_vm5, %v4522_v4  ;;  %v4543_v49 = vadd.f32 %v5490_v30, %v3998_v20  ;;  %v2214_v45 = vpop.permute.xlu1 %2213  ;;  %v4030_v48 = vadd.f32 %v8493_v26, %v8563_v8 }
 0x345   : > { %v4534_v43 = vpop.f32.mrf.mxu1  ;;  %v4058_v53 = vpop.f32.mrf.mxu0  ;;  %v3129_v20 = vsel %vm2553_vm2, %v9638_v63, %v2214_v45 }
 0x346   : > { %4976 = vst.msk [vmem:[%s8509_s7 + $0xd0] sm:$0xff] %vm4949_vm5, %v4543_v49  ;;  %v4535_v10 = vadd.f32 %v4534_v43, %v3990_v52  ;;  %v2056_v29 = vpop.permute.xlu0 %2055  ;;  %v4009_v49 = vadd.f32 %v8493_v26, %v8429_v44  ;;  %v4022_v44 = vadd.f32 %v8493_v26, %v8530_v14 }
 0x347   : > { %v2933_v1 = vsel %vm2811_vm3, %v2764_v57, %v2056_v29  ;;  %v5491_v47 = vpop.f32.mrf.mxu1 }
 0x348   : > { %4974 = vst.msk [vmem:[%s8509_s7 + $0xc0] sm:$0xff] %vm4949_vm5, %v4535_v10  ;;  %4212 = vmatmul.mubr.bf16.gmra.mxu0 %v2933_v1  ;;  %v4546_v46 = vadd.f32 %v5491_v47, %v4001_v51  ;;  %v1920_v25 = vpop.permute.xlu1 %1919  ;;  %v8719_v38 = vpop.f32.mrf.mxu0 }
 0x349   : > { %v4537_v58 = vpop.f32.mrf.mxu1  ;;  %v2766_v24 = vsel %vm2682_vm4, %v2637_v41, %v1920_v25  ;;  %v4046_v41 = vadd.f32 %v8493_v26, %v8641_v11 }
 0x34a   : > { %4977 = vst.msk [vmem:[%s8509_s7 + $0xd8] sm:$0xff] %vm4949_vm5, %v4546_v46  ;;  %v4538_v34 = vadd.f32 %v4537_v58, %v3993_v40  ;;  %v2352_v28 = vpop.permute.xlu0 %2351  ;;  %5589 = vmatmul.mubr.msk.bf16.gmra.mxu1 %vm2553_vm2, %v2552_v60  ;;  %v4063_v16 = vpop.f32.mrf.mxu0  ;;  %v4025_v58 = vadd.f32 %v8493_v26, %v8548_v31 }
 0x34b   : > { %v5494_v59 = vpop.f32.mrf.mxu1  ;;  %v3279_v17 = vsel %vm2682_vm4, %v3129_v20, %v2352_v28  ;;  %v5871_v16 = vld [vmem:[%s5957_s22 + $0x1a4] sm:$0xff]  }
 0x34c   : > { %4975 = vst.msk [vmem:[%s8509_s7 + $0xc8] sm:$0xff] %vm4949_vm5, %v4538_v34  ;;  %v4559_v27 = vadd.f32 %v5494_v59, %v4014_v50  ;;  %v2058_v22 = vpop.permute.xlu1 %2057  ;;  %v8736_v4 = vpop.f32.mrf.mxu0 }
 0x34d   : > { %v4550_v55 = vpop.f32.mrf.mxu1  ;;  %v2936_v35 = vsel %vm2811_vm3, %v2766_v24, %v2058_v22 }
 0x34e   : > { %4980 = vst.msk [vmem:[%s8509_s7 + $0xf0] sm:$0xff] %vm4949_vm5, %v4559_v27  ;;  %v4551_v30 = vadd.f32 %v4550_v55, %v4006_v36  ;;  %v2503_v62 = vpop.permute.xlu0 %2502  ;;  %v4066_v2 = vpop.f32.mrf.mxu0  ;;  %v4038_v55 = vadd.f32 %v8493_v26, %v8610_v18  ;;  %v9697_v18 = vld [vmem:[#allocation99_spill] sm:$0xff] }
 0x34f   : > { %v3448_v63 = vsel %vm2811_vm3, %v3279_v17, %v2503_v62  ;;  %v5495_v52 = vpop.f32.mrf.mxu1 }
 0x350   : > { %4978 = vst.msk [vmem:[%s8509_s7 + $0xe0] sm:$0xff] %vm4949_vm5, %v4551_v30  ;;  %4219 = vmatprep.mubr.bf16.mxu0 %v3448_v63  ;;  %v4562_v23 = vadd.f32 %v5495_v52, %v4017_v42  ;;  %v2354_v45 = vpop.permute.xlu1 %2353  ;;  %v4049_v30 = vadd.f32 %v8493_v26, %v8657_v33 }
 0x351   : > { %4220 = vmatmul.mubr.bf16.gmra.mxu0 %v2936_v35  ;;  %v4553_v32 = vpop.f32.mrf.mxu1 }
 0x352   : > { %4981 = vst.msk [vmem:[%s8509_s7 + $0xf8] sm:$0xff] %vm4949_vm5, %v4562_v23  ;;  %v4554_v43 = vadd.f32 %v4553_v32, %v4009_v49  ;;  %v2216_v51 = vpop.permute.xlu0 %2215  ;;  %v5872_v49 = vld [vmem:[%s5957_s22 + $0x1ac] sm:$0xff]  }
 0x353   : > { %v3132_v57 = vsel %vm2553_vm2, %v9640_v19, %v2216_v51  ;;  %v5498_v53 = vpop.f32.mrf.mxu1  ;;  %v8759_v10 = vpop.f32.mrf.mxu0  ;;  %v4033_v19 = vadd.f32 %v8493_v26, %v8583_v37  ;;  %v9696_v37 = vld [vmem:[#allocation100_spill] sm:$0xff]  ;;  %v2641_v23 = vsel %vm2553_vm2, %v5872_v49, %v9697_v18 }
 0x354   : > { %4979 = vst.msk [vmem:[%s8509_s7 + $0xe8] sm:$0xff] %vm4949_vm5, %v4554_v43  ;;  %v4575_v29 = vadd.f32 %v5498_v53, %v4030_v48  ;;  %v2505_v1 = vpop.permute.xlu1 %2504  ;;  %v3281_v8 = vsel %vm2682_vm4, %v3132_v57, %v2354_v45  ;;  %v2639_v59 = vsel %vm2553_vm2, %v5871_v16, %v9696_v37  ;;  %v4041_v45 = vadd.f32 %v8493_v26, %v8622_v15 }
 0x355   : > { %v4566_v47 = vpop.f32.mrf.mxu1  ;;  %v3451_v60 = vsel %vm2811_vm3, %v3281_v8, %v2505_v1  ;;  %v4071_v14 = vpop.f32.mrf.mxu0  ;;  %v4062_v53 = vadd.f32 %v8493_v26, %v8719_v38 }
 0x356   : > { %4984 = vst.msk [vmem:[%s8509_s7 + $0x110] sm:$0xff] %vm4949_vm5, %v4575_v29  ;;  %v4567_v40 = vadd.f32 %v4566_v47, %v4022_v44  ;;  %v1922_v46 = vpop.permute.xlu0 %1921  ;;  %4227 = vmatprep.mubr.bf16.mxu0 %v3451_v60  ;;  %v4054_v60 = vadd.f32 %v8493_v26, %v8686_v54  ;;  %v4057_v54 = vadd.f32 %v8493_v26, %v8703_v13 }
 0x357   : > { %v5499_v25 = vpop.f32.mrf.mxu1  ;;  %v8771_v50 = vpop.f32.mrf.mxu0  ;;  %v2768_v36 = vsel %vm2682_vm4, %v2639_v59, %v1922_v46 }
 0x358   : > { %4982 = vst.msk [vmem:[%s8509_s7 + $0x100] sm:$0xff] %vm4949_vm5, %v4567_v40  ;;  %v4578_v34 = vadd.f32 %v5499_v25, %v4033_v19  ;;  %v2218_v28 = vpop.permute.xlu1 %2217  ;;  %v4065_v40 = vadd.f32 %v8493_v26, %v8736_v4  ;;  %v4073_v49 = vadd.f32 %v8493_v26, %v8771_v50 }
 0x359   : > { %v4569_v3 = vpop.f32.mrf.mxu1  ;;  %v4074_v31 = vpop.f32.mrf.mxu0  ;;  %v3135_v33 = vsel %vm2553_vm2, %v9644_v21, %v2218_v28 }
 0x35a   : > { %4985 = vst.msk [vmem:[%s8509_s7 + $0x118] sm:$0xff] %vm4949_vm5, %v4578_v34  ;;  %v4570_v27 = vadd.f32 %v4569_v3, %v4025_v58  ;;  %v2060_v22 = vpop.permute.xlu0 %2059 }
 0x35b   : > { %v2939_v20 = vsel %vm2811_vm3, %v2768_v36, %v2060_v22  ;;  %v5502_v24 = vpop.f32.mrf.mxu1 }
 0x35c   : > { %4983 = vst.msk [vmem:[%s8509_s7 + $0x108] sm:$0xff] %vm4949_vm5, %v4570_v27  ;;  %4228 = vmatmul.mubr.bf16.gmra.mxu0 %v2939_v20  ;;  %v4591_v11 = vadd.f32 %v5502_v24, %v4046_v41  ;;  %v1924_v42 = vpop.permute.xlu1 %1923  ;;  %v4077_v17 = vpop.f32.mrf.mxu0  ;;  %v4070_v27 = vadd.f32 %v8493_v26, %v8759_v10 }
 0x35d   : > { %v4582_v35 = vpop.f32.mrf.mxu1  ;;  %v2770_v43 = vsel %vm2682_vm4, %v2641_v23, %v1924_v42  ;;  %v4078_v41 = vadd.f32 %v8493_v26, %v4077_v17 }
 0x35e   : > { %4988 = vst.msk [vmem:[%s8509_s7 + $0x130] sm:$0xff] %vm4949_vm5, %v4591_v11  ;;  %v4583_v62 = vadd.f32 %v4582_v35, %v4038_v55  ;;  %v2356_v2 = vpop.permute.xlu0 %2355  ;;  %v4079_v63 = vpop.f32.mrf.mxu0  ;;  %v5873_v55 = vld [vmem:[%s5957_s22 + $0x1b8] sm:$0xff]   ;;  %v9698_v11 = vld [vmem:[#allocation102_spill] sm:$0xff] }
 0x35f   : > { %v5503_v52 = vpop.f32.mrf.mxu1  ;;  %v3283_v44 = vsel %vm2682_vm4, %v3135_v33, %v2356_v2  ;;  %v2643_v42 = vsel %vm2553_vm2, %v5873_v55, %v9698_v11 }
 0x360   : > { %4986 = vst.msk [vmem:[%s8509_s7 + $0x120] sm:$0xff] %vm4949_vm5, %v4583_v62  ;;  %v4594_v32 = vadd.f32 %v5503_v52, %v4049_v30  ;;  %v2062_v48 = vpop.permute.xlu1 %2061  ;;  %v4080_v51 = vpop.f32.mrf.mxu0 }
 0x361   : > { %v4585_v57 = vpop.f32.mrf.mxu1  ;;  %v2942_v15 = vsel %vm2811_vm3, %v2770_v43, %v2062_v48  ;;  %v4081_v35 = vadd.f32 %v8493_v26, %v4080_v51 }
 0x362   : > { %4989 = vst.msk [vmem:[%s8509_s7 + $0x138] sm:$0xff] %vm4949_vm5, %v4594_v32  ;;  %v4586_v29 = vadd.f32 %v4585_v57, %v4041_v45  ;;  %v2507_v1 = vpop.permute.xlu0 %2506  ;;  %v4082_v8 = vpop.f32.mrf.mxu0 }
 0x363   : > { %v3454_v47 = vsel %vm2811_vm3, %v3283_v44, %v2507_v1  ;;  %v5506_v21 = vpop.f32.mrf.mxu1  ;;  %v9699_v44 = vld [vmem:[#allocation101_spill] sm:$0xff] }
 0x364   : > { %4987 = vst.msk [vmem:[%s8509_s7 + $0x128] sm:$0xff] %vm4949_vm5, %v4586_v29  ;;  %4235 = vmatprep.mubr.bf16.mxu0 %v3454_v47  ;;  %v4607_v38 = vadd.f32 %v5506_v21, %v4062_v53  ;;  %v2358_v19 = vpop.permute.xlu1 %2357  ;;  %v5874_v53 = vld [vmem:[%s5957_s22 + $0x1c0] sm:$0xff]  }
 0x365   : > { %4236 = vmatmul.mubr.bf16.gmra.mxu0 %v2942_v15  ;;  %v4598_v14 = vpop.f32.mrf.mxu1  ;;  %v2645_v50 = vsel %vm2553_vm2, %v5874_v53, %v9699_v44  ;;  %v9701_v53 = vld [vmem:[#allocation104_spill] sm:$0xff] }
 0x366   : > { %4992 = vst.msk [vmem:[%s8509_s7 + $0x150] sm:$0xff] %vm4949_vm5, %v4607_v38  ;;  %v4599_v46 = vadd.f32 %v4598_v14, %v4054_v60  ;;  %v2220_v25 = vpop.permute.xlu0 %2219 }
 0x367   : > { %v3138_v58 = vsel %vm2553_vm2, %v9646_v5, %v2220_v25  ;;  %v5507_v34 = vpop.f32.mrf.mxu1  ;;  %v4085_v28 = vpop.f32.mrf.mxu0 }
 0x368   : > { %4990 = vst.msk [vmem:[%s8509_s7 + $0x140] sm:$0xff] %vm4949_vm5, %v4599_v46  ;;  %v4610_v16 = vadd.f32 %v5507_v34, %v4065_v40  ;;  %v2509_v37 = vpop.permute.xlu1 %2508  ;;  %v3285_v4 = vsel %vm2682_vm4, %v3138_v58, %v2358_v19  ;;  %v4086_v15 = vadd.f32 %v8493_v26, %v4085_v28 }
 0x369   : > { %v4601_v59 = vpop.f32.mrf.mxu1  ;;  %v3457_v3 = vsel %vm2811_vm3, %v3285_v4, %v2509_v37  ;;  %v4087_v5 = vpop.f32.mrf.mxu0 }
 0x36a   : > { %4993 = vst.msk [vmem:[%s8509_s7 + $0x158] sm:$0xff] %vm4949_vm5, %v4610_v16  ;;  %v4602_v36 = vadd.f32 %v4601_v59, %v4057_v54  ;;  %v1926_v13 = vpop.permute.xlu0 %1925  ;;  %4243 = vmatprep.mubr.bf16.mxu0 %v3457_v3 }
 0x36b   : > { %v5510_v31 = vpop.f32.mrf.mxu1  ;;  %v4088_v22 = vpop.f32.mrf.mxu0  ;;  %v2772_v30 = vsel %vm2682_vm4, %v2643_v42, %v1926_v13  ;;  %v5875_v42 = vld [vmem:[%s5957_s22 + $0x1cc] sm:$0xff]  }
 0x36c   : > { %4991 = vst.msk [vmem:[%s8509_s7 + $0x148] sm:$0xff] %vm4949_vm5, %v4602_v36  ;;  %v4623_v20 = vadd.f32 %v5510_v31, %v4078_v41  ;;  %v2222_v24 = vpop.permute.xlu1 %2221  ;;  %v4089_v34 = vadd.f32 %v8493_v26, %v4088_v22 }
 0x36d   : > { %v4614_v17 = vpop.f32.mrf.mxu1  ;;  %v4090_v62 = vpop.f32.mrf.mxu0  ;;  %v3141_v8 = vsel %vm2553_vm2, %v9649_v7, %v2222_v24 }
 0x36e   : > { %4996 = vst.msk [vmem:[%s8509_s7 + $0x170] sm:$0xff] %vm4949_vm5, %v4623_v20  ;;  %v4615_v10 = vadd.f32 %v4614_v17, %v4070_v27  ;;  %v2064_v2 = vpop.permute.xlu0 %2063  ;;  %v9700_v17 = vld [vmem:[#allocation105_spill] sm:$0xff] }
 0x36f   : > { %v2945_v63 = vsel %vm2811_vm3, %v2772_v30, %v2064_v2  ;;  %v5511_v52 = vpop.f32.mrf.mxu1 }
 0x370   : > { %4994 = vst.msk [vmem:[%s8509_s7 + $0x160] sm:$0xff] %vm4949_vm5, %v4615_v10  ;;  %4244 = vmatmul.mubr.bf16.gmra.mxu0 %v2945_v63  ;;  %v4626_v18 = vadd.f32 %v5511_v52, %v4081_v35  ;;  %v1928_v23 = vpop.permute.xlu1 %1927  ;;  %v4093_v45 = vpop.f32.mrf.mxu0  ;;  %v2647_v35 = vsel %vm2553_vm2, %v5875_v42, %v9700_v17 }
 0x371   : > { %v4617_v32 = vpop.f32.mrf.mxu1  ;;  %v4094_v48 = vadd.f32 %v8493_v26, %v4093_v45  ;;  %v2774_v47 = vsel %vm2682_vm4, %v2645_v50, %v1928_v23 }
 0x372   : > { %4997 = vst.msk [vmem:[%s8509_s7 + $0x178] sm:$0xff] %vm4949_vm5, %v4626_v18  ;;  %v4618_v33 = vadd.f32 %v4617_v32, %v4073_v49  ;;  %v2360_v43 = vpop.permute.xlu0 %2359  ;;  %v4095_v51 = vpop.f32.mrf.mxu0 }
 0x373   : > { %v5514_v57 = vpop.f32.mrf.mxu1  ;;  %v3287_v38 = vsel %vm2682_vm4, %v3141_v8, %v2360_v43 }
 0x374   : > { %4995 = vst.msk [vmem:[%s8509_s7 + $0x168] sm:$0xff] %vm4949_vm5, %v4618_v33  ;;  %v4639_v29 = vadd.f32 %v5514_v57, %v4094_v48  ;;  %v2066_v1 = vpop.permute.xlu1 %2065  ;;  %v4096_v21 = vpop.f32.mrf.mxu0  ;;  %v5876_v57 = vld [vmem:[%s5957_s22 + $0x1d4] sm:$0xff]  }
 0x375   : > { %v4630_v60 = vpop.f32.mrf.mxu1  ;;  %v4097_v19 = vadd.f32 %v8493_v26, %v4096_v21  ;;  %v2948_v14 = vsel %vm2811_vm3, %v2774_v47, %v2066_v1  ;;  %v2649_v44 = vsel %vm2553_vm2, %v5876_v57, %v9701_v53  ;;  %v8942_v53 = vld [vmem:[%s9252_s3] ss:$0 sm:$0xff] }
 0x376   : > { %5000 = vst.msk [vmem:[%s8509_s7 + $0x190] sm:$0xff] %vm4949_vm5, %v4639_v29  ;;  %v4631_v40 = vadd.f32 %v4630_v60, %v4086_v15  ;;  %v2511_v46 = vpop.permute.xlu0 %2510  ;;  %v4098_v25 = vpop.f32.mrf.mxu0 }
 0x377   : > { %v3460_v58 = vsel %vm2811_vm3, %v3287_v38, %v2511_v46  ;;  %v5515_v7 = vpop.f32.mrf.mxu1 }
 0x378   : > { %4998 = vst.msk [vmem:[%s8509_s7 + $0x180] sm:$0xff] %vm4949_vm5, %v4631_v40  ;;  %4251 = vmatprep.mubr.bf16.mxu0 %v3460_v58  ;;  %v4642_v54 = vadd.f32 %v5515_v7, %v4097_v19  ;;  %v2362_v28 = vpop.permute.xlu1 %2361 }
 0x379   : > { %4252 = vmatmul.mubr.bf16.gmra.mxu0 %v2948_v14  ;;  %v4633_v16 = vpop.f32.mrf.mxu1 }
 0x37a   : > { %5001 = vst.msk [vmem:[%s8509_s7 + $0x198] sm:$0xff] %vm4949_vm5, %v4642_v54  ;;  %v4634_v37 = vadd.f32 %v4633_v16, %v4089_v34  ;;  %v2224_v4 = vpop.permute.xlu0 %2223 }
 0x37b   : > { %v3144_v59 = vsel %vm2553_vm2, %v9651_v56, %v2224_v4  ;;  %v5518_v3 = vpop.f32.mrf.mxu1  ;;  %v4101_v41 = vpop.f32.mrf.mxu0 }
 0x37c   : > { %4999 = vst.msk [vmem:[%s8509_s7 + $0x188] sm:$0xff] %vm4949_vm5, %v4634_v37  ;;  %v2513_v5 = vpop.permute.xlu1 %2512  ;;  %v3289_v36 = vsel %vm2682_vm4, %v3144_v59, %v2362_v28  ;;  %v4102_v13 = vadd.f32 %v8493_v26, %v4101_v41 }
 0x37d   : > { %v4646_v31 = vpop.f32.mrf.mxu1  ;;  %v3463_v27 = vsel %vm2811_vm3, %v3289_v36, %v2513_v5  ;;  %v4103_v22 = vpop.f32.mrf.mxu0 }
 0x37e   : > { %v1930_v20 = vpop.permute.xlu0 %1929  ;;  %4259 = vmatprep.mubr.bf16.mxu0 %v3463_v27  ;;  %v4647_v24 = vadd.f32 %v4646_v31, %v4102_v13 }
 0x37f   : > { %v5519_v55 = vpop.f32.mrf.mxu1  ;;  %v4104_v56 = vpop.f32.mrf.mxu0  ;;  %v2776_v10 = vsel %vm2682_vm4, %v2647_v35, %v1930_v20 }
 0x380   : > { %v2226_v11 = vpop.permute.xlu1 %2225  ;;  %5002 = vst.msk [vmem:[%s8509_s7 + $0x1a0] sm:$0xff] %vm4949_vm5, %v4647_v24  ;;  %v4105_v30 = vadd.f32 %v8493_v26, %v4104_v56 }
 0x381   : > { %v4649_v62 = vpop.f32.mrf.mxu1  ;;  %v4106_v2 = vpop.f32.mrf.mxu0  ;;  %v3147_v29 = vsel %vm2553_vm2, %v9658_v9, %v2226_v11 }
 0x382   : > { %v2068_v63 = vpop.permute.xlu0 %2067  ;;  %v4650_v52 = vadd.f32 %v4649_v62, %v4105_v30 }
 0x383   : > { %v2951_v49 = vsel %vm2811_vm3, %v2776_v10, %v2068_v63  ;;  %v5522_v18 = vpop.f32.mrf.mxu1 }
 0x384   : > { %4260 = vmatmul.mubr.bf16.gmra.mxu0 %v2951_v49  ;;  %v1932_v23 = vpop.permute.xlu1 %1931  ;;  %5003 = vst.msk [vmem:[%s8509_s7 + $0x1a8] sm:$0xff] %vm4949_vm5, %v4650_v52  ;;  %v4109_v45 = vpop.f32.mrf.mxu0 }
 0x385   : > { %v4662_v32 = vpop.f32.mrf.mxu1  ;;  %v4110_v48 = vadd.f32 %v8493_v26, %v4109_v45  ;;  %v2778_v1 = vsel %vm2682_vm4, %v2649_v44, %v1932_v23 }
 0x386   : > { %v2364_v33 = vpop.permute.xlu0 %2363  ;;  %v4111_v43 = vpop.f32.mrf.mxu0 }
 0x387   : > { %v5523_v51 = vpop.f32.mrf.mxu1  ;;  %v4655_v50 = vadd.f32 %v5518_v3, %v4110_v48  ;;  %v3291_v21 = vsel %vm2682_vm4, %v3147_v29, %v2364_v33 }
 0x388   : > { %v2070_v15 = vpop.permute.xlu1 %2069  ;;  %v4112_v8 = vpop.f32.mrf.mxu0 }
 0x389   : > { %v4665_v47 = vpop.f32.mrf.mxu1  ;;  %5004 = vst.msk [vmem:[%s8509_s7 + $0x1b0] sm:$0xff] %vm4949_vm5, %v4655_v50  ;;  %v4113_v60 = vadd.f32 %v8493_v26, %v4112_v8  ;;  %v2954_v38 = vsel %vm2811_vm3, %v2778_v1, %v2070_v15 }
 0x38a   : > { %v2515_v19 = vpop.permute.xlu0 %2514  ;;  %v4114_v14 = vpop.f32.mrf.mxu0 }
 0x38b   : > { %v3466_v40 = vsel %vm2811_vm3, %v3291_v21, %v2515_v19  ;;  %v5526_v46 = vpop.f32.mrf.mxu1  ;;  %v4658_v9 = vadd.f32 %v5519_v55, %v4113_v60 }
 0x38c   : > { %4267 = vmatprep.mubr.bf16.mxu0 %v3466_v40 }
 0x38d   : > { %4268 = vmatmul.mubr.bf16.gmra.mxu0 %v2954_v38  ;;  %v4678_v25 = vpop.f32.mrf.mxu1  ;;  %5005 = vst.msk [vmem:[%s8509_s7 + $0x1b8] sm:$0xff] %vm4949_vm5, %v4658_v9 }
 0x38f   : > { %v5527_v58 = vpop.f32.mrf.mxu1 }
 0x390   : > { %v4117_v7 = vpop.f32.mrf.mxu0 }
 0x391   : > { %v4118_v34 = vadd.f32 %v8493_v26, %v4117_v7  ;;  %v4681_v54 = vpop.f32.mrf.mxu1 }
 0x392   : > { %v4119_v28 = vpop.f32.mrf.mxu0 }
 0x393   : > { %v4663_v16 = vadd.f32 %v4662_v32, %v4118_v34  ;;  %v8898_v37 = vpop.f32.mrf.mxu1 }
 0x394   : > { %v4120_v4 = vpop.f32.mrf.mxu0 }
 0x395   : > { %5006 = vst.msk [vmem:[%s8509_s7 + $0x1c0] sm:$0xff] %vm4949_vm5, %v4663_v16  ;;  %v4121_v59 = vadd.f32 %v8493_v26, %v4120_v4  ;;  %v4694_v3 = vpop.f32.mrf.mxu1 }
 0x396   : > { %v4122_v41 = vpop.f32.mrf.mxu0 }
 0x397   : > { %v4666_v5 = vadd.f32 %v4665_v47, %v4121_v59  ;;  %v8903_v36 = vpop.f32.mrf.mxu1 }
 0x399   : > { %5007 = vst.msk [vmem:[%s8509_s7 + $0x1c8] sm:$0xff] %vm4949_vm5, %v4666_v5  ;;  %v4125_v13 = vpop.f32.mrf.mxu0  ;;  %v4697_v31 = vpop.f32.mrf.mxu1 }
 0x39a   : > { %v4126_v27 = vadd.f32 %v8493_v26, %v4125_v13 }
 0x39b   : > { %v4127_v22 = vpop.f32.mrf.mxu0  ;;  %v8908_v20 = vpop.f32.mrf.mxu1 }
 0x39c   : > { %v4671_v24 = vadd.f32 %v5522_v18, %v4126_v27 }
 0x39d   : > { %v4128_v55 = vpop.f32.mrf.mxu0  ;;  %v8910_v56 = vpop.f32.mrf.mxu1 }
 0x39e   : > { %5008 = vst.msk [vmem:[%s8509_s7 + $0x1d0] sm:$0xff] %vm4949_vm5, %v4671_v24  ;;  %v4129_v11 = vadd.f32 %v8493_v26, %v4128_v55 }
 0x39f   : > { %v4130_v42 = vpop.f32.mrf.mxu0  ;;  %v8915_v17 = vpop.f32.mrf.mxu1 }
 0x3a0   : > { %v4674_v35 = vadd.f32 %v5523_v51, %v4129_v11 }
 0x3a1   : > { %v8917_v30 = vpop.f32.mrf.mxu1 }
 0x3a2   : > { %5009 = vst.msk [vmem:[%s8509_s7 + $0x1d8] sm:$0xff] %vm4949_vm5, %v4674_v35 }
 0x3a3   : > { %v8921_v62 = vpop.f32.mrf.mxu1 }
 0x3a4   : > { %v4133_v10 = vpop.f32.mrf.mxu0 }
 0x3a5   : > { %v4134_v2 = vadd.f32 %v8493_v26, %v4133_v10  ;;  %v8924_v63 = vpop.f32.mrf.mxu1 }
 0x3a6   : > { %v4135_v52 = vpop.f32.mrf.mxu0 }
 0x3a7   : > { %v4679_v49 = vadd.f32 %v4678_v25, %v4134_v2  ;;  %v8926_v18 = vpop.f32.mrf.mxu1 }
 0x3a8   : > { %v4136_v23 = vpop.f32.mrf.mxu0 }
 0x3a9   : > { %5010 = vst.msk [vmem:[%s8509_s7 + $0x1e0] sm:$0xff] %vm4949_vm5, %v4679_v49  ;;  %v4137_v45 = vadd.f32 %v8493_v26, %v4136_v23  ;;  %v8931_v32 = vpop.f32.mrf.mxu1 }
 0x3aa   : > { %v4138_v48 = vpop.f32.mrf.mxu0 }
 0x3ab   : > { %v4682_v33 = vadd.f32 %v4681_v54, %v4137_v45  ;;  %v8933_v43 = vpop.f32.mrf.mxu1 }
 0x3ad   : > { %5011 = vst.msk [vmem:[%s8509_s7 + $0x1e8] sm:$0xff] %vm4949_vm5, %v4682_v33  ;;  %v4141_v51 = vpop.f32.mrf.mxu0  ;;  %v8937_v57 = vpop.f32.mrf.mxu1 }
 0x3ae   : > { %v4142_v44 = vadd.f32 %v8942_v53, %v4141_v51  ;;  %v9702_v51 = vld [vmem:[#allocation6_spill] sm:$0xff] }
 0x3af   : > { %v4143_v26 = vpop.f32.mrf.mxu0  ;;  %v8945_v50 = vpop.f32.mrf.mxu1 }
 0x3b0   : > { %v4687_v15 = vadd.f32 %v5526_v46, %v4142_v44  ;;  %v4286_v44 = vadd.f32 %v8942_v53, %v9702_v51  ;;  %v9708_v51 = vld [vmem:[#allocation52_spill] sm:$0xff] }
 0x3b1   : > { %v4144_v29 = vpop.f32.mrf.mxu0  ;;  %v8947_v1 = vpop.f32.mrf.mxu1 }
 0x3b2   : > { %5012 = vst.msk [vmem:[%s8509_s7 + $0x1f0] sm:$0xff] %vm4949_vm5, %v4687_v15  ;;  %v4145_v8 = vadd.f32 %v8942_v53, %v4144_v29 }
 0x3b3   : > { %v4146_v47 = vpop.f32.mrf.mxu0  ;;  %v8952_v21 = vpop.f32.mrf.mxu1 }
 0x3b4   : > { %v4690_v60 = vadd.f32 %v5527_v58, %v4145_v8  ;;  %v9703_v8 = vld [vmem:[#allocation106_spill] sm:$0xff] }
 0x3b5   : > { %v8954_v38 = vpop.f32.mrf.mxu1 }
 0x3b6   : > { %5013 = vst.msk [vmem:[%s8509_s7 + $0x1f8] sm:$0xff] %vm4949_vm5, %v4690_v60 }
 0x3b7   : > { %v8958_v19 = vpop.f32.mrf.mxu1 }
 0x3b8   : > { %v4149_v14 = vpop.f32.mrf.mxu0 }
 0x3b9   : > { %v4150_v40 = vadd.f32 %v8942_v53, %v4149_v14  ;;  %v8961_v46 = vpop.f32.mrf.mxu1 }
 0x3ba   : > { %v4151_v9 = vpop.f32.mrf.mxu0 }
 0x3bb   : > { %v4695_v25 = vadd.f32 %v4694_v3, %v4150_v40  ;;  %v8963_v7 = vpop.f32.mrf.mxu1  ;;  %v9704_v40 = vld [vmem:[#allocation4_spill] sm:$0xff] }
 0x3bc   : > { %v4152_v34 = vpop.f32.mrf.mxu0  ;;  %v4289_v9 = vadd.f32 %v8942_v53, %v9704_v40 }
 0x3bd   : > { %5014 = vst.msk [vmem:[%s8509_s7 + $0x200] sm:$0xff] %vm4949_vm5, %v4695_v25  ;;  %v4153_v58 = vadd.f32 %v8942_v53, %v4152_v34  ;;  %v8968_v54 = vpop.f32.mrf.mxu1 }
 0x3be   : > { %v4154_v28 = vpop.f32.mrf.mxu0 }
 0x3bf   : > { %v4698_v16 = vadd.f32 %v4697_v31, %v4153_v58  ;;  %v8970_v4 = vpop.f32.mrf.mxu1  ;;  %v9705_v28 = vld [vmem:[#allocation70_spill] sm:$0xff] }
 0x3c1   : > { %5015 = vst.msk [vmem:[%s8509_s7 + $0x208] sm:$0xff] %vm4949_vm5, %v4698_v16  ;;  %v4157_v59 = vpop.f32.mrf.mxu0  ;;  %v8974_v41 = vpop.f32.mrf.mxu1  ;;  %v4281_v16 = vadd.f32 %v8942_v53, %v9705_v28 }
 0x3c2   : > { %v4158_v3 = vadd.f32 %v8942_v53, %v4157_v59 }
 0x3c3   : > { %v4159_v5 = vpop.f32.mrf.mxu0  ;;  %v8977_v13 = vpop.f32.mrf.mxu1 }
 0x3c4   : > { %v4703_v27 = vadd.f32 %v8898_v37, %v4158_v3 }
 0x3c5   : > { %v4160_v22 = vpop.f32.mrf.mxu0  ;;  %v8980_v24 = vpop.f32.mrf.mxu1 }
 0x3c6   : > { %5016 = vst.msk [vmem:[%s8509_s7 + $0x210] sm:$0xff] %vm4949_vm5, %v4703_v27  ;;  %v4161_v31 = vadd.f32 %v8942_v53, %v4160_v22  ;;  %v9706_v22 = vld [vmem:[#allocation3_spill] sm:$0xff] }
 0x3c7   : > { %v4162_v55 = vpop.f32.mrf.mxu0  ;;  %v8985_v11 = vpop.f32.mrf.mxu1 }
 0x3c8   : > { %v4706_v42 = vadd.f32 %v8903_v36, %v4161_v31  ;;  %v4302_v31 = vadd.f32 %v8942_v53, %v9706_v22 }
 0x3c9   : > { %v8988_v35 = vpop.f32.mrf.mxu1 }
 0x3ca   : > { %5017 = vst.msk [vmem:[%s8509_s7 + $0x218] sm:$0xff] %vm4949_vm5, %v4706_v42 }
 0x3cb   : > { %v8992_v10 = vpop.f32.mrf.mxu1 }
 0x3cc   : > { %v4165_v37 = vpop.f32.mrf.mxu0 }
 0x3cd   : > { %v4166_v2 = vadd.f32 %v8942_v53, %v4165_v37  ;;  %v8995_v52 = vpop.f32.mrf.mxu1 }
 0x3ce   : > { %v4167_v49 = vpop.f32.mrf.mxu0 }
 0x3cf   : > { %v4711_v23 = vadd.f32 %v8910_v56, %v4166_v2  ;;  %v8998_v45 = vpop.f32.mrf.mxu1  ;;  %v4278_v56 = vadd.f32 %v8942_v53, %v9703_v8  ;;  %v9707_v2 = vld [vmem:[#allocation53_spill] sm:$0xff] }
 0x3d0   : > { %v4168_v48 = vpop.f32.mrf.mxu0  ;;  %v4294_v49 = vadd.f32 %v8942_v53, %v9707_v2 }
 0x3d1   : > { %5018 = vst.msk [vmem:[%s8509_s7 + $0x220] sm:$0xff] %vm4949_vm5, %v4711_v23  ;;  %v4169_v36 = vadd.f32 %v8942_v53, %v4168_v48  ;;  %v9003_v33 = vpop.f32.mrf.mxu1 }
 0x3d2   : > { %v4170_v26 = vpop.f32.mrf.mxu0 }
 0x3d3   : > { %v4714_v15 = vadd.f32 %v8917_v30, %v4169_v36  ;;  %v5562_v29 = vpop.f32.mrf.mxu1 }
 0x3d4   : > { %v4831_v47 = vadd.f32 %v5562_v29, %v4286_v44  ;;  %v4305_v44 = vadd.f32 %v8942_v53, %v9708_v51  ;;  %v9709_v29 = vld [vmem:[#allocation9_spill] sm:$0xff] }
 0x3d5   : > { %5019 = vst.msk [vmem:[%s8509_s7 + $0x228] sm:$0xff] %vm4949_vm5, %v4714_v15  ;;  %v4173_v60 = vpop.f32.mrf.mxu0  ;;  %v4822_v14 = vpop.f32.mrf.mxu1  ;;  %v4297_v8 = vadd.f32 %v8942_v53, %v9709_v29 }
 0x3d6   : > { %5048 = vst.msk [vmem:[%s8509_s7 + $0x310] sm:$0xff] %vm4949_vm5, %v4831_v47  ;;  %v4174_v25 = vadd.f32 %v8942_v53, %v4173_v60  ;;  %v4823_v34 = vadd.f32 %v4822_v14, %v4278_v56  ;;  %v9710_v14 = vld [vmem:[#allocation110_spill] sm:$0xff] }
 0x3d7   : > { %v4175_v30 = vpop.f32.mrf.mxu0  ;;  %v5563_v58 = vpop.f32.mrf.mxu1  ;;  %v4318_v40 = vadd.f32 %v8942_v53, %v9710_v14 }
 0x3d8   : > { %v4719_v59 = vadd.f32 %v8908_v20, %v4174_v25  ;;  %5046 = vst.msk [vmem:[%s8509_s7 + $0x300] sm:$0xff] %vm4949_vm5, %v4823_v34  ;;  %v4834_v3 = vadd.f32 %v5563_v58, %v4289_v9  ;;  %v9711_v58 = vld [vmem:[#allocation8_spill] sm:$0xff] }
 0x3d9   : > { %v4176_v5 = vpop.f32.mrf.mxu0  ;;  %v4825_v27 = vpop.f32.mrf.mxu1  ;;  %v4310_v28 = vadd.f32 %v8942_v53, %v9711_v58 }
 0x3da   : > { %5020 = vst.msk [vmem:[%s8509_s7 + $0x230] sm:$0xff] %vm4949_vm5, %v4719_v59  ;;  %5049 = vst.msk [vmem:[%s8509_s7 + $0x318] sm:$0xff] %vm4949_vm5, %v4834_v3  ;;  %v4177_v55 = vadd.f32 %v8942_v53, %v4176_v5  ;;  %v4826_v42 = vadd.f32 %v4825_v27, %v4281_v16  ;;  %v9712_v27 = vld [vmem:[#allocation54_spill] sm:$0xff] }
 0x3db   : > { %v4178_v37 = vpop.f32.mrf.mxu0  ;;  %v5566_v20 = vpop.f32.mrf.mxu1  ;;  %v4321_v22 = vadd.f32 %v8942_v53, %v9712_v27  ;;  %v4342_v27 = vadd.f32 %v8942_v53, %v7986_v61 }
 0x3dc   : > { %v4722_v23 = vadd.f32 %v8915_v17, %v4177_v55  ;;  %5047 = vst.msk [vmem:[%s8509_s7 + $0x308] sm:$0xff] %vm4949_vm5, %v4826_v42  ;;  %v4847_v48 = vadd.f32 %v5566_v20, %v4302_v31  ;;  %v9713_v37 = vld [vmem:[#allocation56_spill] sm:$0xff] }
 0x3dd   : > { %v4838_v36 = vpop.f32.mrf.mxu1  ;;  %v4313_v20 = vadd.f32 %v8942_v53, %v9713_v37 }
 0x3de   : > { %5021 = vst.msk [vmem:[%s8509_s7 + $0x238] sm:$0xff] %vm4949_vm5, %v4722_v23  ;;  %5052 = vst.msk [vmem:[%s8509_s7 + $0x330] sm:$0xff] %vm4949_vm5, %v4847_v48  ;;  %v4839_v26 = vadd.f32 %v4838_v36, %v4294_v49  ;;  %v9714_v48 = vld [vmem:[#allocation59_spill] sm:$0xff] }
 0x3df   : > { %v5567_v15 = vpop.f32.mrf.mxu1  ;;  %v4334_v36 = vadd.f32 %v8942_v53, %v9714_v48 }
 0x3e0   : > { %5050 = vst.msk [vmem:[%s8509_s7 + $0x320] sm:$0xff] %vm4949_vm5, %v4839_v26  ;;  %v4181_v17 = vpop.f32.mrf.mxu0  ;;  %v4850_v56 = vadd.f32 %v5567_v15, %v4305_v44  ;;  %v9715_v15 = vld [vmem:[#allocation10_spill] sm:$0xff] }
 0x3e1   : > { %v4182_v47 = vadd.f32 %v8942_v53, %v4181_v17  ;;  %v4841_v60 = vpop.f32.mrf.mxu1  ;;  %v4326_v29 = vadd.f32 %v8942_v53, %v9715_v15 }
 0x3e2   : > { %5053 = vst.msk [vmem:[%s8509_s7 + $0x338] sm:$0xff] %vm4949_vm5, %v4850_v56  ;;  %v4183_v9 = vpop.f32.mrf.mxu0  ;;  %v4842_v25 = vadd.f32 %v4841_v60, %v4297_v8  ;;  %v9716_v60 = vld [vmem:[#allocation12_spill] sm:$0xff] }
 0x3e3   : > { %v4727_v34 = vadd.f32 %v8924_v63, %v4182_v47  ;;  %v5570_v30 = vpop.f32.mrf.mxu1  ;;  %v4337_v14 = vadd.f32 %v8942_v53, %v9716_v60 }
 0x3e4   : > { %5051 = vst.msk [vmem:[%s8509_s7 + $0x328] sm:$0xff] %vm4949_vm5, %v4842_v25  ;;  %v4184_v16 = vpop.f32.mrf.mxu0  ;;  %v4863_v59 = vadd.f32 %v5570_v30, %v4318_v40 }
 0x3e5   : > { %5022 = vst.msk [vmem:[%s8509_s7 + $0x240] sm:$0xff] %vm4949_vm5, %v4727_v34  ;;  %v4185_v3 = vadd.f32 %v8942_v53, %v4184_v16  ;;  %v4854_v5 = vpop.f32.mrf.mxu1  ;;  %v9717_v34 = vld [vmem:[#allocation13_spill] sm:$0xff] }
 0x3e6   : > { %5056 = vst.msk [vmem:[%s8509_s7 + $0x350] sm:$0xff] %vm4949_vm5, %v4863_v59  ;;  %v4186_v63 = vpop.f32.mrf.mxu0  ;;  %v4855_v31 = vadd.f32 %v4854_v5, %v4310_v28  ;;  %v4329_v30 = vadd.f32 %v8942_v53, %v9717_v34  ;;  %v4350_v59 = vadd.f32 %v8942_v53, %v8055_v39  ;;  %v9718_v39 = vld [vmem:[#allocation58_spill] sm:$0xff]  ;;  %v9723_v34 = vld [vmem:[#allocation17_spill] sm:$0xff] }
 0x3e7   : > { %v4730_v55 = vadd.f32 %v8931_v32, %v4185_v3  ;;  %v5571_v42 = vpop.f32.mrf.mxu1 }
 0x3e8   : > { %5054 = vst.msk [vmem:[%s8509_s7 + $0x340] sm:$0xff] %vm4949_vm5, %v4855_v31  ;;  %v4866_v2 = vadd.f32 %v5571_v42, %v4321_v22 }
 0x3e9   : > { %5023 = vst.msk [vmem:[%s8509_s7 + $0x248] sm:$0xff] %vm4949_vm5, %v4730_v55  ;;  %v4189_v49 = vpop.f32.mrf.mxu0  ;;  %v4857_v23 = vpop.f32.mrf.mxu1  ;;  %v4353_v55 = vadd.f32 %v8942_v53, %v9718_v39 }
 0x3ea   : > { %5057 = vst.msk [vmem:[%s8509_s7 + $0x358] sm:$0xff] %vm4949_vm5, %v4866_v2  ;;  %v4190_v32 = vadd.f32 %v8942_v53, %v4189_v49  ;;  %v4858_v51 = vadd.f32 %v4857_v23, %v4313_v20  ;;  %v9719_v2 = vld [vmem:[#allocation112_spill] sm:$0xff] }
 0x3eb   : > { %v4191_v44 = vpop.f32.mrf.mxu0  ;;  %v5574_v26 = vpop.f32.mrf.mxu1  ;;  %v4345_v49 = vadd.f32 %v8942_v53, %v9719_v2 }
 0x3ec   : > { %v4735_v8 = vadd.f32 %v8921_v62, %v4190_v32  ;;  %5055 = vst.msk [vmem:[%s8509_s7 + $0x348] sm:$0xff] %vm4949_vm5, %v4858_v51  ;;  %v4879_v17 = vadd.f32 %v5574_v26, %v4334_v36  ;;  %v9720_v51 = vld [vmem:[#allocation115_spill] sm:$0xff] }
 0x3ed   : > { %v4192_v56 = vpop.f32.mrf.mxu0  ;;  %v4870_v47 = vpop.f32.mrf.mxu1  ;;  %v4366_v44 = vadd.f32 %v8942_v53, %v9720_v51 }
 0x3ee   : > { %5024 = vst.msk [vmem:[%s8509_s7 + $0x250] sm:$0xff] %vm4949_vm5, %v4735_v8  ;;  %5060 = vst.msk [vmem:[%s8509_s7 + $0x370] sm:$0xff] %vm4949_vm5, %v4879_v17  ;;  %v4193_v40 = vadd.f32 %v8942_v53, %v4192_v56  ;;  %v4871_v9 = vadd.f32 %v4870_v47, %v4326_v29  ;;  %v9721_v8 = vld [vmem:[#allocation14_spill] sm:$0xff] }
 0x3ef   : > { %v4194_v25 = vpop.f32.mrf.mxu0  ;;  %v5575_v62 = vpop.f32.mrf.mxu1  ;;  %v4358_v17 = vadd.f32 %v8942_v53, %v9721_v8 }
 0x3f0   : > { %v4738_v58 = vadd.f32 %v8926_v18, %v4193_v40  ;;  %5058 = vst.msk [vmem:[%s8509_s7 + $0x360] sm:$0xff] %vm4949_vm5, %v4871_v9  ;;  %v4882_v28 = vadd.f32 %v5575_v62, %v4337_v14  ;;  %v9722_v14 = vld [vmem:[#allocation61_spill] sm:$0xff] }
 0x3f1   : > { %v4873_v16 = vpop.f32.mrf.mxu1  ;;  %v4369_v40 = vadd.f32 %v8942_v53, %v9722_v14 }
 0x3f2   : > { %5025 = vst.msk [vmem:[%s8509_s7 + $0x258] sm:$0xff] %vm4949_vm5, %v4738_v58  ;;  %5061 = vst.msk [vmem:[%s8509_s7 + $0x378] sm:$0xff] %vm4949_vm5, %v4882_v28  ;;  %v4874_v3 = vadd.f32 %v4873_v16, %v4329_v30  ;;  %v4361_v30 = vadd.f32 %v8942_v53, %v9723_v34 }
 0x3f3   : > { %v5578_v5 = vpop.f32.mrf.mxu1 }
 0x3f4   : > { %5059 = vst.msk [vmem:[%s8509_s7 + $0x368] sm:$0xff] %vm4949_vm5, %v4874_v3  ;;  %v4197_v18 = vpop.f32.mrf.mxu0  ;;  %v4895_v22 = vadd.f32 %v5578_v5, %v4350_v59  ;;  %v4382_v3 = vadd.f32 %v8942_v53, %v8339_v12 }
 0x3f5   : > { %v4198_v63 = vadd.f32 %v8942_v53, %v4197_v18  ;;  %v4886_v31 = vpop.f32.mrf.mxu1 }
 0x3f6   : > { %5064 = vst.msk [vmem:[%s8509_s7 + $0x390] sm:$0xff] %vm4949_vm5, %v4895_v22  ;;  %v4199_v42 = vpop.f32.mrf.mxu0  ;;  %v4887_v37 = vadd.f32 %v4886_v31, %v4342_v27  ;;  %v9724_v22 = vld [vmem:[#allocation16_spill] sm:$0xff] }
 0x3f7   : > { %v4743_v20 = vadd.f32 %v8937_v57, %v4198_v63  ;;  %v5579_v61 = vpop.f32.mrf.mxu1  ;;  %v4374_v63 = vadd.f32 %v8942_v53, %v9724_v22 }
 0x3f8   : > { %5062 = vst.msk [vmem:[%s8509_s7 + $0x380] sm:$0xff] %vm4949_vm5, %v4887_v37  ;;  %v4200_v23 = vpop.f32.mrf.mxu0  ;;  %v4898_v48 = vadd.f32 %v5579_v61, %v4353_v55  ;;  %v9725_v55 = vld [vmem:[#allocation114_spill] sm:$0xff]  ;;  %v9726_v61 = vld [vmem:[#allocation19_spill] sm:$0xff] }
 0x3f9   : > { %5026 = vst.msk [vmem:[%s8509_s7 + $0x260] sm:$0xff] %vm4949_vm5, %v4743_v20  ;;  %v4201_v36 = vadd.f32 %v8942_v53, %v4200_v23  ;;  %v4889_v32 = vpop.f32.mrf.mxu1  ;;  %v4385_v42 = vadd.f32 %v8942_v53, %v9725_v55  ;;  %v4377_v2 = vadd.f32 %v8942_v53, %v9726_v61 }
 0x3fa   : > { %5065 = vst.msk [vmem:[%s8509_s7 + $0x398] sm:$0xff] %vm4949_vm5, %v4898_v48  ;;  %v4202_v57 = vpop.f32.mrf.mxu0  ;;  %v4890_v26 = vadd.f32 %v4889_v32, %v4345_v49 }
 0x3fb   : > { %v4746_v15 = vadd.f32 %v8947_v1, %v4201_v36  ;;  %v5582_v29 = vpop.f32.mrf.mxu1  ;;  %v4398_v36 = vadd.f32 %v8942_v53, %v8467_v0 }
 0x3fc   : > { %5063 = vst.msk [vmem:[%s8509_s7 + $0x388] sm:$0xff] %vm4949_vm5, %v4890_v26  ;;  %v4911_v56 = vadd.f32 %v5582_v29, %v4366_v44  ;;  %v9727_v26 = vld [vmem:[#allocation60_spill] sm:$0xff] }
 0x3fd   : > { %5027 = vst.msk [vmem:[%s8509_s7 + $0x268] sm:$0xff] %vm4949_vm5, %v4746_v15  ;;  %v4205_v47 = vpop.f32.mrf.mxu0  ;;  %v4902_v60 = vpop.f32.mrf.mxu1  ;;  %v4390_v15 = vadd.f32 %v8942_v53, %v9727_v26 }
 0x3fe   : > { %5068 = vst.msk [vmem:[%s8509_s7 + $0x3b0] sm:$0xff] %vm4949_vm5, %v4911_v56  ;;  %v4206_v1 = vadd.f32 %v8942_v53, %v4205_v47  ;;  %v4903_v9 = vadd.f32 %v4902_v60, %v4358_v17  ;;  %v4401_v56 = vadd.f32 %v8942_v53, %v8480_v6 }
 0x3ff   : > { %v4207_v25 = vpop.f32.mrf.mxu0  ;;  %v5583_v62 = vpop.f32.mrf.mxu1 }
 0x400   : > { %v4751_v58 = vadd.f32 %v8933_v43, %v4206_v1  ;;  %5066 = vst.msk [vmem:[%s8509_s7 + $0x3a0] sm:$0xff] %vm4949_vm5, %v4903_v9  ;;  %v4914_v28 = vadd.f32 %v5583_v62, %v4369_v40  ;;  %v9728_v40 = vld [vmem:[#allocation18_spill] sm:$0xff] }
 0x401   : > { %v4208_v16 = vpop.f32.mrf.mxu0  ;;  %v4905_v59 = vpop.f32.mrf.mxu1  ;;  %v4393_v1 = vadd.f32 %v8942_v53, %v9728_v40 }
 0x402   : > { %5028 = vst.msk [vmem:[%s8509_s7 + $0x270] sm:$0xff] %vm4949_vm5, %v4751_v58  ;;  %5069 = vst.msk [vmem:[%s8509_s7 + $0x3b8] sm:$0xff] %vm4949_vm5, %v4914_v28  ;;  %v4209_v5 = vadd.f32 %v8942_v53, %v4208_v16  ;;  %v4906_v27 = vadd.f32 %v4905_v59, %v4361_v30 }
 0x403   : > { %v4210_v18 = vpop.f32.mrf.mxu0  ;;  %v5586_v43 = vpop.f32.mrf.mxu1 }
 0x404   : > { %v4754_v31 = vadd.f32 %v8945_v50, %v4209_v5  ;;  %5067 = vst.msk [vmem:[%s8509_s7 + $0x3a8] sm:$0xff] %vm4949_vm5, %v4906_v27  ;;  %v4927_v39 = vadd.f32 %v5586_v43, %v4382_v3 }
 0x405   : > { %v4918_v12 = vpop.f32.mrf.mxu1 }
 0x406   : > { %5029 = vst.msk [vmem:[%s8509_s7 + $0x278] sm:$0xff] %vm4949_vm5, %v4754_v31  ;;  %5072 = vst.msk [vmem:[%s8509_s7 + $0x3d0] sm:$0xff] %vm4949_vm5, %v4927_v39  ;;  %v4919_v37 = vadd.f32 %v4918_v12, %v4374_v63 }
 0x407   : > { %v5587_v20 = vpop.f32.mrf.mxu1 }
 0x408   : > { %5070 = vst.msk [vmem:[%s8509_s7 + $0x3c0] sm:$0xff] %vm4949_vm5, %v4919_v37  ;;  %v4213_v50 = vpop.f32.mrf.mxu0  ;;  %v4930_v49 = vadd.f32 %v5587_v20, %v4385_v42 }
 0x409   : > { %v4214_v23 = vadd.f32 %v8942_v53, %v4213_v50  ;;  %v4921_v48 = vpop.f32.mrf.mxu1 }
 0x40a   : > { %5073 = vst.msk [vmem:[%s8509_s7 + $0x3d8] sm:$0xff] %vm4949_vm5, %v4930_v49  ;;  %v4215_v32 = vpop.f32.mrf.mxu0  ;;  %v4922_v51 = vadd.f32 %v4921_v48, %v4377_v2 }
 0x40b   : > { %v4759_v44 = vadd.f32 %v8954_v38, %v4214_v23  ;;  %v5590_v57 = vpop.f32.mrf.mxu1 }
 0x40c   : > { %5071 = vst.msk [vmem:[%s8509_s7 + $0x3c8] sm:$0xff] %vm4949_vm5, %v4922_v51  ;;  %v4216_v29 = vpop.f32.mrf.mxu0  ;;  %v4943_v8 = vadd.f32 %v5590_v57, %v4398_v36 }
 0x40d   : > { %5030 = vst.msk [vmem:[%s8509_s7 + $0x280] sm:$0xff] %vm4949_vm5, %v4759_v44  ;;  %v4217_v0 = vadd.f32 %v8942_v53, %v4216_v29  ;;  %v4934_v17 = vpop.f32.mrf.mxu1 }
 0x40e   : > { %5076 = vst.msk [vmem:[%s8509_s7 + $0x3f0] sm:$0xff] %vm4949_vm5, %v4943_v8  ;;  %v4218_v38 = vpop.f32.mrf.mxu0  ;;  %v4935_v47 = vadd.f32 %v4934_v17, %v4390_v15 }
 0x40f   : > { %v4762_v60 = vadd.f32 %v8961_v46, %v4217_v0  ;;  %v5591_v14 = vpop.f32.mrf.mxu1 }
 0x410   : > { %5074 = vst.msk [vmem:[%s8509_s7 + $0x3e0] sm:$0xff] %vm4949_vm5, %v4935_v47  ;;  %v4946_v9 = vadd.f32 %v5591_v14, %v4401_v56 }
 0x411   : > { %5031 = vst.msk [vmem:[%s8509_s7 + $0x288] sm:$0xff] %vm4949_vm5, %v4762_v60  ;;  %v4221_v25 = vpop.f32.mrf.mxu0  ;;  %v4937_v6 = vpop.f32.mrf.mxu1 }
 0x412   : > { %5077 = vst.msk [vmem:[%s8509_s7 + $0x3f8] sm:$0xff] %vm4949_vm5, %v4946_v9  ;;  %v4222_v62 = vadd.f32 %v8942_v53, %v4221_v25  ;;  %v4938_v34 = vadd.f32 %v4937_v6, %v4393_v1 }
 0x413   : > { %v4223_v30 = vpop.f32.mrf.mxu0 }
 0x414   : > { %v4767_v46 = vadd.f32 %v8952_v21, %v4222_v62  ;;  %5075 = vst.msk [vmem:[%s8509_s7 + $0x3e8] sm:$0xff] %vm4949_vm5, %v4938_v34 }
 0x415   : > { %v4224_v58 = vpop.f32.mrf.mxu0 }
 0x416   : > { %5032 = vst.msk [vmem:[%s8509_s7 + $0x290] sm:$0xff] %vm4949_vm5, %v4767_v46  ;;  %v4225_v28 = vadd.f32 %v8942_v53, %v4224_v58 }
 0x417   : > { %v4226_v16 = vpop.f32.mrf.mxu0 }
 0x418   : > { %v4770_v59 = vadd.f32 %v8958_v19, %v4225_v28 }
 0x41a   : > { %5033 = vst.msk [vmem:[%s8509_s7 + $0x298] sm:$0xff] %vm4949_vm5, %v4770_v59 }
 0x41c   : > { %v4229_v3 = vpop.f32.mrf.mxu0 }
 0x41d   : > { %v4230_v5 = vadd.f32 %v8942_v53, %v4229_v3 }
 0x41e   : > { %v4231_v27 = vpop.f32.mrf.mxu0 }
 0x41f   : > { %v4775_v21 = vadd.f32 %v8968_v54, %v4230_v5 }
 0x420   : > { %v4232_v18 = vpop.f32.mrf.mxu0 }
 0x421   : > { %5034 = vst.msk [vmem:[%s8509_s7 + $0x2a0] sm:$0xff] %vm4949_vm5, %v4775_v21  ;;  %v4233_v43 = vadd.f32 %v8942_v53, %v4232_v18 }
 0x422   : > { %v4234_v22 = vpop.f32.mrf.mxu0 }
 0x423   : > { %v4778_v63 = vadd.f32 %v8974_v41, %v4233_v43 }
 0x425   : > { %5035 = vst.msk [vmem:[%s8509_s7 + $0x2a8] sm:$0xff] %vm4949_vm5, %v4778_v63  ;;  %v4237_v19 = vpop.f32.mrf.mxu0 }
 0x426   : > { %v4238_v31 = vadd.f32 %v8942_v53, %v4237_v19 }
 0x427   : > { %v4239_v39 = vpop.f32.mrf.mxu0 }
 0x428   : > { %v4783_v12 = vadd.f32 %v8963_v7, %v4238_v31 }
 0x429   : > { %v4240_v54 = vpop.f32.mrf.mxu0 }
 0x42a   : > { %5036 = vst.msk [vmem:[%s8509_s7 + $0x2b0] sm:$0xff] %vm4949_vm5, %v4783_v12  ;;  %v4241_v55 = vadd.f32 %v8942_v53, %v4240_v54 }
 0x42b   : > { %v4242_v42 = vpop.f32.mrf.mxu0 }
 0x42c   : > { %v4786_v37 = vadd.f32 %v8970_v4, %v4241_v55 }
 0x42e   : > { %5037 = vst.msk [vmem:[%s8509_s7 + $0x2b8] sm:$0xff] %vm4949_vm5, %v4786_v37 }
 0x430   : > { %v4245_v41 = vpop.f32.mrf.mxu0 }
 0x431   : > { %v4246_v20 = vadd.f32 %v8942_v53, %v4245_v41 }
 0x432   : > { %v4247_v61 = vpop.f32.mrf.mxu0 }
 0x433   : > { %v4791_v2 = vadd.f32 %v8980_v24, %v4246_v20 }
 0x434   : > { %v4248_v7 = vpop.f32.mrf.mxu0 }
 0x435   : > { %5038 = vst.msk [vmem:[%s8509_s7 + $0x2c0] sm:$0xff] %vm4949_vm5, %v4791_v2  ;;  %v4249_v50 = vadd.f32 %v8942_v53, %v4248_v7 }
 0x436   : > { %v4250_v49 = vpop.f32.mrf.mxu0 }
 0x437   : > { %v4794_v23 = vadd.f32 %v8988_v35, %v4249_v50 }
 0x439   : > { %5039 = vst.msk [vmem:[%s8509_s7 + $0x2c8] sm:$0xff] %vm4949_vm5, %v4794_v23  ;;  %v4253_v4 = vpop.f32.mrf.mxu0 }
 0x43a   : > { %v4254_v48 = vadd.f32 %v8942_v53, %v4253_v4 }
 0x43b   : > { %v4255_v36 = vpop.f32.mrf.mxu0 }
 0x43c   : > { %v4799_v32 = vadd.f32 %v8977_v13, %v4254_v48 }
 0x43d   : > { %v4256_v24 = vpop.f32.mrf.mxu0 }
 0x43e   : > { %5040 = vst.msk [vmem:[%s8509_s7 + $0x2d0] sm:$0xff] %vm4949_vm5, %v4799_v32  ;;  %v4257_v51 = vadd.f32 %v8942_v53, %v4256_v24 }
 0x43f   : > { %v4258_v44 = vpop.f32.mrf.mxu0 }
 0x440   : > { %v4802_v57 = vadd.f32 %v8985_v11, %v4257_v51 }
 0x442   : > { %5041 = vst.msk [vmem:[%s8509_s7 + $0x2d8] sm:$0xff] %vm4949_vm5, %v4802_v57 }
 0x444   : > { %v4261_v35 = vpop.f32.mrf.mxu0 }
 0x445   : > { %v4262_v26 = vadd.f32 %v8942_v53, %v4261_v35 }
 0x446   : > { %v4263_v15 = vpop.f32.mrf.mxu0 }
 0x447   : > { %v4807_v29 = vadd.f32 %v8995_v52, %v4262_v26 }
 0x448   : > { %v4264_v13 = vpop.f32.mrf.mxu0 }
 0x449   : > { %5042 = vst.msk [vmem:[%s8509_s7 + $0x2e0] sm:$0xff] %vm4949_vm5, %v4807_v29  ;;  %v4265_v8 = vadd.f32 %v8942_v53, %v4264_v13 }
 0x44a   : > { %v4266_v0 = vpop.f32.mrf.mxu0 }
 0x44b   : > { %v4810_v17 = vadd.f32 %v9003_v33, %v4265_v8 }
 0x44d   : > { %5043 = vst.msk [vmem:[%s8509_s7 + $0x2e8] sm:$0xff] %vm4949_vm5, %v4810_v17  ;;  %v4269_v11 = vpop.f32.mrf.mxu0 }
 0x44e   : > { %v4270_v56 = vadd.f32 %v8942_v53, %v4269_v11 }
 0x44f   : > { %v4271_v38 = vpop.f32.mrf.mxu0 }
 0x450   : > { %v4815_v47 = vadd.f32 %v8992_v10, %v4270_v56 }
 0x451   : > { %v4272_v60 = vpop.f32.mrf.mxu0 }
 0x452   : > { %5044 = vst.msk [vmem:[%s8509_s7 + $0x2f0] sm:$0xff] %vm4949_vm5, %v4815_v47  ;;  %v4273_v52 = vadd.f32 %v8942_v53, %v4272_v60 }
 0x453   : > { %v4274_v14 = vpop.f32.mrf.mxu0 }
 0x454   : > { %v4818_v40 = vadd.f32 %v8998_v45, %v4273_v52 }
 0x456   : > { %5045 = vst.msk [vmem:[%s8509_s7 + $0x2f8] sm:$0xff] %vm4949_vm5, %v4818_v40 }
 0x457 PF: > { %s14_s17 = sadd.s32 1, %s5900_s17   ;;  %s9729_s15 = smov %s5896_s16 }
 0x458   : > { %p11_p5 = scmp.ge.s32.totalorder %s14_s17, 4   ;;  %s9730_s16 = smov %s9732_s18 }
 0x45a   :  { %13 = sbr.rel (!%p11_p5) target bundleno = 2 (0x2), region = 69 }

</bundles_post_ra>
